<compile_context>
chip_gen: v5e
topology: v5e:2x2
jax: 0.10.0
libtpu: 0.0.40
codegen_flags: <defaults>
</compile_context>

<pallas_src>
import jax
import jax.numpy as jnp
from jax.experimental import pallas as pl
from jax.experimental.pallas import tpu as pltpu


def _leaky_relu(x, negative_slope=0.2):
    return jnp.where(x >= 0, x, negative_slope * x)


def _mlp_kernel(x_ref,
                w1_ref, b1_ref,
                w2_ref, b2_ref,
                w3_ref, b3_ref,
                w4_ref, b4_ref,
                w5_ref, b5_ref,
                o_ref):
    # One batch tile (TB, F) per grid step; all weights are VMEM-resident.
    h = x_ref[...]

    h = _leaky_relu(jnp.dot(h, w1_ref[...], preferred_element_type=jnp.float32)
                    + b1_ref[...])                 # Dropout(0.5) -> identity (eval)
    h = _leaky_relu(jnp.dot(h, w2_ref[...], preferred_element_type=jnp.float32)
                    + b2_ref[...])
    h = _leaky_relu(jnp.dot(h, w3_ref[...], preferred_element_type=jnp.float32)
                    + b3_ref[...])
    h = _leaky_relu(jnp.dot(h, w4_ref[...], preferred_element_type=jnp.float32)
                    + b4_ref[...])

    # Final Linear(32, 1): N=1 matmul wastes an MXU push/pop -> do it on the
    # VPU as a multiply-reduce. w5_ref is passed pre-reshaped as (1, 32).
    logits = jnp.sum(h * w5_ref[...], axis=-1, keepdims=True) + b5_ref[...]
    o_ref[...] = jax.nn.sigmoid(logits)            # final Sigmoid


def binary_classifier_forward(x, params, tb=1024):
    """x: (batch, num_features) f32.  params: list of 5 (W, b) pairs.

    Tiles the batch with TB rows per grid step (default 1024; sweep 512-4096
    for production).  Weights/biases ride along as grid-invariant VMEM blocks.
    """
    batch, num_features = x.shape

    # Clamp tile to batch and round up to a sublane multiple (8).
    tb = min(tb, max(batch, 8))
    tb = ((tb + 7) // 8) * 8
    padded = pl.cdiv(batch, tb) * tb
    if padded != batch:
        x = jnp.pad(x, ((0, padded - batch), (0, 0)))
    grid = (padded // tb,)

    (w1, b1), (w2, b2), (w3, b3), (w4, b4), (w5, b5) = params
    flat_args = [
        x,
        w1, b1.reshape(1, -1),
        w2, b2.reshape(1, -1),
        w3, b3.reshape(1, -1),
        w4, b4.reshape(1, -1),
        w5.reshape(1, -1),            # (32,1) -> (1,32) row for the VPU reduce
        b5.reshape(1, -1),            # (1,1)
    ]

    def const_spec(a):
        # Full-array block, constant index map -> grid-invariant, stays in VMEM.
        return pl.BlockSpec(a.shape, lambda i: (0, 0))

    in_specs = [pl.BlockSpec((tb, num_features), lambda i: (i, 0))]
    in_specs += [const_spec(a) for a in flat_args[1:]]

    out = pl.pallas_call(
        _mlp_kernel,
        out_shape=jax.ShapeDtypeStruct((padded, 1), jnp.float32),
        grid=grid,
        in_specs=in_specs,
        out_specs=pl.BlockSpec((tb, 1), lambda i: (i, 0)),
        compiler_params=pltpu.CompilerParams(
            dimension_semantics=("parallel",),   # megacore: shard batch tiles on v7x
        ),
    )(*flat_args)
    return out[:batch]


def init_params(key, num_features):
    """Deterministic init mimicking PyTorch Linear default (U[-1/sqrt(fan_in), +])."""
    dims = [num_features, 64, 128, 64, 32, 1]
    params = []
    for i in range(len(dims) - 1):
        fan_in, fan_out = dims[i], dims[i + 1]
        key, kw, kb = jax.random.split(key, 3)
        bound = 1.0 / jnp.sqrt(fan_in)
        w = jax.random.uniform(kw, (fan_in, fan_out), jnp.float32, -bound, bound)
        b = jax.random.uniform(kb, (fan_out,), jnp.float32, -bound, bound)
        params.append((w, b))
    return params


def reference_forward(x, params):
    """Plain-JAX reference for sanity checking."""
    h = x
    for i, (w, b) in enumerate(params):
        h = h @ w + b
        if i < len(params) - 1:
            h = _leaky_relu(h)
        else:
            h = jax.nn.sigmoid(h)
    return h


if __name__ == "__main__":
    key = jax.random.PRNGKey(0)
    num_features = 32

    kx, kp = jax.random.split(key)
    params = init_params(kp, num_features)

    # (batch, tile) cases: multi-tile grid, and a ragged batch that exercises
    # the padding path (tile clamps to a sublane-aligned size).
    for batch, tb in ((2048, 1024), (100, 1024)):
        x = jax.random.normal(jax.random.fold_in(kx, batch),
                              (batch, num_features), dtype=jnp.float32)
        out = jax.block_until_ready(binary_classifier_forward(x, params, tb=tb))
        ref = reference_forward(x, params)
        assert out.shape == (batch, 1)
        assert jnp.allclose(out, ref, atol=1e-5, rtol=1e-5), \
            f"mismatch vs reference for batch={batch}"

    print("KERNEL_OK")
</pallas_src>

<mosaic_0001>
module attributes {stable_mosaic.version = 11 : i64} {
  func.func @_mlp_kernel(%arg0: i32, %arg1: memref<1024x32xf32, #tpu.memory_space<vmem>>, %arg2: memref<32x64xf32, #tpu.memory_space<vmem>>, %arg3: memref<1x64xf32, #tpu.memory_space<vmem>>, %arg4: memref<64x128xf32, #tpu.memory_space<vmem>>, %arg5: memref<1x128xf32, #tpu.memory_space<vmem>>, %arg6: memref<128x64xf32, #tpu.memory_space<vmem>>, %arg7: memref<1x64xf32, #tpu.memory_space<vmem>>, %arg8: memref<64x32xf32, #tpu.memory_space<vmem>>, %arg9: memref<1x32xf32, #tpu.memory_space<vmem>>, %arg10: memref<1x32xf32, #tpu.memory_space<vmem>>, %arg11: memref<1x1xf32, #tpu.memory_space<vmem>>, %arg12: memref<1024x1xf32, #tpu.memory_space<vmem>>) attributes {dimension_semantics = [#tpu.dimension_semantics<parallel>], iteration_bounds = array<i64: 2>, scalar_prefetch = 0 : i64, scratch_operands = 0 : i64, tpu.core_type = #tpu.core_type<tc>, window_params = [{transform_indices = @transform_0, window_bounds = array<i64: 1024, 32>}, {pipeline_mode = #tpu.pipeline_mode<synchronous>, transform_indices = @transform_1, window_bounds = array<i64: 32, 64>}, {pipeline_mode = #tpu.pipeline_mode<synchronous>, transform_indices = @transform_2, window_bounds = array<i64: 1, 64>}, {pipeline_mode = #tpu.pipeline_mode<synchronous>, transform_indices = @transform_3, window_bounds = array<i64: 64, 128>}, {pipeline_mode = #tpu.pipeline_mode<synchronous>, transform_indices = @transform_4, window_bounds = array<i64: 1, 128>}, {pipeline_mode = #tpu.pipeline_mode<synchronous>, transform_indices = @transform_5, window_bounds = array<i64: 128, 64>}, {pipeline_mode = #tpu.pipeline_mode<synchronous>, transform_indices = @transform_6, window_bounds = array<i64: 1, 64>}, {pipeline_mode = #tpu.pipeline_mode<synchronous>, transform_indices = @transform_7, window_bounds = array<i64: 64, 32>}, {pipeline_mode = #tpu.pipeline_mode<synchronous>, transform_indices = @transform_8, window_bounds = array<i64: 1, 32>}, {pipeline_mode = #tpu.pipeline_mode<synchronous>, transform_indices = @transform_9, window_bounds = array<i64: 1, 32>}, {pipeline_mode = #tpu.pipeline_mode<synchronous>, transform_indices = @transform_10, window_bounds = array<i64: 1, 1>}, {transform_indices = @transform_11, window_bounds = array<i64: 1024, 1>}]} {
    %c0 = arith.constant 0 : index
    %c0_0 = arith.constant 0 : index
    %0 = vector.load %arg1[%c0, %c0_0] : memref<1024x32xf32, #tpu.memory_space<vmem>>, vector<1024x32xf32>
    %c0_1 = arith.constant 0 : index
    %c0_2 = arith.constant 0 : index
    %1 = vector.load %arg2[%c0_1, %c0_2] : memref<32x64xf32, #tpu.memory_space<vmem>>, vector<32x64xf32>
    %cst = arith.constant dense<0.000000e+00> : vector<1024x64xf32>
    %2 = tpu.matmul %0, %1, %cst {dimension_numbers = #tpu.dot_dimension_numbers<[1], [0], [0], [1], [0, 0, 1, 1], [], []>} : vector<1024x32xf32>, vector<32x64xf32>, vector<1024x64xf32> -> vector<1024x64xf32>
    %c0_3 = arith.constant 0 : index
    %c0_4 = arith.constant 0 : index
    %3 = vector.load %arg3[%c0_3, %c0_4] : memref<1x64xf32, #tpu.memory_space<vmem>>, vector<1x64xf32>
    %4 = vector.broadcast %3 : vector<1x64xf32> to vector<1024x64xf32>
    %5 = arith.addf %2, %4 : vector<1024x64xf32>
    %cst_5 = arith.constant 0.000000e+00 : f32
    %6 = vector.broadcast %cst_5 : f32 to vector<1024x64xf32>
    %7 = arith.cmpf oge, %5, %6 : vector<1024x64xf32>
    %cst_6 = arith.constant 2.000000e-01 : f32
    %8 = vector.broadcast %cst_6 : f32 to vector<1024x64xf32>
    %9 = arith.mulf %8, %5 : vector<1024x64xf32>
    %10 = arith.select %7, %5, %9 : vector<1024x64xi1>, vector<1024x64xf32>
    %c0_7 = arith.constant 0 : index
    %c0_8 = arith.constant 0 : index
    %11 = vector.load %arg4[%c0_7, %c0_8] : memref<64x128xf32, #tpu.memory_space<vmem>>, vector<64x128xf32>
    %cst_9 = arith.constant dense<0.000000e+00> : vector<1024x128xf32>
    %12 = tpu.matmul %10, %11, %cst_9 {dimension_numbers = #tpu.dot_dimension_numbers<[1], [0], [0], [1], [0, 0, 1, 1], [], []>} : vector<1024x64xf32>, vector<64x128xf32>, vector<1024x128xf32> -> vector<1024x128xf32>
    %c0_10 = arith.constant 0 : index
    %c0_11 = arith.constant 0 : index
    %13 = vector.load %arg5[%c0_10, %c0_11] : memref<1x128xf32, #tpu.memory_space<vmem>>, vector<1x128xf32>
    %14 = vector.broadcast %13 : vector<1x128xf32> to vector<1024x128xf32>
    %15 = arith.addf %12, %14 : vector<1024x128xf32>
    %cst_12 = arith.constant 0.000000e+00 : f32
    %16 = vector.broadcast %cst_12 : f32 to vector<1024x128xf32>
    %17 = arith.cmpf oge, %15, %16 : vector<1024x128xf32>
    %cst_13 = arith.constant 2.000000e-01 : f32
    %18 = vector.broadcast %cst_13 : f32 to vector<1024x128xf32>
    %19 = arith.mulf %18, %15 : vector<1024x128xf32>
    %20 = arith.select %17, %15, %19 : vector<1024x128xi1>, vector<1024x128xf32>
    %c0_14 = arith.constant 0 : index
    %c0_15 = arith.constant 0 : index
    %21 = vector.load %arg6[%c0_14, %c0_15] : memref<128x64xf32, #tpu.memory_space<vmem>>, vector<128x64xf32>
    %cst_16 = arith.constant dense<0.000000e+00> : vector<1024x64xf32>
    %22 = tpu.matmul %20, %21, %cst_16 {dimension_numbers = #tpu.dot_dimension_numbers<[1], [0], [0], [1], [0, 0, 1, 1], [], []>} : vector<1024x128xf32>, vector<128x64xf32>, vector<1024x64xf32> -> vector<1024x64xf32>
    %c0_17 = arith.constant 0 : index
    %c0_18 = arith.constant 0 : index
    %23 = vector.load %arg7[%c0_17, %c0_18] : memref<1x64xf32, #tpu.memory_space<vmem>>, vector<1x64xf32>
    %24 = vector.broadcast %23 : vector<1x64xf32> to vector<1024x64xf32>
    %25 = arith.addf %22, %24 : vector<1024x64xf32>
    %cst_19 = arith.constant 0.000000e+00 : f32
    %26 = vector.broadcast %cst_19 : f32 to vector<1024x64xf32>
    %27 = arith.cmpf oge, %25, %26 : vector<1024x64xf32>
    %cst_20 = arith.constant 2.000000e-01 : f32
    %28 = vector.broadcast %cst_20 : f32 to vector<1024x64xf32>
    %29 = arith.mulf %28, %25 : vector<1024x64xf32>
    %30 = arith.select %27, %25, %29 : vector<1024x64xi1>, vector<1024x64xf32>
    %c0_21 = arith.constant 0 : index
    %c0_22 = arith.constant 0 : index
    %31 = vector.load %arg8[%c0_21, %c0_22] : memref<64x32xf32, #tpu.memory_space<vmem>>, vector<64x32xf32>
    %cst_23 = arith.constant dense<0.000000e+00> : vector<1024x32xf32>
    %32 = tpu.matmul %30, %31, %cst_23 {dimension_numbers = #tpu.dot_dimension_numbers<[1], [0], [0], [1], [0, 0, 1, 1], [], []>} : vector<1024x64xf32>, vector<64x32xf32>, vector<1024x32xf32> -> vector<1024x32xf32>
    %c0_24 = arith.constant 0 : index
    %c0_25 = arith.constant 0 : index
    %33 = vector.load %arg9[%c0_24, %c0_25] : memref<1x32xf32, #tpu.memory_space<vmem>>, vector<1x32xf32>
    %34 = vector.broadcast %33 : vector<1x32xf32> to vector<1024x32xf32>
    %35 = arith.addf %32, %34 : vector<1024x32xf32>
    %cst_26 = arith.constant 0.000000e+00 : f32
    %36 = vector.broadcast %cst_26 : f32 to vector<1024x32xf32>
    %37 = arith.cmpf oge, %35, %36 : vector<1024x32xf32>
    %cst_27 = arith.constant 2.000000e-01 : f32
    %38 = vector.broadcast %cst_27 : f32 to vector<1024x32xf32>
    %39 = arith.mulf %38, %35 : vector<1024x32xf32>
    %40 = arith.select %37, %35, %39 : vector<1024x32xi1>, vector<1024x32xf32>
    %c0_28 = arith.constant 0 : index
    %c0_29 = arith.constant 0 : index
    %41 = vector.load %arg10[%c0_28, %c0_29] : memref<1x32xf32, #tpu.memory_space<vmem>>, vector<1x32xf32>
    %42 = vector.broadcast %41 : vector<1x32xf32> to vector<1024x32xf32>
    %43 = arith.mulf %40, %42 : vector<1024x32xf32>
    %cst_30 = arith.constant dense<0.000000e+00> : vector<1024xf32>
    %44 = vector.multi_reduction <add>, %43, %cst_30 [1] : vector<1024x32xf32> to vector<1024xf32>
    %45 = vector.shape_cast %44 : vector<1024xf32> to vector<1024x1xf32>
    %c0_31 = arith.constant 0 : index
    %c0_32 = arith.constant 0 : index
    %46 = vector.load %arg11[%c0_31, %c0_32] : memref<1x1xf32, #tpu.memory_space<vmem>>, vector<1x1xf32>
    %47 = vector.broadcast %46 : vector<1x1xf32> to vector<1024x1xf32>
    %48 = arith.addf %45, %47 : vector<1024x1xf32>
    %49 = arith.negf %48 : vector<1024x1xf32>
    %50 = math.exp %49 : vector<1024x1xf32>
    %cst_33 = arith.constant 1.000000e+00 : f32
    %51 = vector.broadcast %cst_33 : f32 to vector<1024x1xf32>
    %52 = arith.addf %51, %50 : vector<1024x1xf32>
    %53 = arith.divf %51, %52 : vector<1024x1xf32>
    %c0_34 = arith.constant 0 : index
    %c0_35 = arith.constant 0 : index
    %54 = vector.load %arg12[%c0_34, %c0_35] : memref<1024x1xf32, #tpu.memory_space<vmem>>, vector<1024x1xf32>
    tpu.vector_store %arg12[%c0_34, %c0_35], %53 {strides = array<i32>} : memref<1024x1xf32, #tpu.memory_space<vmem>>, vector<1024x1xf32>,
    return
  }
  func.func @transform_0(%arg0: i32) -> (i32, i32) {
    %c0_i32 = arith.constant 0 : i32
    %c0_i32_0 = arith.constant 0 : i32
    return %arg0, %c0_i32 : i32, i32
  }
  func.func @transform_1(%arg0: i32) -> (i32, i32) {
    %c0_i32 = arith.constant 0 : i32
    %c0_i32_0 = arith.constant 0 : i32
    %c0_i32_1 = arith.constant 0 : i32
    return %c0_i32, %c0_i32_0 : i32, i32
  }
  func.func @transform_2(%arg0: i32) -> (i32, i32) {
    %c0_i32 = arith.constant 0 : i32
    %c0_i32_0 = arith.constant 0 : i32
    %c0_i32_1 = arith.constant 0 : i32
    return %c0_i32, %c0_i32_0 : i32, i32
  }
  func.func @transform_3(%arg0: i32) -> (i32, i32) {
    %c0_i32 = arith.constant 0 : i32
    %c0_i32_0 = arith.constant 0 : i32
    %c0_i32_1 = arith.constant 0 : i32
    return %c0_i32, %c0_i32_0 : i32, i32
  }
  func.func @transform_4(%arg0: i32) -> (i32, i32) {
    %c0_i32 = arith.constant 0 : i32
    %c0_i32_0 = arith.constant 0 : i32
    %c0_i32_1 = arith.constant 0 : i32
    return %c0_i32, %c0_i32_0 : i32, i32
  }
  func.func @transform_5(%arg0: i32) -> (i32, i32) {
    %c0_i32 = arith.constant 0 : i32
    %c0_i32_0 = arith.constant 0 : i32
    %c0_i32_1 = arith.constant 0 : i32
    return %c0_i32, %c0_i32_0 : i32, i32
  }
  func.func @transform_6(%arg0: i32) -> (i32, i32) {
    %c0_i32 = arith.constant 0 : i32
    %c0_i32_0 = arith.constant 0 : i32
    %c0_i32_1 = arith.constant 0 : i32
    return %c0_i32, %c0_i32_0 : i32, i32
  }
  func.func @transform_7(%arg0: i32) -> (i32, i32) {
    %c0_i32 = arith.constant 0 : i32
    %c0_i32_0 = arith.constant 0 : i32
    %c0_i32_1 = arith.constant 0 : i32
    return %c0_i32, %c0_i32_0 : i32, i32
  }
  func.func @transform_8(%arg0: i32) -> (i32, i32) {
    %c0_i32 = arith.constant 0 : i32
    %c0_i32_0 = arith.constant 0 : i32
    %c0_i32_1 = arith.constant 0 : i32
    return %c0_i32, %c0_i32_0 : i32, i32
  }
  func.func @transform_9(%arg0: i32) -> (i32, i32) {
    %c0_i32 = arith.constant 0 : i32
    %c0_i32_0 = arith.constant 0 : i32
    %c0_i32_1 = arith.constant 0 : i32
    return %c0_i32, %c0_i32_0 : i32, i32
  }
  func.func @transform_10(%arg0: i32) -> (i32, i32) {
    %c0_i32 = arith.constant 0 : i32
    %c0_i32_0 = arith.constant 0 : i32
    %c0_i32_1 = arith.constant 0 : i32
    return %c0_i32, %c0_i32_0 : i32, i32
  }
  func.func @transform_11(%arg0: i32) -> (i32, i32) {
    %c0_i32 = arith.constant 0 : i32
    %c0_i32_0 = arith.constant 0 : i32
    return %arg0, %c0_i32 : i32, i32
  }
}

</mosaic_0001>

<bundles_post_ra>
// kernel: tpu_custom_call.1
= control target key start
LH: loop header
LB: loop body
LE: loop exit
PB: predicated region body
PF: predicated region fallthrough
CT: control target
= control target key end

     0   :  { %s9300_s19 = smov 0   ;;  %s12481_s0 = inlined_call_operand.vmem [shape: f32[2048,32], index: 0, kind: input, shape index: {}]   ;;  %s12482_s1 = inlined_call_operand.vmem [shape: f32[32,64], index: 1, kind: input, shape index: {}]   ;;  %s12483_s2 = inlined_call_operand.vmem [shape: f32[1,64], index: 2, kind: input, shape index: {}]   ;;  %s12484_s3 = inlined_call_operand.vmem [shape: f32[64,128], index: 3, kind: input, shape index: {}]   ;;  %s12485_s4 = inlined_call_operand.vmem [shape: f32[1,128], index: 4, kind: input, shape index: {}]   ;;  %s12486_s5 = inlined_call_operand.vmem [shape: f32[128,64], index: 5, kind: input, shape index: {}]   ;;  %s12487_s6 = inlined_call_operand.vmem [shape: f32[1,64], index: 6, kind: input, shape index: {}]   ;;  %s12488_s7 = inlined_call_operand.vmem [shape: f32[64,32], index: 7, kind: input, shape index: {}]   ;;  %s12489_s8 = inlined_call_operand.vmem [shape: f32[1,32], index: 8, kind: input, shape index: {}]   ;;  %s12490_s9 = inlined_call_operand.vmem [shape: f32[1,32], index: 9, kind: input, shape index: {}]   ;;  %s12491_s10 = inlined_call_operand.<no memory space> [shape: f32[1,1], index: 10, kind: input, shape index: {}]   ;;  %s12492_s11 = inlined_call_operand.vmem [shape: f32[2048,1], index: 11, kind: output, shape index: {}]  }
   0x1   :  { %v16_v0 = vstv %s12491_s10 }
   0x2   :  { %17 = vst [vmem:[#allocation2] sm:$0x1] %v16_v0 }
   0x3 LB: > { %s8131_s20 = sadd.s32 4294967295, %s9235_s19   ;;  %p8135_p0 = scmp.ge.s32.totalorder %s9235_s19, 1  ;;  %s9235_s19 = sphi %s9300_s19, %s23_s19  }
   0x4   : > { %p340_p1 = scmp.lt.s32.totalorder %s9235_s19, 3 }
   0x6   : > { %p341_p2 = pnand %p8135_p0, %p340_p1 }
   0x8   : > { %344 = sbr.rel (%p341_p2) target bundleno = 2479 (0x9af), region = 64 }
   0xd   : > { %v523_v1 = vld [vmem:[%s12482_s1 + $0x18] sm:$0xff]  ;;  %v522_v2 = vld [vmem:[%s12482_s1 + $0x10] sm:$0xff]  ;;  %s8136_s24 = sshll.u32 %s8131_s20, 7  ;;  %v521_v3 = vld [vmem:[%s12482_s1 + $0x8] sm:$0xff]  ;;  %vm528_vm0 = vcmask 261120   ;;  %vm1710_vm2 = vcmask 523264  }
   0xe   : > { %925 = vmatpush.msra.mxu0 %v523_v1  ;;  %p381_p3 = scmp.lt.s32.totalorder %s8136_s24, 255  ;;  %v2895_v4 = vld [vmem:[%s12486_s5 + $0x78] sm:$0xff]  ;;  %v520_v5 = vld [vmem:[%s12482_s1] sm:$0xff]  ;;  %v2894_v11 = vld [vmem:[%s12486_s5 + $0x70] sm:$0xff] }
   0xf   : > { %8654 = vmatpush.msra.mxu2 %v2895_v4  ;;  %v1705_v18 = vld [vmem:[%s12484_s3 + $0x38] sm:$0xff]  ;;  %v1704_v19 = vld [vmem:[%s12484_s3 + $0x30] sm:$0xff]  ;;  %v1703_v21 = vld [vmem:[%s12484_s3 + $0x28] sm:$0xff] }
  0x10   : > { %926 = vmatpush.msra.mxu0 %v522_v2  ;;  %s12578_s24 = smov (!%p381_p3, %s8136_s24), 255  ;;  %2103 = vmatpush.msra.mxu1 %v1705_v18  ;;  %v1702_v22 = vld [vmem:[%s12484_s3 + $0x20] sm:$0xff]  ;;  %v1701_v23 = vld [vmem:[%s12484_s3 + $0x18] sm:$0xff]  ;;  %v1700_v25 = vld [vmem:[%s12484_s3 + $0x10] sm:$0xff] }
  0x11   : > { %s8137_s12 = sshll.u32 %s12578_s24, 3  ;;  %8655 = vmatpush.msra.mxu2 %v2894_v11  ;;  %v1699_v26 = vld [vmem:[%s12484_s3 + $0x8] sm:$0xff]  ;;  %v1698_v28 = vld [vmem:[%s12484_s3] sm:$0xff] }
  0x12   : > { %927 = vmatpush.msra.mxu0 %v521_v3  ;;  %s9331_s15 = scalar_lea.vmem %s12481_s0, %s8137_s12  ;;  %2104 = vmatpush.msra.mxu1 %v1704_v19  ;;  %v2893_v27 = vld [vmem:[%s12486_s5 + $0x68] sm:$0xff]  ;;  %v9398_v32 = vld [vmem:[%s12483_s2] ss:$0 sm:$0xff]  ;;  %s10509_s21 = scalar_lea.vmem %s12492_s11, %s8137_s12 }
  0x13   : > { %v392_v6 = vld [vmem:[%s9331_s15] sm:$0xff]  ;;  %v393_v7 = vld [vmem:[%s9331_s15 + $0x8] sm:$0xff]  ;;  %v394_v8 = vld [vmem:[%s9331_s15 + $0x10] sm:$0xff]  ;;  %8656 = vmatpush.msra.mxu2 %v2893_v27 }
  0x14   : > { %928 = vmatpush.msra.mxu0 %v520_v5  ;;  %v395_v9 = vld [vmem:[%s9331_s15 + $0x18] sm:$0xff]  ;;  %v396_v10 = vld [vmem:[%s9331_s15 + $0x20] sm:$0xff]  ;;  %v397_v12 = vld [vmem:[%s9331_s15 + $0x28] sm:$0xff]  ;;  %2105 = vmatpush.msra.mxu1 %v1703_v21 }
  0x15   : > { %8140 = vmatmul.msk.f32.vlgmr.msra.gmra.mxu0 %vm528_vm0, %v392_v6  ;;  %v398_v13 = vld [vmem:[%s9331_s15 + $0x30] sm:$0xff]  ;;  %v399_v14 = vld [vmem:[%s9331_s15 + $0x38] sm:$0xff]  ;;  %v400_v15 = vld [vmem:[%s9331_s15 + $0x40] sm:$0xff] }
  0x16   : > { %2900 = vmatpush.msrb.mxu0 %v2895_v4  ;;  %v401_v16 = vld [vmem:[%s9331_s15 + $0x48] sm:$0xff]  ;;  %v402_v17 = vld [vmem:[%s9331_s15 + $0x50] sm:$0xff]  ;;  %v403_v20 = vld [vmem:[%s9331_s15 + $0x58] sm:$0xff]  ;;  %2106 = vmatpush.msra.mxu1 %v1702_v22 }
  0x17   : > { %v404_v24 = vld [vmem:[%s9331_s15 + $0x60] sm:$0xff]  ;;  %v405_v29 = vld [vmem:[%s9331_s15 + $0x68] sm:$0xff]  ;;  %v406_v30 = vld [vmem:[%s9331_s15 + $0x70] sm:$0xff] }
  0x18   : > { %2901 = vmatpush.msrb.mxu0 %v2894_v11  ;;  %2107 = vmatpush.msra.mxu1 %v1701_v23  ;;  %v407_v31 = vld [vmem:[%s9331_s15 + $0x78] sm:$0xff]  ;;  %v408_v34 = vld [vmem:[%s9331_s15 + $0x80] sm:$0xff]  ;;  %v409_v39 = vld [vmem:[%s9331_s15 + $0x88] sm:$0xff] }
  0x19   : > { %v410_v44 = vld [vmem:[%s9331_s15 + $0x90] sm:$0xff]  ;;  %v411_v49 = vld [vmem:[%s9331_s15 + $0x98] sm:$0xff]  ;;  %v412_v54 = vld [vmem:[%s9331_s15 + $0xa0] sm:$0xff] }
  0x1a   : > { %2108 = vmatpush.msra.mxu1 %v1700_v25  ;;  %2902 = vmatpush.msrb.mxu0 %v2893_v27  ;;  %v2892_v57 = vld [vmem:[%s12486_s5 + $0x60] sm:$0xff]  ;;  %v413_v60 = vld [vmem:[%s9331_s15 + $0xa8] sm:$0xff]  ;;  %v414_v1 = vld [vmem:[%s9331_s15 + $0xb0] sm:$0xff] }
  0x1b   : > { %8657 = vmatpush.msra.mxu2 %v2892_v57  ;;  %v415_v6 = vld [vmem:[%s9331_s15 + $0xb8] sm:$0xff]  ;;  %v416_v11 = vld [vmem:[%s9331_s15 + $0xc0] sm:$0xff]  ;;  %v418_v21 = vld [vmem:[%s9331_s15 + $0xd0] sm:$0xff] }
  0x1c   : > { %2109 = vmatpush.msra.mxu1 %v1699_v26  ;;  %2903 = vmatpush.msrb.mxu0 %v2892_v57  ;;  %v419_v26 = vld [vmem:[%s9331_s15 + $0xd8] sm:$0xff] }
  0x1d   : > { %8141 = vmatmul.msk.f32.gmra.mxu0 %vm528_vm0, %v393_v7 }
  0x1e   : > { %2110 = vmatpush.msra.mxu1 %v1698_v28  ;;  %v2891_v28 = vld [vmem:[%s12486_s5 + $0x58] sm:$0xff] }
  0x1f   : > { %8658 = vmatpush.msra.mxu2 %v2891_v28  ;;  %2904 = vmatpush.msrb.mxu0 %v2891_v28 }
  0x25   : > { %8142 = vmatmul.msk.f32.gmra.mxu0 %vm528_vm0, %v394_v8 }
  0x2d   : > { %8143 = vmatmul.msk.f32.gmra.mxu0 %vm528_vm0, %v395_v9 }
  0x35   : > { %8144 = vmatmul.msk.f32.gmra.mxu0 %vm528_vm0, %v396_v10 }
  0x3d   : > { %8145 = vmatmul.msk.f32.gmra.mxu0 %vm528_vm0, %v397_v12 }
  0x45   : > { %8146 = vmatmul.msk.f32.gmra.mxu0 %vm528_vm0, %v398_v13 }
  0x4d   : > { %8147 = vmatmul.msk.f32.gmra.mxu0 %vm528_vm0, %v399_v14 }
  0x55   : > { %8148 = vmatmul.msk.f32.gmra.mxu0 %vm528_vm0, %v400_v15 }
  0x5d   : > { %8149 = vmatmul.msk.f32.gmra.mxu0 %vm528_vm0, %v401_v16  ;;  %v417_v16 = vld [vmem:[%s9331_s15 + $0xc8] sm:$0xff] }
  0x65   : > { %8150 = vmatmul.msk.f32.gmra.mxu0 %vm528_vm0, %v402_v17 }
  0x6d   : > { %8151 = vmatmul.msk.f32.gmra.mxu0 %vm528_vm0, %v403_v20 }
  0x75   : > { %8152 = vmatmul.msk.f32.gmra.mxu0 %vm528_vm0, %v404_v24 }
  0x7d   : > { %8153 = vmatmul.msk.f32.gmra.mxu0 %vm528_vm0, %v405_v29 }
  0x85   : > { %8154 = vmatmul.msk.f32.gmra.mxu0 %vm528_vm0, %v406_v30  ;;  %v2890_v30 = vld [vmem:[%s12486_s5 + $0x50] sm:$0xff] }
  0x86   : > { %8659 = vmatpush.msra.mxu2 %v2890_v30  ;;  %2905 = vmatpush.msrb.mxu0 %v2890_v30 }
  0x8d   : > { %8155 = vmatmul.msk.f32.gmra.mxu0 %vm528_vm0, %v407_v31 }
  0x92   : > { %v930_v33 = vpop.f32.mrf.mxu0 }
  0x93   : > { %v931_v35 = vadd.f32 %v9398_v32, %v930_v33  ;;  %v2889_v33 = vld [vmem:[%s12486_s5 + $0x48] sm:$0xff] }
  0x94   : > { %8660 = vmatpush.msra.mxu2 %v2889_v33  ;;  %2906 = vmatpush.msrb.mxu0 %v2889_v33 }
  0x95   : > { %8156 = vmatmul.msk.f32.gmra.mxu0 %vm528_vm0, %v408_v34  ;;  %vm1314_vm1 = vcmp.ge.f32.partialorder %v931_v35, 0.0  ;;  %v1442_v36 = vmul.f32 0.2, %v931_v35  ;;  %v2888_v34 = vld [vmem:[%s12486_s5 + $0x40] sm:$0xff] }
  0x96   : > { %8661 = vmatpush.msra.mxu2 %v2888_v34  ;;  %2907 = vmatpush.msrb.mxu0 %v2888_v34 }
  0x97   : > { %v1570_v37 = vsel %vm1314_vm1, %v931_v35, %v1442_v36  ;;  %v420_v36 = vld [vmem:[%s9331_s15 + $0xe0] sm:$0xff] }
  0x98   : > { %8268 = vmatmul.msk.f32.vlgmr.msra.gmra.mxu1 %vm1710_vm2, %v1570_v37 }
  0x9a   : > { %v933_v38 = vpop.f32.mrf.mxu0 }
  0x9b   : > { %v934_v40 = vadd.f32 %v9398_v32, %v933_v38  ;;  %v2887_v38 = vld [vmem:[%s12486_s5 + $0x38] sm:$0xff] }
  0x9c   : > { %8662 = vmatpush.msra.mxu2 %v2887_v38  ;;  %2908 = vmatpush.msrb.mxu0 %v2887_v38 }
  0x9d   : > { %8157 = vmatmul.msk.f32.gmra.mxu0 %vm528_vm0, %v409_v39  ;;  %vm1315_vm3 = vcmp.ge.f32.partialorder %v934_v40, 0.0  ;;  %v1443_v41 = vmul.f32 0.2, %v934_v40 }
  0x9f   : > { %v1571_v42 = vsel %vm1315_vm3, %v934_v40, %v1443_v41  ;;  %v2886_v40 = vld [vmem:[%s12486_s5 + $0x30] sm:$0xff] }
  0xa0   : > { %8269 = vmatmul.msk.f32.gmra.mxu1 %vm1710_vm2, %v1571_v42  ;;  %8663 = vmatpush.msra.mxu2 %v2886_v40  ;;  %v2885_v42 = vld [vmem:[%s12486_s5 + $0x28] sm:$0xff] }
  0xa1   : > { %2909 = vmatpush.msrb.mxu0 %v2886_v40 }
  0xa2   : > { %v936_v43 = vpop.f32.mrf.mxu0  ;;  %8664 = vmatpush.msra.mxu2 %v2885_v42 }
  0xa3   : > { %v937_v45 = vadd.f32 %v9398_v32, %v936_v43  ;;  %v2884_v43 = vld [vmem:[%s12486_s5 + $0x20] sm:$0xff]  ;;  %2910 = vmatpush.msrb.mxu0 %v2885_v42 }
  0xa4   : > { %8665 = vmatpush.msra.mxu2 %v2884_v43 }
  0xa5   : > { %8158 = vmatmul.msk.f32.gmra.mxu0 %vm528_vm0, %v410_v44  ;;  %vm1316_vm4 = vcmp.ge.f32.partialorder %v937_v45, 0.0  ;;  %v1444_v46 = vmul.f32 0.2, %v937_v45 }
  0xa6   : > { %2911 = vmatpush.msrb.mxu0 %v2884_v43 }
  0xa7   : > { %v1572_v47 = vsel %vm1316_vm4, %v937_v45, %v1444_v46  ;;  %v421_v45 = vld [vmem:[%s9331_s15 + $0xe8] sm:$0xff] }
  0xa8   : > { %8270 = vmatmul.msk.f32.gmra.mxu1 %vm1710_vm2, %v1572_v47  ;;  %v2883_v47 = vld [vmem:[%s12486_s5 + $0x18] sm:$0xff] }
  0xa9   : > { %8666 = vmatpush.msra.mxu2 %v2883_v47  ;;  %2912 = vmatpush.msrb.mxu0 %v2883_v47 }
  0xaa   : > { %v939_v48 = vpop.f32.mrf.mxu0 }
  0xab   : > { %v940_v50 = vadd.f32 %v9398_v32, %v939_v48 }
  0xad   : > { %8159 = vmatmul.msk.f32.gmra.mxu0 %vm528_vm0, %v411_v49  ;;  %vm1317_vm5 = vcmp.ge.f32.partialorder %v940_v50, 0.0  ;;  %v1445_v51 = vmul.f32 0.2, %v940_v50  ;;  %v2882_v49 = vld [vmem:[%s12486_s5 + $0x10] sm:$0xff] }
  0xae   : > { %8667 = vmatpush.msra.mxu2 %v2882_v49  ;;  %2913 = vmatpush.msrb.mxu0 %v2882_v49 }
  0xaf   : > { %v1573_v52 = vsel %vm1317_vm5, %v940_v50, %v1445_v51  ;;  %v2881_v51 = vld [vmem:[%s12486_s5 + $0x8] sm:$0xff] }
  0xb0   : > { %8271 = vmatmul.msk.f32.gmra.mxu1 %vm1710_vm2, %v1573_v52  ;;  %8668 = vmatpush.msra.mxu2 %v2881_v51  ;;  %v2880_v52 = vld [vmem:[%s12486_s5] sm:$0xff] }
  0xb1   : > { %2914 = vmatpush.msrb.mxu0 %v2881_v51 }
  0xb2   : > { %v942_v53 = vpop.f32.mrf.mxu0  ;;  %8669 = vmatpush.msra.mxu2 %v2880_v52 }
  0xb3   : > { %v943_v55 = vadd.f32 %v9398_v32, %v942_v53  ;;  %2915 = vmatpush.msrb.mxu0 %v2880_v52 }
  0xb5   : > { %8160 = vmatmul.msk.f32.gmra.mxu0 %vm528_vm0, %v412_v54  ;;  %vm1318_vm6 = vcmp.ge.f32.partialorder %v943_v55, 0.0  ;;  %v1446_v56 = vmul.f32 0.2, %v943_v55  ;;  %v422_v54 = vld [vmem:[%s9331_s15 + $0xf0] sm:$0xff] }
  0xb7   : > { %v1574_v58 = vsel %vm1318_vm6, %v943_v55, %v1446_v56 }
  0xb8   : > { %8272 = vmatmul.msk.f32.gmra.mxu1 %vm1710_vm2, %v1574_v58 }
  0xba   : > { %v945_v59 = vpop.f32.mrf.mxu0 }
  0xbb   : > { %v946_v61 = vadd.f32 %v9398_v32, %v945_v59  ;;  %v423_v59 = vld [vmem:[%s9331_s15 + $0xf8] sm:$0xff] }
  0xbd   : > { %8161 = vmatmul.msk.f32.gmra.mxu0 %vm528_vm0, %v413_v60  ;;  %vm1319_vm7 = vcmp.ge.f32.partialorder %v946_v61, 0.0  ;;  %v1447_v62 = vmul.f32 0.2, %v946_v61 }
  0xbf   : > { %v1575_v63 = vsel %vm1319_vm7, %v946_v61, %v1447_v62 }
  0xc0   : > { %8273 = vmatmul.msk.f32.gmra.mxu1 %vm1710_vm2, %v1575_v63 }
  0xc2   : > { %v948_v0 = vpop.f32.mrf.mxu0 }
  0xc3   : > { %v949_v2 = vadd.f32 %v9398_v32, %v948_v0  ;;  %v424_v0 = vld [vmem:[%s9331_s15 + $0x100] sm:$0xff] }
  0xc5   : > { %8162 = vmatmul.msk.f32.gmra.mxu0 %vm528_vm0, %v414_v1  ;;  %vm1320_vm8 = vcmp.ge.f32.partialorder %v949_v2, 0.0  ;;  %v1448_v3 = vmul.f32 0.2, %v949_v2 }
  0xc7   : > { %v1576_v4 = vsel %vm1320_vm8, %v949_v2, %v1448_v3 }
  0xc8   : > { %8274 = vmatmul.msk.f32.gmra.mxu1 %vm1710_vm2, %v1576_v4 }
  0xca   : > { %v951_v5 = vpop.f32.mrf.mxu0 }
  0xcb   : > { %v952_v7 = vadd.f32 %v9398_v32, %v951_v5 }
  0xcd   : > { %8163 = vmatmul.msk.f32.gmra.mxu0 %vm528_vm0, %v415_v6  ;;  %vm1321_vm9 = vcmp.ge.f32.partialorder %v952_v7, 0.0  ;;  %v1449_v8 = vmul.f32 0.2, %v952_v7  ;;  %v425_v6 = vld [vmem:[%s9331_s15 + $0x108] sm:$0xff] }
  0xcf   : > { %v1577_v9 = vsel %vm1321_vm9, %v952_v7, %v1449_v8  ;;  %v9514_v8 = vld [vmem:[%s12485_s4] ss:$0 sm:$0xff] }
  0xd0   : > { %8275 = vmatmul.msk.f32.gmra.mxu1 %vm1710_vm2, %v1577_v9 }
  0xd2   : > { %v954_v10 = vpop.f32.mrf.mxu0 }
  0xd3   : > { %v955_v12 = vadd.f32 %v9398_v32, %v954_v10 }
  0xd5   : > { %8164 = vmatmul.msk.f32.gmra.mxu0 %vm528_vm0, %v416_v11  ;;  %vm1322_vm10 = vcmp.ge.f32.partialorder %v955_v12, 0.0  ;;  %v1450_v13 = vmul.f32 0.2, %v955_v12 }
  0xd7   : > { %v1578_v14 = vsel %vm1322_vm10, %v955_v12, %v1450_v13 }
  0xd8   : > { %8276 = vmatmul.msk.f32.gmra.mxu1 %vm1710_vm2, %v1578_v14 }
  0xda   : > { %v957_v15 = vpop.f32.mrf.mxu0 }
  0xdb   : > { %v958_v17 = vadd.f32 %v9398_v32, %v957_v15 }
  0xdd   : > { %8165 = vmatmul.msk.f32.gmra.mxu0 %vm528_vm0, %v417_v16  ;;  %vm1323_vm11 = vcmp.ge.f32.partialorder %v958_v17, 0.0  ;;  %v1451_v18 = vmul.f32 0.2, %v958_v17  ;;  %v426_v16 = vld [vmem:[%s9331_s15 + $0x110] sm:$0xff] }
  0xdf   : > { %v1579_v19 = vsel %vm1323_vm11, %v958_v17, %v1451_v18 }
  0xe0   : > { %8277 = vmatmul.msk.f32.gmra.mxu1 %vm1710_vm2, %v1579_v19 }
  0xe2   : > { %v960_v20 = vpop.f32.mrf.mxu0 }
  0xe3   : > { %v961_v22 = vadd.f32 %v9398_v32, %v960_v20 }
  0xe5   : > { %8166 = vmatmul.msk.f32.gmra.mxu0 %vm528_vm0, %v418_v21  ;;  %vm1324_vm12 = vcmp.ge.f32.partialorder %v961_v22, 0.0  ;;  %v1452_v23 = vmul.f32 0.2, %v961_v22 }
  0xe7   : > { %v1580_v24 = vsel %vm1324_vm12, %v961_v22, %v1452_v23 }
  0xe8   : > { %8278 = vmatmul.msk.f32.gmra.mxu1 %vm1710_vm2, %v1580_v24 }
  0xea   : > { %v963_v25 = vpop.f32.mrf.mxu0 }
  0xeb   : > { %v964_v27 = vadd.f32 %v9398_v32, %v963_v25  ;;  %v427_v25 = vld [vmem:[%s9331_s15 + $0x118] sm:$0xff] }
  0xed   : > { %8167 = vmatmul.msk.f32.gmra.mxu0 %vm528_vm0, %v419_v26  ;;  %vm1325_vm13 = vcmp.ge.f32.partialorder %v964_v27, 0.0  ;;  %v1453_v29 = vmul.f32 0.2, %v964_v27 }
  0xef   : > { %v1581_v31 = vsel %vm1325_vm13, %v964_v27, %v1453_v29 }
  0xf0   : > { %8279 = vmatmul.msk.f32.gmra.mxu1 %vm1710_vm2, %v1581_v31 }
  0xf2   : > { %v966_v35 = vpop.f32.mrf.mxu0 }
  0xf3   : > { %v967_v37 = vadd.f32 %v9398_v32, %v966_v35  ;;  %v428_v35 = vld [vmem:[%s9331_s15 + $0x120] sm:$0xff] }
  0xf5   : > { %8168 = vmatmul.msk.f32.gmra.mxu0 %vm528_vm0, %v420_v36  ;;  %vm1326_vm14 = vcmp.ge.f32.partialorder %v967_v37, 0.0  ;;  %v1454_v39 = vmul.f32 0.2, %v967_v37 }
  0xf7   : > { %v1582_v41 = vsel %vm1326_vm14, %v967_v37, %v1454_v39 }
  0xf8   : > { %8280 = vmatmul.msk.f32.gmra.mxu1 %vm1710_vm2, %v1582_v41 }
  0xfa   : > { %v969_v44 = vpop.f32.mrf.mxu0 }
  0xfb   : > { %v970_v46 = vadd.f32 %v9398_v32, %v969_v44  ;;  %v429_v44 = vld [vmem:[%s9331_s15 + $0x128] sm:$0xff] }
  0xfd   : > { %8169 = vmatmul.msk.f32.gmra.mxu0 %vm528_vm0, %v421_v45  ;;  %vm1327_vm15 = vcmp.ge.f32.partialorder %v970_v46, 0.0  ;;  %v1455_v48 = vmul.f32 0.2, %v970_v46 }
  0xff   : > { %v1583_v50 = vsel %vm1327_vm15, %v970_v46, %v1455_v48 }
 0x100   : > { %8281 = vmatmul.msk.f32.gmra.mxu1 %vm1710_vm2, %v1583_v50 }
 0x102   : > { %v972_v53 = vpop.f32.mrf.mxu0 }
 0x103   : > { %v973_v55 = vadd.f32 %v9398_v32, %v972_v53  ;;  %v430_v53 = vld [vmem:[%s9331_s15 + $0x130] sm:$0xff] }
 0x105   : > { %8170 = vmatmul.msk.f32.gmra.mxu0 %vm528_vm0, %v422_v54  ;;  %vm1328_vm1 = vcmp.ge.f32.partialorder %v973_v55, 0.0  ;;  %v1456_v56 = vmul.f32 0.2, %v973_v55 }
 0x107   : > { %v1584_v57 = vsel %vm1328_vm1, %v973_v55, %v1456_v56 }
 0x108   : > { %8282 = vmatmul.msk.f32.gmra.mxu1 %vm1710_vm2, %v1584_v57 }
 0x10a   : > { %v975_v58 = vpop.f32.mrf.mxu0 }
 0x10b   : > { %v976_v60 = vadd.f32 %v9398_v32, %v975_v58 }
 0x10d   : > { %8171 = vmatmul.msk.f32.gmra.mxu0 %vm528_vm0, %v423_v59  ;;  %vm1329_vm3 = vcmp.ge.f32.partialorder %v976_v60, 0.0  ;;  %v1457_v61 = vmul.f32 0.2, %v976_v60 }
 0x10f   : > { %v1585_v62 = vsel %vm1329_vm3, %v976_v60, %v1457_v61 }
 0x110   : > { %8283 = vmatmul.msk.f32.gmra.mxu1 %vm1710_vm2, %v1585_v62  ;;  %v431_v62 = vld [vmem:[%s9331_s15 + $0x138] sm:$0xff] }
 0x112   : > { %v978_v63 = vpop.f32.mrf.mxu0 }
 0x113   : > { %v979_v1 = vadd.f32 %v9398_v32, %v978_v63 }
 0x115   : > { %8172 = vmatmul.msk.f32.gmra.mxu0 %vm528_vm0, %v424_v0  ;;  %v9506_v2 = vpop.f32.mrf.mxu1  ;;  %vm1330_vm4 = vcmp.ge.f32.partialorder %v979_v1, 0.0  ;;  %v1458_v3 = vmul.f32 0.2, %v979_v1 }
 0x117   : > { %v1586_v4 = vsel %vm1330_vm4, %v979_v1, %v1458_v3 }
 0x118   : > { %8284 = vmatmul.msk.f32.gmra.mxu1 %vm1710_vm2, %v1586_v4 }
 0x11a   : > { %v981_v5 = vpop.f32.mrf.mxu0 }
 0x11b   : > { %v982_v7 = vadd.f32 %v9398_v32, %v981_v5 }
 0x11d   : > { %8173 = vmatmul.msk.f32.gmra.mxu0 %vm528_vm0, %v425_v6  ;;  %v2115_v9 = vpop.f32.mrf.mxu1  ;;  %vm1331_vm5 = vcmp.ge.f32.partialorder %v982_v7, 0.0  ;;  %v1459_v10 = vmul.f32 0.2, %v982_v7 }
 0x11e   : > { %v2116_v11 = vadd.f32 %v9514_v8, %v2115_v9  ;;  %v432_v9 = vld [vmem:[%s9331_s15 + $0x140] sm:$0xff] }
 0x11f   : > { %v1587_v12 = vsel %vm1331_vm5, %v982_v7, %v1459_v10 }
 0x120   : > { %8285 = vmatmul.msk.f32.gmra.mxu1 %vm1710_vm2, %v1587_v12  ;;  %vm2497_vm6 = vcmp.ge.f32.partialorder %v2116_v11, 0.0  ;;  %v2625_v13 = vmul.f32 0.2, %v2116_v11 }
 0x122   : > { %v984_v14 = vpop.f32.mrf.mxu0  ;;  %v2753_v15 = vsel %vm2497_vm6, %v2116_v11, %v2625_v13 }
 0x123   : > { %v985_v17 = vadd.f32 %v9398_v32, %v984_v14  ;;  %2919 = vmatmul.f32.vlgmr.msra.gmra.mxu2 %v2753_v15 }
 0x125   : > { %8174 = vmatmul.msk.f32.gmra.mxu0 %vm528_vm0, %v426_v16  ;;  %v2118_v18 = vpop.f32.mrf.mxu1  ;;  %vm1332_vm7 = vcmp.ge.f32.partialorder %v985_v17, 0.0  ;;  %v1460_v19 = vmul.f32 0.2, %v985_v17 }
 0x126   : > { %v2119_v20 = vadd.f32 %v9514_v8, %v2118_v18  ;;  %v433_v18 = vld [vmem:[%s9331_s15 + $0x148] sm:$0xff] }
 0x127   : > { %v1588_v21 = vsel %vm1332_vm7, %v985_v17, %v1460_v19 }
 0x128   : > { %8286 = vmatmul.msk.f32.gmra.mxu1 %vm1710_vm2, %v1588_v21  ;;  %vm2498_vm8 = vcmp.ge.f32.partialorder %v2119_v20, 0.0  ;;  %v2626_v22 = vmul.f32 0.2, %v2119_v20 }
 0x12a   : > { %v987_v23 = vpop.f32.mrf.mxu0  ;;  %v2754_v24 = vsel %vm2498_vm8, %v2119_v20, %v2626_v22 }
 0x12b   : > { %v988_v26 = vadd.f32 %v9398_v32, %v987_v23  ;;  %2922 = vmatmul.f32.gmra.mxu2 %v2754_v24 }
 0x12d   : > { %8175 = vmatmul.msk.f32.gmra.mxu0 %vm528_vm0, %v427_v25  ;;  %v2121_v27 = vpop.f32.mrf.mxu1  ;;  %vm1333_vm9 = vcmp.ge.f32.partialorder %v988_v26, 0.0  ;;  %v1461_v28 = vmul.f32 0.2, %v988_v26 }
 0x12e   : > { %v2122_v29 = vadd.f32 %v9514_v8, %v2121_v27  ;;  %v434_v27 = vld [vmem:[%s9331_s15 + $0x150] sm:$0xff] }
 0x12f   : > { %v1589_v30 = vsel %vm1333_vm9, %v988_v26, %v1461_v28 }
 0x130   : > { %8287 = vmatmul.msk.f32.gmra.mxu1 %vm1710_vm2, %v1589_v30  ;;  %vm2499_vm10 = vcmp.ge.f32.partialorder %v2122_v29, 0.0  ;;  %v2627_v31 = vmul.f32 0.2, %v2122_v29 }
 0x132   : > { %v990_v33 = vpop.f32.mrf.mxu0  ;;  %v2755_v34 = vsel %vm2499_vm10, %v2122_v29, %v2627_v31 }
 0x133   : > { %v991_v36 = vadd.f32 %v9398_v32, %v990_v33  ;;  %2925 = vmatmul.f32.gmra.mxu2 %v2755_v34 }
 0x135   : > { %8176 = vmatmul.msk.f32.gmra.mxu0 %vm528_vm0, %v428_v35  ;;  %v2124_v37 = vpop.f32.mrf.mxu1  ;;  %vm1334_vm11 = vcmp.ge.f32.partialorder %v991_v36, 0.0  ;;  %v1462_v38 = vmul.f32 0.2, %v991_v36 }
 0x136   : > { %v2125_v39 = vadd.f32 %v9514_v8, %v2124_v37  ;;  %v435_v37 = vld [vmem:[%s9331_s15 + $0x158] sm:$0xff] }
 0x137   : > { %v1590_v40 = vsel %vm1334_vm11, %v991_v36, %v1462_v38 }
 0x138   : > { %8288 = vmatmul.msk.f32.gmra.mxu1 %vm1710_vm2, %v1590_v40  ;;  %vm2500_vm12 = vcmp.ge.f32.partialorder %v2125_v39, 0.0  ;;  %v2628_v41 = vmul.f32 0.2, %v2125_v39 }
 0x13a   : > { %v993_v42 = vpop.f32.mrf.mxu0  ;;  %v2756_v43 = vsel %vm2500_vm12, %v2125_v39, %v2628_v41 }
 0x13b   : > { %v994_v45 = vadd.f32 %v9398_v32, %v993_v42  ;;  %2928 = vmatmul.f32.gmra.mxu2 %v2756_v43 }
 0x13d   : > { %8177 = vmatmul.msk.f32.gmra.mxu0 %vm528_vm0, %v429_v44  ;;  %v2127_v46 = vpop.f32.mrf.mxu1  ;;  %vm1335_vm13 = vcmp.ge.f32.partialorder %v994_v45, 0.0  ;;  %v1463_v47 = vmul.f32 0.2, %v994_v45 }
 0x13e   : > { %v2128_v48 = vadd.f32 %v9514_v8, %v2127_v46  ;;  %v436_v46 = vld [vmem:[%s9331_s15 + $0x160] sm:$0xff] }
 0x13f   : > { %v1591_v49 = vsel %vm1335_vm13, %v994_v45, %v1463_v47 }
 0x140   : > { %8289 = vmatmul.msk.f32.gmra.mxu1 %vm1710_vm2, %v1591_v49  ;;  %vm2501_vm14 = vcmp.ge.f32.partialorder %v2128_v48, 0.0  ;;  %v2629_v50 = vmul.f32 0.2, %v2128_v48 }
 0x142   : > { %v996_v51 = vpop.f32.mrf.mxu0  ;;  %v2757_v52 = vsel %vm2501_vm14, %v2128_v48, %v2629_v50 }
 0x143   : > { %v997_v54 = vadd.f32 %v9398_v32, %v996_v51  ;;  %2931 = vmatmul.f32.gmra.mxu2 %v2757_v52 }
 0x145   : > { %8178 = vmatmul.msk.f32.gmra.mxu0 %vm528_vm0, %v430_v53  ;;  %v2130_v55 = vpop.f32.mrf.mxu1  ;;  %vm1336_vm15 = vcmp.ge.f32.partialorder %v997_v54, 0.0  ;;  %v1464_v56 = vmul.f32 0.2, %v997_v54 }
 0x146   : > { %v2131_v57 = vadd.f32 %v9514_v8, %v2130_v55  ;;  %v437_v55 = vld [vmem:[%s9331_s15 + $0x168] sm:$0xff] }
 0x147   : > { %v1592_v58 = vsel %vm1336_vm15, %v997_v54, %v1464_v56 }
 0x148   : > { %8290 = vmatmul.msk.f32.gmra.mxu1 %vm1710_vm2, %v1592_v58  ;;  %vm2502_vm1 = vcmp.ge.f32.partialorder %v2131_v57, 0.0  ;;  %v2630_v59 = vmul.f32 0.2, %v2131_v57 }
 0x14a   : > { %v999_v60 = vpop.f32.mrf.mxu0  ;;  %v2758_v61 = vsel %vm2502_vm1, %v2131_v57, %v2630_v59 }
 0x14b   : > { %v1000_v63 = vadd.f32 %v9398_v32, %v999_v60  ;;  %2934 = vmatmul.f32.gmra.mxu2 %v2758_v61 }
 0x14d   : > { %8179 = vmatmul.msk.f32.gmra.mxu0 %vm528_vm0, %v431_v62  ;;  %v2133_v0 = vpop.f32.mrf.mxu1  ;;  %vm1337_vm3 = vcmp.ge.f32.partialorder %v1000_v63, 0.0  ;;  %v1465_v1 = vmul.f32 0.2, %v1000_v63 }
 0x14e   : > { %v2134_v3 = vadd.f32 %v9514_v8, %v2133_v0  ;;  %v438_v0 = vld [vmem:[%s9331_s15 + $0x170] sm:$0xff] }
 0x14f   : > { %v1593_v4 = vsel %vm1337_vm3, %v1000_v63, %v1465_v1 }
 0x150   : > { %8291 = vmatmul.msk.f32.gmra.mxu1 %vm1710_vm2, %v1593_v4  ;;  %vm2503_vm4 = vcmp.ge.f32.partialorder %v2134_v3, 0.0  ;;  %v2631_v5 = vmul.f32 0.2, %v2134_v3 }
 0x152   : > { %v1002_v6 = vpop.f32.mrf.mxu0  ;;  %v2759_v7 = vsel %vm2503_vm4, %v2134_v3, %v2631_v5 }
 0x153   : > { %v1003_v10 = vadd.f32 %v9398_v32, %v1002_v6  ;;  %2937 = vmatmul.f32.gmra.mxu2 %v2759_v7 }
 0x155   : > { %v1466_v11 = vmul.f32 0.2, %v1003_v10  ;;  %8180 = vmatmul.msk.f32.gmra.mxu0 %vm528_vm0, %v432_v9  ;;  %v2136_v12 = vpop.f32.mrf.mxu1  ;;  %vm1338_vm5 = vcmp.ge.f32.partialorder %v1003_v10, 0.0 }
 0x156   : > { %v2137_v13 = vadd.f32 %v9514_v8, %v2136_v12 }
 0x157   : > { %v1594_v14 = vsel %vm1338_vm5, %v1003_v10, %v1466_v11  ;;  %v439_v11 = vld [vmem:[%s9331_s15 + $0x178] sm:$0xff] }
 0x158   : > { %8292 = vmatmul.msk.f32.gmra.mxu1 %vm1710_vm2, %v1594_v14  ;;  %vm2504_vm6 = vcmp.ge.f32.partialorder %v2137_v13, 0.0  ;;  %v2632_v15 = vmul.f32 0.2, %v2137_v13 }
 0x15a   : > { %v1005_v16 = vpop.f32.mrf.mxu0  ;;  %v2760_v17 = vsel %vm2504_vm6, %v2137_v13, %v2632_v15 }
 0x15b   : > { %v1006_v19 = vadd.f32 %v9398_v32, %v1005_v16  ;;  %2940 = vmatmul.f32.gmra.mxu2 %v2760_v17 }
 0x15d   : > { %v1467_v20 = vmul.f32 0.2, %v1006_v19  ;;  %8181 = vmatmul.msk.f32.gmra.mxu0 %vm528_vm0, %v433_v18  ;;  %v2139_v21 = vpop.f32.mrf.mxu1  ;;  %vm1339_vm7 = vcmp.ge.f32.partialorder %v1006_v19, 0.0 }
 0x15e   : > { %v2140_v22 = vadd.f32 %v9514_v8, %v2139_v21 }
 0x15f   : > { %v1595_v23 = vsel %vm1339_vm7, %v1006_v19, %v1467_v20  ;;  %v440_v20 = vld [vmem:[%s9331_s15 + $0x180] sm:$0xff] }
 0x160   : > { %8293 = vmatmul.msk.f32.gmra.mxu1 %vm1710_vm2, %v1595_v23  ;;  %vm2505_vm8 = vcmp.ge.f32.partialorder %v2140_v22, 0.0  ;;  %v2633_v24 = vmul.f32 0.2, %v2140_v22 }
 0x162   : > { %v1008_v25 = vpop.f32.mrf.mxu0  ;;  %v2761_v26 = vsel %vm2505_vm8, %v2140_v22, %v2633_v24 }
 0x163   : > { %v1009_v28 = vadd.f32 %v9398_v32, %v1008_v25  ;;  %2943 = vmatmul.f32.gmra.mxu2 %v2761_v26 }
 0x165   : > { %v1468_v29 = vmul.f32 0.2, %v1009_v28  ;;  %8182 = vmatmul.msk.f32.gmra.mxu0 %vm528_vm0, %v434_v27  ;;  %v2142_v30 = vpop.f32.mrf.mxu1  ;;  %vm1340_vm9 = vcmp.ge.f32.partialorder %v1009_v28, 0.0 }
 0x166   : > { %v2143_v31 = vadd.f32 %v9514_v8, %v2142_v30 }
 0x167   : > { %v1596_v33 = vsel %vm1340_vm9, %v1009_v28, %v1468_v29  ;;  %v441_v29 = vld [vmem:[%s9331_s15 + $0x188] sm:$0xff] }
 0x168   : > { %8294 = vmatmul.msk.f32.gmra.mxu1 %vm1710_vm2, %v1596_v33  ;;  %vm2506_vm10 = vcmp.ge.f32.partialorder %v2143_v31, 0.0  ;;  %v2634_v34 = vmul.f32 0.2, %v2143_v31 }
 0x16a   : > { %v1011_v35 = vpop.f32.mrf.mxu0  ;;  %v2762_v36 = vsel %vm2506_vm10, %v2143_v31, %v2634_v34 }
 0x16b   : > { %v1012_v38 = vadd.f32 %v9398_v32, %v1011_v35  ;;  %2946 = vmatmul.f32.gmra.mxu2 %v2762_v36 }
 0x16d   : > { %v1469_v39 = vmul.f32 0.2, %v1012_v38  ;;  %8183 = vmatmul.msk.f32.gmra.mxu0 %vm528_vm0, %v435_v37  ;;  %v2145_v40 = vpop.f32.mrf.mxu1  ;;  %vm1341_vm11 = vcmp.ge.f32.partialorder %v1012_v38, 0.0 }
 0x16e   : > { %v2146_v41 = vadd.f32 %v9514_v8, %v2145_v40 }
 0x16f   : > { %v1597_v42 = vsel %vm1341_vm11, %v1012_v38, %v1469_v39  ;;  %v442_v39 = vld [vmem:[%s9331_s15 + $0x190] sm:$0xff] }
 0x170   : > { %8295 = vmatmul.msk.f32.gmra.mxu1 %vm1710_vm2, %v1597_v42  ;;  %vm2507_vm12 = vcmp.ge.f32.partialorder %v2146_v41, 0.0  ;;  %v2635_v43 = vmul.f32 0.2, %v2146_v41 }
 0x172   : > { %v1014_v44 = vpop.f32.mrf.mxu0  ;;  %v2763_v45 = vsel %vm2507_vm12, %v2146_v41, %v2635_v43 }
 0x173   : > { %v1015_v47 = vadd.f32 %v9398_v32, %v1014_v44  ;;  %2949 = vmatmul.f32.gmra.mxu2 %v2763_v45 }
 0x175   : > { %v1470_v48 = vmul.f32 0.2, %v1015_v47  ;;  %8184 = vmatmul.msk.f32.gmra.mxu0 %vm528_vm0, %v436_v46  ;;  %v2148_v49 = vpop.f32.mrf.mxu1  ;;  %vm1342_vm13 = vcmp.ge.f32.partialorder %v1015_v47, 0.0 }
 0x176   : > { %v2149_v50 = vadd.f32 %v9514_v8, %v2148_v49  ;;  %v443_v49 = vld [vmem:[%s9331_s15 + $0x198] sm:$0xff] }
 0x177   : > { %v1598_v51 = vsel %vm1342_vm13, %v1015_v47, %v1470_v48 }
 0x178   : > { %8296 = vmatmul.msk.f32.gmra.mxu1 %vm1710_vm2, %v1598_v51  ;;  %vm2508_vm14 = vcmp.ge.f32.partialorder %v2149_v50, 0.0  ;;  %v2636_v52 = vmul.f32 0.2, %v2149_v50 }
 0x17a   : > { %v1017_v53 = vpop.f32.mrf.mxu0  ;;  %v2764_v54 = vsel %vm2508_vm14, %v2149_v50, %v2636_v52 }
 0x17b   : > { %v1018_v56 = vadd.f32 %v9398_v32, %v1017_v53  ;;  %2952 = vmatmul.f32.gmra.mxu2 %v2764_v54 }
 0x17d   : > { %v1471_v57 = vmul.f32 0.2, %v1018_v56  ;;  %8185 = vmatmul.msk.f32.gmra.mxu0 %vm528_vm0, %v437_v55  ;;  %v2151_v58 = vpop.f32.mrf.mxu1  ;;  %vm1343_vm15 = vcmp.ge.f32.partialorder %v1018_v56, 0.0 }
 0x17e   : > { %v2152_v59 = vadd.f32 %v9514_v8, %v2151_v58 }
 0x17f   : > { %v1599_v60 = vsel %vm1343_vm15, %v1018_v56, %v1471_v57 }
 0x180   : > { %8297 = vmatmul.msk.f32.gmra.mxu1 %vm1710_vm2, %v1599_v60  ;;  %vm2509_vm1 = vcmp.ge.f32.partialorder %v2152_v59, 0.0  ;;  %v2637_v61 = vmul.f32 0.2, %v2152_v59 }
 0x182   : > { %v1020_v62 = vpop.f32.mrf.mxu0  ;;  %v2765_v63 = vsel %vm2509_vm1, %v2152_v59, %v2637_v61  ;;  %v444_v59 = vld [vmem:[%s9331_s15 + $0x1a0] sm:$0xff] }
 0x183   : > { %v1021_v1 = vadd.f32 %v9398_v32, %v1020_v62  ;;  %2955 = vmatmul.f32.gmra.mxu2 %v2765_v63 }
 0x185   : > { %v1472_v3 = vmul.f32 0.2, %v1021_v1  ;;  %8186 = vmatmul.msk.f32.gmra.mxu0 %vm528_vm0, %v438_v0  ;;  %v2154_v4 = vpop.f32.mrf.mxu1  ;;  %vm1344_vm3 = vcmp.ge.f32.partialorder %v1021_v1, 0.0 }
 0x186   : > { %v2155_v5 = vadd.f32 %v9514_v8, %v2154_v4 }
 0x187   : > { %v1600_v6 = vsel %vm1344_vm3, %v1021_v1, %v1472_v3 }
 0x188   : > { %8298 = vmatmul.msk.f32.gmra.mxu1 %vm1710_vm2, %v1600_v6  ;;  %vm2510_vm4 = vcmp.ge.f32.partialorder %v2155_v5, 0.0  ;;  %v2638_v7 = vmul.f32 0.2, %v2155_v5  ;;  %v445_v6 = vld [vmem:[%s9331_s15 + $0x1a8] sm:$0xff] }
 0x18a   : > { %v1023_v9 = vpop.f32.mrf.mxu0  ;;  %v2766_v10 = vsel %vm2510_vm4, %v2155_v5, %v2638_v7 }
 0x18b   : > { %v1024_v12 = vadd.f32 %v9398_v32, %v1023_v9  ;;  %2958 = vmatmul.f32.gmra.mxu2 %v2766_v10 }
 0x18d   : > { %v1473_v13 = vmul.f32 0.2, %v1024_v12  ;;  %8187 = vmatmul.msk.f32.gmra.mxu0 %vm528_vm0, %v439_v11  ;;  %v2157_v14 = vpop.f32.mrf.mxu1  ;;  %vm1345_vm5 = vcmp.ge.f32.partialorder %v1024_v12, 0.0 }
 0x18e   : > { %v2158_v15 = vadd.f32 %v9514_v8, %v2157_v14 }
 0x18f   : > { %v1601_v16 = vsel %vm1345_vm5, %v1024_v12, %v1473_v13 }
 0x190   : > { %8299 = vmatmul.msk.f32.gmra.mxu1 %vm1710_vm2, %v1601_v16  ;;  %vm2511_vm6 = vcmp.ge.f32.partialorder %v2158_v15, 0.0  ;;  %v2639_v17 = vmul.f32 0.2, %v2158_v15 }
 0x192   : > { %v1026_v18 = vpop.f32.mrf.mxu0  ;;  %v2767_v19 = vsel %vm2511_vm6, %v2158_v15, %v2639_v17  ;;  %v446_v17 = vld [vmem:[%s9331_s15 + $0x1b0] sm:$0xff] }
 0x193   : > { %v1027_v21 = vadd.f32 %v9398_v32, %v1026_v18  ;;  %2961 = vmatmul.f32.gmra.mxu2 %v2767_v19 }
 0x195   : > { %v1474_v22 = vmul.f32 0.2, %v1027_v21  ;;  %8188 = vmatmul.msk.f32.gmra.mxu0 %vm528_vm0, %v440_v20  ;;  %v2160_v23 = vpop.f32.mrf.mxu1  ;;  %vm1346_vm7 = vcmp.ge.f32.partialorder %v1027_v21, 0.0 }
 0x196   : > { %v2161_v24 = vadd.f32 %v9514_v8, %v2160_v23 }
 0x197   : > { %v1602_v25 = vsel %vm1346_vm7, %v1027_v21, %v1474_v22 }
 0x198   : > { %8300 = vmatmul.msk.f32.gmra.mxu1 %vm1710_vm2, %v1602_v25  ;;  %vm2512_vm8 = vcmp.ge.f32.partialorder %v2161_v24, 0.0  ;;  %v2640_v26 = vmul.f32 0.2, %v2161_v24 }
 0x19a   : > { %v1029_v27 = vpop.f32.mrf.mxu0  ;;  %v2768_v28 = vsel %vm2512_vm8, %v2161_v24, %v2640_v26 }
 0x19b   : > { %v1030_v30 = vadd.f32 %v9398_v32, %v1029_v27  ;;  %2964 = vmatmul.f32.gmra.mxu2 %v2768_v28  ;;  %v447_v27 = vld [vmem:[%s9331_s15 + $0x1b8] sm:$0xff] }
 0x19d   : > { %v1475_v31 = vmul.f32 0.2, %v1030_v30  ;;  %8189 = vmatmul.msk.f32.gmra.mxu0 %vm528_vm0, %v441_v29  ;;  %v2163_v33 = vpop.f32.mrf.mxu1  ;;  %vm1347_vm9 = vcmp.ge.f32.partialorder %v1030_v30, 0.0 }
 0x19e   : > { %v2164_v34 = vadd.f32 %v9514_v8, %v2163_v33 }
 0x19f   : > { %v1603_v35 = vsel %vm1347_vm9, %v1030_v30, %v1475_v31 }
 0x1a0   : > { %8301 = vmatmul.msk.f32.gmra.mxu1 %vm1710_vm2, %v1603_v35  ;;  %vm2513_vm10 = vcmp.ge.f32.partialorder %v2164_v34, 0.0  ;;  %v2641_v36 = vmul.f32 0.2, %v2164_v34 }
 0x1a2   : > { %v1032_v37 = vpop.f32.mrf.mxu0  ;;  %v2769_v38 = vsel %vm2513_vm10, %v2164_v34, %v2641_v36 }
 0x1a3   : > { %v1033_v40 = vadd.f32 %v9398_v32, %v1032_v37  ;;  %2967 = vmatmul.f32.gmra.mxu2 %v2769_v38  ;;  %v448_v38 = vld [vmem:[%s9331_s15 + $0x1c0] sm:$0xff] }
 0x1a5   : > { %v1476_v41 = vmul.f32 0.2, %v1033_v40  ;;  %8190 = vmatmul.msk.f32.gmra.mxu0 %vm528_vm0, %v442_v39  ;;  %v2166_v42 = vpop.f32.mrf.mxu1  ;;  %vm1348_vm11 = vcmp.ge.f32.partialorder %v1033_v40, 0.0 }
 0x1a6   : > { %v2167_v43 = vadd.f32 %v9514_v8, %v2166_v42  ;;  %v9603_v44 = vpop.f32.mrf.mxu2 }
 0x1a7   : > { %v1604_v45 = vsel %vm1348_vm11, %v1033_v40, %v1476_v41 }
 0x1a8   : > { %8302 = vmatmul.msk.f32.gmra.mxu1 %vm1710_vm2, %v1604_v45  ;;  %vm2514_vm12 = vcmp.ge.f32.partialorder %v2167_v43, 0.0  ;;  %v2642_v46 = vmul.f32 0.2, %v2167_v43 }
 0x1aa   : > { %v1035_v47 = vpop.f32.mrf.mxu0  ;;  %v2770_v48 = vsel %vm2514_vm12, %v2167_v43, %v2642_v46 }
 0x1ab   : > { %v1036_v50 = vadd.f32 %v9398_v32, %v1035_v47  ;;  %2970 = vmatmul.f32.gmra.mxu2 %v2770_v48 }
 0x1ad   : > { %v1477_v51 = vmul.f32 0.2, %v1036_v50  ;;  %8191 = vmatmul.msk.f32.gmra.mxu0 %vm528_vm0, %v443_v49  ;;  %v2169_v52 = vpop.f32.mrf.mxu1  ;;  %vm1349_vm13 = vcmp.ge.f32.partialorder %v1036_v50, 0.0  ;;  %v449_v49 = vld [vmem:[%s9331_s15 + $0x1c8] sm:$0xff] }
 0x1ae   : > { %v2170_v53 = vadd.f32 %v9514_v8, %v2169_v52  ;;  %v9610_v54 = vpop.f32.mrf.mxu2 }
 0x1af   : > { %v1605_v55 = vsel %vm1349_vm13, %v1036_v50, %v1477_v51 }
 0x1b0   : > { %8303 = vmatmul.msk.f32.gmra.mxu1 %vm1710_vm2, %v1605_v55  ;;  %vm2515_vm14 = vcmp.ge.f32.partialorder %v2170_v53, 0.0  ;;  %v2643_v56 = vmul.f32 0.2, %v2170_v53 }
 0x1b2   : > { %v1038_v57 = vpop.f32.mrf.mxu0  ;;  %v2771_v58 = vsel %vm2515_vm14, %v2170_v53, %v2643_v56 }
 0x1b3   : > { %v1039_v60 = vadd.f32 %v9398_v32, %v1038_v57  ;;  %2973 = vmatmul.f32.gmra.mxu2 %v2771_v58 }
 0x1b5   : > { %v1478_v61 = vmul.f32 0.2, %v1039_v60  ;;  %8192 = vmatmul.msk.f32.gmra.mxu0 %vm528_vm0, %v444_v59  ;;  %v2172_v62 = vpop.f32.mrf.mxu1  ;;  %vm1350_vm15 = vcmp.ge.f32.partialorder %v1039_v60, 0.0 }
 0x1b6   : > { %v2173_v63 = vadd.f32 %v9514_v8, %v2172_v62  ;;  %v9617_v0 = vpop.f32.mrf.mxu2 }
 0x1b7   : > { %v1606_v1 = vsel %vm1350_vm15, %v1039_v60, %v1478_v61  ;;  %v450_v60 = vld [vmem:[%s9331_s15 + $0x1d0] sm:$0xff] }
 0x1b8   : > { %8304 = vmatmul.msk.f32.gmra.mxu1 %vm1710_vm2, %v1606_v1  ;;  %vm2516_vm1 = vcmp.ge.f32.partialorder %v2173_v63, 0.0  ;;  %v2644_v3 = vmul.f32 0.2, %v2173_v63 }
 0x1ba   : > { %v1041_v4 = vpop.f32.mrf.mxu0  ;;  %v2772_v5 = vsel %vm2516_vm1, %v2173_v63, %v2644_v3 }
 0x1bb   : > { %v1042_v7 = vadd.f32 %v9398_v32, %v1041_v4  ;;  %2976 = vmatmul.f32.gmra.mxu2 %v2772_v5 }
 0x1bd   : > { %v1479_v9 = vmul.f32 0.2, %v1042_v7  ;;  %8193 = vmatmul.msk.f32.gmra.mxu0 %vm528_vm0, %v445_v6  ;;  %v2175_v10 = vpop.f32.mrf.mxu1  ;;  %vm1351_vm3 = vcmp.ge.f32.partialorder %v1042_v7, 0.0 }
 0x1be   : > { %v2176_v11 = vadd.f32 %v9514_v8, %v2175_v10  ;;  %v9624_v12 = vpop.f32.mrf.mxu2 }
 0x1bf   : > { %v1607_v13 = vsel %vm1351_vm3, %v1042_v7, %v1479_v9  ;;  %v451_v9 = vld [vmem:[%s9331_s15 + $0x1d8] sm:$0xff] }
 0x1c0   : > { %8305 = vmatmul.msk.f32.gmra.mxu1 %vm1710_vm2, %v1607_v13  ;;  %vm2517_vm4 = vcmp.ge.f32.partialorder %v2176_v11, 0.0  ;;  %v2645_v14 = vmul.f32 0.2, %v2176_v11 }
 0x1c2   : > { %v1044_v15 = vpop.f32.mrf.mxu0  ;;  %v2773_v16 = vsel %vm2517_vm4, %v2176_v11, %v2645_v14 }
 0x1c3   : > { %v1045_v18 = vadd.f32 %v9398_v32, %v1044_v15  ;;  %2979 = vmatmul.f32.gmra.mxu2 %v2773_v16 }
 0x1c5   : > { %v1480_v19 = vmul.f32 0.2, %v1045_v18  ;;  %8194 = vmatmul.msk.f32.gmra.mxu0 %vm528_vm0, %v446_v17  ;;  %v2178_v20 = vpop.f32.mrf.mxu1  ;;  %vm1352_vm5 = vcmp.ge.f32.partialorder %v1045_v18, 0.0 }
 0x1c6   : > { %v2179_v21 = vadd.f32 %v9514_v8, %v2178_v20  ;;  %v9631_v22 = vpop.f32.mrf.mxu2  ;;  %v452_v20 = vld [vmem:[%s9331_s15 + $0x1e0] sm:$0xff] }
 0x1c7   : > { %v1608_v23 = vsel %vm1352_vm5, %v1045_v18, %v1480_v19 }
 0x1c8   : > { %8306 = vmatmul.msk.f32.gmra.mxu1 %vm1710_vm2, %v1608_v23  ;;  %vm2518_vm6 = vcmp.ge.f32.partialorder %v2179_v21, 0.0  ;;  %v2646_v24 = vmul.f32 0.2, %v2179_v21 }
 0x1ca   : > { %v1047_v25 = vpop.f32.mrf.mxu0  ;;  %v2774_v26 = vsel %vm2518_vm6, %v2179_v21, %v2646_v24 }
 0x1cb   : > { %v1048_v28 = vadd.f32 %v9398_v32, %v1047_v25  ;;  %2982 = vmatmul.f32.gmra.mxu2 %v2774_v26 }
 0x1cd   : > { %v1481_v29 = vmul.f32 0.2, %v1048_v28  ;;  %8195 = vmatmul.msk.f32.gmra.mxu0 %vm528_vm0, %v447_v27  ;;  %v2181_v30 = vpop.f32.mrf.mxu1  ;;  %vm1353_vm7 = vcmp.ge.f32.partialorder %v1048_v28, 0.0 }
 0x1ce   : > { %v2182_v31 = vadd.f32 %v9514_v8, %v2181_v30  ;;  %v9638_v33 = vpop.f32.mrf.mxu2 }
 0x1cf   : > { %v1609_v34 = vsel %vm1353_vm7, %v1048_v28, %v1481_v29 }
 0x1d0   : > { %8307 = vmatmul.msk.f32.gmra.mxu1 %vm1710_vm2, %v1609_v34  ;;  %vm2519_vm8 = vcmp.ge.f32.partialorder %v2182_v31, 0.0  ;;  %v2647_v35 = vmul.f32 0.2, %v2182_v31 }
 0x1d2   : > { %v1050_v36 = vpop.f32.mrf.mxu0  ;;  %v2775_v37 = vsel %vm2519_vm8, %v2182_v31, %v2647_v35  ;;  %v453_v31 = vld [vmem:[%s9331_s15 + $0x1e8] sm:$0xff] }
 0x1d3   : > { %v1051_v39 = vadd.f32 %v9398_v32, %v1050_v36  ;;  %2985 = vmatmul.f32.gmra.mxu2 %v2775_v37  ;;  %v9652_v32 = vld [vmem:[%s12483_s2] ss:$0 sm:$0xff] }
 0x1d5   : > { %v1482_v40 = vmul.f32 0.2, %v1051_v39  ;;  %8196 = vmatmul.msk.f32.gmra.mxu0 %vm528_vm0, %v448_v38  ;;  %v2184_v41 = vpop.f32.mrf.mxu1  ;;  %vm1354_vm9 = vcmp.ge.f32.partialorder %v1051_v39, 0.0 }
 0x1d6   : > { %v2185_v42 = vadd.f32 %v9514_v8, %v2184_v41  ;;  %v9645_v43 = vpop.f32.mrf.mxu2 }
 0x1d7   : > { %v1610_v45 = vsel %vm1354_vm9, %v1051_v39, %v1482_v40 }
 0x1d8   : > { %8308 = vmatmul.msk.f32.gmra.mxu1 %vm1710_vm2, %v1610_v45  ;;  %vm2520_vm10 = vcmp.ge.f32.partialorder %v2185_v42, 0.0  ;;  %v2648_v46 = vmul.f32 0.2, %v2185_v42  ;;  %v454_v45 = vld [vmem:[%s9331_s15 + $0x1f0] sm:$0xff] }
 0x1da   : > { %v1053_v47 = vpop.f32.mrf.mxu0  ;;  %v2776_v48 = vsel %vm2520_vm10, %v2185_v42, %v2648_v46 }
 0x1db   : > { %v1054_v50 = vadd.f32 %v9652_v32, %v1053_v47  ;;  %2988 = vmatmul.f32.gmra.mxu2 %v2776_v48 }
 0x1dd   : > { %v1483_v51 = vmul.f32 0.2, %v1054_v50  ;;  %8197 = vmatmul.msk.f32.gmra.mxu0 %vm528_vm0, %v449_v49  ;;  %v2187_v52 = vpop.f32.mrf.mxu1  ;;  %vm1355_vm11 = vcmp.ge.f32.partialorder %v1054_v50, 0.0 }
 0x1de   : > { %v2188_v53 = vadd.f32 %v9514_v8, %v2187_v52  ;;  %v9657_v55 = vpop.f32.mrf.mxu2 }
 0x1df   : > { %v1611_v56 = vsel %vm1355_vm11, %v1054_v50, %v1483_v51 }
 0x1e0   : > { %8309 = vmatmul.msk.f32.gmra.mxu1 %vm1710_vm2, %v1611_v56  ;;  %vm2521_vm12 = vcmp.ge.f32.partialorder %v2188_v53, 0.0  ;;  %v2649_v57 = vmul.f32 0.2, %v2188_v53 }
 0x1e2   : > { %v1056_v58 = vpop.f32.mrf.mxu0  ;;  %v2777_v59 = vsel %vm2521_vm12, %v2188_v53, %v2649_v57  ;;  %v455_v57 = vld [vmem:[%s9331_s15 + $0x1f8] sm:$0xff] }
 0x1e3   : > { %v1057_v61 = vadd.f32 %v9652_v32, %v1056_v58  ;;  %2991 = vmatmul.f32.gmra.mxu2 %v2777_v59 }
 0x1e5   : > { %v1484_v62 = vmul.f32 0.2, %v1057_v61  ;;  %8198 = vmatmul.msk.f32.gmra.mxu0 %vm528_vm0, %v450_v60  ;;  %v2190_v63 = vpop.f32.mrf.mxu1  ;;  %vm1356_vm13 = vcmp.ge.f32.partialorder %v1057_v61, 0.0 }
 0x1e6   : > { %v2191_v1 = vadd.f32 %v9514_v8, %v2190_v63  ;;  %v9664_v3 = vpop.f32.mrf.mxu2 }
 0x1e7   : > { %v1612_v4 = vsel %vm1356_vm13, %v1057_v61, %v1484_v62 }
 0x1e8   : > { %8310 = vmatmul.msk.f32.gmra.mxu1 %vm1710_vm2, %v1612_v4  ;;  %vm2522_vm14 = vcmp.ge.f32.partialorder %v2191_v1, 0.0  ;;  %v2650_v5 = vmul.f32 0.2, %v2191_v1 }
 0x1ea   : > { %v1059_v6 = vpop.f32.mrf.mxu0  ;;  %v2778_v7 = vsel %vm2522_vm14, %v2191_v1, %v2650_v5 }
 0x1eb   : > { %v1060_v10 = vadd.f32 %v9652_v32, %v1059_v6  ;;  %2994 = vmatmul.f32.gmra.mxu2 %v2778_v7  ;;  %v456_v6 = vld [vmem:[%s9331_s15 + $0x200] sm:$0xff] }
 0x1ed   : > { %v1485_v11 = vmul.f32 0.2, %v1060_v10  ;;  %8199 = vmatmul.msk.f32.gmra.mxu0 %vm528_vm0, %v451_v9  ;;  %v2193_v13 = vpop.f32.mrf.mxu1  ;;  %vm1357_vm15 = vcmp.ge.f32.partialorder %v1060_v10, 0.0 }
 0x1ee   : > { %v2194_v14 = vadd.f32 %v9514_v8, %v2193_v13  ;;  %v9671_v15 = vpop.f32.mrf.mxu2 }
 0x1ef   : > { %v1613_v16 = vsel %vm1357_vm15, %v1060_v10, %v1485_v11 }
 0x1f0   : > { %8311 = vmatmul.msk.f32.gmra.mxu1 %vm1710_vm2, %v1613_v16  ;;  %vm2523_vm1 = vcmp.ge.f32.partialorder %v2194_v14, 0.0  ;;  %v2651_v17 = vmul.f32 0.2, %v2194_v14 }
 0x1f2   : > { %v1062_v18 = vpop.f32.mrf.mxu0  ;;  %v2779_v19 = vsel %vm2523_vm1, %v2194_v14, %v2651_v17 }
 0x1f3   : > { %v1063_v21 = vadd.f32 %v9652_v32, %v1062_v18  ;;  %2997 = vmatmul.f32.gmra.mxu2 %v2779_v19  ;;  %v457_v19 = vld [vmem:[%s9331_s15 + $0x208] sm:$0xff] }
 0x1f5   : > { %v1486_v23 = vmul.f32 0.2, %v1063_v21  ;;  %8200 = vmatmul.msk.f32.gmra.mxu0 %vm528_vm0, %v452_v20  ;;  %v2196_v24 = vpop.f32.mrf.mxu1  ;;  %vm1358_vm3 = vcmp.ge.f32.partialorder %v1063_v21, 0.0 }
 0x1f6   : > { %v2197_v25 = vadd.f32 %v9514_v8, %v2196_v24  ;;  %v9678_v26 = vpop.f32.mrf.mxu2 }
 0x1f7   : > { %v1614_v27 = vsel %vm1358_vm3, %v1063_v21, %v1486_v23 }
 0x1f8   : > { %8312 = vmatmul.msk.f32.gmra.mxu1 %vm1710_vm2, %v1614_v27  ;;  %vm2524_vm4 = vcmp.ge.f32.partialorder %v2197_v25, 0.0  ;;  %v2652_v28 = vmul.f32 0.2, %v2197_v25 }
 0x1fa   : > { %v1065_v29 = vpop.f32.mrf.mxu0  ;;  %v2780_v30 = vsel %vm2524_vm4, %v2197_v25, %v2652_v28 }
 0x1fb   : > { %v1066_v34 = vadd.f32 %v9652_v32, %v1065_v29  ;;  %3000 = vmatmul.f32.gmra.mxu2 %v2780_v30 }
 0x1fd   : > { %v1487_v35 = vmul.f32 0.2, %v1066_v34  ;;  %8201 = vmatmul.msk.f32.gmra.mxu0 %vm528_vm0, %v453_v31  ;;  %v2199_v36 = vpop.f32.mrf.mxu1  ;;  %vm1359_vm5 = vcmp.ge.f32.partialorder %v1066_v34, 0.0  ;;  %v458_v31 = vld [vmem:[%s9331_s15 + $0x210] sm:$0xff] }
 0x1fe   : > { %v2200_v37 = vadd.f32 %v9514_v8, %v2199_v36  ;;  %v9685_v38 = vpop.f32.mrf.mxu2 }
 0x1ff   : > { %v1615_v39 = vsel %vm1359_vm5, %v1066_v34, %v1487_v35 }
 0x200   : > { %8313 = vmatmul.msk.f32.gmra.mxu1 %vm1710_vm2, %v1615_v39  ;;  %vm2525_vm6 = vcmp.ge.f32.partialorder %v2200_v37, 0.0  ;;  %v2653_v40 = vmul.f32 0.2, %v2200_v37 }
 0x202   : > { %v1068_v41 = vpop.f32.mrf.mxu0  ;;  %v2781_v42 = vsel %vm2525_vm6, %v2200_v37, %v2653_v40 }
 0x203   : > { %v1069_v46 = vadd.f32 %v9652_v32, %v1068_v41  ;;  %3003 = vmatmul.f32.gmra.mxu2 %v2781_v42 }
 0x205   : > { %v1488_v47 = vmul.f32 0.2, %v1069_v46  ;;  %8202 = vmatmul.msk.f32.gmra.mxu0 %vm528_vm0, %v454_v45  ;;  %v2202_v48 = vpop.f32.mrf.mxu1  ;;  %vm1360_vm7 = vcmp.ge.f32.partialorder %v1069_v46, 0.0 }
 0x206   : > { %v2203_v49 = vadd.f32 %v9514_v8, %v2202_v48  ;;  %v9692_v50 = vpop.f32.mrf.mxu2 }
 0x207   : > { %v1616_v51 = vsel %vm1360_vm7, %v1069_v46, %v1488_v47  ;;  %v459_v46 = vld [vmem:[%s9331_s15 + $0x218] sm:$0xff] }
 0x208   : > { %8314 = vmatmul.msk.f32.gmra.mxu1 %vm1710_vm2, %v1616_v51  ;;  %vm2526_vm8 = vcmp.ge.f32.partialorder %v2203_v49, 0.0  ;;  %v2654_v52 = vmul.f32 0.2, %v2203_v49 }
 0x20a   : > { %v1071_v53 = vpop.f32.mrf.mxu0  ;;  %v2782_v56 = vsel %vm2526_vm8, %v2203_v49, %v2654_v52 }
 0x20b   : > { %v1072_v58 = vadd.f32 %v9652_v32, %v1071_v53  ;;  %3006 = vmatmul.f32.gmra.mxu2 %v2782_v56 }
 0x20d   : > { %v1489_v59 = vmul.f32 0.2, %v1072_v58  ;;  %8203 = vmatmul.msk.f32.gmra.mxu0 %vm528_vm0, %v455_v57  ;;  %v2205_v60 = vpop.f32.mrf.mxu1  ;;  %vm1361_vm9 = vcmp.ge.f32.partialorder %v1072_v58, 0.0 }
 0x20e   : > { %v2206_v61 = vadd.f32 %v9514_v8, %v2205_v60  ;;  %v9699_v62 = vpop.f32.mrf.mxu2 }
 0x20f   : > { %v1617_v63 = vsel %vm1361_vm9, %v1072_v58, %v1489_v59  ;;  %v460_v59 = vld [vmem:[%s9331_s15 + $0x220] sm:$0xff] }
 0x210   : > { %8315 = vmatmul.msk.f32.gmra.mxu1 %vm1710_vm2, %v1617_v63  ;;  %vm2527_vm10 = vcmp.ge.f32.partialorder %v2206_v61, 0.0  ;;  %v2655_v1 = vmul.f32 0.2, %v2206_v61 }
 0x212   : > { %v1074_v4 = vpop.f32.mrf.mxu0  ;;  %v2783_v5 = vsel %vm2527_vm10, %v2206_v61, %v2655_v1 }
 0x213   : > { %v1075_v7 = vadd.f32 %v9652_v32, %v1074_v4  ;;  %3009 = vmatmul.f32.gmra.mxu2 %v2783_v5 }
 0x215   : > { %v1490_v9 = vmul.f32 0.2, %v1075_v7  ;;  %8204 = vmatmul.msk.f32.gmra.mxu0 %vm528_vm0, %v456_v6  ;;  %v2208_v10 = vpop.f32.mrf.mxu1  ;;  %vm1362_vm11 = vcmp.ge.f32.partialorder %v1075_v7, 0.0 }
 0x216   : > { %v2209_v11 = vadd.f32 %v9514_v8, %v2208_v10  ;;  %v9706_v13 = vpop.f32.mrf.mxu2  ;;  %v461_v10 = vld [vmem:[%s9331_s15 + $0x228] sm:$0xff] }
 0x217   : > { %v1618_v14 = vsel %vm1362_vm11, %v1075_v7, %v1490_v9 }
 0x218   : > { %8316 = vmatmul.msk.f32.gmra.mxu1 %vm1710_vm2, %v1618_v14  ;;  %vm2528_vm12 = vcmp.ge.f32.partialorder %v2209_v11, 0.0  ;;  %v2656_v16 = vmul.f32 0.2, %v2209_v11 }
 0x21a   : > { %v1077_v17 = vpop.f32.mrf.mxu0  ;;  %v2784_v18 = vsel %vm2528_vm12, %v2209_v11, %v2656_v16 }
 0x21b   : > { %v1078_v20 = vadd.f32 %v9652_v32, %v1077_v17  ;;  %3012 = vmatmul.f32.gmra.mxu2 %v2784_v18 }
 0x21d   : > { %v1491_v21 = vmul.f32 0.2, %v1078_v20  ;;  %8205 = vmatmul.msk.f32.gmra.mxu0 %vm528_vm0, %v457_v19  ;;  %v2211_v23 = vpop.f32.mrf.mxu1  ;;  %vm1363_vm13 = vcmp.ge.f32.partialorder %v1078_v20, 0.0 }
 0x21e   : > { %v2212_v24 = vadd.f32 %v9514_v8, %v2211_v23  ;;  %v9713_v25 = vpop.f32.mrf.mxu2 }
 0x21f   : > { %v1619_v27 = vsel %vm1363_vm13, %v1078_v20, %v1491_v21 }
 0x220   : > { %8317 = vmatmul.msk.f32.gmra.mxu1 %vm1710_vm2, %v1619_v27  ;;  %vm2529_vm14 = vcmp.ge.f32.partialorder %v2212_v24, 0.0  ;;  %v2657_v28 = vmul.f32 0.2, %v2212_v24 }
 0x222   : > { %v1080_v29 = vpop.f32.mrf.mxu0  ;;  %v2785_v30 = vsel %vm2529_vm14, %v2212_v24, %v2657_v28  ;;  %v462_v24 = vld [vmem:[%s9331_s15 + $0x230] sm:$0xff] }
 0x223   : > { %v1081_v34 = vadd.f32 %v9652_v32, %v1080_v29  ;;  %3015 = vmatmul.f32.gmra.mxu2 %v2785_v30 }
 0x225   : > { %v1492_v35 = vmul.f32 0.2, %v1081_v34  ;;  %8206 = vmatmul.msk.f32.gmra.mxu0 %vm528_vm0, %v458_v31  ;;  %v2214_v36 = vpop.f32.mrf.mxu1  ;;  %vm1364_vm15 = vcmp.ge.f32.partialorder %v1081_v34, 0.0 }
 0x226   : > { %v2215_v37 = vadd.f32 %v9514_v8, %v2214_v36  ;;  %v9720_v39 = vpop.f32.mrf.mxu2 }
 0x227   : > { %v1620_v40 = vsel %vm1364_vm15, %v1081_v34, %v1492_v35 }
 0x228   : > { %8318 = vmatmul.msk.f32.gmra.mxu1 %vm1710_vm2, %v1620_v40  ;;  %vm2530_vm1 = vcmp.ge.f32.partialorder %v2215_v37, 0.0  ;;  %v2658_v41 = vmul.f32 0.2, %v2215_v37  ;;  %v463_v40 = vld [vmem:[%s9331_s15 + $0x238] sm:$0xff] }
 0x22a   : > { %v1083_v42 = vpop.f32.mrf.mxu0  ;;  %v2786_v45 = vsel %vm2530_vm1, %v2215_v37, %v2658_v41 }
 0x22b   : > { %v1084_v47 = vadd.f32 %v9652_v32, %v1083_v42  ;;  %3018 = vmatmul.f32.gmra.mxu2 %v2786_v45 }
 0x22d   : > { %v1493_v48 = vmul.f32 0.2, %v1084_v47  ;;  %8207 = vmatmul.msk.f32.gmra.mxu0 %vm528_vm0, %v459_v46  ;;  %v2217_v49 = vpop.f32.mrf.mxu1  ;;  %vm1365_vm3 = vcmp.ge.f32.partialorder %v1084_v47, 0.0 }
 0x22e   : > { %v2218_v51 = vadd.f32 %v9514_v8, %v2217_v49  ;;  %v9727_v52 = vpop.f32.mrf.mxu2  ;;  %v9736_v8 = vld [vmem:[%s12485_s4] ss:$0 sm:$0xff] }
 0x22f   : > { %v1621_v53 = vsel %vm1365_vm3, %v1084_v47, %v1493_v48 }
 0x230   : > { %8319 = vmatmul.msk.f32.gmra.mxu1 %vm1710_vm2, %v1621_v53  ;;  %vm2531_vm4 = vcmp.ge.f32.partialorder %v2218_v51, 0.0  ;;  %v2659_v56 = vmul.f32 0.2, %v2218_v51 }
 0x232   : > { %v1086_v57 = vpop.f32.mrf.mxu0  ;;  %v2787_v58 = vsel %vm2531_vm4, %v2218_v51, %v2659_v56  ;;  %v464_v56 = vld [vmem:[%s9331_s15 + $0x240] sm:$0xff] }
 0x233   : > { %v1087_v60 = vadd.f32 %v9652_v32, %v1086_v57  ;;  %3021 = vmatmul.f32.gmra.mxu2 %v2787_v58 }
 0x235   : > { %v1494_v61 = vmul.f32 0.2, %v1087_v60  ;;  %8208 = vmatmul.msk.f32.gmra.mxu0 %vm528_vm0, %v460_v59  ;;  %v2220_v63 = vpop.f32.mrf.mxu1  ;;  %vm1366_vm5 = vcmp.ge.f32.partialorder %v1087_v60, 0.0 }
 0x236   : > { %v2221_v1 = vadd.f32 %v9736_v8, %v2220_v63  ;;  %v9739_v4 = vpop.f32.mrf.mxu2 }
 0x237   : > { %v1622_v5 = vsel %vm1366_vm5, %v1087_v60, %v1494_v61 }
 0x238   : > { %8320 = vmatmul.msk.f32.gmra.mxu1 %vm1710_vm2, %v1622_v5  ;;  %vm2532_vm6 = vcmp.ge.f32.partialorder %v2221_v1, 0.0  ;;  %v2660_v6 = vmul.f32 0.2, %v2221_v1 }
 0x23a   : > { %v1089_v7 = vpop.f32.mrf.mxu0  ;;  %v2788_v9 = vsel %vm2532_vm6, %v2221_v1, %v2660_v6 }
 0x23b   : > { %v1090_v11 = vadd.f32 %v9652_v32, %v1089_v7  ;;  %3024 = vmatmul.f32.gmra.mxu2 %v2788_v9  ;;  %v465_v7 = vld [vmem:[%s9331_s15 + $0x248] sm:$0xff] }
 0x23d   : > { %v1495_v14 = vmul.f32 0.2, %v1090_v11  ;;  %8209 = vmatmul.msk.f32.gmra.mxu0 %vm528_vm0, %v461_v10  ;;  %v2223_v16 = vpop.f32.mrf.mxu1  ;;  %vm1367_vm7 = vcmp.ge.f32.partialorder %v1090_v11, 0.0 }
 0x23e   : > { %v2224_v17 = vadd.f32 %v9736_v8, %v2223_v16  ;;  %v9746_v18 = vpop.f32.mrf.mxu2 }
 0x23f   : > { %v1623_v19 = vsel %vm1367_vm7, %v1090_v11, %v1495_v14 }
 0x240   : > { %8321 = vmatmul.msk.f32.gmra.mxu1 %vm1710_vm2, %v1623_v19  ;;  %vm2533_vm8 = vcmp.ge.f32.partialorder %v2224_v17, 0.0  ;;  %v2661_v20 = vmul.f32 0.2, %v2224_v17 }
 0x242   : > { %v1092_v21 = vpop.f32.mrf.mxu0  ;;  %v2789_v23 = vsel %vm2533_vm8, %v2224_v17, %v2661_v20 }
 0x243   : > { %v1093_v27 = vadd.f32 %v9652_v32, %v1092_v21  ;;  %3027 = vmatmul.f32.gmra.mxu2 %v2789_v23  ;;  %v466_v23 = vld [vmem:[%s9331_s15 + $0x250] sm:$0xff] }
 0x245   : > { %v1496_v28 = vmul.f32 0.2, %v1093_v27  ;;  %8210 = vmatmul.msk.f32.gmra.mxu0 %vm528_vm0, %v462_v24  ;;  %v2226_v29 = vpop.f32.mrf.mxu1  ;;  %vm1368_vm9 = vcmp.ge.f32.partialorder %v1093_v27, 0.0 }
 0x246   : > { %v2227_v30 = vadd.f32 %v9736_v8, %v2226_v29  ;;  %v9753_v31 = vpop.f32.mrf.mxu2 }
 0x247   : > { %v1624_v34 = vsel %vm1368_vm9, %v1093_v27, %v1496_v28 }
 0x248   : > { %8322 = vmatmul.msk.f32.gmra.mxu1 %vm1710_vm2, %v1624_v34  ;;  %vm2534_vm10 = vcmp.ge.f32.partialorder %v2227_v30, 0.0  ;;  %v2662_v35 = vmul.f32 0.2, %v2227_v30 }
 0x24a   : > { %v1095_v36 = vpop.f32.mrf.mxu0  ;;  %v2790_v37 = vsel %vm2534_vm10, %v2227_v30, %v2662_v35 }
 0x24b   : > { %v1096_v41 = vadd.f32 %v9652_v32, %v1095_v36  ;;  %3030 = vmatmul.f32.gmra.mxu2 %v2790_v37 }
 0x24d   : > { %v1497_v42 = vmul.f32 0.2, %v1096_v41  ;;  %8211 = vmatmul.msk.f32.gmra.mxu0 %vm528_vm0, %v463_v40  ;;  %v2229_v45 = vpop.f32.mrf.mxu1  ;;  %vm1369_vm11 = vcmp.ge.f32.partialorder %v1096_v41, 0.0  ;;  %v467_v40 = vld [vmem:[%s9331_s15 + $0x258] sm:$0xff] }
 0x24e   : > { %v2230_v46 = vadd.f32 %v9736_v8, %v2229_v45  ;;  %v9760_v47 = vpop.f32.mrf.mxu2 }
 0x24f   : > { %v1625_v48 = vsel %vm1369_vm11, %v1096_v41, %v1497_v42 }
 0x250   : > { %8323 = vmatmul.msk.f32.gmra.mxu1 %vm1710_vm2, %v1625_v48  ;;  %vm2535_vm12 = vcmp.ge.f32.partialorder %v2230_v46, 0.0  ;;  %v2663_v49 = vmul.f32 0.2, %v2230_v46 }
 0x252   : > { %v1098_v51 = vpop.f32.mrf.mxu0  ;;  %v2791_v53 = vsel %vm2535_vm12, %v2230_v46, %v2663_v49 }
 0x253   : > { %v1099_v57 = vadd.f32 %v9652_v32, %v1098_v51  ;;  %3033 = vmatmul.f32.gmra.mxu2 %v2791_v53 }
 0x255   : > { %v1498_v58 = vmul.f32 0.2, %v1099_v57  ;;  %8212 = vmatmul.msk.f32.gmra.mxu0 %vm528_vm0, %v464_v56  ;;  %v2232_v59 = vpop.f32.mrf.mxu1  ;;  %vm1370_vm13 = vcmp.ge.f32.partialorder %v1099_v57, 0.0 }
 0x256   : > { %v2233_v60 = vadd.f32 %v9736_v8, %v2232_v59  ;;  %v9767_v61 = vpop.f32.mrf.mxu2 }
 0x257   : > { %v1626_v63 = vsel %vm1370_vm13, %v1099_v57, %v1498_v58  ;;  %v468_v57 = vld [vmem:[%s9331_s15 + $0x260] sm:$0xff] }
 0x258   : > { %8324 = vmatmul.msk.f32.gmra.mxu1 %vm1710_vm2, %v1626_v63  ;;  %vm2536_vm14 = vcmp.ge.f32.partialorder %v2233_v60, 0.0  ;;  %v2664_v1 = vmul.f32 0.2, %v2233_v60 }
 0x25a   : > { %v1101_v5 = vpop.f32.mrf.mxu0  ;;  %v2792_v6 = vsel %vm2536_vm14, %v2233_v60, %v2664_v1 }
 0x25b   : > { %v1102_v9 = vadd.f32 %v9652_v32, %v1101_v5  ;;  %3036 = vmatmul.f32.gmra.mxu2 %v2792_v6 }
 0x25d   : > { %v1499_v10 = vmul.f32 0.2, %v1102_v9  ;;  %8213 = vmatmul.msk.f32.gmra.mxu0 %vm528_vm0, %v465_v7  ;;  %v2235_v11 = vpop.f32.mrf.mxu1  ;;  %vm1371_vm15 = vcmp.ge.f32.partialorder %v1102_v9, 0.0 }
 0x25e   : > { %v2236_v14 = vadd.f32 %v9736_v8, %v2235_v11  ;;  %v9774_v16 = vpop.f32.mrf.mxu2 }
 0x25f   : > { %v1627_v17 = vsel %vm1371_vm15, %v1102_v9, %v1499_v10  ;;  %v469_v10 = vld [vmem:[%s9331_s15 + $0x268] sm:$0xff] }
 0x260   : > { %8325 = vmatmul.msk.f32.gmra.mxu1 %vm1710_vm2, %v1627_v17  ;;  %vm2537_vm1 = vcmp.ge.f32.partialorder %v2236_v14, 0.0  ;;  %v2665_v19 = vmul.f32 0.2, %v2236_v14 }
 0x262   : > { %v1104_v20 = vpop.f32.mrf.mxu0  ;;  %v2793_v21 = vsel %vm2537_vm1, %v2236_v14, %v2665_v19 }
 0x263   : > { %v1105_v24 = vadd.f32 %v9652_v32, %v1104_v20  ;;  %3039 = vmatmul.f32.gmra.mxu2 %v2793_v21 }
 0x265   : > { %v1500_v27 = vmul.f32 0.2, %v1105_v24  ;;  %8214 = vmatmul.msk.f32.gmra.mxu0 %vm528_vm0, %v466_v23  ;;  %v2238_v28 = vpop.f32.mrf.mxu1  ;;  %vm1372_vm3 = vcmp.ge.f32.partialorder %v1105_v24, 0.0 }
 0x266   : > { %v2239_v29 = vadd.f32 %v9736_v8, %v2238_v28  ;;  %v9781_v30 = vpop.f32.mrf.mxu2  ;;  %v470_v28 = vld [vmem:[%s9331_s15 + $0x270] sm:$0xff] }
 0x267   : > { %v1628_v34 = vsel %vm1372_vm3, %v1105_v24, %v1500_v27 }
 0x268   : > { %8326 = vmatmul.msk.f32.gmra.mxu1 %vm1710_vm2, %v1628_v34  ;;  %vm2538_vm4 = vcmp.ge.f32.partialorder %v2239_v29, 0.0  ;;  %v2666_v35 = vmul.f32 0.2, %v2239_v29 }
 0x26a   : > { %v1107_v36 = vpop.f32.mrf.mxu0  ;;  %v2794_v37 = vsel %vm2538_vm4, %v2239_v29, %v2666_v35 }
 0x26b   : > { %v1108_v41 = vadd.f32 %v9652_v32, %v1107_v36  ;;  %3042 = vmatmul.f32.gmra.mxu2 %v2794_v37 }
 0x26d   : > { %v1501_v42 = vmul.f32 0.2, %v1108_v41  ;;  %8215 = vmatmul.msk.f32.gmra.mxu0 %vm528_vm0, %v467_v40  ;;  %v2241_v45 = vpop.f32.mrf.mxu1  ;;  %vm1373_vm5 = vcmp.ge.f32.partialorder %v1108_v41, 0.0 }
 0x26e   : > { %v2242_v46 = vadd.f32 %v9736_v8, %v2241_v45  ;;  %v9788_v48 = vpop.f32.mrf.mxu2 }
 0x26f   : > { %v1629_v49 = vsel %vm1373_vm5, %v1108_v41, %v1501_v42 }
 0x270   : > { %8327 = vmatmul.msk.f32.gmra.mxu1 %vm1710_vm2, %v1629_v49  ;;  %vm2539_vm6 = vcmp.ge.f32.partialorder %v2242_v46, 0.0  ;;  %v2667_v51 = vmul.f32 0.2, %v2242_v46 }
 0x272   : > { %v1110_v53 = vpop.f32.mrf.mxu0  ;;  %v2795_v56 = vsel %vm2539_vm6, %v2242_v46, %v2667_v51  ;;  %v471_v46 = vld [vmem:[%s9331_s15 + $0x278] sm:$0xff] }
 0x273   : > { %v1111_v58 = vadd.f32 %v9652_v32, %v1110_v53  ;;  %3045 = vmatmul.f32.gmra.mxu2 %v2795_v56 }
 0x275   : > { %v1502_v59 = vmul.f32 0.2, %v1111_v58  ;;  %8216 = vmatmul.msk.f32.gmra.mxu0 %vm528_vm0, %v468_v57  ;;  %v2244_v60 = vpop.f32.mrf.mxu1  ;;  %vm1374_vm7 = vcmp.ge.f32.partialorder %v1111_v58, 0.0 }
 0x276   : > { %v2245_v63 = vadd.f32 %v9736_v8, %v2244_v60  ;;  %v9795_v1 = vpop.f32.mrf.mxu2 }
 0x277   : > { %v1630_v5 = vsel %vm1374_vm7, %v1111_v58, %v1502_v59 }
 0x278   : > { %8328 = vmatmul.msk.f32.gmra.mxu1 %vm1710_vm2, %v1630_v5  ;;  %vm2540_vm8 = vcmp.ge.f32.partialorder %v2245_v63, 0.0  ;;  %v2668_v6 = vmul.f32 0.2, %v2245_v63  ;;  %v472_v5 = vld [vmem:[%s9331_s15 + $0x280] sm:$0xff] }
 0x27a   : > { %v1113_v7 = vpop.f32.mrf.mxu0  ;;  %v2796_v9 = vsel %vm2540_vm8, %v2245_v63, %v2668_v6 }
 0x27b   : > { %v1114_v11 = vadd.f32 %v9652_v32, %v1113_v7  ;;  %3048 = vmatmul.f32.gmra.mxu2 %v2796_v9 }
 0x27d   : > { %v1503_v14 = vmul.f32 0.2, %v1114_v11  ;;  %8217 = vmatmul.msk.f32.gmra.mxu0 %vm528_vm0, %v469_v10  ;;  %v2247_v17 = vpop.f32.mrf.mxu1  ;;  %vm1375_vm9 = vcmp.ge.f32.partialorder %v1114_v11, 0.0 }
 0x27e   : > { %v2248_v19 = vadd.f32 %v9736_v8, %v2247_v17  ;;  %v9802_v20 = vpop.f32.mrf.mxu2 }
 0x27f   : > { %v1631_v21 = vsel %vm1375_vm9, %v1114_v11, %v1503_v14 }
 0x280   : > { %8329 = vmatmul.msk.f32.gmra.mxu1 %vm1710_vm2, %v1631_v21  ;;  %vm2541_vm10 = vcmp.ge.f32.partialorder %v2248_v19, 0.0  ;;  %v2669_v23 = vmul.f32 0.2, %v2248_v19 }
 0x282   : > { %v1116_v24 = vpop.f32.mrf.mxu0  ;;  %v2797_v27 = vsel %vm2541_vm10, %v2248_v19, %v2669_v23  ;;  %v473_v23 = vld [vmem:[%s9331_s15 + $0x288] sm:$0xff] }
 0x283   : > { %v1117_v29 = vadd.f32 %v9652_v32, %v1116_v24  ;;  %3051 = vmatmul.f32.gmra.mxu2 %v2797_v27 }
 0x285   : > { %v1504_v34 = vmul.f32 0.2, %v1117_v29  ;;  %8218 = vmatmul.msk.f32.gmra.mxu0 %vm528_vm0, %v470_v28  ;;  %v2250_v35 = vpop.f32.mrf.mxu1  ;;  %vm1376_vm11 = vcmp.ge.f32.partialorder %v1117_v29, 0.0 }
 0x286   : > { %v2251_v36 = vadd.f32 %v9736_v8, %v2250_v35  ;;  %v9809_v37 = vpop.f32.mrf.mxu2 }
 0x287   : > { %v1632_v40 = vsel %vm1376_vm11, %v1117_v29, %v1504_v34 }
 0x288   : > { %8330 = vmatmul.msk.f32.gmra.mxu1 %vm1710_vm2, %v1632_v40  ;;  %vm2542_vm12 = vcmp.ge.f32.partialorder %v2251_v36, 0.0  ;;  %v2670_v41 = vmul.f32 0.2, %v2251_v36 }
 0x28a   : > { %v1119_v42 = vpop.f32.mrf.mxu0  ;;  %v2798_v45 = vsel %vm2542_vm12, %v2251_v36, %v2670_v41 }
 0x28b   : > { %v1120_v49 = vadd.f32 %v9652_v32, %v1119_v42  ;;  %3054 = vmatmul.f32.gmra.mxu2 %v2798_v45  ;;  %v474_v42 = vld [vmem:[%s9331_s15 + $0x290] sm:$0xff] }
 0x28d   : > { %v1505_v51 = vmul.f32 0.2, %v1120_v49  ;;  %8219 = vmatmul.msk.f32.gmra.mxu0 %vm528_vm0, %v471_v46  ;;  %v2253_v53 = vpop.f32.mrf.mxu1  ;;  %vm1377_vm13 = vcmp.ge.f32.partialorder %v1120_v49, 0.0 }
 0x28e   : > { %v2254_v56 = vadd.f32 %v9736_v8, %v2253_v53  ;;  %v9816_v57 = vpop.f32.mrf.mxu2 }
 0x28f   : > { %v1633_v58 = vsel %vm1377_vm13, %v1120_v49, %v1505_v51 }
 0x290   : > { %8331 = vmatmul.msk.f32.gmra.mxu1 %vm1710_vm2, %v1633_v58  ;;  %vm2543_vm14 = vcmp.ge.f32.partialorder %v2254_v56, 0.0  ;;  %v2671_v59 = vmul.f32 0.2, %v2254_v56 }
 0x292   : > { %v1122_v60 = vpop.f32.mrf.mxu0  ;;  %v2799_v63 = vsel %vm2543_vm14, %v2254_v56, %v2671_v59 }
 0x293   : > { %v1123_v6 = vadd.f32 %v9652_v32, %v1122_v60  ;;  %3057 = vmatmul.f32.gmra.mxu2 %v2799_v63  ;;  %v475_v63 = vld [vmem:[%s9331_s15 + $0x298] sm:$0xff] }
 0x295   : > { %v1506_v7 = vmul.f32 0.2, %v1123_v6  ;;  %8220 = vmatmul.msk.f32.gmra.mxu0 %vm528_vm0, %v472_v5  ;;  %v2256_v9 = vpop.f32.mrf.mxu1  ;;  %vm1378_vm15 = vcmp.ge.f32.partialorder %v1123_v6, 0.0 }
 0x296   : > { %v2257_v10 = vadd.f32 %v9736_v8, %v2256_v9  ;;  %v9823_v11 = vpop.f32.mrf.mxu2 }
 0x297   : > { %v1634_v14 = vsel %vm1378_vm15, %v1123_v6, %v1506_v7 }
 0x298   : > { %8332 = vmatmul.msk.f32.gmra.mxu1 %vm1710_vm2, %v1634_v14  ;;  %vm2544_vm1 = vcmp.ge.f32.partialorder %v2257_v10, 0.0  ;;  %v2672_v17 = vmul.f32 0.2, %v2257_v10 }
 0x29a   : > { %v1125_v19 = vpop.f32.mrf.mxu0  ;;  %v2800_v21 = vsel %vm2544_vm1, %v2257_v10, %v2672_v17 }
 0x29b   : > { %v1126_v24 = vadd.f32 %v9652_v32, %v1125_v19  ;;  %3060 = vmatmul.f32.gmra.mxu2 %v2800_v21 }
 0x29d   : > { %v1507_v27 = vmul.f32 0.2, %v1126_v24  ;;  %8221 = vmatmul.msk.f32.gmra.mxu0 %vm528_vm0, %v473_v23  ;;  %v2259_v28 = vpop.f32.mrf.mxu1  ;;  %vm1379_vm3 = vcmp.ge.f32.partialorder %v1126_v24, 0.0  ;;  %v476_v23 = vld [vmem:[%s9331_s15 + $0x2a0] sm:$0xff] }
 0x29e   : > { %v2260_v29 = vadd.f32 %v9736_v8, %v2259_v28  ;;  %v9830_v34 = vpop.f32.mrf.mxu2 }
 0x29f   : > { %v1635_v35 = vsel %vm1379_vm3, %v1126_v24, %v1507_v27 }
 0x2a0   : > { %8333 = vmatmul.msk.f32.gmra.mxu1 %vm1710_vm2, %v1635_v35  ;;  %vm2545_vm4 = vcmp.ge.f32.partialorder %v2260_v29, 0.0  ;;  %v2673_v36 = vmul.f32 0.2, %v2260_v29 }
 0x2a2   : > { %v1128_v40 = vpop.f32.mrf.mxu0  ;;  %v2801_v41 = vsel %vm2545_vm4, %v2260_v29, %v2673_v36 }
 0x2a3   : > { %v1129_v45 = vadd.f32 %v9652_v32, %v1128_v40  ;;  %3063 = vmatmul.f32.gmra.mxu2 %v2801_v41 }
 0x2a5   : > { %v1508_v46 = vmul.f32 0.2, %v1129_v45  ;;  %8222 = vmatmul.msk.f32.gmra.mxu0 %vm528_vm0, %v474_v42  ;;  %v2262_v49 = vpop.f32.mrf.mxu1  ;;  %vm1380_vm5 = vcmp.ge.f32.partialorder %v1129_v45, 0.0 }
 0x2a6   : > { %v2263_v51 = vadd.f32 %v9736_v8, %v2262_v49  ;;  %v9837_v53 = vpop.f32.mrf.mxu2 }
 0x2a7   : > { %v1636_v56 = vsel %vm1380_vm5, %v1129_v45, %v1508_v46  ;;  %v477_v45 = vld [vmem:[%s9331_s15 + $0x2a8] sm:$0xff] }
 0x2a8   : > { %8334 = vmatmul.msk.f32.gmra.mxu1 %vm1710_vm2, %v1636_v56  ;;  %vm2546_vm6 = vcmp.ge.f32.partialorder %v2263_v51, 0.0  ;;  %v2674_v58 = vmul.f32 0.2, %v2263_v51 }
 0x2aa   : > { %v1131_v59 = vpop.f32.mrf.mxu0  ;;  %v2802_v60 = vsel %vm2546_vm6, %v2263_v51, %v2674_v58 }
 0x2ab   : > { %v1132_v5 = vadd.f32 %v9652_v32, %v1131_v59  ;;  %3066 = vmatmul.f32.gmra.mxu2 %v2802_v60 }
 0x2ad   : > { %v1509_v6 = vmul.f32 0.2, %v1132_v5  ;;  %8223 = vmatmul.msk.f32.gmra.mxu0 %vm528_vm0, %v475_v63  ;;  %v2265_v7 = vpop.f32.mrf.mxu1  ;;  %vm1381_vm7 = vcmp.ge.f32.partialorder %v1132_v5, 0.0 }
 0x2ae   : > { %v2266_v9 = vadd.f32 %v9736_v8, %v2265_v7  ;;  %v9844_v10 = vpop.f32.mrf.mxu2 }
 0x2af   : > { %v1637_v14 = vsel %vm1381_vm7, %v1132_v5, %v1509_v6  ;;  %v478_v6 = vld [vmem:[%s9331_s15 + $0x2b0] sm:$0xff] }
 0x2b0   : > { %8335 = vmatmul.msk.f32.gmra.mxu1 %vm1710_vm2, %v1637_v14  ;;  %vm2547_vm8 = vcmp.ge.f32.partialorder %v2266_v9, 0.0  ;;  %v2675_v17 = vmul.f32 0.2, %v2266_v9 }
 0x2b2   : > { %v1134_v19 = vpop.f32.mrf.mxu0  ;;  %v2803_v21 = vsel %vm2547_vm8, %v2266_v9, %v2675_v17 }
 0x2b3   : > { %v1135_v24 = vadd.f32 %v9652_v32, %v1134_v19  ;;  %3069 = vmatmul.f32.gmra.mxu2 %v2803_v21 }
 0x2b5   : > { %v1510_v27 = vmul.f32 0.2, %v1135_v24  ;;  %8224 = vmatmul.msk.f32.gmra.mxu0 %vm528_vm0, %v476_v23  ;;  %v2268_v28 = vpop.f32.mrf.mxu1  ;;  %vm1382_vm9 = vcmp.ge.f32.partialorder %v1135_v24, 0.0 }
 0x2b6   : > { %v2269_v29 = vadd.f32 %v9736_v8, %v2268_v28  ;;  %v9851_v35 = vpop.f32.mrf.mxu2  ;;  %v479_v28 = vld [vmem:[%s9331_s15 + $0x2b8] sm:$0xff] }
 0x2b7   : > { %v1638_v36 = vsel %vm1382_vm9, %v1135_v24, %v1510_v27 }
 0x2b8   : > { %8336 = vmatmul.msk.f32.gmra.mxu1 %vm1710_vm2, %v1638_v36  ;;  %vm2548_vm10 = vcmp.ge.f32.partialorder %v2269_v29, 0.0  ;;  %v2676_v40 = vmul.f32 0.2, %v2269_v29 }
 0x2ba   : > { %v1137_v41 = vpop.f32.mrf.mxu0  ;;  %v2804_v42 = vsel %vm2548_vm10, %v2269_v29, %v2676_v40 }
 0x2bb   : > { %v1138_v46 = vadd.f32 %v9652_v32, %v1137_v41  ;;  %3072 = vmatmul.f32.gmra.mxu2 %v2804_v42 }
 0x2bd   : > { %v1511_v49 = vmul.f32 0.2, %v1138_v46  ;;  %8225 = vmatmul.msk.f32.gmra.mxu0 %vm528_vm0, %v477_v45  ;;  %v2271_v51 = vpop.f32.mrf.mxu1  ;;  %vm1383_vm11 = vcmp.ge.f32.partialorder %v1138_v46, 0.0 }
 0x2be   : > { %v2272_v56 = vadd.f32 %v9736_v8, %v2271_v51  ;;  %v9858_v58 = vpop.f32.mrf.mxu2 }
 0x2bf   : > { %v1639_v59 = vsel %vm1383_vm11, %v1138_v46, %v1511_v49 }
 0x2c0   : > { %8337 = vmatmul.msk.f32.gmra.mxu1 %vm1710_vm2, %v1639_v59  ;;  %vm2549_vm12 = vcmp.ge.f32.partialorder %v2272_v56, 0.0  ;;  %v2677_v60 = vmul.f32 0.2, %v2272_v56 }
 0x2c2   : > { %v1140_v63 = vpop.f32.mrf.mxu0  ;;  %v2805_v5 = vsel %vm2549_vm12, %v2272_v56, %v2677_v60  ;;  %v480_v56 = vld [vmem:[%s9331_s15 + $0x2c0] sm:$0xff] }
 0x2c3   : > { %v1141_v7 = vadd.f32 %v9652_v32, %v1140_v63  ;;  %3075 = vmatmul.f32.gmra.mxu2 %v2805_v5 }
 0x2c5   : > { %v1512_v9 = vmul.f32 0.2, %v1141_v7  ;;  %8226 = vmatmul.msk.f32.gmra.mxu0 %vm528_vm0, %v478_v6  ;;  %v2274_v14 = vpop.f32.mrf.mxu1  ;;  %vm1384_vm13 = vcmp.ge.f32.partialorder %v1141_v7, 0.0 }
 0x2c6   : > { %v2275_v17 = vadd.f32 %v9736_v8, %v2274_v14  ;;  %v9865_v19 = vpop.f32.mrf.mxu2 }
 0x2c7   : > { %v1640_v21 = vsel %vm1384_vm13, %v1141_v7, %v1512_v9 }
 0x2c8   : > { %8338 = vmatmul.msk.f32.gmra.mxu1 %vm1710_vm2, %v1640_v21  ;;  %vm2550_vm14 = vcmp.ge.f32.partialorder %v2275_v17, 0.0  ;;  %v2678_v23 = vmul.f32 0.2, %v2275_v17  ;;  %v481_v21 = vld [vmem:[%s9331_s15 + $0x2c8] sm:$0xff] }
 0x2ca   : > { %v1143_v24 = vpop.f32.mrf.mxu0  ;;  %v2806_v27 = vsel %vm2550_vm14, %v2275_v17, %v2678_v23 }
 0x2cb   : > { %v1144_v29 = vadd.f32 %v9652_v32, %v1143_v24  ;;  %3078 = vmatmul.f32.gmra.mxu2 %v2806_v27 }
 0x2cd   : > { %v1513_v36 = vmul.f32 0.2, %v1144_v29  ;;  %8227 = vmatmul.msk.f32.gmra.mxu0 %vm528_vm0, %v479_v28  ;;  %v2277_v40 = vpop.f32.mrf.mxu1  ;;  %vm1385_vm15 = vcmp.ge.f32.partialorder %v1144_v29, 0.0 }
 0x2ce   : > { %v2278_v41 = vadd.f32 %v9736_v8, %v2277_v40  ;;  %v9872_v42 = vpop.f32.mrf.mxu2 }
 0x2cf   : > { %v1641_v45 = vsel %vm1385_vm15, %v1144_v29, %v1513_v36 }
 0x2d0   : > { %8339 = vmatmul.msk.f32.gmra.mxu1 %vm1710_vm2, %v1641_v45  ;;  %vm2551_vm1 = vcmp.ge.f32.partialorder %v2278_v41, 0.0  ;;  %v2679_v46 = vmul.f32 0.2, %v2278_v41 }
 0x2d2   : > { %v1146_v49 = vpop.f32.mrf.mxu0  ;;  %v2807_v51 = vsel %vm2551_vm1, %v2278_v41, %v2679_v46  ;;  %v482_v46 = vld [vmem:[%s9331_s15 + $0x2d0] sm:$0xff] }
 0x2d3   : > { %v1147_v59 = vadd.f32 %v9652_v32, %v1146_v49  ;;  %3081 = vmatmul.f32.gmra.mxu2 %v2807_v51 }
 0x2d5   : > { %v1514_v60 = vmul.f32 0.2, %v1147_v59  ;;  %8228 = vmatmul.msk.f32.gmra.mxu0 %vm528_vm0, %v480_v56  ;;  %v2280_v63 = vpop.f32.mrf.mxu1  ;;  %vm1386_vm3 = vcmp.ge.f32.partialorder %v1147_v59, 0.0 }
 0x2d6   : > { %v2281_v5 = vadd.f32 %v9736_v8, %v2280_v63  ;;  %v9879_v6 = vpop.f32.mrf.mxu2 }
 0x2d7   : > { %v1642_v7 = vsel %vm1386_vm3, %v1147_v59, %v1514_v60 }
 0x2d8   : > { %8340 = vmatmul.msk.f32.gmra.mxu1 %vm1710_vm2, %v1642_v7  ;;  %vm2552_vm4 = vcmp.ge.f32.partialorder %v2281_v5, 0.0  ;;  %v2680_v9 = vmul.f32 0.2, %v2281_v5 }
 0x2da   : > { %v1149_v14 = vpop.f32.mrf.mxu0  ;;  %v2808_v17 = vsel %vm2552_vm4, %v2281_v5, %v2680_v9 }
 0x2db   : > { %v1150_v23 = vadd.f32 %v9652_v32, %v1149_v14  ;;  %3084 = vmatmul.f32.gmra.mxu2 %v2808_v17  ;;  %v483_v14 = vld [vmem:[%s9331_s15 + $0x2d8] sm:$0xff] }
 0x2dd   : > { %v1515_v24 = vmul.f32 0.2, %v1150_v23  ;;  %8229 = vmatmul.msk.f32.gmra.mxu0 %vm528_vm0, %v481_v21  ;;  %v2283_v27 = vpop.f32.mrf.mxu1  ;;  %vm1387_vm5 = vcmp.ge.f32.partialorder %v1150_v23, 0.0 }
 0x2de   : > { %v2284_v28 = vadd.f32 %v9736_v8, %v2283_v27  ;;  %v9886_v29 = vpop.f32.mrf.mxu2 }
 0x2df   : > { %v1643_v36 = vsel %vm1387_vm5, %v1150_v23, %v1515_v24 }
 0x2e0   : > { %8341 = vmatmul.msk.f32.gmra.mxu1 %vm1710_vm2, %v1643_v36  ;;  %vm2553_vm6 = vcmp.ge.f32.partialorder %v2284_v28, 0.0  ;;  %v2681_v40 = vmul.f32 0.2, %v2284_v28 }
 0x2e2   : > { %v1152_v41 = vpop.f32.mrf.mxu0  ;;  %v2809_v45 = vsel %vm2553_vm6, %v2284_v28, %v2681_v40 }
 0x2e3   : > { %v1153_v49 = vadd.f32 %v9652_v32, %v1152_v41  ;;  %3087 = vmatmul.f32.gmra.mxu2 %v2809_v45  ;;  %v484_v45 = vld [vmem:[%s9331_s15 + $0x2e0] sm:$0xff] }
 0x2e5   : > { %v1516_v51 = vmul.f32 0.2, %v1153_v49  ;;  %8230 = vmatmul.msk.f32.gmra.mxu0 %vm528_vm0, %v482_v46  ;;  %v2286_v56 = vpop.f32.mrf.mxu1  ;;  %vm1388_vm7 = vcmp.ge.f32.partialorder %v1153_v49, 0.0 }
 0x2e6   : > { %v2287_v59 = vadd.f32 %v9736_v8, %v2286_v56  ;;  %v9893_v60 = vpop.f32.mrf.mxu2 }
 0x2e7   : > { %v1644_v63 = vsel %vm1388_vm7, %v1153_v49, %v1516_v51 }
 0x2e8   : > { %8342 = vmatmul.msk.f32.gmra.mxu1 %vm1710_vm2, %v1644_v63  ;;  %vm2554_vm8 = vcmp.ge.f32.partialorder %v2287_v59, 0.0  ;;  %v2682_v5 = vmul.f32 0.2, %v2287_v59 }
 0x2ea   : > { %v1155_v7 = vpop.f32.mrf.mxu0  ;;  %v2810_v9 = vsel %vm2554_vm8, %v2287_v59, %v2682_v5 }
 0x2eb   : > { %v1156_v17 = vadd.f32 %v9652_v32, %v1155_v7  ;;  %3090 = vmatmul.f32.gmra.mxu2 %v2810_v9  ;;  %v9907_v32 = vld [vmem:[%s12483_s2] ss:$0 sm:$0xff] }
 0x2ed   : > { %v1517_v21 = vmul.f32 0.2, %v1156_v17  ;;  %8231 = vmatmul.msk.f32.gmra.mxu0 %vm528_vm0, %v483_v14  ;;  %v2289_v23 = vpop.f32.mrf.mxu1  ;;  %vm1389_vm9 = vcmp.ge.f32.partialorder %v1156_v17, 0.0  ;;  %v485_v14 = vld [vmem:[%s9331_s15 + $0x2e8] sm:$0xff] }
 0x2ee   : > { %v2290_v24 = vadd.f32 %v9736_v8, %v2289_v23  ;;  %v9900_v27 = vpop.f32.mrf.mxu2 }
 0x2ef   : > { %v1645_v28 = vsel %vm1389_vm9, %v1156_v17, %v1517_v21 }
 0x2f0   : > { %8343 = vmatmul.msk.f32.gmra.mxu1 %vm1710_vm2, %v1645_v28  ;;  %vm2555_vm10 = vcmp.ge.f32.partialorder %v2290_v24, 0.0  ;;  %v2683_v36 = vmul.f32 0.2, %v2290_v24 }
 0x2f2   : > { %v1158_v40 = vpop.f32.mrf.mxu0  ;;  %v2811_v41 = vsel %vm2555_vm10, %v2290_v24, %v2683_v36 }
 0x2f3   : > { %v1159_v46 = vadd.f32 %v9907_v32, %v1158_v40  ;;  %3093 = vmatmul.f32.gmra.mxu2 %v2811_v41 }
 0x2f5   : > { %v1518_v49 = vmul.f32 0.2, %v1159_v46  ;;  %8232 = vmatmul.msk.f32.gmra.mxu0 %vm528_vm0, %v484_v45  ;;  %v2292_v51 = vpop.f32.mrf.mxu1  ;;  %vm1390_vm11 = vcmp.ge.f32.partialorder %v1159_v46, 0.0 }
 0x2f6   : > { %v2293_v56 = vadd.f32 %v9736_v8, %v2292_v51  ;;  %v9912_v59 = vpop.f32.mrf.mxu2 }
 0x2f7   : > { %v1646_v63 = vsel %vm1390_vm11, %v1159_v46, %v1518_v49  ;;  %v486_v46 = vld [vmem:[%s9331_s15 + $0x2f0] sm:$0xff] }
 0x2f8   : > { %8344 = vmatmul.msk.f32.gmra.mxu1 %vm1710_vm2, %v1646_v63  ;;  %vm2556_vm12 = vcmp.ge.f32.partialorder %v2293_v56, 0.0  ;;  %v2684_v5 = vmul.f32 0.2, %v2293_v56 }
 0x2fa   : > { %v1161_v7 = vpop.f32.mrf.mxu0  ;;  %v2812_v9 = vsel %vm2556_vm12, %v2293_v56, %v2684_v5 }
 0x2fb   : > { %v1162_v17 = vadd.f32 %v9907_v32, %v1161_v7  ;;  %3096 = vmatmul.f32.gmra.mxu2 %v2812_v9 }
 0x2fd   : > { %v1519_v21 = vmul.f32 0.2, %v1162_v17  ;;  %8233 = vmatmul.msk.f32.gmra.mxu0 %vm528_vm0, %v485_v14  ;;  %v2295_v23 = vpop.f32.mrf.mxu1  ;;  %vm1391_vm13 = vcmp.ge.f32.partialorder %v1162_v17, 0.0 }
 0x2fe   : > { %v2296_v24 = vadd.f32 %v9736_v8, %v2295_v23  ;;  %v9919_v28 = vpop.f32.mrf.mxu2 }
 0x2ff   : > { %v1647_v36 = vsel %vm1391_vm13, %v1162_v17, %v1519_v21  ;;  %v487_v21 = vld [vmem:[%s9331_s15 + $0x2f8] sm:$0xff] }
 0x300   : > { %8345 = vmatmul.msk.f32.gmra.mxu1 %vm1710_vm2, %v1647_v36  ;;  %vm2557_vm14 = vcmp.ge.f32.partialorder %v2296_v24, 0.0  ;;  %v2685_v40 = vmul.f32 0.2, %v2296_v24 }
 0x302   : > { %v1164_v41 = vpop.f32.mrf.mxu0  ;;  %v2813_v45 = vsel %vm2557_vm14, %v2296_v24, %v2685_v40 }
 0x303   : > { %v1165_v49 = vadd.f32 %v9907_v32, %v1164_v41  ;;  %3099 = vmatmul.f32.gmra.mxu2 %v2813_v45 }
 0x305   : > { %v1520_v51 = vmul.f32 0.2, %v1165_v49  ;;  %8234 = vmatmul.msk.f32.gmra.mxu0 %vm528_vm0, %v486_v46  ;;  %v2298_v56 = vpop.f32.mrf.mxu1  ;;  %vm1392_vm15 = vcmp.ge.f32.partialorder %v1165_v49, 0.0 }
 0x306   : > { %v2299_v63 = vadd.f32 %v9736_v8, %v2298_v56  ;;  %v9926_v5 = vpop.f32.mrf.mxu2  ;;  %v488_v56 = vld [vmem:[%s9331_s15 + $0x300] sm:$0xff] }
 0x307   : > { %v1648_v7 = vsel %vm1392_vm15, %v1165_v49, %v1520_v51 }
 0x308   : > { %8346 = vmatmul.msk.f32.gmra.mxu1 %vm1710_vm2, %v1648_v7  ;;  %vm2558_vm1 = vcmp.ge.f32.partialorder %v2299_v63, 0.0  ;;  %v2686_v9 = vmul.f32 0.2, %v2299_v63 }
 0x30a   : > { %v1167_v14 = vpop.f32.mrf.mxu0  ;;  %v2814_v17 = vsel %vm2558_vm1, %v2299_v63, %v2686_v9 }
 0x30b   : > { %v1168_v23 = vadd.f32 %v9907_v32, %v1167_v14  ;;  %3102 = vmatmul.f32.gmra.mxu2 %v2814_v17 }
 0x30d   : > { %v1521_v24 = vmul.f32 0.2, %v1168_v23  ;;  %8235 = vmatmul.msk.f32.gmra.mxu0 %vm528_vm0, %v487_v21  ;;  %v2301_v36 = vpop.f32.mrf.mxu1  ;;  %vm1393_vm3 = vcmp.ge.f32.partialorder %v1168_v23, 0.0 }
 0x30e   : > { %v2302_v40 = vadd.f32 %v9736_v8, %v2301_v36  ;;  %v9933_v41 = vpop.f32.mrf.mxu2 }
 0x30f   : > { %v1649_v45 = vsel %vm1393_vm3, %v1168_v23, %v1521_v24 }
 0x310   : > { %8347 = vmatmul.msk.f32.gmra.mxu1 %vm1710_vm2, %v1649_v45  ;;  %vm2559_vm4 = vcmp.ge.f32.partialorder %v2302_v40, 0.0  ;;  %v2687_v46 = vmul.f32 0.2, %v2302_v40 }
 0x312   : > { %v1170_v49 = vpop.f32.mrf.mxu0  ;;  %v2815_v51 = vsel %vm2559_vm4, %v2302_v40, %v2687_v46  ;;  %v489_v40 = vld [vmem:[%s9331_s15 + $0x308] sm:$0xff] }
 0x313   : > { %v1171_v63 = vadd.f32 %v9907_v32, %v1170_v49  ;;  %3105 = vmatmul.f32.gmra.mxu2 %v2815_v51 }
 0x315   : > { %v1522_v7 = vmul.f32 0.2, %v1171_v63  ;;  %8236 = vmatmul.msk.f32.gmra.mxu0 %vm528_vm0, %v488_v56  ;;  %v2304_v9 = vpop.f32.mrf.mxu1  ;;  %vm1394_vm5 = vcmp.ge.f32.partialorder %v1171_v63, 0.0 }
 0x316   : > { %v2305_v14 = vadd.f32 %v9736_v8, %v2304_v9  ;;  %v9940_v17 = vpop.f32.mrf.mxu2 }
 0x317   : > { %12493 = vst [vmem:[#allocation3_spill] sm:$0xff] %v9940_v17  ;;  %v1650_v21 = vsel %vm1394_vm5, %v1171_v63, %v1522_v7 }
 0x318   : > { %8348 = vmatmul.msk.f32.gmra.mxu1 %vm1710_vm2, %v1650_v21  ;;  %vm2560_vm6 = vcmp.ge.f32.partialorder %v2305_v14, 0.0  ;;  %v2688_v23 = vmul.f32 0.2, %v2305_v14  ;;  %v490_v21 = vld [vmem:[%s9331_s15 + $0x310] sm:$0xff] }
 0x31a   : > { %v1173_v24 = vpop.f32.mrf.mxu0  ;;  %v2816_v36 = vsel %vm2560_vm6, %v2305_v14, %v2688_v23 }
 0x31b   : > { %v1174_v45 = vadd.f32 %v9907_v32, %v1173_v24  ;;  %3108 = vmatmul.f32.gmra.mxu2 %v2816_v36 }
 0x31d   : > { %v1523_v46 = vmul.f32 0.2, %v1174_v45  ;;  %8237 = vmatmul.msk.f32.gmra.mxu0 %vm528_vm0, %v489_v40  ;;  %v2307_v49 = vpop.f32.mrf.mxu1  ;;  %vm1395_vm7 = vcmp.ge.f32.partialorder %v1174_v45, 0.0 }
 0x31e   : > { %v2308_v51 = vadd.f32 %v9736_v8, %v2307_v49  ;;  %v9947_v56 = vpop.f32.mrf.mxu2 }
 0x31f   : > { %12494 = vst [vmem:[#allocation4_spill] sm:$0xff] %v9947_v56  ;;  %v1651_v63 = vsel %vm1395_vm7, %v1174_v45, %v1523_v46 }
 0x320   : > { %8349 = vmatmul.msk.f32.gmra.mxu1 %vm1710_vm2, %v1651_v63  ;;  %vm2561_vm8 = vcmp.ge.f32.partialorder %v2308_v51, 0.0  ;;  %v2689_v7 = vmul.f32 0.2, %v2308_v51 }
 0x322   : > { %v1176_v9 = vpop.f32.mrf.mxu0  ;;  %v2817_v14 = vsel %vm2561_vm8, %v2308_v51, %v2689_v7  ;;  %v491_v7 = vld [vmem:[%s9331_s15 + $0x318] sm:$0xff] }
 0x323   : > { %v1177_v23 = vadd.f32 %v9907_v32, %v1176_v9  ;;  %3111 = vmatmul.f32.gmra.mxu2 %v2817_v14 }
 0x325   : > { %v1524_v24 = vmul.f32 0.2, %v1177_v23  ;;  %8238 = vmatmul.msk.f32.gmra.mxu0 %vm528_vm0, %v490_v21  ;;  %v2310_v36 = vpop.f32.mrf.mxu1  ;;  %vm1396_vm9 = vcmp.ge.f32.partialorder %v1177_v23, 0.0 }
 0x326   : > { %v2311_v40 = vadd.f32 %v9736_v8, %v2310_v36  ;;  %v9954_v49 = vpop.f32.mrf.mxu2 }
 0x327   : > { %12495 = vst [vmem:[#allocation5_spill] sm:$0xff] %v9954_v49  ;;  %v1652_v45 = vsel %vm1396_vm9, %v1177_v23, %v1524_v24 }
 0x328   : > { %8350 = vmatmul.msk.f32.gmra.mxu1 %vm1710_vm2, %v1652_v45  ;;  %vm2562_vm10 = vcmp.ge.f32.partialorder %v2311_v40, 0.0  ;;  %v2690_v46 = vmul.f32 0.2, %v2311_v40 }
 0x32a   : > { %v1179_v51 = vpop.f32.mrf.mxu0  ;;  %v2818_v63 = vsel %vm2562_vm10, %v2311_v40, %v2690_v46  ;;  %v492_v46 = vld [vmem:[%s9331_s15 + $0x320] sm:$0xff] }
 0x32b   : > { %v1180_v9 = vadd.f32 %v9907_v32, %v1179_v51  ;;  %3114 = vmatmul.f32.gmra.mxu2 %v2818_v63 }
 0x32d   : > { %v1525_v14 = vmul.f32 0.2, %v1180_v9  ;;  %8239 = vmatmul.msk.f32.gmra.mxu0 %vm528_vm0, %v491_v7  ;;  %v2313_v21 = vpop.f32.mrf.mxu1  ;;  %vm1397_vm11 = vcmp.ge.f32.partialorder %v1180_v9, 0.0 }
 0x32e   : > { %v2314_v36 = vadd.f32 %v9736_v8, %v2313_v21  ;;  %v9961_v49 = vpop.f32.mrf.mxu2 }
 0x32f   : > { %12496 = vst [vmem:[#allocation6_spill] sm:$0xff] %v9961_v49  ;;  %v1653_v23 = vsel %vm1397_vm11, %v1180_v9, %v1525_v14 }
 0x330   : > { %8351 = vmatmul.msk.f32.gmra.mxu1 %vm1710_vm2, %v1653_v23  ;;  %vm2563_vm12 = vcmp.ge.f32.partialorder %v2314_v36, 0.0  ;;  %v2691_v24 = vmul.f32 0.2, %v2314_v36 }
 0x332   : > { %v1182_v40 = vpop.f32.mrf.mxu0  ;;  %v2819_v45 = vsel %vm2563_vm12, %v2314_v36, %v2691_v24  ;;  %v493_v24 = vld [vmem:[%s9331_s15 + $0x328] sm:$0xff] }
 0x333   : > { %v1183_v51 = vadd.f32 %v9907_v32, %v1182_v40  ;;  %3117 = vmatmul.f32.gmra.mxu2 %v2819_v45 }
 0x335   : > { %v1526_v63 = vmul.f32 0.2, %v1183_v51  ;;  %8240 = vmatmul.msk.f32.gmra.mxu0 %vm528_vm0, %v492_v46  ;;  %v2316_v7 = vpop.f32.mrf.mxu1  ;;  %vm1398_vm13 = vcmp.ge.f32.partialorder %v1183_v51, 0.0 }
 0x336   : > { %v2317_v21 = vadd.f32 %v9736_v8, %v2316_v7  ;;  %v9968_v49 = vpop.f32.mrf.mxu2 }
 0x337   : > { %12497 = vst [vmem:[#allocation7_spill] sm:$0xff] %v9968_v49  ;;  %v1654_v9 = vsel %vm1398_vm13, %v1183_v51, %v1526_v63 }
 0x338   : > { %8352 = vmatmul.msk.f32.gmra.mxu1 %vm1710_vm2, %v1654_v9  ;;  %vm2564_vm14 = vcmp.ge.f32.partialorder %v2317_v21, 0.0  ;;  %v2692_v14 = vmul.f32 0.2, %v2317_v21 }
 0x33a   : > { %v1185_v36 = vpop.f32.mrf.mxu0  ;;  %v2820_v23 = vsel %vm2564_vm14, %v2317_v21, %v2692_v14  ;;  %v494_v14 = vld [vmem:[%s9331_s15 + $0x330] sm:$0xff] }
 0x33b   : > { %v1186_v40 = vadd.f32 %v9907_v32, %v1185_v36  ;;  %3120 = vmatmul.f32.gmra.mxu2 %v2820_v23 }
 0x33d   : > { %v1527_v45 = vmul.f32 0.2, %v1186_v40  ;;  %8241 = vmatmul.msk.f32.gmra.mxu0 %vm528_vm0, %v493_v24  ;;  %v2319_v46 = vpop.f32.mrf.mxu1  ;;  %vm1399_vm15 = vcmp.ge.f32.partialorder %v1186_v40, 0.0 }
 0x33e   : > { %v2320_v7 = vadd.f32 %v9736_v8, %v2319_v46  ;;  %v9975_v49 = vpop.f32.mrf.mxu2 }
 0x33f   : > { %12498 = vst [vmem:[#allocation8_spill] sm:$0xff] %v9975_v49  ;;  %v1655_v51 = vsel %vm1399_vm15, %v1186_v40, %v1527_v45 }
 0x340   : > { %8353 = vmatmul.msk.f32.gmra.mxu1 %vm1710_vm2, %v1655_v51  ;;  %vm2565_vm1 = vcmp.ge.f32.partialorder %v2320_v7, 0.0  ;;  %v2693_v63 = vmul.f32 0.2, %v2320_v7 }
 0x342   : > { %v1188_v21 = vpop.f32.mrf.mxu0  ;;  %v2821_v9 = vsel %vm2565_vm1, %v2320_v7, %v2693_v63  ;;  %v495_v63 = vld [vmem:[%s9331_s15 + $0x338] sm:$0xff] }
 0x343   : > { %v1189_v36 = vadd.f32 %v9907_v32, %v1188_v21  ;;  %3123 = vmatmul.f32.gmra.mxu2 %v2821_v9 }
 0x345   : > { %v1528_v23 = vmul.f32 0.2, %v1189_v36  ;;  %8242 = vmatmul.msk.f32.gmra.mxu0 %vm528_vm0, %v494_v14  ;;  %v2322_v24 = vpop.f32.mrf.mxu1  ;;  %vm1400_vm3 = vcmp.ge.f32.partialorder %v1189_v36, 0.0 }
 0x346   : > { %v2323_v46 = vadd.f32 %v9736_v8, %v2322_v24  ;;  %v9982_v49 = vpop.f32.mrf.mxu2  ;;  %v9991_v8 = vld [vmem:[%s12485_s4] ss:$0 sm:$0xff] }
 0x347   : > { %12499 = vst [vmem:[#allocation9_spill] sm:$0xff] %v9982_v49  ;;  %v1656_v40 = vsel %vm1400_vm3, %v1189_v36, %v1528_v23 }
 0x348   : > { %8354 = vmatmul.msk.f32.gmra.mxu1 %vm1710_vm2, %v1656_v40  ;;  %vm2566_vm4 = vcmp.ge.f32.partialorder %v2323_v46, 0.0  ;;  %v2694_v45 = vmul.f32 0.2, %v2323_v46 }
 0x34a   : > { %v1191_v7 = vpop.f32.mrf.mxu0  ;;  %v2822_v51 = vsel %vm2566_vm4, %v2323_v46, %v2694_v45 }
 0x34b   : > { %v1192_v21 = vadd.f32 %v9907_v32, %v1191_v7  ;;  %3126 = vmatmul.f32.gmra.mxu2 %v2822_v51  ;;  %v496_v7 = vld [vmem:[%s9331_s15 + $0x340] sm:$0xff] }
 0x34d   : > { %v1529_v9 = vmul.f32 0.2, %v1192_v21  ;;  %8243 = vmatmul.msk.f32.gmra.mxu0 %vm528_vm0, %v495_v63  ;;  %v2325_v14 = vpop.f32.mrf.mxu1  ;;  %vm1401_vm5 = vcmp.ge.f32.partialorder %v1192_v21, 0.0 }
 0x34e   : > { %v2326_v36 = vadd.f32 %v9991_v8, %v2325_v14  ;;  %v9994_v23 = vpop.f32.mrf.mxu2 }
 0x34f   : > { %12500 = vst [vmem:[#allocation10_spill] sm:$0xff] %v9994_v23  ;;  %v1657_v24 = vsel %vm1401_vm5, %v1192_v21, %v1529_v9 }
 0x350   : > { %8355 = vmatmul.msk.f32.gmra.mxu1 %vm1710_vm2, %v1657_v24  ;;  %vm2567_vm6 = vcmp.ge.f32.partialorder %v2326_v36, 0.0  ;;  %v2695_v46 = vmul.f32 0.2, %v2326_v36 }
 0x352   : > { %v1194_v40 = vpop.f32.mrf.mxu0  ;;  %v2823_v45 = vsel %vm2567_vm6, %v2326_v36, %v2695_v46  ;;  %v497_v46 = vld [vmem:[%s9331_s15 + $0x348] sm:$0xff] }
 0x353   : > { %v1195_v51 = vadd.f32 %v9907_v32, %v1194_v40  ;;  %3129 = vmatmul.f32.gmra.mxu2 %v2823_v45 }
 0x355   : > { %v1530_v63 = vmul.f32 0.2, %v1195_v51  ;;  %8244 = vmatmul.msk.f32.gmra.mxu0 %vm528_vm0, %v496_v7  ;;  %v2328_v49 = vpop.f32.mrf.mxu1  ;;  %vm1402_vm7 = vcmp.ge.f32.partialorder %v1195_v51, 0.0 }
 0x356   : > { %v2329_v14 = vadd.f32 %v9991_v8, %v2328_v49  ;;  %v10001_v23 = vpop.f32.mrf.mxu2 }
 0x357   : > { %12501 = vst [vmem:[#allocation11_spill] sm:$0xff] %v10001_v23  ;;  %v1658_v21 = vsel %vm1402_vm7, %v1195_v51, %v1530_v63 }
 0x358   : > { %8356 = vmatmul.msk.f32.gmra.mxu1 %vm1710_vm2, %v1658_v21  ;;  %vm2568_vm8 = vcmp.ge.f32.partialorder %v2329_v14, 0.0  ;;  %v2696_v9 = vmul.f32 0.2, %v2329_v14 }
 0x35a   : > { %v1197_v36 = vpop.f32.mrf.mxu0  ;;  %v2824_v24 = vsel %vm2568_vm8, %v2329_v14, %v2696_v9  ;;  %v498_v9 = vld [vmem:[%s9331_s15 + $0x350] sm:$0xff] }
 0x35b   : > { %v1198_v40 = vadd.f32 %v9907_v32, %v1197_v36  ;;  %3132 = vmatmul.f32.gmra.mxu2 %v2824_v24 }
 0x35d   : > { %v1531_v45 = vmul.f32 0.2, %v1198_v40  ;;  %8245 = vmatmul.msk.f32.gmra.mxu0 %vm528_vm0, %v497_v46  ;;  %v2331_v7 = vpop.f32.mrf.mxu1  ;;  %vm1403_vm9 = vcmp.ge.f32.partialorder %v1198_v40, 0.0 }
 0x35e   : > { %v2332_v49 = vadd.f32 %v9991_v8, %v2331_v7  ;;  %v10008_v23 = vpop.f32.mrf.mxu2 }
 0x35f   : > { %12502 = vst [vmem:[#allocation12_spill] sm:$0xff] %v10008_v23  ;;  %v1659_v51 = vsel %vm1403_vm9, %v1198_v40, %v1531_v45 }
 0x360   : > { %8357 = vmatmul.msk.f32.gmra.mxu1 %vm1710_vm2, %v1659_v51  ;;  %vm2569_vm10 = vcmp.ge.f32.partialorder %v2332_v49, 0.0  ;;  %v2697_v63 = vmul.f32 0.2, %v2332_v49 }
 0x362   : > { %v1200_v14 = vpop.f32.mrf.mxu0  ;;  %v2825_v21 = vsel %vm2569_vm10, %v2332_v49, %v2697_v63  ;;  %v499_v63 = vld [vmem:[%s9331_s15 + $0x358] sm:$0xff] }
 0x363   : > { %v1201_v36 = vadd.f32 %v9907_v32, %v1200_v14  ;;  %3135 = vmatmul.f32.gmra.mxu2 %v2825_v21 }
 0x365   : > { %v1532_v24 = vmul.f32 0.2, %v1201_v36  ;;  %8246 = vmatmul.msk.f32.gmra.mxu0 %vm528_vm0, %v498_v9  ;;  %v2334_v46 = vpop.f32.mrf.mxu1  ;;  %vm1404_vm11 = vcmp.ge.f32.partialorder %v1201_v36, 0.0 }
 0x366   : > { %v2335_v7 = vadd.f32 %v9991_v8, %v2334_v46  ;;  %v10015_v23 = vpop.f32.mrf.mxu2 }
 0x367   : > { %12503 = vst [vmem:[#allocation13_spill] sm:$0xff] %v10015_v23  ;;  %v1660_v40 = vsel %vm1404_vm11, %v1201_v36, %v1532_v24 }
 0x368   : > { %8358 = vmatmul.msk.f32.gmra.mxu1 %vm1710_vm2, %v1660_v40  ;;  %vm2570_vm12 = vcmp.ge.f32.partialorder %v2335_v7, 0.0  ;;  %v2698_v45 = vmul.f32 0.2, %v2335_v7 }
 0x36a   : > { %v1203_v49 = vpop.f32.mrf.mxu0  ;;  %v2826_v51 = vsel %vm2570_vm12, %v2335_v7, %v2698_v45  ;;  %v500_v45 = vld [vmem:[%s9331_s15 + $0x360] sm:$0xff] }
 0x36b   : > { %v1204_v14 = vadd.f32 %v9907_v32, %v1203_v49  ;;  %3138 = vmatmul.f32.gmra.mxu2 %v2826_v51 }
 0x36d   : > { %v1533_v21 = vmul.f32 0.2, %v1204_v14  ;;  %8247 = vmatmul.msk.f32.gmra.mxu0 %vm528_vm0, %v499_v63  ;;  %v2337_v9 = vpop.f32.mrf.mxu1  ;;  %vm1405_vm13 = vcmp.ge.f32.partialorder %v1204_v14, 0.0 }
 0x36e   : > { %v2338_v46 = vadd.f32 %v9991_v8, %v2337_v9  ;;  %v10022_v23 = vpop.f32.mrf.mxu2 }
 0x36f   : > { %12504 = vst [vmem:[#allocation14_spill] sm:$0xff] %v10022_v23  ;;  %v1661_v36 = vsel %vm1405_vm13, %v1204_v14, %v1533_v21 }
 0x370   : > { %8359 = vmatmul.msk.f32.gmra.mxu1 %vm1710_vm2, %v1661_v36  ;;  %vm2571_vm14 = vcmp.ge.f32.partialorder %v2338_v46, 0.0  ;;  %v2699_v24 = vmul.f32 0.2, %v2338_v46 }
 0x372   : > { %v1206_v7 = vpop.f32.mrf.mxu0  ;;  %v2827_v40 = vsel %vm2571_vm14, %v2338_v46, %v2699_v24  ;;  %v501_v24 = vld [vmem:[%s9331_s15 + $0x368] sm:$0xff] }
 0x373   : > { %v1207_v49 = vadd.f32 %v9907_v32, %v1206_v7  ;;  %3141 = vmatmul.f32.gmra.mxu2 %v2827_v40 }
 0x375   : > { %v1534_v51 = vmul.f32 0.2, %v1207_v49  ;;  %8248 = vmatmul.msk.f32.gmra.mxu0 %vm528_vm0, %v500_v45  ;;  %v2340_v63 = vpop.f32.mrf.mxu1  ;;  %vm1406_vm15 = vcmp.ge.f32.partialorder %v1207_v49, 0.0 }
 0x376   : > { %v2341_v9 = vadd.f32 %v9991_v8, %v2340_v63  ;;  %v10029_v23 = vpop.f32.mrf.mxu2 }
 0x377   : > { %12505 = vst [vmem:[#allocation15_spill] sm:$0xff] %v10029_v23  ;;  %v1662_v14 = vsel %vm1406_vm15, %v1207_v49, %v1534_v51 }
 0x378   : > { %8360 = vmatmul.msk.f32.gmra.mxu1 %vm1710_vm2, %v1662_v14  ;;  %vm2572_vm1 = vcmp.ge.f32.partialorder %v2341_v9, 0.0  ;;  %v2700_v21 = vmul.f32 0.2, %v2341_v9 }
 0x37a   : > { %v1209_v46 = vpop.f32.mrf.mxu0  ;;  %v2828_v36 = vsel %vm2572_vm1, %v2341_v9, %v2700_v21  ;;  %v502_v21 = vld [vmem:[%s9331_s15 + $0x370] sm:$0xff] }
 0x37b   : > { %v1210_v7 = vadd.f32 %v9907_v32, %v1209_v46  ;;  %3144 = vmatmul.f32.gmra.mxu2 %v2828_v36 }
 0x37d   : > { %v1535_v40 = vmul.f32 0.2, %v1210_v7  ;;  %8249 = vmatmul.msk.f32.gmra.mxu0 %vm528_vm0, %v501_v24  ;;  %v2343_v45 = vpop.f32.mrf.mxu1  ;;  %vm1407_vm3 = vcmp.ge.f32.partialorder %v1210_v7, 0.0 }
 0x37e   : > { %v2344_v63 = vadd.f32 %v9991_v8, %v2343_v45  ;;  %v10036_v23 = vpop.f32.mrf.mxu2 }
 0x37f   : > { %12506 = vst [vmem:[#allocation16_spill] sm:$0xff] %v10036_v23  ;;  %v1663_v49 = vsel %vm1407_vm3, %v1210_v7, %v1535_v40 }
 0x380   : > { %8361 = vmatmul.msk.f32.gmra.mxu1 %vm1710_vm2, %v1663_v49  ;;  %vm2573_vm4 = vcmp.ge.f32.partialorder %v2344_v63, 0.0  ;;  %v2701_v51 = vmul.f32 0.2, %v2344_v63 }
 0x382   : > { %v1212_v9 = vpop.f32.mrf.mxu0  ;;  %v2829_v14 = vsel %vm2573_vm4, %v2344_v63, %v2701_v51  ;;  %v503_v51 = vld [vmem:[%s9331_s15 + $0x378] sm:$0xff] }
 0x383   : > { %v1213_v46 = vadd.f32 %v9907_v32, %v1212_v9  ;;  %3147 = vmatmul.f32.gmra.mxu2 %v2829_v14 }
 0x385   : > { %v1536_v36 = vmul.f32 0.2, %v1213_v46  ;;  %8250 = vmatmul.msk.f32.gmra.mxu0 %vm528_vm0, %v502_v21  ;;  %v2346_v24 = vpop.f32.mrf.mxu1  ;;  %vm1408_vm5 = vcmp.ge.f32.partialorder %v1213_v46, 0.0 }
 0x386   : > { %v2347_v45 = vadd.f32 %v9991_v8, %v2346_v24  ;;  %v10043_v23 = vpop.f32.mrf.mxu2 }
 0x387   : > { %12507 = vst [vmem:[#allocation17_spill] sm:$0xff] %v10043_v23  ;;  %v1664_v7 = vsel %vm1408_vm5, %v1213_v46, %v1536_v36 }
 0x388   : > { %8362 = vmatmul.msk.f32.gmra.mxu1 %vm1710_vm2, %v1664_v7  ;;  %vm2574_vm6 = vcmp.ge.f32.partialorder %v2347_v45, 0.0  ;;  %v2702_v40 = vmul.f32 0.2, %v2347_v45 }
 0x38a   : > { %v1215_v63 = vpop.f32.mrf.mxu0  ;;  %v2830_v49 = vsel %vm2574_vm6, %v2347_v45, %v2702_v40  ;;  %v504_v40 = vld [vmem:[%s9331_s15 + $0x380] sm:$0xff] }
 0x38b   : > { %v1216_v9 = vadd.f32 %v9907_v32, %v1215_v63  ;;  %3150 = vmatmul.f32.gmra.mxu2 %v2830_v49 }
 0x38d   : > { %v1537_v14 = vmul.f32 0.2, %v1216_v9  ;;  %8251 = vmatmul.msk.f32.gmra.mxu0 %vm528_vm0, %v503_v51  ;;  %v2349_v21 = vpop.f32.mrf.mxu1  ;;  %vm1409_vm7 = vcmp.ge.f32.partialorder %v1216_v9, 0.0 }
 0x38e   : > { %v2350_v24 = vadd.f32 %v9991_v8, %v2349_v21  ;;  %v10050_v23 = vpop.f32.mrf.mxu2 }
 0x38f   : > { %12508 = vst [vmem:[#allocation18_spill] sm:$0xff] %v10050_v23  ;;  %v1665_v46 = vsel %vm1409_vm7, %v1216_v9, %v1537_v14 }
 0x390   : > { %8363 = vmatmul.msk.f32.gmra.mxu1 %vm1710_vm2, %v1665_v46  ;;  %vm2575_vm8 = vcmp.ge.f32.partialorder %v2350_v24, 0.0  ;;  %v2703_v36 = vmul.f32 0.2, %v2350_v24 }
 0x392   : > { %v1218_v45 = vpop.f32.mrf.mxu0  ;;  %v2831_v7 = vsel %vm2575_vm8, %v2350_v24, %v2703_v36  ;;  %v505_v36 = vld [vmem:[%s9331_s15 + $0x388] sm:$0xff] }
 0x393   : > { %v1219_v63 = vadd.f32 %v9907_v32, %v1218_v45  ;;  %3153 = vmatmul.f32.gmra.mxu2 %v2831_v7 }
 0x395   : > { %v1538_v49 = vmul.f32 0.2, %v1219_v63  ;;  %8252 = vmatmul.msk.f32.gmra.mxu0 %vm528_vm0, %v504_v40  ;;  %v2352_v51 = vpop.f32.mrf.mxu1  ;;  %vm1410_vm9 = vcmp.ge.f32.partialorder %v1219_v63, 0.0 }
 0x396   : > { %v2353_v21 = vadd.f32 %v9991_v8, %v2352_v51  ;;  %v10057_v23 = vpop.f32.mrf.mxu2 }
 0x397   : > { %12509 = vst [vmem:[#allocation19_spill] sm:$0xff] %v10057_v23  ;;  %v1666_v9 = vsel %vm1410_vm9, %v1219_v63, %v1538_v49 }
 0x398   : > { %8364 = vmatmul.msk.f32.gmra.mxu1 %vm1710_vm2, %v1666_v9  ;;  %vm2576_vm10 = vcmp.ge.f32.partialorder %v2353_v21, 0.0  ;;  %v2704_v14 = vmul.f32 0.2, %v2353_v21 }
 0x39a   : > { %v1221_v24 = vpop.f32.mrf.mxu0  ;;  %v2832_v46 = vsel %vm2576_vm10, %v2353_v21, %v2704_v14  ;;  %v506_v14 = vld [vmem:[%s9331_s15 + $0x390] sm:$0xff] }
 0x39b   : > { %v1222_v45 = vadd.f32 %v9907_v32, %v1221_v24  ;;  %3156 = vmatmul.f32.gmra.mxu2 %v2832_v46 }
 0x39d   : > { %v1539_v7 = vmul.f32 0.2, %v1222_v45  ;;  %8253 = vmatmul.msk.f32.gmra.mxu0 %vm528_vm0, %v505_v36  ;;  %v2355_v40 = vpop.f32.mrf.mxu1  ;;  %vm1411_vm11 = vcmp.ge.f32.partialorder %v1222_v45, 0.0 }
 0x39e   : > { %v2356_v51 = vadd.f32 %v9991_v8, %v2355_v40  ;;  %v10064_v23 = vpop.f32.mrf.mxu2 }
 0x39f   : > { %12510 = vst [vmem:[#allocation20_spill] sm:$0xff] %v10064_v23  ;;  %v1667_v63 = vsel %vm1411_vm11, %v1222_v45, %v1539_v7 }
 0x3a0   : > { %8365 = vmatmul.msk.f32.gmra.mxu1 %vm1710_vm2, %v1667_v63  ;;  %vm2577_vm12 = vcmp.ge.f32.partialorder %v2356_v51, 0.0  ;;  %v2705_v49 = vmul.f32 0.2, %v2356_v51 }
 0x3a2   : > { %v1224_v21 = vpop.f32.mrf.mxu0  ;;  %v2833_v9 = vsel %vm2577_vm12, %v2356_v51, %v2705_v49  ;;  %v507_v49 = vld [vmem:[%s9331_s15 + $0x398] sm:$0xff] }
 0x3a3   : > { %v1225_v24 = vadd.f32 %v9907_v32, %v1224_v21  ;;  %3159 = vmatmul.f32.gmra.mxu2 %v2833_v9 }
 0x3a5   : > { %v1540_v46 = vmul.f32 0.2, %v1225_v24  ;;  %8254 = vmatmul.msk.f32.gmra.mxu0 %vm528_vm0, %v506_v14  ;;  %v2358_v36 = vpop.f32.mrf.mxu1  ;;  %vm1412_vm13 = vcmp.ge.f32.partialorder %v1225_v24, 0.0 }
 0x3a6   : > { %v2359_v40 = vadd.f32 %v9991_v8, %v2358_v36  ;;  %v10071_v23 = vpop.f32.mrf.mxu2 }
 0x3a7   : > { %12511 = vst [vmem:[#allocation21_spill] sm:$0xff] %v10071_v23  ;;  %v1668_v45 = vsel %vm1412_vm13, %v1225_v24, %v1540_v46 }
 0x3a8   : > { %8366 = vmatmul.msk.f32.gmra.mxu1 %vm1710_vm2, %v1668_v45  ;;  %vm2578_vm14 = vcmp.ge.f32.partialorder %v2359_v40, 0.0  ;;  %v2706_v7 = vmul.f32 0.2, %v2359_v40 }
 0x3aa   : > { %v1227_v51 = vpop.f32.mrf.mxu0  ;;  %v2834_v63 = vsel %vm2578_vm14, %v2359_v40, %v2706_v7  ;;  %v508_v7 = vld [vmem:[%s9331_s15 + $0x3a0] sm:$0xff] }
 0x3ab   : > { %v1228_v21 = vadd.f32 %v9907_v32, %v1227_v51  ;;  %3162 = vmatmul.f32.gmra.mxu2 %v2834_v63 }
 0x3ad   : > { %v1541_v9 = vmul.f32 0.2, %v1228_v21  ;;  %8255 = vmatmul.msk.f32.gmra.mxu0 %vm528_vm0, %v507_v49  ;;  %v2361_v14 = vpop.f32.mrf.mxu1  ;;  %vm1413_vm15 = vcmp.ge.f32.partialorder %v1228_v21, 0.0 }
 0x3ae   : > { %v2362_v36 = vadd.f32 %v9991_v8, %v2361_v14  ;;  %v10078_v23 = vpop.f32.mrf.mxu2 }
 0x3af   : > { %12512 = vst [vmem:[#allocation22_spill] sm:$0xff] %v10078_v23  ;;  %v1669_v24 = vsel %vm1413_vm15, %v1228_v21, %v1541_v9 }
 0x3b0   : > { %8367 = vmatmul.msk.f32.gmra.mxu1 %vm1710_vm2, %v1669_v24  ;;  %vm2579_vm1 = vcmp.ge.f32.partialorder %v2362_v36, 0.0  ;;  %v2707_v46 = vmul.f32 0.2, %v2362_v36 }
 0x3b2   : > { %v1230_v40 = vpop.f32.mrf.mxu0  ;;  %v2835_v45 = vsel %vm2579_vm1, %v2362_v36, %v2707_v46  ;;  %v509_v46 = vld [vmem:[%s9331_s15 + $0x3a8] sm:$0xff] }
 0x3b3   : > { %v1231_v51 = vadd.f32 %v9907_v32, %v1230_v40  ;;  %3165 = vmatmul.f32.gmra.mxu2 %v2835_v45 }
 0x3b5   : > { %v1542_v63 = vmul.f32 0.2, %v1231_v51  ;;  %8256 = vmatmul.msk.f32.gmra.mxu0 %vm528_vm0, %v508_v7  ;;  %v2364_v49 = vpop.f32.mrf.mxu1  ;;  %vm1414_vm3 = vcmp.ge.f32.partialorder %v1231_v51, 0.0 }
 0x3b6   : > { %v2365_v14 = vadd.f32 %v9991_v8, %v2364_v49  ;;  %v10085_v23 = vpop.f32.mrf.mxu2 }
 0x3b7   : > { %12513 = vst [vmem:[#allocation23_spill] sm:$0xff] %v10085_v23  ;;  %v1670_v21 = vsel %vm1414_vm3, %v1231_v51, %v1542_v63 }
 0x3b8   : > { %8368 = vmatmul.msk.f32.gmra.mxu1 %vm1710_vm2, %v1670_v21  ;;  %vm2580_vm4 = vcmp.ge.f32.partialorder %v2365_v14, 0.0  ;;  %v2708_v9 = vmul.f32 0.2, %v2365_v14 }
 0x3ba   : > { %v1233_v36 = vpop.f32.mrf.mxu0  ;;  %v2836_v24 = vsel %vm2580_vm4, %v2365_v14, %v2708_v9  ;;  %v510_v9 = vld [vmem:[%s9331_s15 + $0x3b0] sm:$0xff] }
 0x3bb   : > { %v1234_v40 = vadd.f32 %v9907_v32, %v1233_v36  ;;  %3168 = vmatmul.f32.gmra.mxu2 %v2836_v24 }
 0x3bd   : > { %v1543_v45 = vmul.f32 0.2, %v1234_v40  ;;  %8257 = vmatmul.msk.f32.gmra.mxu0 %vm528_vm0, %v509_v46  ;;  %v2367_v7 = vpop.f32.mrf.mxu1  ;;  %vm1415_vm5 = vcmp.ge.f32.partialorder %v1234_v40, 0.0 }
 0x3be   : > { %v2368_v49 = vadd.f32 %v9991_v8, %v2367_v7  ;;  %v10092_v23 = vpop.f32.mrf.mxu2 }
 0x3bf   : > { %12514 = vst [vmem:[#allocation24_spill] sm:$0xff] %v10092_v23  ;;  %v1671_v51 = vsel %vm1415_vm5, %v1234_v40, %v1543_v45 }
 0x3c0   : > { %8369 = vmatmul.msk.f32.gmra.mxu1 %vm1710_vm2, %v1671_v51  ;;  %vm2581_vm6 = vcmp.ge.f32.partialorder %v2368_v49, 0.0  ;;  %v2709_v63 = vmul.f32 0.2, %v2368_v49 }
 0x3c2   : > { %v1236_v14 = vpop.f32.mrf.mxu0  ;;  %v2837_v21 = vsel %vm2581_vm6, %v2368_v49, %v2709_v63  ;;  %v511_v63 = vld [vmem:[%s9331_s15 + $0x3b8] sm:$0xff] }
 0x3c3   : > { %v1237_v36 = vadd.f32 %v9907_v32, %v1236_v14  ;;  %3171 = vmatmul.f32.gmra.mxu2 %v2837_v21 }
 0x3c5   : > { %v1544_v24 = vmul.f32 0.2, %v1237_v36  ;;  %8258 = vmatmul.msk.f32.gmra.mxu0 %vm528_vm0, %v510_v9  ;;  %v2370_v46 = vpop.f32.mrf.mxu1  ;;  %vm1416_vm7 = vcmp.ge.f32.partialorder %v1237_v36, 0.0 }
 0x3c6   : > { %v2371_v7 = vadd.f32 %v9991_v8, %v2370_v46  ;;  %v10099_v23 = vpop.f32.mrf.mxu2 }
 0x3c7   : > { %12515 = vst [vmem:[#allocation25_spill] sm:$0xff] %v10099_v23  ;;  %v1672_v40 = vsel %vm1416_vm7, %v1237_v36, %v1544_v24 }
 0x3c8   : > { %8370 = vmatmul.msk.f32.gmra.mxu1 %vm1710_vm2, %v1672_v40  ;;  %vm2582_vm8 = vcmp.ge.f32.partialorder %v2371_v7, 0.0  ;;  %v2710_v45 = vmul.f32 0.2, %v2371_v7 }
 0x3ca   : > { %v1239_v49 = vpop.f32.mrf.mxu0  ;;  %v2838_v51 = vsel %vm2582_vm8, %v2371_v7, %v2710_v45  ;;  %v512_v45 = vld [vmem:[%s9331_s15 + $0x3c0] sm:$0xff] }
 0x3cb   : > { %v1240_v14 = vadd.f32 %v9907_v32, %v1239_v49  ;;  %3174 = vmatmul.f32.gmra.mxu2 %v2838_v51 }
 0x3cd   : > { %v1545_v21 = vmul.f32 0.2, %v1240_v14  ;;  %8259 = vmatmul.msk.f32.gmra.mxu0 %vm528_vm0, %v511_v63  ;;  %v2373_v9 = vpop.f32.mrf.mxu1  ;;  %vm1417_vm9 = vcmp.ge.f32.partialorder %v1240_v14, 0.0 }
 0x3ce   : > { %v2374_v46 = vadd.f32 %v9991_v8, %v2373_v9  ;;  %v10106_v23 = vpop.f32.mrf.mxu2 }
 0x3cf   : > { %12516 = vst [vmem:[#allocation26_spill] sm:$0xff] %v10106_v23  ;;  %v1673_v36 = vsel %vm1417_vm9, %v1240_v14, %v1545_v21 }
 0x3d0   : > { %8371 = vmatmul.msk.f32.gmra.mxu1 %vm1710_vm2, %v1673_v36  ;;  %vm2583_vm10 = vcmp.ge.f32.partialorder %v2374_v46, 0.0  ;;  %v2711_v24 = vmul.f32 0.2, %v2374_v46 }
 0x3d2   : > { %v1242_v7 = vpop.f32.mrf.mxu0  ;;  %v2839_v40 = vsel %vm2583_vm10, %v2374_v46, %v2711_v24  ;;  %v513_v24 = vld [vmem:[%s9331_s15 + $0x3c8] sm:$0xff] }
 0x3d3   : > { %v1243_v49 = vadd.f32 %v9907_v32, %v1242_v7  ;;  %3177 = vmatmul.f32.gmra.mxu2 %v2839_v40 }
 0x3d5   : > { %v1546_v51 = vmul.f32 0.2, %v1243_v49  ;;  %8260 = vmatmul.msk.f32.gmra.mxu0 %vm528_vm0, %v512_v45  ;;  %v2376_v63 = vpop.f32.mrf.mxu1  ;;  %vm1418_vm11 = vcmp.ge.f32.partialorder %v1243_v49, 0.0 }
 0x3d6   : > { %v2377_v9 = vadd.f32 %v9991_v8, %v2376_v63  ;;  %v10113_v23 = vpop.f32.mrf.mxu2 }
 0x3d7   : > { %12517 = vst [vmem:[#allocation27_spill] sm:$0xff] %v10113_v23  ;;  %v1674_v14 = vsel %vm1418_vm11, %v1243_v49, %v1546_v51 }
 0x3d8   : > { %8372 = vmatmul.msk.f32.gmra.mxu1 %vm1710_vm2, %v1674_v14  ;;  %vm2584_vm12 = vcmp.ge.f32.partialorder %v2377_v9, 0.0  ;;  %v2712_v21 = vmul.f32 0.2, %v2377_v9 }
 0x3da   : > { %v1245_v46 = vpop.f32.mrf.mxu0  ;;  %v2840_v36 = vsel %vm2584_vm12, %v2377_v9, %v2712_v21  ;;  %v514_v21 = vld [vmem:[%s9331_s15 + $0x3d0] sm:$0xff] }
 0x3db   : > { %v1246_v7 = vadd.f32 %v9907_v32, %v1245_v46  ;;  %3180 = vmatmul.f32.gmra.mxu2 %v2840_v36 }
 0x3dd   : > { %vm1419_vm13 = vcmp.ge.f32.partialorder %v1246_v7, 0.0  ;;  %v1547_v40 = vmul.f32 0.2, %v1246_v7  ;;  %8261 = vmatmul.msk.f32.gmra.mxu0 %vm528_vm0, %v513_v24  ;;  %v2379_v45 = vpop.f32.mrf.mxu1 }
 0x3de   : > { %v2380_v63 = vadd.f32 %v9991_v8, %v2379_v45  ;;  %v10120_v23 = vpop.f32.mrf.mxu2 }
 0x3df   : > { %12518 = vst [vmem:[#allocation28_spill] sm:$0xff] %v10120_v23  ;;  %v1675_v49 = vsel %vm1419_vm13, %v1246_v7, %v1547_v40 }
 0x3e0   : > { %8373 = vmatmul.msk.f32.gmra.mxu1 %vm1710_vm2, %v1675_v49  ;;  %vm2585_vm14 = vcmp.ge.f32.partialorder %v2380_v63, 0.0  ;;  %v2713_v51 = vmul.f32 0.2, %v2380_v63 }
 0x3e2   : > { %v1248_v9 = vpop.f32.mrf.mxu0  ;;  %v2841_v14 = vsel %vm2585_vm14, %v2380_v63, %v2713_v51  ;;  %v515_v51 = vld [vmem:[%s9331_s15 + $0x3d8] sm:$0xff] }
 0x3e3   : > { %v1249_v46 = vadd.f32 %v9907_v32, %v1248_v9  ;;  %3183 = vmatmul.f32.gmra.mxu2 %v2841_v14 }
 0x3e5   : > { %vm1420_vm15 = vcmp.ge.f32.partialorder %v1249_v46, 0.0  ;;  %v1548_v36 = vmul.f32 0.2, %v1249_v46  ;;  %8262 = vmatmul.msk.f32.gmra.mxu0 %vm528_vm0, %v514_v21  ;;  %v2382_v24 = vpop.f32.mrf.mxu1 }
 0x3e6   : > { %v2383_v45 = vadd.f32 %v9991_v8, %v2382_v24  ;;  %v10127_v23 = vpop.f32.mrf.mxu2 }
 0x3e7   : > { %12519 = vst [vmem:[#allocation29_spill] sm:$0xff] %v10127_v23  ;;  %v1676_v7 = vsel %vm1420_vm15, %v1249_v46, %v1548_v36 }
 0x3e8   : > { %8374 = vmatmul.msk.f32.gmra.mxu1 %vm1710_vm2, %v1676_v7  ;;  %vm2586_vm1 = vcmp.ge.f32.partialorder %v2383_v45, 0.0  ;;  %v2714_v40 = vmul.f32 0.2, %v2383_v45 }
 0x3ea   : > { %v1251_v63 = vpop.f32.mrf.mxu0  ;;  %v2842_v49 = vsel %vm2586_vm1, %v2383_v45, %v2714_v40  ;;  %v516_v40 = vld [vmem:[%s9331_s15 + $0x3e0] sm:$0xff] }
 0x3eb   : > { %v1252_v9 = vadd.f32 %v9907_v32, %v1251_v63  ;;  %3186 = vmatmul.f32.gmra.mxu2 %v2842_v49 }
 0x3ed   : > { %vm1421_vm3 = vcmp.ge.f32.partialorder %v1252_v9, 0.0  ;;  %v1549_v14 = vmul.f32 0.2, %v1252_v9  ;;  %8263 = vmatmul.msk.f32.gmra.mxu0 %vm528_vm0, %v515_v51  ;;  %v2385_v21 = vpop.f32.mrf.mxu1 }
 0x3ee   : > { %v2386_v24 = vadd.f32 %v9991_v8, %v2385_v21  ;;  %v10135_v36 = vpop.f32.mrf.mxu2 }
 0x3ef   : > { %v1677_v23 = vsel %vm1421_vm3, %v1252_v9, %v1549_v14  ;;  %12520 = vst [vmem:[#allocation30_spill] sm:$0xff] %v10135_v36 }
 0x3f0   : > { %8375 = vmatmul.msk.f32.gmra.mxu1 %vm1710_vm2, %v1677_v23  ;;  %vm2587_vm4 = vcmp.ge.f32.partialorder %v2386_v24, 0.0  ;;  %v2715_v46 = vmul.f32 0.2, %v2386_v24 }
 0x3f2   : > { %v1254_v45 = vpop.f32.mrf.mxu0  ;;  %v2843_v7 = vsel %vm2587_vm4, %v2386_v24, %v2715_v46  ;;  %v517_v24 = vld [vmem:[%s9331_s15 + $0x3e8] sm:$0xff] }
 0x3f3   : > { %v1255_v63 = vadd.f32 %v9907_v32, %v1254_v45  ;;  %3189 = vmatmul.f32.gmra.mxu2 %v2843_v7 }
 0x3f5   : > { %vm1422_vm5 = vcmp.ge.f32.partialorder %v1255_v63, 0.0  ;;  %v1550_v49 = vmul.f32 0.2, %v1255_v63  ;;  %8264 = vmatmul.msk.f32.gmra.mxu0 %vm528_vm0, %v516_v40  ;;  %v2388_v51 = vpop.f32.mrf.mxu1 }
 0x3f6   : > { %v2389_v9 = vadd.f32 %v9991_v8, %v2388_v51  ;;  %v10143_v46 = vpop.f32.mrf.mxu2 }
 0x3f7   : > { %v1678_v14 = vsel %vm1422_vm5, %v1255_v63, %v1550_v49  ;;  %12521 = vst [vmem:[#allocation31_spill] sm:$0xff] %v10143_v46 }
 0x3f8   : > { %8376 = vmatmul.msk.f32.gmra.mxu1 %vm1710_vm2, %v1678_v14  ;;  %vm2588_vm6 = vcmp.ge.f32.partialorder %v2389_v9, 0.0  ;;  %v2716_v23 = vmul.f32 0.2, %v2389_v9 }
 0x3fa   : > { %v1257_v21 = vpop.f32.mrf.mxu0  ;;  %v2844_v36 = vsel %vm2588_vm6, %v2389_v9, %v2716_v23  ;;  %v518_v23 = vld [vmem:[%s9331_s15 + $0x3f0] sm:$0xff] }
 0x3fb   : > { %v1258_v45 = vadd.f32 %v9907_v32, %v1257_v21  ;;  %3192 = vmatmul.f32.gmra.mxu2 %v2844_v36 }
 0x3fd   : > { %vm1423_vm7 = vcmp.ge.f32.partialorder %v1258_v45, 0.0  ;;  %v1551_v7 = vmul.f32 0.2, %v1258_v45  ;;  %8265 = vmatmul.msk.f32.gmra.mxu0 %vm528_vm0, %v517_v24  ;;  %v2391_v40 = vpop.f32.mrf.mxu1 }
 0x3fe   : > { %v2392_v63 = vadd.f32 %v9991_v8, %v2391_v40  ;;  %v10151_v36 = vpop.f32.mrf.mxu2 }
 0x3ff   : > { %v1679_v49 = vsel %vm1423_vm7, %v1258_v45, %v1551_v7  ;;  %12522 = vst [vmem:[#allocation32_spill] sm:$0xff] %v10151_v36 }
 0x400   : > { %8377 = vmatmul.msk.f32.gmra.mxu1 %vm1710_vm2, %v1679_v49  ;;  %vm2589_vm8 = vcmp.ge.f32.partialorder %v2392_v63, 0.0  ;;  %v2717_v51 = vmul.f32 0.2, %v2392_v63 }
 0x402   : > { %v1260_v9 = vpop.f32.mrf.mxu0  ;;  %v2845_v14 = vsel %vm2589_vm8, %v2392_v63, %v2717_v51  ;;  %v519_v51 = vld [vmem:[%s9331_s15 + $0x3f8] sm:$0xff] }
 0x403   : > { %v1261_v46 = vadd.f32 %v9907_v32, %v1260_v9  ;;  %3195 = vmatmul.f32.gmra.mxu2 %v2845_v14  ;;  %v10160_v32 = vld [vmem:[%s12483_s2] ss:$0 sm:$0xff]  ;;  %v2113_v14 = vadd.f32 %v9991_v8, %v9506_v2 }
 0x405   : > { %vm1424_vm9 = vcmp.ge.f32.partialorder %v1261_v46, 0.0  ;;  %v1552_v21 = vmul.f32 0.2, %v1261_v46  ;;  %8266 = vmatmul.msk.f32.gmra.mxu0 %vm528_vm0, %v518_v23  ;;  %v2394_v24 = vpop.f32.mrf.mxu1  ;;  %vm2496_vm13 = vcmp.ge.f32.partialorder %v2113_v14, 0.0 }
 0x406   : > { %v2395_v45 = vadd.f32 %v9991_v8, %v2394_v24  ;;  %v10167_v24 = vpop.f32.mrf.mxu2 }
 0x407   : > { %v1680_v7 = vsel %vm1424_vm9, %v1261_v46, %v1552_v21  ;;  %12523 = vst [vmem:[#allocation33_spill] sm:$0xff] %v10167_v24 }
 0x408   : > { %8378 = vmatmul.msk.f32.gmra.mxu1 %vm1710_vm2, %v1680_v7  ;;  %vm2590_vm10 = vcmp.ge.f32.partialorder %v2395_v45, 0.0  ;;  %v2718_v40 = vmul.f32 0.2, %v2395_v45  ;;  %v2624_v7 = vmul.f32 0.2, %v2113_v14 }
 0x40a   : > { %v1263_v63 = vpop.f32.mrf.mxu0  ;;  %v2846_v49 = vsel %vm2590_vm10, %v2395_v45, %v2718_v40  ;;  %v2752_v36 = vsel %vm2496_vm13, %v2113_v14, %v2624_v7 }
 0x40b   : > { %v1264_v9 = vadd.f32 %v10160_v32, %v1263_v63  ;;  %3198 = vmatmul.f32.gmra.mxu2 %v2846_v49 }
 0x40d   : > { %vm1425_vm11 = vcmp.ge.f32.partialorder %v1264_v9, 0.0  ;;  %v1553_v46 = vmul.f32 0.2, %v1264_v9  ;;  %8267 = vmatmul.msk.f32.gmra.mxu0 %vm528_vm0, %v519_v51  ;;  %v2397_v23 = vpop.f32.mrf.mxu1 }
 0x40e   : > { %v2398_v21 = vadd.f32 %v9991_v8, %v2397_v23 }
 0x40f   : > { %v1681_v45 = vsel %vm1425_vm11, %v1264_v9, %v1553_v46  ;;  %v10173_v46 = vpop.f32.mrf.mxu2 }
 0x410   : > { %8379 = vmatmul.msk.f32.gmra.mxu1 %vm1710_vm2, %v1681_v45  ;;  %vm2591_vm12 = vcmp.ge.f32.partialorder %v2398_v21, 0.0  ;;  %v2719_v40 = vmul.f32 0.2, %v2398_v21 }
 0x412   : > { %v1266_v63 = vpop.f32.mrf.mxu0  ;;  %v2847_v49 = vsel %vm2591_vm12, %v2398_v21, %v2719_v40 }
 0x413   : > { %v1267_v2 = vadd.f32 %v10160_v32, %v1266_v63  ;;  %3201 = vmatmul.f32.gmra.mxu2 %v2847_v49 }
 0x415   : > { %vm1426_vm14 = vcmp.ge.f32.partialorder %v1267_v2, 0.0  ;;  %v1554_v51 = vmul.f32 0.2, %v1267_v2  ;;  %v2400_v56 = vpop.f32.mrf.mxu1  ;;  %2916 = vmatmul.f32.vlgmr.msrb.gmra.mxu0 %v2752_v36 }
 0x416   : > { %v2401_v23 = vadd.f32 %v9991_v8, %v2400_v56 }
 0x417   : > { %v1682_v24 = vsel %vm1426_vm14, %v1267_v2, %v1554_v51  ;;  %v10178_v49 = vpop.f32.mrf.mxu2 }
 0x418   : > { %8380 = vmatmul.msk.f32.gmra.mxu1 %vm1710_vm2, %v1682_v24  ;;  %vm2592_vm15 = vcmp.ge.f32.partialorder %v2401_v23, 0.0  ;;  %v2720_v9 = vmul.f32 0.2, %v2401_v23  ;;  %12524 = vst [vmem:[#allocation34_spill] sm:$0xff] %v10178_v49 }
 0x41a   : > { %v1269_v45 = vpop.f32.mrf.mxu0  ;;  %v2848_v17 = vsel %vm2592_vm15, %v2401_v23, %v2720_v9 }
 0x41b   : > { %v1270_v21 = vadd.f32 %v10160_v32, %v1269_v45  ;;  %3204 = vmatmul.f32.gmra.mxu2 %v2848_v17 }
 0x41d   : > { %vm1427_vm1 = vcmp.ge.f32.partialorder %v1270_v21, 0.0  ;;  %v1555_v14 = vmul.f32 0.2, %v1270_v21  ;;  %v2403_v7 = vpop.f32.mrf.mxu1 }
 0x41e   : > { %v2404_v40 = vadd.f32 %v9991_v8, %v2403_v7 }
 0x41f   : > { %v1683_v36 = vsel %vm1427_vm1, %v1270_v21, %v1555_v14 }
 0x420   : > { %8381 = vmatmul.msk.f32.gmra.mxu1 %vm1710_vm2, %v1683_v36  ;;  %vm2593_vm3 = vcmp.ge.f32.partialorder %v2404_v40, 0.0  ;;  %v2721_v56 = vmul.f32 0.2, %v2404_v40 }
 0x422   : > { %v1272_v24 = vpop.f32.mrf.mxu0  ;;  %v2849_v63 = vsel %vm2593_vm3, %v2404_v40, %v2721_v56  ;;  %v10184_v40 = vpop.f32.mrf.mxu2 }
 0x423   : > { %v1273_v2 = vadd.f32 %v10160_v32, %v1272_v24  ;;  %3207 = vmatmul.f32.gmra.mxu2 %v2849_v63  ;;  %12525 = vst [vmem:[#allocation35_spill] sm:$0xff] %v10184_v40 }
 0x425   : > { %vm1428_vm4 = vcmp.ge.f32.partialorder %v1273_v2, 0.0  ;;  %v1556_v51 = vmul.f32 0.2, %v1273_v2  ;;  %v2406_v17 = vpop.f32.mrf.mxu1 }
 0x426   : > { %v2407_v23 = vadd.f32 %v9991_v8, %v2406_v17 }
 0x427   : > { %v1684_v9 = vsel %vm1428_vm4, %v1273_v2, %v1556_v51 }
 0x428   : > { %8382 = vmatmul.msk.f32.gmra.mxu1 %vm1710_vm2, %v1684_v9  ;;  %vm2594_vm5 = vcmp.ge.f32.partialorder %v2407_v23, 0.0  ;;  %v2722_v45 = vmul.f32 0.2, %v2407_v23 }
 0x42a   : > { %v1275_v21 = vpop.f32.mrf.mxu0  ;;  %v2850_v14 = vsel %vm2594_vm5, %v2407_v23, %v2722_v45 }
 0x42b   : > { %v1276_v7 = vadd.f32 %v10160_v32, %v1275_v21  ;;  %3210 = vmatmul.f32.gmra.mxu2 %v2850_v14  ;;  %v10190_v14 = vpop.f32.mrf.mxu2 }
 0x42c   : > { %12526 = vst [vmem:[#allocation36_spill] sm:$0xff] %v10190_v14 }
 0x42d   : > { %vm1429_vm6 = vcmp.ge.f32.partialorder %v1276_v7, 0.0  ;;  %v1557_v36 = vmul.f32 0.2, %v1276_v7  ;;  %v2409_v56 = vpop.f32.mrf.mxu1 }
 0x42e   : > { %v2410_v24 = vadd.f32 %v9991_v8, %v2409_v56 }
 0x42f   : > { %v1685_v63 = vsel %vm1429_vm6, %v1276_v7, %v1557_v36 }
 0x430   : > { %8383 = vmatmul.msk.f32.gmra.mxu1 %vm1710_vm2, %v1685_v63  ;;  %vm2595_vm7 = vcmp.ge.f32.partialorder %v2410_v24, 0.0  ;;  %v2723_v2 = vmul.f32 0.2, %v2410_v24 }
 0x432   : > { %v1278_v51 = vpop.f32.mrf.mxu0  ;;  %v2851_v17 = vsel %vm2595_vm7, %v2410_v24, %v2723_v2 }
 0x433   : > { %v1279_v9 = vadd.f32 %v10160_v32, %v1278_v51  ;;  %3213 = vmatmul.f32.gmra.mxu2 %v2851_v17 }
 0x435   : > { %vm1430_vm8 = vcmp.ge.f32.partialorder %v1279_v9, 0.0  ;;  %v1558_v23 = vmul.f32 0.2, %v1279_v9  ;;  %v2412_v45 = vpop.f32.mrf.mxu1 }
 0x436   : > { %v2413_v21 = vadd.f32 %v9991_v8, %v2412_v45 }
 0x437   : > { %v1686_v40 = vsel %vm1430_vm8, %v1279_v9, %v1558_v23  ;;  %v10196_v9 = vpop.f32.mrf.mxu2 }
 0x438   : > { %8384 = vmatmul.msk.f32.gmra.mxu1 %vm1710_vm2, %v1686_v40  ;;  %vm2596_vm9 = vcmp.ge.f32.partialorder %v2413_v21, 0.0  ;;  %v2724_v7 = vmul.f32 0.2, %v2413_v21  ;;  %12527 = vst [vmem:[#allocation37_spill] sm:$0xff] %v10196_v9 }
 0x43a   : > { %v1281_v36 = vpop.f32.mrf.mxu0  ;;  %v2852_v56 = vsel %vm2596_vm9, %v2413_v21, %v2724_v7 }
 0x43b   : > { %v1282_v63 = vadd.f32 %v10160_v32, %v1281_v36  ;;  %3216 = vmatmul.f32.gmra.mxu2 %v2852_v56 }
 0x43d   : > { %vm1431_vm10 = vcmp.ge.f32.partialorder %v1282_v63, 0.0  ;;  %v1559_v24 = vmul.f32 0.2, %v1282_v63  ;;  %v2415_v2 = vpop.f32.mrf.mxu1 }
 0x43e   : > { %v2416_v51 = vadd.f32 %v9991_v8, %v2415_v2 }
 0x43f   : > { %v1687_v17 = vsel %vm1431_vm10, %v1282_v63, %v1559_v24 }
 0x440   : > { %8385 = vmatmul.msk.f32.gmra.mxu1 %vm1710_vm2, %v1687_v17  ;;  %vm2597_vm11 = vcmp.ge.f32.partialorder %v2416_v51, 0.0  ;;  %v2725_v45 = vmul.f32 0.2, %v2416_v51  ;;  %v10201_v17 = vpop.f32.mrf.mxu2 }
 0x441   : > { %12528 = vst [vmem:[#allocation38_spill] sm:$0xff] %v10201_v17 }
 0x442   : > { %v1284_v40 = vpop.f32.mrf.mxu0  ;;  %v2853_v23 = vsel %vm2597_vm11, %v2416_v51, %v2725_v45 }
 0x443   : > { %v1285_v14 = vadd.f32 %v10160_v32, %v1284_v40  ;;  %3219 = vmatmul.f32.gmra.mxu2 %v2853_v23 }
 0x445   : > { %vm1432_vm12 = vcmp.ge.f32.partialorder %v1285_v14, 0.0  ;;  %v1560_v21 = vmul.f32 0.2, %v1285_v14  ;;  %v2418_v7 = vpop.f32.mrf.mxu1 }
 0x446   : > { %v2419_v36 = vadd.f32 %v9991_v8, %v2418_v7 }
 0x447   : > { %v1688_v56 = vsel %vm1432_vm12, %v1285_v14, %v1560_v21 }
 0x448   : > { %8386 = vmatmul.msk.f32.gmra.mxu1 %vm1710_vm2, %v1688_v56  ;;  %vm2598_vm13 = vcmp.ge.f32.partialorder %v2419_v36, 0.0  ;;  %v2726_v63 = vmul.f32 0.2, %v2419_v36 }
 0x44a   : > { %v1287_v24 = vpop.f32.mrf.mxu0  ;;  %v2854_v2 = vsel %vm2598_vm13, %v2419_v36, %v2726_v63  ;;  %v10207_v36 = vpop.f32.mrf.mxu2 }
 0x44b   : > { %v1288_v9 = vadd.f32 %v10160_v32, %v1287_v24  ;;  %3222 = vmatmul.f32.gmra.mxu2 %v2854_v2  ;;  %12529 = vst [vmem:[#allocation39_spill] sm:$0xff] %v10207_v36 }
 0x44d   : > { %vm1433_vm14 = vcmp.ge.f32.partialorder %v1288_v9, 0.0  ;;  %v1561_v51 = vmul.f32 0.2, %v1288_v9  ;;  %v2421_v45 = vpop.f32.mrf.mxu1 }
 0x44e   : > { %v2422_v40 = vadd.f32 %v9991_v8, %v2421_v45 }
 0x44f   : > { %v1689_v23 = vsel %vm1433_vm14, %v1288_v9, %v1561_v51 }
 0x450   : > { %8387 = vmatmul.msk.f32.gmra.mxu1 %vm1710_vm2, %v1689_v23  ;;  %vm2599_vm15 = vcmp.ge.f32.partialorder %v2422_v40, 0.0  ;;  %v2727_v14 = vmul.f32 0.2, %v2422_v40 }
 0x452   : > { %v1290_v21 = vpop.f32.mrf.mxu0  ;;  %v2855_v7 = vsel %vm2599_vm15, %v2422_v40, %v2727_v14 }
 0x453   : > { %v1291_v56 = vadd.f32 %v10160_v32, %v1290_v21  ;;  %3225 = vmatmul.f32.gmra.mxu2 %v2855_v7  ;;  %v10213_v21 = vpop.f32.mrf.mxu2 }
 0x454   : > { %12530 = vst [vmem:[#allocation40_spill] sm:$0xff] %v10213_v21 }
 0x455   : > { %vm1434_vm1 = vcmp.ge.f32.partialorder %v1291_v56, 0.0  ;;  %v1562_v63 = vmul.f32 0.2, %v1291_v56  ;;  %v2424_v24 = vpop.f32.mrf.mxu1 }
 0x456   : > { %v2425_v2 = vadd.f32 %v9991_v8, %v2424_v24 }
 0x457   : > { %v1690_v17 = vsel %vm1434_vm1, %v1291_v56, %v1562_v63 }
 0x458   : > { %v2728_v49 = vmul.f32 0.2, %v2425_v2  ;;  %8388 = vmatmul.msk.f32.gmra.mxu1 %vm1710_vm2, %v1690_v17  ;;  %vm2600_vm3 = vcmp.ge.f32.partialorder %v2425_v2, 0.0 }
 0x45a   : > { %v1293_v9 = vpop.f32.mrf.mxu0  ;;  %v2856_v51 = vsel %vm2600_vm3, %v2425_v2, %v2728_v49 }
 0x45b   : > { %v1294_v45 = vadd.f32 %v10160_v32, %v1293_v9  ;;  %3228 = vmatmul.f32.gmra.mxu2 %v2856_v51 }
 0x45d   : > { %vm1435_vm4 = vcmp.ge.f32.partialorder %v1294_v45, 0.0  ;;  %v1563_v40 = vmul.f32 0.2, %v1294_v45  ;;  %v2427_v23 = vpop.f32.mrf.mxu1 }
 0x45e   : > { %v2428_v14 = vadd.f32 %v9991_v8, %v2427_v23 }
 0x45f   : > { %v1691_v7 = vsel %vm1435_vm4, %v1294_v45, %v1563_v40  ;;  %v3692_v45 = vld [vmem:[%s12488_s7 + $0x38] sm:$0xff]  ;;  %v10222_v40 = vpop.f32.mrf.mxu2 }
 0x460   : > { %v2729_v36 = vmul.f32 0.2, %v2428_v14  ;;  %8389 = vmatmul.msk.f32.gmra.mxu1 %vm1710_vm2, %v1691_v7  ;;  %vm2601_vm5 = vcmp.ge.f32.partialorder %v2428_v14, 0.0  ;;  %12531 = vst [vmem:[#allocation41_spill] sm:$0xff] %v10222_v40  ;;  %4089 = vmatpush.msra.mxu3 %v3692_v45  ;;  %v3690_v7 = vld [vmem:[%s12488_s7 + $0x28] sm:$0xff] }
 0x462   : > { %v1296_v56 = vpop.f32.mrf.mxu0  ;;  %v2857_v17 = vsel %vm2601_vm5, %v2428_v14, %v2729_v36  ;;  %v3691_v14 = vld [vmem:[%s12488_s7 + $0x30] sm:$0xff] }
 0x463   : > { %v1297_v63 = vadd.f32 %v10160_v32, %v1296_v56  ;;  %3231 = vmatmul.f32.gmra.mxu2 %v2857_v17  ;;  %4090 = vmatpush.msra.mxu3 %v3691_v14 }
 0x465   : > { %vm1436_vm6 = vcmp.ge.f32.partialorder %v1297_v63, 0.0  ;;  %v1564_v49 = vmul.f32 0.2, %v1297_v63  ;;  %v2430_v24 = vpop.f32.mrf.mxu1  ;;  %4091 = vmatpush.msra.mxu3 %v3690_v7  ;;  %v3686_v7 = vld [vmem:[%s12488_s7 + $0x8] sm:$0xff] }
 0x466   : > { %v2431_v2 = vadd.f32 %v9991_v8, %v2430_v24  ;;  %v3689_v24 = vld [vmem:[%s12488_s7 + $0x20] sm:$0xff] }
 0x467   : > { %v1692_v9 = vsel %vm1436_vm6, %v1297_v63, %v1564_v49  ;;  %v10234_v63 = vld [vmem:[%s12485_s4] ss:$0 sm:$0xff]  ;;  %4092 = vmatpush.msra.mxu3 %v3689_v24  ;;  %v10247_v14 = vpop.f32.mrf.mxu2 }
 0x468   : > { %v2730_v51 = vmul.f32 0.2, %v2431_v2  ;;  %8390 = vmatmul.msk.f32.gmra.mxu1 %vm1710_vm2, %v1692_v9  ;;  %vm2602_vm7 = vcmp.ge.f32.partialorder %v2431_v2, 0.0  ;;  %12532 = vst [vmem:[#allocation42_spill] sm:$0xff] %v10247_v14  ;;  %v3685_v24 = vld [vmem:[%s12488_s7] sm:$0xff] }
 0x46a   : > { %v1299_v36 = vpop.f32.mrf.mxu0  ;;  %v2858_v23 = vsel %vm2602_vm7, %v2431_v2, %v2730_v51  ;;  %v3688_v51 = vld [vmem:[%s12488_s7 + $0x18] sm:$0xff] }
 0x46b   : > { %v1300_v8 = vadd.f32 %v10160_v32, %v1299_v36  ;;  %3234 = vmatmul.f32.gmra.mxu2 %v2858_v23  ;;  %4093 = vmatpush.msra.mxu3 %v3688_v51  ;;  %v3687_v23 = vld [vmem:[%s12488_s7 + $0x10] sm:$0xff] }
 0x46d   : > { %vm1437_vm8 = vcmp.ge.f32.partialorder %v1300_v8, 0.0  ;;  %v1565_v56 = vmul.f32 0.2, %v1300_v8  ;;  %v2433_v17 = vpop.f32.mrf.mxu1  ;;  %4094 = vmatpush.msra.mxu3 %v3687_v23 }
 0x46e   : > { %v2434_v49 = vadd.f32 %v10234_v63, %v2433_v17 }
 0x46f   : > { %v1693_v2 = vsel %vm1437_vm8, %v1300_v8, %v1565_v56  ;;  %4095 = vmatpush.msra.mxu3 %v3686_v7  ;;  %v10259_v23 = vpop.f32.mrf.mxu2 }
 0x470   : > { %v2731_v9 = vmul.f32 0.2, %v2434_v49  ;;  %8391 = vmatmul.msk.f32.gmra.mxu1 %vm1710_vm2, %v1693_v2  ;;  %vm2603_vm9 = vcmp.ge.f32.partialorder %v2434_v49, 0.0  ;;  %12533 = vst [vmem:[#allocation43_spill] sm:$0xff] %v10259_v23 }
 0x471   : > { %4096 = vmatpush.msra.mxu3 %v3685_v24 }
 0x472   : > { %v1302_v45 = vpop.f32.mrf.mxu0  ;;  %v2859_v36 = vsel %vm2603_vm9, %v2434_v49, %v2731_v9 }
 0x473   : > { %v1303_v8 = vadd.f32 %v10160_v32, %v1302_v45  ;;  %3237 = vmatmul.f32.gmra.mxu2 %v2859_v36 }
 0x475   : > { %vm1438_vm10 = vcmp.ge.f32.partialorder %v1303_v8, 0.0  ;;  %v1566_v56 = vmul.f32 0.2, %v1303_v8  ;;  %v2436_v17 = vpop.f32.mrf.mxu1 }
 0x476   : > { %v2437_v49 = vadd.f32 %v10234_v63, %v2436_v17 }
 0x477   : > { %v1694_v2 = vsel %vm1438_vm10, %v1303_v8, %v1566_v56 }
 0x478   : > { %v2732_v9 = vmul.f32 0.2, %v2437_v49  ;;  %8392 = vmatmul.msk.f32.gmra.mxu1 %vm1710_vm2, %v1694_v2  ;;  %vm2604_vm11 = vcmp.ge.f32.partialorder %v2437_v49, 0.0 }
 0x47a   : > { %v1305_v51 = vpop.f32.mrf.mxu0  ;;  %v2860_v45 = vsel %vm2604_vm11, %v2437_v49, %v2732_v9 }
 0x47b   : > { %v1306_v36 = vadd.f32 %v10160_v32, %v1305_v51  ;;  %3240 = vmatmul.f32.gmra.mxu2 %v2860_v45  ;;  %v10265_v51 = vpop.f32.mrf.mxu2 }
 0x47d   : > { %vm1439_vm12 = vcmp.ge.f32.partialorder %v1306_v36, 0.0  ;;  %v1567_v7 = vmul.f32 0.2, %v1306_v36  ;;  %v2439_v17 = vpop.f32.mrf.mxu1 }
 0x47e   : > { %v2440_v14 = vadd.f32 %v10234_v63, %v2439_v17 }
 0x47f   : > { %v1695_v40 = vsel %vm1439_vm12, %v1306_v36, %v1567_v7 }
 0x480   : > { %v2733_v21 = vmul.f32 0.2, %v2440_v14  ;;  %8393 = vmatmul.msk.f32.gmra.mxu1 %vm1710_vm2, %v1695_v40  ;;  %vm2605_vm13 = vcmp.ge.f32.partialorder %v2440_v14, 0.0 }
 0x482   : > { %v1308_v8 = vpop.f32.mrf.mxu0  ;;  %v2861_v56 = vsel %vm2605_vm13, %v2440_v14, %v2733_v21 }
 0x483   : > { %v1309_v24 = vadd.f32 %v10160_v32, %v1308_v8  ;;  %3243 = vmatmul.f32.gmra.mxu2 %v2861_v56 }
 0x485   : > { %vm1440_vm14 = vcmp.ge.f32.partialorder %v1309_v24, 0.0  ;;  %v1568_v49 = vmul.f32 0.2, %v1309_v24  ;;  %v2442_v2 = vpop.f32.mrf.mxu1 }
 0x486   : > { %v2443_v9 = vadd.f32 %v10234_v63, %v2442_v2 }
 0x487   : > { %v1696_v45 = vsel %vm1440_vm14, %v1309_v24, %v1568_v49  ;;  %v10274_v24 = vld [vmem:[%s12487_s6] ss:$0 sm:$0xff]  ;;  %v10276_v49 = vpop.f32.mrf.mxu2 }
 0x488   : > { %v2734_v23 = vmul.f32 0.2, %v2443_v9  ;;  %8394 = vmatmul.msk.f32.gmra.mxu1 %vm1710_vm2, %v1696_v45  ;;  %vm2606_vm15 = vcmp.ge.f32.partialorder %v2443_v9, 0.0  ;;  %12534 = vst [vmem:[#allocation44_spill] sm:$0xff] %v10276_v49 }
 0x48a   : > { %v1311_v36 = vpop.f32.mrf.mxu0  ;;  %v2862_v40 = vsel %vm2606_vm15, %v2443_v9, %v2734_v23 }
 0x48b   : > { %v1312_v7 = vadd.f32 %v10160_v32, %v1311_v36  ;;  %3246 = vmatmul.f32.gmra.mxu2 %v2862_v40  ;;  %v2921_v40 = vadd.f32 %v10274_v24, %v9603_v44 }
 0x48d   : > { %vm1441_vm1 = vcmp.ge.f32.partialorder %v1312_v7, 0.0  ;;  %v1569_v21 = vmul.f32 0.2, %v1312_v7  ;;  %v2445_v14 = vpop.f32.mrf.mxu1  ;;  %vm3302_vm6 = vcmp.ge.f32.partialorder %v2921_v40, 0.0 }
 0x48e   : > { %v2446_v17 = vadd.f32 %v10234_v63, %v2445_v14 }
 0x48f   : > { %v1697_v8 = vsel %vm1441_vm1, %v1312_v7, %v1569_v21 }
 0x490   : > { %v2735_v56 = vmul.f32 0.2, %v2446_v17  ;;  %8395 = vmatmul.msk.f32.gmra.mxu1 %vm1710_vm2, %v1697_v8  ;;  %vm2607_vm3 = vcmp.ge.f32.partialorder %v2446_v17, 0.0  ;;  %v10283_v8 = vpop.f32.mrf.mxu2 }
 0x492   : > { %v2917_v23 = vpop.f32.mrf.mxu0  ;;  %v2863_v32 = vsel %vm2607_vm3, %v2446_v17, %v2735_v56  ;;  %v3430_v17 = vmul.f32 0.2, %v2921_v40 }
 0x493   : > { %v2918_v2 = vadd.f32 %v10274_v24, %v2917_v23  ;;  %3249 = vmatmul.f32.gmra.mxu2 %v2863_v32  ;;  %v2924_v32 = vadd.f32 %v10274_v24, %v9610_v54 }
 0x495   : > { %v3429_v9 = vmul.f32 0.2, %v2918_v2  ;;  %v2448_v45 = vpop.f32.mrf.mxu1  ;;  %vm3301_vm4 = vcmp.ge.f32.partialorder %v2918_v2, 0.0  ;;  %vm3303_vm8 = vcmp.ge.f32.partialorder %v2924_v32, 0.0 }
 0x496   : > { %v2449_v36 = vadd.f32 %v10234_v63, %v2448_v45  ;;  %v3558_v45 = vsel %vm3302_vm6, %v2921_v40, %v3430_v17 }
 0x497   : > { %v3557_v7 = vsel %vm3301_vm4, %v2918_v2, %v3429_v9  ;;  %v3431_v2 = vmul.f32 0.2, %v2924_v32 }
 0x498   : > { %v2736_v21 = vmul.f32 0.2, %v2449_v36  ;;  %8396 = vmatmul.msk.f32.vlgmr.msra.gmra.mxu3 %vm1710_vm2, %v3557_v7  ;;  %vm2608_vm5 = vcmp.ge.f32.partialorder %v2449_v36, 0.0  ;;  %v10289_v9 = vpop.f32.mrf.mxu2 }
 0x49a   : > { %v2864_v14 = vsel %vm2608_vm5, %v2449_v36, %v2736_v21  ;;  %v2927_v21 = vadd.f32 %v10274_v24, %v9617_v0 }
 0x49b   : > { %3252 = vmatmul.f32.gmra.mxu2 %v2864_v14  ;;  %v3559_v14 = vsel %vm3303_vm8, %v2924_v32, %v3431_v2 }
 0x49c   : > { %v3432_v40 = vmul.f32 0.2, %v2927_v21  ;;  %vm3304_vm10 = vcmp.ge.f32.partialorder %v2927_v21, 0.0 }
 0x49d   : > { %v2451_v56 = vpop.f32.mrf.mxu1 }
 0x49e   : > { %v2452_v23 = vadd.f32 %v10234_v63, %v2451_v56 }
 0x4a0   : > { %v2737_v49 = vmul.f32 0.2, %v2452_v23  ;;  %8397 = vmatmul.msk.f32.gmra.mxu3 %vm1710_vm2, %v3558_v45  ;;  %vm2609_vm7 = vcmp.ge.f32.partialorder %v2452_v23, 0.0  ;;  %v10298_v45 = vpop.f32.mrf.mxu2 }
 0x4a2   : > { %v2865_v44 = vsel %vm2609_vm7, %v2452_v23, %v2737_v49  ;;  %v2930_v23 = vadd.f32 %v10274_v24, %v9624_v12 }
 0x4a3   : > { %3255 = vmatmul.f32.gmra.mxu2 %v2865_v44  ;;  %v3560_v44 = vsel %vm3304_vm10, %v2927_v21, %v3432_v40 }
 0x4a4   : > { %v3433_v32 = vmul.f32 0.2, %v2930_v23  ;;  %vm3305_vm12 = vcmp.ge.f32.partialorder %v2930_v23, 0.0 }
 0x4a5   : > { %v2454_v36 = vpop.f32.mrf.mxu1 }
 0x4a6   : > { %v2455_v7 = vadd.f32 %v10234_v63, %v2454_v36 }
 0x4a8   : > { %v2738_v56 = vmul.f32 0.2, %v2455_v7  ;;  %8398 = vmatmul.msk.f32.gmra.mxu3 %vm1710_vm2, %v3559_v14  ;;  %vm2610_vm9 = vcmp.ge.f32.partialorder %v2455_v7, 0.0  ;;  %v2933_v14 = vadd.f32 %v10274_v24, %v9631_v22  ;;  %v10305_v12 = vpop.f32.mrf.mxu2 }
 0x4aa   : > { %v2866_v54 = vsel %vm2610_vm9, %v2455_v7, %v2738_v56  ;;  %v3561_v56 = vsel %vm3305_vm12, %v2930_v23, %v3433_v32  ;;  %v3434_v40 = vmul.f32 0.2, %v2933_v14  ;;  %vm3306_vm14 = vcmp.ge.f32.partialorder %v2933_v14, 0.0 }
 0x4ab   : > { %3258 = vmatmul.f32.gmra.mxu2 %v2866_v54 }
 0x4ad   : > { %v2457_v49 = vpop.f32.mrf.mxu1 }
 0x4ae   : > { %v2458_v17 = vadd.f32 %v10234_v63, %v2457_v49 }
 0x4b0   : > { %v2739_v36 = vmul.f32 0.2, %v2458_v17  ;;  %8399 = vmatmul.msk.f32.gmra.mxu3 %vm1710_vm2, %v3560_v44  ;;  %vm2611_vm11 = vcmp.ge.f32.partialorder %v2458_v17, 0.0  ;;  %v2936_v44 = vadd.f32 %v10274_v24, %v9638_v33  ;;  %v10311_v23 = vpop.f32.mrf.mxu2 }
 0x4b2   : > { %v2867_v0 = vsel %vm2611_vm11, %v2458_v17, %v2739_v36  ;;  %v3562_v36 = vsel %vm3306_vm14, %v2933_v14, %v3434_v40  ;;  %v3435_v32 = vmul.f32 0.2, %v2936_v44  ;;  %vm3307_vm1 = vcmp.ge.f32.partialorder %v2936_v44, 0.0 }
 0x4b3   : > { %3261 = vmatmul.f32.gmra.mxu2 %v2867_v0 }
 0x4b5   : > { %v2460_v2 = vpop.f32.mrf.mxu1 }
 0x4b6   : > { %v2461_v7 = vadd.f32 %v10234_v63, %v2460_v2 }
 0x4b8   : > { %v2740_v54 = vmul.f32 0.2, %v2461_v7  ;;  %8400 = vmatmul.msk.f32.gmra.mxu3 %vm1710_vm2, %v3561_v56  ;;  %vm2612_vm13 = vcmp.ge.f32.partialorder %v2461_v7, 0.0  ;;  %v2939_v56 = vadd.f32 %v10274_v24, %v9645_v43  ;;  %v10317_v40 = vpop.f32.mrf.mxu2 }
 0x4ba   : > { %v2868_v21 = vsel %vm2612_vm13, %v2461_v7, %v2740_v54  ;;  %v3563_v54 = vsel %vm3307_vm1, %v2936_v44, %v3435_v32  ;;  %v3436_v14 = vmul.f32 0.2, %v2939_v56  ;;  %vm3308_vm4 = vcmp.ge.f32.partialorder %v2939_v56, 0.0 }
 0x4bb   : > { %3264 = vmatmul.f32.gmra.mxu2 %v2868_v21 }
 0x4bd   : > { %v2463_v49 = vpop.f32.mrf.mxu1 }
 0x4be   : > { %v2464_v17 = vadd.f32 %v10234_v63, %v2463_v49 }
 0x4c0   : > { %v2741_v0 = vmul.f32 0.2, %v2464_v17  ;;  %8401 = vmatmul.msk.f32.gmra.mxu3 %vm1710_vm2, %v3562_v36  ;;  %vm2613_vm15 = vcmp.ge.f32.partialorder %v2464_v17, 0.0  ;;  %v2942_v36 = vadd.f32 %v10274_v24, %v9657_v55 }
 0x4c2   : > { %v2869_v22 = vsel %vm2613_vm15, %v2464_v17, %v2741_v0  ;;  %v3564_v0 = vsel %vm3308_vm4, %v2939_v56, %v3436_v14  ;;  %v3437_v44 = vmul.f32 0.2, %v2942_v36  ;;  %vm3309_vm6 = vcmp.ge.f32.partialorder %v2942_v36, 0.0 }
 0x4c3   : > { %3267 = vmatmul.f32.gmra.mxu2 %v2869_v22 }
 0x4c5   : > { %v2466_v2 = vpop.f32.mrf.mxu1 }
 0x4c6   : > { %v2467_v7 = vadd.f32 %v10234_v63, %v2466_v2 }
 0x4c8   : > { %v2742_v21 = vmul.f32 0.2, %v2467_v7  ;;  %8402 = vmatmul.msk.f32.gmra.mxu3 %vm1710_vm2, %v3563_v54  ;;  %vm2614_vm3 = vcmp.ge.f32.partialorder %v2467_v7, 0.0  ;;  %v10326_v54 = vpop.f32.mrf.mxu2 }
 0x4ca   : > { %v2870_v33 = vsel %vm2614_vm3, %v2467_v7, %v2742_v21  ;;  %v2945_v7 = vadd.f32 %v10274_v24, %v9664_v3  ;;  %v3565_v21 = vsel %vm3309_vm6, %v2942_v36, %v3437_v44 }
 0x4cb   : > { %3270 = vmatmul.f32.gmra.mxu2 %v2870_v33 }
 0x4cc   : > { %v3438_v56 = vmul.f32 0.2, %v2945_v7  ;;  %vm3310_vm8 = vcmp.ge.f32.partialorder %v2945_v7, 0.0 }
 0x4cd   : > { %v2469_v49 = vpop.f32.mrf.mxu1 }
 0x4ce   : > { %v2470_v17 = vadd.f32 %v10234_v63, %v2469_v49 }
 0x4d0   : > { %v2743_v22 = vmul.f32 0.2, %v2470_v17  ;;  %8403 = vmatmul.msk.f32.gmra.mxu3 %vm1710_vm2, %v3564_v0  ;;  %vm2615_vm5 = vcmp.ge.f32.partialorder %v2470_v17, 0.0  ;;  %v3566_v0 = vsel %vm3310_vm8, %v2945_v7, %v3438_v56  ;;  %v10333_v3 = vpop.f32.mrf.mxu2 }
 0x4d2   : > { %v2871_v43 = vsel %vm2615_vm5, %v2470_v17, %v2743_v22  ;;  %v2948_v17 = vadd.f32 %v10274_v24, %v9671_v15 }
 0x4d3   : > { %3273 = vmatmul.f32.gmra.mxu2 %v2871_v43 }
 0x4d4   : > { %v3439_v43 = vmul.f32 0.2, %v2948_v17  ;;  %vm3311_vm10 = vcmp.ge.f32.partialorder %v2948_v17, 0.0 }
 0x4d5   : > { %v2472_v32 = vpop.f32.mrf.mxu1 }
 0x4d6   : > { %v2473_v2 = vadd.f32 %v10234_v63, %v2472_v32 }
 0x4d8   : > { %v2744_v33 = vmul.f32 0.2, %v2473_v2  ;;  %8404 = vmatmul.msk.f32.gmra.mxu3 %vm1710_vm2, %v3565_v21  ;;  %vm2616_vm7 = vcmp.ge.f32.partialorder %v2473_v2, 0.0  ;;  %v3567_v21 = vsel %vm3311_vm10, %v2948_v17, %v3439_v43  ;;  %v10339_v7 = vpop.f32.mrf.mxu2 }
 0x4da   : > { %v2872_v55 = vsel %vm2616_vm7, %v2473_v2, %v2744_v33  ;;  %v2951_v2 = vadd.f32 %v10274_v24, %v9678_v26 }
 0x4db   : > { %3276 = vmatmul.f32.gmra.mxu2 %v2872_v55 }
 0x4dc   : > { %v3440_v55 = vmul.f32 0.2, %v2951_v2  ;;  %vm3312_vm12 = vcmp.ge.f32.partialorder %v2951_v2, 0.0 }
 0x4dd   : > { %v2475_v14 = vpop.f32.mrf.mxu1 }
 0x4de   : > { %v2476_v49 = vadd.f32 %v10234_v63, %v2475_v14 }
 0x4e0   : > { %v2745_v22 = vmul.f32 0.2, %v2476_v49  ;;  %8405 = vmatmul.msk.f32.gmra.mxu3 %vm1710_vm2, %v3566_v0  ;;  %vm2617_vm9 = vcmp.ge.f32.partialorder %v2476_v49, 0.0  ;;  %v3568_v0 = vsel %vm3312_vm12, %v2951_v2, %v3440_v55 }
 0x4e2   : > { %v2873_v36 = vsel %vm2617_vm9, %v2476_v49, %v2745_v22  ;;  %v2954_v49 = vadd.f32 %v10274_v24, %v9685_v38 }
 0x4e3   : > { %3279 = vmatmul.f32.gmra.mxu2 %v2873_v36  ;;  %v10345_v36 = vpop.f32.mrf.mxu2 }
 0x4e4   : > { %v3441_v17 = vmul.f32 0.2, %v2954_v49  ;;  %vm3313_vm14 = vcmp.ge.f32.partialorder %v2954_v49, 0.0 }
 0x4e5   : > { %v2478_v44 = vpop.f32.mrf.mxu1 }
 0x4e6   : > { %v2479_v32 = vadd.f32 %v10234_v63, %v2478_v44 }
 0x4e8   : > { %v2746_v33 = vmul.f32 0.2, %v2479_v32  ;;  %8406 = vmatmul.msk.f32.gmra.mxu3 %vm1710_vm2, %v3567_v21  ;;  %vm2618_vm11 = vcmp.ge.f32.partialorder %v2479_v32, 0.0  ;;  %v3569_v21 = vsel %vm3313_vm14, %v2954_v49, %v3441_v17 }
 0x4ea   : > { %v2874_v15 = vsel %vm2618_vm11, %v2479_v32, %v2746_v33  ;;  %v2957_v32 = vadd.f32 %v10274_v24, %v9692_v50 }
 0x4eb   : > { %3282 = vmatmul.f32.gmra.mxu2 %v2874_v15 }
 0x4ec   : > { %v3442_v2 = vmul.f32 0.2, %v2957_v32  ;;  %vm3314_vm1 = vcmp.ge.f32.partialorder %v2957_v32, 0.0 }
 0x4ed   : > { %v2481_v56 = vpop.f32.mrf.mxu1 }
 0x4ee   : > { %v2482_v14 = vadd.f32 %v10234_v63, %v2481_v56  ;;  %v2960_v56 = vadd.f32 %v10274_v24, %v9699_v62 }
 0x4f0   : > { %v2747_v22 = vmul.f32 0.2, %v2482_v14  ;;  %8407 = vmatmul.msk.f32.gmra.mxu3 %vm1710_vm2, %v3568_v0  ;;  %vm2619_vm13 = vcmp.ge.f32.partialorder %v2482_v14, 0.0  ;;  %v3570_v0 = vsel %vm3314_vm1, %v2957_v32, %v3442_v2  ;;  %v3443_v49 = vmul.f32 0.2, %v2960_v56 }
 0x4f1   : > { %vm3315_vm4 = vcmp.ge.f32.partialorder %v2960_v56, 0.0 }
 0x4f2   : > { %v2875_v26 = vsel %vm2619_vm13, %v2482_v14, %v2747_v22  ;;  %v10354_v14 = vpop.f32.mrf.mxu2 }
 0x4f3   : > { %3285 = vmatmul.f32.gmra.mxu2 %v2875_v26 }
 0x4f5   : > { %v2484_v43 = vpop.f32.mrf.mxu1 }
 0x4f6   : > { %v2485_v44 = vadd.f32 %v10234_v63, %v2484_v43  ;;  %v2963_v43 = vadd.f32 %v10274_v24, %v9706_v13 }
 0x4f8   : > { %v2748_v33 = vmul.f32 0.2, %v2485_v44  ;;  %8408 = vmatmul.msk.f32.gmra.mxu3 %vm1710_vm2, %v3569_v21  ;;  %vm2620_vm15 = vcmp.ge.f32.partialorder %v2485_v44, 0.0  ;;  %vm3316_vm6 = vcmp.ge.f32.partialorder %v2963_v43, 0.0 }
 0x4fa   : > { %v2876_v38 = vsel %vm2620_vm15, %v2485_v44, %v2748_v33  ;;  %v3571_v44 = vsel %vm3315_vm4, %v2960_v56, %v3443_v49  ;;  %v10361_v62 = vpop.f32.mrf.mxu2  ;;  %v3444_v33 = vmul.f32 0.2, %v2963_v43 }
 0x4fb   : > { %3288 = vmatmul.f32.gmra.mxu2 %v2876_v38 }
 0x4fd   : > { %v2487_v15 = vpop.f32.mrf.mxu1 }
 0x4fe   : > { %v2488_v55 = vadd.f32 %v10234_v63, %v2487_v15  ;;  %v2966_v15 = vadd.f32 %v10274_v24, %v9713_v25  ;;  %v10375_v25 = vld [vmem:[%s12489_s8] ss:$0 sm:$0xff] }
 0x500   : > { %v2749_v22 = vmul.f32 0.2, %v2488_v55  ;;  %8409 = vmatmul.msk.f32.gmra.mxu3 %vm1710_vm2, %v3570_v0  ;;  %vm2621_vm3 = vcmp.ge.f32.partialorder %v2488_v55, 0.0  ;;  %vm3317_vm8 = vcmp.ge.f32.partialorder %v2966_v15, 0.0 }
 0x502   : > { %v2877_v50 = vsel %vm2621_vm3, %v2488_v55, %v2749_v22  ;;  %v3572_v55 = vsel %vm3316_vm6, %v2963_v43, %v3444_v33  ;;  %v10367_v56 = vpop.f32.mrf.mxu2  ;;  %v3445_v22 = vmul.f32 0.2, %v2966_v15  ;;  %v10381_v43 = vld [vmem:[%s12490_s9] ss:$0 sm:$0xff] }
 0x503   : > { %3291 = vmatmul.f32.gmra.mxu2 %v2877_v50  ;;  %v2969_v50 = vadd.f32 %v10274_v24, %v9720_v39  ;;  %v2972_v39 = vadd.f32 %v10274_v24, %v9727_v52 }
 0x504   : > { %v3573_v49 = vsel %vm3317_vm8, %v2966_v15, %v3445_v22 }
 0x505   : > { %v2490_v26 = vpop.f32.mrf.mxu1  ;;  %vm3318_vm9 = vcmp.ge.f32.partialorder %v2969_v50, 0.0  ;;  %v3447_v15 = vmul.f32 0.2, %v2972_v39  ;;  %vm3319_vm11 = vcmp.ge.f32.partialorder %v2972_v39, 0.0 }
 0x506   : > { %v2491_v17 = vadd.f32 %v10234_v63, %v2490_v26  ;;  %v3446_v26 = vmul.f32 0.2, %v2969_v50 }
 0x507   : > { %v3575_v52 = vsel %vm3319_vm11, %v2972_v39, %v3447_v15 }
 0x508   : > { %v2750_v21 = vmul.f32 0.2, %v2491_v17  ;;  %8410 = vmatmul.msk.f32.gmra.mxu3 %vm1710_vm2, %v3571_v44  ;;  %vm2622_vm5 = vcmp.ge.f32.partialorder %v2491_v17, 0.0 }
 0x50a   : > { %v2878_v32 = vsel %vm2622_vm5, %v2491_v17, %v2750_v21  ;;  %v3574_v21 = vsel %vm3318_vm9, %v2969_v50, %v3446_v26 }
 0x50b   : > { %3294 = vmatmul.f32.gmra.mxu2 %v2878_v32 }
 0x50d   : > { %v2493_v38 = vpop.f32.mrf.mxu1 }
 0x50e   : > { %v2494_v2 = vadd.f32 %v10234_v63, %v2493_v38 }
 0x510   : > { %v2751_v0 = vmul.f32 0.2, %v2494_v2  ;;  %8411 = vmatmul.msk.f32.gmra.mxu3 %vm1710_vm2, %v3572_v55  ;;  %vm2623_vm7 = vcmp.ge.f32.partialorder %v2494_v2, 0.0 }
 0x512   : > { %v2879_v13 = vsel %vm2623_vm7, %v2494_v2, %v2751_v0 }
 0x513   : > { %3297 = vmatmul.f32.gmra.mxu2 %v2879_v13  ;;  %v2975_v13 = vadd.f32 %v10274_v24, %v9739_v4 }
 0x515   : > { %v3448_v26 = vmul.f32 0.2, %v2975_v13  ;;  %vm3320_vm13 = vcmp.ge.f32.partialorder %v2975_v13, 0.0 }
 0x517   : > { %v3576_v4 = vsel %vm3320_vm13, %v2975_v13, %v3448_v26 }
 0x518   : > { %8412 = vmatmul.msk.f32.gmra.mxu3 %vm1710_vm2, %v3573_v49 }
 0x51b   : > { %v4098_v63 = vpop.f32.mrf.mxu3 }
 0x51c   : > { %v4099_v17 = vadd.f32 %v10375_v25, %v4098_v63 }
 0x51e   : > { %v4610_v44 = vmul.f32 0.2, %v4099_v17  ;;  %vm4482_vm10 = vcmp.ge.f32.partialorder %v4099_v17, 0.0 }
 0x520   : > { %8413 = vmatmul.msk.f32.gmra.mxu3 %vm1710_vm2, %v3574_v21  ;;  %v4738_v32 = vsel %vm4482_vm10, %v4099_v17, %v4610_v44  ;;  %v2978_v21 = vadd.f32 %v10274_v24, %v9746_v18 }
 0x521   : > { %v4870_v33 = vmul.f32 %v10381_v43, %v4738_v32 }
 0x522   : > { %vm3321_vm15 = vcmp.ge.f32.partialorder %v2978_v21, 0.0 }
 0x523   : > { %v4101_v38 = vpop.f32.mrf.mxu3  ;;  %v4998_v2 = vsel %vm528_vm0, %v4870_v33, 0.0 }
 0x524   : > { %v4102_v55 = vadd.f32 %v10375_v25, %v4101_v38  ;;  %4999 = vadd.xlane.f32.xlu0 %v4998_v2  ;;  %v3449_v2 = vmul.f32 0.2, %v2978_v21 }
 0x526   : > { %v4611_v0 = vmul.f32 0.2, %v4102_v55  ;;  %vm4483_vm12 = vcmp.ge.f32.partialorder %v4102_v55, 0.0  ;;  %v3577_v18 = vsel %vm3321_vm15, %v2978_v21, %v3449_v2  ;;  %v2987_v2 = vadd.f32 %v10274_v24, %v9767_v61 }
 0x528   : > { %8414 = vmatmul.msk.f32.gmra.mxu3 %vm1710_vm2, %v3575_v52  ;;  %v4739_v22 = vsel %vm4483_vm12, %v4102_v55, %v4611_v0  ;;  %v2981_v0 = vadd.f32 %v10274_v24, %v9753_v31  ;;  %vm3324_vm7 = vcmp.ge.f32.partialorder %v2987_v2, 0.0 }
 0x529   : > { %v4871_v50 = vmul.f32 %v10381_v43, %v4739_v22 }
 0x52a   : > { %vm3322_vm3 = vcmp.ge.f32.partialorder %v2981_v0, 0.0 }
 0x52b   : > { %v4104_v49 = vpop.f32.mrf.mxu3  ;;  %v5001_v63 = vsel %vm528_vm0, %v4871_v50, 0.0 }
 0x52c   : > { %v4105_v17 = vadd.f32 %v10375_v25, %v4104_v49  ;;  %5002 = vadd.xlane.f32.xlu0 %v5001_v63  ;;  %v3450_v49 = vmul.f32 0.2, %v2981_v0 }
 0x52e   : > { %v4612_v44 = vmul.f32 0.2, %v4105_v17  ;;  %vm4484_vm14 = vcmp.ge.f32.partialorder %v4105_v17, 0.0  ;;  %v3578_v31 = vsel %vm3322_vm3, %v2981_v0, %v3450_v49 }
 0x530   : > { %8415 = vmatmul.msk.f32.gmra.mxu3 %vm1710_vm2, %v3576_v4  ;;  %v4740_v39 = vsel %vm4484_vm14, %v4105_v17, %v4612_v44  ;;  %v2984_v17 = vadd.f32 %v10274_v24, %v9760_v47 }
 0x531   : > { %v4872_v32 = vmul.f32 %v10381_v43, %v4740_v39 }
 0x532   : > { %vm3323_vm5 = vcmp.ge.f32.partialorder %v2984_v17, 0.0 }
 0x533   : > { %v4107_v33 = vpop.f32.mrf.mxu3  ;;  %v5004_v38 = vsel %vm528_vm0, %v4872_v32, 0.0  ;;  %v3451_v32 = vmul.f32 0.2, %v2984_v17 }
 0x534   : > { %v4108_v15 = vadd.f32 %v10375_v25, %v4107_v33  ;;  %5005 = vadd.xlane.f32.xlu1 %v5004_v38 }
 0x535   : > { %v3579_v47 = vsel %vm3323_vm5, %v2984_v17, %v3451_v32 }
 0x536   : > { %v4613_v55 = vmul.f32 0.2, %v4108_v15  ;;  %vm4485_vm1 = vcmp.ge.f32.partialorder %v4108_v15, 0.0 }
 0x538   : > { %8416 = vmatmul.msk.f32.gmra.mxu3 %vm1710_vm2, %v3577_v18  ;;  %v4741_v13 = vsel %vm4485_vm1, %v4108_v15, %v4613_v55 }
 0x539   : > { %v4873_v52 = vmul.f32 %v10381_v43, %v4741_v13  ;;  %v3452_v13 = vmul.f32 0.2, %v2987_v2 }
 0x53b   : > { %v4110_v22 = vpop.f32.mrf.mxu3  ;;  %v5007_v50 = vsel %vm528_vm0, %v4873_v52, 0.0  ;;  %v3580_v61 = vsel %vm3324_vm7, %v2987_v2, %v3452_v13 }
 0x53c   : > { %v4111_v63 = vadd.f32 %v10375_v25, %v4110_v22  ;;  %5008 = vadd.xlane.f32.xlu1 %v5007_v50  ;;  %v2990_v50 = vadd.f32 %v10274_v24, %v9774_v16 }
 0x53e   : > { %v4614_v26 = vmul.f32 0.2, %v4111_v63  ;;  %vm4486_vm4 = vcmp.ge.f32.partialorder %v4111_v63, 0.0  ;;  %vm3325_vm9 = vcmp.ge.f32.partialorder %v2990_v50, 0.0 }
 0x540   : > { %8417 = vmatmul.msk.f32.gmra.mxu3 %vm1710_vm2, %v3578_v31  ;;  %v4742_v44 = vsel %vm4486_vm4, %v4111_v63, %v4614_v26  ;;  %v3453_v26 = vmul.f32 0.2, %v2990_v50 }
 0x541   : > { %v4874_v21 = vmul.f32 %v10381_v43, %v4742_v44 }
 0x542   : > { %v3581_v16 = vsel %vm3325_vm9, %v2990_v50, %v3453_v26 }
 0x543   : > { %v4113_v4 = vpop.f32.mrf.mxu3  ;;  %v5010_v39 = vsel %vm528_vm0, %v4874_v21, 0.0 }
 0x544   : > { %v4114_v33 = vadd.f32 %v10375_v25, %v4113_v4  ;;  %5011 = vadd.xlane.f32.xlu2 %v5010_v39  ;;  %v2993_v4 = vadd.f32 %v10274_v24, %v9781_v30 }
 0x546   : > { %v4615_v38 = vmul.f32 0.2, %v4114_v33  ;;  %vm4487_vm6 = vcmp.ge.f32.partialorder %v4114_v33, 0.0  ;;  %vm3326_vm11 = vcmp.ge.f32.partialorder %v2993_v4, 0.0 }
 0x548   : > { %8418 = vmatmul.msk.f32.gmra.mxu3 %vm1710_vm2, %v3579_v47  ;;  %v4743_v15 = vsel %vm4487_vm6, %v4114_v33, %v4615_v38  ;;  %v3454_v33 = vmul.f32 0.2, %v2993_v4 }
 0x549   : > { %v4875_v55 = vmul.f32 %v10381_v43, %v4743_v15 }
 0x54a   : > { %v3582_v30 = vsel %vm3326_vm11, %v2993_v4, %v3454_v33 }
 0x54b   : > { %v4116_v0 = vpop.f32.mrf.mxu3  ;;  %v5013_v18 = vsel %vm528_vm0, %v4875_v55, 0.0  ;;  %v2996_v55 = vadd.f32 %v10274_v24, %v9788_v48 }
 0x54c   : > { %v4117_v52 = vadd.f32 %v10375_v25, %v4116_v0  ;;  %5014 = vadd.xlane.f32.xlu2 %v5013_v18 }
 0x54d   : > { %v3455_v13 = vmul.f32 0.2, %v2996_v55  ;;  %vm3327_vm13 = vcmp.ge.f32.partialorder %v2996_v55, 0.0 }
 0x54e   : > { %v4616_v22 = vmul.f32 0.2, %v4117_v52  ;;  %vm4488_vm8 = vcmp.ge.f32.partialorder %v4117_v52, 0.0 }
 0x54f   : > { %v3583_v48 = vsel %vm3327_vm13, %v2996_v55, %v3455_v13  ;;  %v3005_v55 = vadd.f32 %v10274_v24, %v9809_v37 }
 0x550   : > { %8419 = vmatmul.msk.f32.gmra.mxu3 %vm1710_vm2, %v3580_v61  ;;  %v4744_v49 = vsel %vm4488_vm8, %v4117_v52, %v4616_v22 }
 0x551   : > { %v4876_v63 = vmul.f32 %v10381_v43, %v4744_v49  ;;  %v2999_v49 = vadd.f32 %v10274_v24, %v9795_v1  ;;  %vm3330_vm5 = vcmp.ge.f32.partialorder %v3005_v55, 0.0 }
 0x553   : > { %v4119_v17 = vpop.f32.mrf.mxu3  ;;  %v5016_v31 = vsel %vm528_vm0, %v4876_v63, 0.0  ;;  %vm3328_vm15 = vcmp.ge.f32.partialorder %v2999_v49, 0.0 }
 0x554   : > { %v4120_v44 = vadd.f32 %v10375_v25, %v4119_v17  ;;  %5017 = vadd.xlane.f32.xlu0 %v5016_v31  ;;  %v3456_v17 = vmul.f32 0.2, %v2999_v49 }
 0x556   : > { %v4617_v21 = vmul.f32 0.2, %v4120_v44  ;;  %vm4489_vm10 = vcmp.ge.f32.partialorder %v4120_v44, 0.0  ;;  %v3584_v1 = vsel %vm3328_vm15, %v2999_v49, %v3456_v17 }
 0x558   : > { %8420 = vmatmul.msk.f32.gmra.mxu3 %vm1710_vm2, %v3581_v16  ;;  %v4745_v39 = vsel %vm4489_vm10, %v4120_v44, %v4617_v21  ;;  %v3002_v16 = vadd.f32 %v10274_v24, %v9802_v20 }
 0x559   : > { %v4877_v32 = vmul.f32 %v10381_v43, %v4745_v39 }
 0x55a   : > { %v3457_v33 = vmul.f32 0.2, %v3002_v16  ;;  %vm3329_vm3 = vcmp.ge.f32.partialorder %v3002_v16, 0.0 }
 0x55b   : > { %v4122_v38 = vpop.f32.mrf.mxu3  ;;  %v5019_v2 = vsel %vm528_vm0, %v4877_v32, 0.0 }
 0x55c   : > { %v4123_v47 = vadd.f32 %v10375_v25, %v4122_v38  ;;  %5020 = vadd.xlane.f32.xlu1 %v5019_v2  ;;  %v3585_v20 = vsel %vm3329_vm3, %v3002_v16, %v3457_v33 }
 0x55e   : > { %v4618_v15 = vmul.f32 0.2, %v4123_v47  ;;  %vm4490_vm12 = vcmp.ge.f32.partialorder %v4123_v47, 0.0 }
 0x560   : > { %8421 = vmatmul.msk.f32.gmra.mxu3 %vm1710_vm2, %v3582_v30  ;;  %v4746_v0 = vsel %vm4490_vm12, %v4123_v47, %v4618_v15 }
 0x561   : > { %v4878_v18 = vmul.f32 %v10381_v43, %v4746_v0 }
 0x563   : > { %v4125_v52 = vpop.f32.mrf.mxu3  ;;  %v5022_v22 = vsel %vm528_vm0, %v4878_v18, 0.0  ;;  %v3458_v18 = vmul.f32 0.2, %v3005_v55 }
 0x564   : > { %v4126_v50 = vadd.f32 %v10375_v25, %v4125_v52  ;;  %5023 = vadd.xlane.f32.xlu2 %v5022_v22 }
 0x565   : > { %v3586_v37 = vsel %vm3330_vm5, %v3005_v55, %v3458_v18  ;;  %v10473_v18 = vld [vmem:[#allocation2] ss:$0 sm:$0xff] }
 0x566   : > { %v4619_v61 = vmul.f32 0.2, %v4126_v50  ;;  %vm4491_vm14 = vcmp.ge.f32.partialorder %v4126_v50, 0.0 }
 0x568   : > { %8422 = vmatmul.msk.f32.gmra.mxu3 %vm1710_vm2, %v3583_v48  ;;  %v4747_v63 = vsel %vm4491_vm14, %v4126_v50, %v4619_v61  ;;  %v3008_v61 = vadd.f32 %v10274_v24, %v9816_v57 }
 0x569   : > { %v4879_v26 = vmul.f32 %v10381_v43, %v4747_v63 }
 0x56a   : > { %v3459_v63 = vmul.f32 0.2, %v3008_v61  ;;  %vm3331_vm7 = vcmp.ge.f32.partialorder %v3008_v61, 0.0 }
 0x56b   : > { %v4128_v31 = vpop.f32.mrf.mxu3  ;;  %v5025_v44 = vsel %vm528_vm0, %v4879_v26, 0.0 }
 0x56c   : > { %v4129_v21 = vadd.f32 %v10375_v25, %v4128_v31  ;;  %5026 = vadd.xlane.f32.xlu0 %v5025_v44  ;;  %v3587_v57 = vsel %vm3331_vm7, %v3008_v61, %v3459_v63 }
 0x56e   : > { %v4620_v4 = vmul.f32 0.2, %v4129_v21  ;;  %vm4492_vm1 = vcmp.ge.f32.partialorder %v4129_v21, 0.0 }
 0x570   : > { %8423 = vmatmul.msk.f32.gmra.mxu3 %vm1710_vm2, %v3584_v1  ;;  %v4748_v39 = vsel %vm4492_vm1, %v4129_v21, %v4620_v4  ;;  %v3011_v21 = vadd.f32 %v10274_v24, %v9823_v11 }
 0x571   : > { %v4880_v32 = vmul.f32 %v10381_v43, %v4748_v39 }
 0x572   : > { %v3460_v1 = vmul.f32 0.2, %v3011_v21  ;;  %vm3332_vm9 = vcmp.ge.f32.partialorder %v3011_v21, 0.0 }
 0x573   : > { %v4131_v38 = vpop.f32.mrf.mxu3  ;;  %v5028_v2 = vsel %vm528_vm0, %v4880_v32, 0.0 }
 0x574   : > { %v4132_v47 = vadd.f32 %v10375_v25, %v4131_v38  ;;  %5029 = vadd.xlane.f32.xlu1 %v5028_v2  ;;  %v3014_v2 = vadd.f32 %v10274_v24, %v9830_v34  ;;  %v3588_v11 = vsel %vm3332_vm9, %v3011_v21, %v3460_v1  ;;  %v3017_v34 = vadd.f32 %v10274_v24, %v9837_v53 }
 0x576   : > { %v4621_v15 = vmul.f32 0.2, %v4132_v47  ;;  %vm4493_vm4 = vcmp.ge.f32.partialorder %v4132_v47, 0.0  ;;  %v3461_v55 = vmul.f32 0.2, %v3014_v2  ;;  %vm3333_vm11 = vcmp.ge.f32.partialorder %v3014_v2, 0.0 }
 0x577   : > { %vm3334_vm13 = vcmp.ge.f32.partialorder %v3017_v34, 0.0 }
 0x578   : > { %8424 = vmatmul.msk.f32.gmra.mxu3 %vm1710_vm2, %v3585_v20  ;;  %v4749_v30 = vsel %vm4493_vm4, %v4132_v47, %v4621_v15 }
 0x579   : > { %v4881_v0 = vmul.f32 %v10381_v43, %v4749_v30 }
 0x57b   : > { %v4134_v13 = vpop.f32.mrf.mxu3  ;;  %v5031_v52 = vsel %vm528_vm0, %v4881_v0, 0.0 }
 0x57c   : > { %v4135_v22 = vadd.f32 %v10375_v25, %v4134_v13  ;;  %5032 = vadd.xlane.f32.xlu2 %v5031_v52 }
 0x57e   : > { %v4622_v50 = vmul.f32 0.2, %v4135_v22  ;;  %vm4494_vm6 = vcmp.ge.f32.partialorder %v4135_v22, 0.0 }
 0x580   : > { %8425 = vmatmul.msk.f32.gmra.mxu3 %vm1710_vm2, %v3586_v37  ;;  %v4750_v49 = vsel %vm4494_vm6, %v4135_v22, %v4622_v50  ;;  %v3589_v22 = vsel %vm3333_vm11, %v3014_v2, %v3461_v55 }
 0x581   : > { %v4882_v48 = vmul.f32 %v10381_v43, %v4750_v49 }
 0x583   : > { %v4137_v26 = vpop.f32.mrf.mxu3  ;;  %v5034_v17 = vsel %vm528_vm0, %v4882_v48, 0.0  ;;  %v3462_v48 = vmul.f32 0.2, %v3017_v34 }
 0x584   : > { %v4138_v31 = vadd.f32 %v10375_v25, %v4137_v26  ;;  %5035 = vadd.xlane.f32.xlu0 %v5034_v17 }
 0x585   : > { %v3590_v21 = vsel %vm3334_vm13, %v3017_v34, %v3462_v48  ;;  %v3026_v48 = vadd.f32 %v10274_v24, %v9858_v58 }
 0x586   : > { %v4623_v44 = vmul.f32 0.2, %v4138_v31  ;;  %vm4495_vm8 = vcmp.ge.f32.partialorder %v4138_v31, 0.0 }
 0x587   : > { %vm3337_vm7 = vcmp.ge.f32.partialorder %v3026_v48, 0.0 }
 0x588   : > { %8426 = vmatmul.msk.f32.gmra.mxu3 %vm1710_vm2, %v3587_v57  ;;  %v4751_v4 = vsel %vm4495_vm8, %v4138_v31, %v4623_v44  ;;  %v3020_v31 = vadd.f32 %v10274_v24, %v9844_v10  ;;  %vm7946_vm8 = vcmask 7168  }
 0x589   : > { %v4883_v16 = vmul.f32 %v10381_v43, %v4751_v4 }
 0x58a   : > { %vm3335_vm15 = vcmp.ge.f32.partialorder %v3020_v31, 0.0 }
 0x58b   : > { %v4140_v39 = vpop.f32.mrf.mxu3  ;;  %v5037_v32 = vsel %vm528_vm0, %v4883_v16, 0.0 }
 0x58c   : > { %v4141_v33 = vadd.f32 %v10375_v25, %v4140_v39  ;;  %5038 = vadd.xlane.f32.xlu1 %v5037_v32  ;;  %v3463_v32 = vmul.f32 0.2, %v3020_v31 }
 0x58e   : > { %v4624_v38 = vmul.f32 0.2, %v4141_v33  ;;  %vm4496_vm10 = vcmp.ge.f32.partialorder %v4141_v33, 0.0  ;;  %v3591_v55 = vsel %vm3335_vm15, %v3020_v31, %v3463_v32 }
 0x590   : > { %8427 = vmatmul.msk.f32.gmra.mxu3 %vm1710_vm2, %v3588_v11  ;;  %v4752_v47 = vsel %vm4496_vm10, %v4141_v33, %v4624_v38 }
 0x591   : > { %v4884_v15 = vmul.f32 %v10381_v43, %v4752_v47  ;;  %v3023_v47 = vadd.f32 %v10274_v24, %v9851_v35 }
 0x593   : > { %v4143_v20 = vpop.f32.mrf.mxu3  ;;  %v5040_v30 = vsel %vm528_vm0, %v4884_v15, 0.0  ;;  %vm3336_vm3 = vcmp.ge.f32.partialorder %v3023_v47, 0.0 }
 0x594   : > { %v4144_v0 = vadd.f32 %v10375_v25, %v4143_v20  ;;  %5041 = vadd.xlane.f32.xlu2 %v5040_v30 }
 0x596   : > { %v4625_v13 = vmul.f32 0.2, %v4144_v0  ;;  %vm4497_vm12 = vcmp.ge.f32.partialorder %v4144_v0, 0.0 }
 0x597   : > { %v5000_v52 = vpop.xlane.xlu0 %4999 }
 0x598   : > { %v5386_v50 = vadd.f32 %v10473_v18, %v5000_v52  ;;  %8428 = vmatmul.msk.f32.gmra.mxu3 %vm1710_vm2, %v3589_v22  ;;  %v4753_v61 = vsel %vm4497_vm12, %v4144_v0, %v4625_v13  ;;  %v3464_v22 = vmul.f32 0.2, %v3023_v47 }
 0x599   : > { %v4885_v37 = vmul.f32 %v10381_v43, %v4753_v61 }
 0x59a   : > { %v8524_v49 = vmul.f32 -1.442695, %v5386_v50 }
 0x59b   : > { %v4146_v63 = vpop.f32.mrf.mxu3  ;;  %v5043_v26 = vsel %vm528_vm0, %v4885_v37, 0.0 }
 0x59c   : > { %8684 = vpow2.f32 %v8524_v49  ;;  %v4147_v17 = vadd.f32 %v10375_v25, %v4146_v63  ;;  %5044 = vadd.xlane.f32.xlu0 %v5043_v26 }
 0x59e   : > { %v4626_v53 = vmul.f32 0.2, %v4147_v17  ;;  %vm4498_vm14 = vcmp.ge.f32.partialorder %v4147_v17, 0.0 }
 0x59f   : > { %v5003_v44 = vpop.xlane.xlu0 %5002 }
 0x5a0   : > { %v5387_v57 = vadd.f32 %v10473_v18, %v5003_v44  ;;  %8429 = vmatmul.msk.f32.gmra.mxu3 %vm1710_vm2, %v3590_v21  ;;  %v4754_v4 = vsel %vm4498_vm14, %v4147_v17, %v4626_v53  ;;  %v3592_v44 = vsel %vm3336_vm3, %v3023_v47, %v3464_v22 }
 0x5a1   : > { %v4886_v16 = vmul.f32 %v10381_v43, %v4754_v4 }
 0x5a2   : > { %v8685_v1 = vpop.eup %8684  ;;  %v8525_v39 = vmul.f32 -1.442695, %v5387_v57 }
 0x5a3   : > { %v5898_v33 = vadd.f32 1.0, %v8685_v1  ;;  %v4149_v38 = vpop.f32.mrf.mxu3  ;;  %v5046_v2 = vsel %vm528_vm0, %v4886_v16, 0.0  ;;  %v3465_v16 = vmul.f32 0.2, %v3026_v48 }
 0x5a4   : > { %8686 = vpow2.f32 %v8525_v39  ;;  %v4150_v11 = vadd.f32 %v10375_v25, %v4149_v38  ;;  %5047 = vadd.xlane.f32.xlu1 %v5046_v2 }
 0x5a5   : > { %8688 = vrcp.f32 %v5898_v33  ;;  %v6035_v17 = vand.u32 2147483647, %v5898_v33  ;;  %v6037_v53 = vand.u32 2147483648, %v5898_v33  ;;  %vm6031_vm6 = vweird.f32 %v5898_v33 }
 0x5a6   : > { %v4627_v10 = vmul.f32 0.2, %v4150_v11  ;;  %vm4499_vm1 = vcmp.ge.f32.partialorder %v4150_v11, 0.0  ;;  %v3593_v22 = vsel %vm3337_vm7, %v3026_v48, %v3465_v16 }
 0x5a7   : > { %v5006_v15 = vpop.xlane.xlu1 %5005  ;;  %v6038_v2 = vor.u32 1.1754944e-38, %v6037_v53  ;;  %vm6036_vm10 = vcmp.eq.f32.partialorder %v6035_v17, 8.507059e+37 }
 0x5a8   : > { %v5388_v20 = vadd.f32 %v10473_v18, %v5006_v15  ;;  %8430 = vmatmul.msk.f32.gmra.mxu3 %vm1710_vm2, %v3591_v55  ;;  %v4755_v30 = vsel %vm4499_vm1, %v4150_v11, %v4627_v10  ;;  %v3029_v55 = vadd.f32 %v10274_v24, %v9865_v19 }
 0x5a9   : > { %v4887_v0 = vmul.f32 %v10381_v43, %v4755_v30 }
 0x5aa   : > { %v8687_v13 = vpop.eup %8686  ;;  %v8526_v34 = vmul.f32 -1.442695, %v5388_v20  ;;  %v3466_v24 = vmul.f32 0.2, %v3029_v55  ;;  %vm3338_vm15 = vcmp.ge.f32.partialorder %v3029_v55, 0.0 }
 0x5ab   : > { %v8689_v52 = vpop.eup %8688  ;;  %v10494_v50 = vadd.f32 1.0, %v8687_v13  ;;  %v4152_v61 = vpop.f32.mrf.mxu3  ;;  %v5049_v37 = vsel %vm528_vm0, %v4887_v0, 0.0 }
 0x5ac   : > { %v6027_v49 = vmul.f32 %v8689_v52, %v5898_v33  ;;  %8690 = vpow2.f32 %v8526_v34  ;;  %v4153_v35 = vadd.f32 %v10375_v25, %v4152_v61  ;;  %5050 = vadd.xlane.f32.xlu2 %v5049_v37  ;;  %vm6032_vm5 = vweird.f32 %v8689_v52 }
 0x5ad   : > { %8692 = vrcp.f32 %v10494_v50  ;;  %vm6033_vm9 = vmor %vm6031_vm6, %vm6032_vm5  ;;  %v6050_v13 = vand.u32 2147483647, %v10494_v50  ;;  %v6052_v34 = vand.u32 2147483648, %v10494_v50  ;;  %vm6046_vm13 = vweird.f32 %v10494_v50 }
 0x5ae   : > { %v6028_v63 = vsub.f32 1.0, %v6027_v49  ;;  %v4628_v26 = vmul.f32 0.2, %v4153_v35  ;;  %vm4500_vm4 = vcmp.ge.f32.partialorder %v4153_v35, 0.0 }
 0x5af   : > { %v5009_v31 = vpop.xlane.xlu1 %5008  ;;  %v6053_v53 = vor.u32 1.1754944e-38, %v6052_v34  ;;  %vm6051_vm1 = vcmp.eq.f32.partialorder %v6050_v13, 8.507059e+37 }
 0x5b0   : > { %v6029_v21 = vmul.f32 %v8689_v52, %v6028_v63  ;;  %v5389_v57 = vadd.f32 %v10473_v18, %v5009_v31  ;;  %8431 = vmatmul.msk.f32.gmra.mxu3 %vm1710_vm2, %v3592_v44  ;;  %v4756_v4 = vsel %vm4500_vm4, %v4153_v35, %v4628_v26 }
 0x5b1   : > { %v4888_v58 = vmul.f32 %v10381_v43, %v4756_v4 }
 0x5b2   : > { %v8691_v1 = vpop.eup %8690  ;;  %v6030_v39 = vadd.f32 %v8689_v52, %v6029_v21  ;;  %v8527_v32 = vmul.f32 -1.442695, %v5389_v57 }
 0x5b3   : > { %v8693_v38 = vpop.eup %8692  ;;  %v10511_v11 = vadd.f32 1.0, %v8691_v1  ;;  %v4155_v10 = vpop.f32.mrf.mxu3  ;;  %v5052_v47 = vsel %vm528_vm0, %v4888_v58, 0.0 }
 0x5b4   : > { %v6034_v15 = vsel %vm6033_vm9, %v8689_v52, %v6030_v39  ;;  %v6042_v33 = vmul.f32 %v8693_v38, %v10494_v50  ;;  %8694 = vpow2.f32 %v8527_v32  ;;  %5053 = vadd.xlane.f32.xlu0 %v5052_v47  ;;  %v4156_v0 = vadd.f32 %v10375_v25, %v4155_v10  ;;  %v10534_v50 = vld [vmem:[%s12487_s6] ss:$0 sm:$0xff] }
 0x5b5   : > { %v6039_v20 = vsel %vm6036_vm10, %v6038_v2, %v6034_v15  ;;  %8696 = vrcp.f32 %v10511_v11  ;;  %vm6047_vm11 = vweird.f32 %v8693_v38  ;;  %v3032_v4 = vadd.f32 %v10534_v50, %v9872_v42 }
 0x5b6   : > { %7947 = vst.msk [vmem:[%s10509_s21] sm:$0xff] %vm7946_vm8, %v6039_v20  ;;  %v6043_v30 = vsub.f32 1.0, %v6042_v33  ;;  %v4629_v37 = vmul.f32 0.2, %v4156_v0  ;;  %vm4501_vm12 = vcmp.ge.f32.partialorder %v4156_v0, 0.0  ;;  %vm6048_vm14 = vmor %vm6046_vm13, %vm6047_vm11  ;;  %v3594_v10 = vsel %vm3338_vm15, %v3029_v55, %v3466_v24 }
 0x5b7   : > { %v5012_v52 = vpop.xlane.xlu2 %5011  ;;  %v6065_v32 = vand.u32 2147483647, %v10511_v11  ;;  %v3467_v33 = vmul.f32 0.2, %v3032_v4  ;;  %vm6061_vm5 = vweird.f32 %v10511_v11  ;;  %vm3339_vm7 = vcmp.ge.f32.partialorder %v3032_v4, 0.0 }
 0x5b8   : > { %v6044_v61 = vmul.f32 %v8693_v38, %v6043_v30  ;;  %v5390_v19 = vadd.f32 %v10473_v18, %v5012_v52  ;;  %8432 = vmatmul.msk.f32.gmra.mxu3 %vm1710_vm2, %v3593_v22  ;;  %v4757_v26 = vsel %vm4501_vm12, %v4156_v0, %v4629_v37 }
 0x5b9   : > { %v4889_v44 = vmul.f32 %v10381_v43, %v4757_v26  ;;  %vm6066_vm9 = vcmp.eq.f32.partialorder %v6065_v32, 8.507059e+37 }
 0x5ba   : > { %v8695_v49 = vpop.eup %8694  ;;  %v6045_v35 = vadd.f32 %v8693_v38, %v6044_v61  ;;  %v8528_v63 = vmul.f32 -1.442695, %v5390_v19 }
 0x5bb   : > { %v8697_v17 = vpop.eup %8696  ;;  %v10527_v48 = vadd.f32 1.0, %v8695_v49  ;;  %v4158_v31 = vpop.f32.mrf.mxu3  ;;  %v5055_v39 = vsel %vm528_vm0, %v4889_v44, 0.0 }
 0x5bc   : > { %v6049_v21 = vsel %vm6048_vm14, %v8693_v38, %v6045_v35  ;;  %v6057_v57 = vmul.f32 %v8697_v17, %v10511_v11  ;;  %8698 = vpow2.f32 %v8528_v63  ;;  %v4159_v1 = vadd.f32 %v10375_v25, %v4158_v31  ;;  %5056 = vadd.xlane.f32.xlu1 %v5055_v39 }
 0x5bd   : > { %v6054_v16 = vsel %vm6051_vm1, %v6053_v53, %v6049_v21  ;;  %8700 = vrcp.f32 %v10527_v48  ;;  %v6067_v38 = vand.u32 2147483648, %v10511_v11  ;;  %vm6062_vm3 = vweird.f32 %v8697_v17 }
 0x5be   : > { %7948 = vst.msk [vmem:[%s10509_s21 + $0x8] sm:$0xff] %vm7946_vm8, %v6054_v16  ;;  %v6058_v58 = vsub.f32 1.0, %v6057_v57  ;;  %v4630_v42 = vmul.f32 0.2, %v4159_v1  ;;  %vm4502_vm4 = vcmp.ge.f32.partialorder %v4159_v1, 0.0  ;;  %vm6063_vm6 = vmor %vm6061_vm5, %vm6062_vm3  ;;  %v3035_v11 = vadd.f32 %v10534_v50, %v9879_v6 }
 0x5bf   : > { %v5015_v2 = vpop.xlane.xlu2 %5014  ;;  %v6068_v52 = vor.u32 1.1754944e-38, %v6067_v38  ;;  %v6080_v26 = vand.u32 2147483647, %v10527_v48  ;;  %v3595_v31 = vsel %vm3339_vm7, %v3032_v4, %v3467_v33  ;;  %vm6076_vm12 = vweird.f32 %v10527_v48 }
 0x5c0   : > { %v6059_v47 = vmul.f32 %v8697_v17, %v6058_v58  ;;  %v5391_v15 = vadd.f32 %v10473_v18, %v5015_v2  ;;  %8433 = vmatmul.msk.f32.gmra.mxu3 %vm1710_vm2, %v3594_v10  ;;  %v4758_v13 = vsel %vm4502_vm4, %v4159_v1, %v4630_v42  ;;  %v3468_v57 = vmul.f32 0.2, %v3035_v11 }
 0x5c1   : > { %v4890_v61 = vmul.f32 %v10381_v43, %v4758_v13  ;;  %vm3340_vm14 = vcmp.ge.f32.partialorder %v3035_v11, 0.0  ;;  %vm6081_vm15 = vcmp.eq.f32.partialorder %v6080_v26, 8.507059e+37 }
 0x5c2   : > { %v8699_v20 = vpop.eup %8698  ;;  %v6060_v30 = vadd.f32 %v8697_v17, %v6059_v47  ;;  %v8529_v0 = vmul.f32 -1.442695, %v5391_v15 }
 0x5c3   : > { %v8701_v34 = vpop.eup %8700  ;;  %v10549_v55 = vadd.f32 1.0, %v8699_v20  ;;  %v4161_v22 = vpop.f32.mrf.mxu3  ;;  %v5058_v63 = vsel %vm528_vm0, %v4890_v61, 0.0 }
 0x5c4   : > { %v6064_v37 = vsel %vm6063_vm6, %v8697_v17, %v6060_v30  ;;  %v6072_v19 = vmul.f32 %v8701_v34, %v10527_v48  ;;  %8702 = vpow2.f32 %v8529_v0  ;;  %v4162_v35 = vadd.f32 %v10375_v25, %v4161_v22  ;;  %5059 = vadd.xlane.f32.xlu2 %v5058_v63 }
 0x5c5   : > { %v6069_v24 = vsel %vm6066_vm9, %v6068_v52, %v6064_v37  ;;  %8704 = vrcp.f32 %v10549_v55  ;;  %v6082_v17 = vand.u32 2147483648, %v10527_v48  ;;  %vm6077_vm10 = vweird.f32 %v8701_v34 }
 0x5c6   : > { %7949 = vst.msk [vmem:[%s10509_s21 + $0x10] sm:$0xff] %vm7946_vm8, %v6069_v24  ;;  %v6073_v49 = vsub.f32 1.0, %v6072_v19  ;;  %v4631_v6 = vmul.f32 0.2, %v4162_v35  ;;  %vm4503_vm11 = vcmp.ge.f32.partialorder %v4162_v35, 0.0  ;;  %vm6078_vm13 = vmor %vm6076_vm12, %vm6077_vm10  ;;  %v3038_v48 = vadd.f32 %v10534_v50, %v9886_v29 }
 0x5c7   : > { %v5018_v53 = vpop.xlane.xlu0 %5017  ;;  %v6083_v38 = vor.u32 1.1754944e-38, %v6082_v17  ;;  %v6095_v0 = vand.u32 2147483647, %v10549_v55  ;;  %v6097_v13 = vand.u32 2147483648, %v10549_v55  ;;  %v3596_v52 = vsel %vm3340_vm14, %v3035_v11, %v3468_v57 }
 0x5c8   : > { %v6074_v44 = vmul.f32 %v8701_v34, %v6073_v49  ;;  %v5392_v21 = vadd.f32 %v10473_v18, %v5018_v53  ;;  %8434 = vmatmul.msk.f32.gmra.mxu3 %vm1710_vm2, %v3595_v31  ;;  %v4759_v39 = vsel %vm4503_vm11, %v4162_v35, %v4631_v6  ;;  %v3469_v37 = vmul.f32 0.2, %v3038_v48 }
 0x5c9   : > { %v4891_v10 = vmul.f32 %v10381_v43, %v4759_v39  ;;  %vm6091_vm4 = vweird.f32 %v10549_v55  ;;  %v6098_v26 = vor.u32 1.1754944e-38, %v6097_v13  ;;  %vm3341_vm6 = vcmp.ge.f32.partialorder %v3038_v48, 0.0 }
 0x5ca   : > { %v8703_v16 = vpop.eup %8702  ;;  %v6075_v58 = vadd.f32 %v8701_v34, %v6074_v44  ;;  %v8530_v1 = vmul.f32 -1.442695, %v5392_v21  ;;  %vm6096_vm7 = vcmp.eq.f32.partialorder %v6095_v0, 8.507059e+37 }
 0x5cb   : > { %v8705_v32 = vpop.eup %8704  ;;  %v10566_v4 = vadd.f32 1.0, %v8703_v16  ;;  %v4164_v2 = vpop.f32.mrf.mxu3  ;;  %v5061_v30 = vsel %vm528_vm0, %v4891_v10, 0.0 }
 0x5cc   : > { %v6079_v47 = vsel %vm6078_vm13, %v8701_v34, %v6075_v58  ;;  %v6087_v42 = vmul.f32 %v8705_v32, %v10549_v55  ;;  %8706 = vpow2.f32 %v8530_v1  ;;  %v4165_v20 = vadd.f32 %v10375_v25, %v4164_v2  ;;  %5062 = vadd.xlane.f32.xlu0 %v5061_v30 }
 0x5cd   : > { %v6084_v15 = vsel %vm6081_vm15, %v6083_v38, %v6079_v47  ;;  %8708 = vrcp.f32 %v10566_v4  ;;  %vm6092_vm1 = vweird.f32 %v8705_v32  ;;  %v3041_v55 = vadd.f32 %v10534_v50, %v9893_v60 }
 0x5ce   : > { %7950 = vst.msk [vmem:[%s10509_s21 + $0x18] sm:$0xff] %vm7946_vm8, %v6084_v15  ;;  %v6088_v33 = vsub.f32 1.0, %v6087_v42  ;;  %v4632_v29 = vmul.f32 0.2, %v4165_v20  ;;  %vm4504_vm3 = vcmp.ge.f32.partialorder %v4165_v20, 0.0  ;;  %vm6093_vm5 = vmor %vm6091_vm4, %vm6092_vm1  ;;  %v6112_v1 = vand.u32 2147483648, %v10566_v4 }
 0x5cf   : > { %v5021_v34 = vpop.xlane.xlu1 %5020  ;;  %v6110_v58 = vand.u32 2147483647, %v10566_v4  ;;  %v3470_v10 = vmul.f32 0.2, %v3041_v55  ;;  %vm6106_vm11 = vweird.f32 %v10566_v4  ;;  %vm3342_vm13 = vcmp.ge.f32.partialorder %v3041_v55, 0.0 }
 0x5d0   : > { %v6089_v22 = vmul.f32 %v8705_v32, %v6088_v33  ;;  %v5393_v61 = vadd.f32 %v10473_v18, %v5021_v34  ;;  %8435 = vmatmul.msk.f32.gmra.mxu3 %vm1710_vm2, %v3596_v52  ;;  %v4760_v35 = vsel %vm4504_vm3, %v4165_v20, %v4632_v29  ;;  %v6113_v30 = vor.u32 1.1754944e-38, %v6112_v1 }
 0x5d1   : > { %v4892_v53 = vmul.f32 %v10381_v43, %v4760_v35  ;;  %vm6111_vm14 = vcmp.eq.f32.partialorder %v6110_v58, 8.507059e+37  ;;  %v3598_v35 = vsel %vm3342_vm13, %v3041_v55, %v3470_v10 }
 0x5d2   : > { %v8707_v19 = vpop.eup %8706  ;;  %v6090_v24 = vadd.f32 %v8705_v32, %v6089_v22  ;;  %v8531_v49 = vmul.f32 -1.442695, %v5393_v61 }
 0x5d3   : > { %v8709_v63 = vpop.eup %8708  ;;  %v10583_v11 = vadd.f32 1.0, %v8707_v19  ;;  %v4167_v17 = vpop.f32.mrf.mxu3  ;;  %v5064_v16 = vsel %vm528_vm0, %v4892_v53, 0.0 }
 0x5d4   : > { %v6094_v31 = vsel %vm6093_vm5, %v8705_v32, %v6090_v24  ;;  %v6102_v44 = vmul.f32 %v8709_v63, %v10566_v4  ;;  %8710 = vpow2.f32 %v8531_v49  ;;  %v4168_v57 = vadd.f32 %v10375_v25, %v4167_v17  ;;  %5065 = vadd.xlane.f32.xlu1 %v5064_v16 }
 0x5d5   : > { %v6099_v6 = vsel %vm6096_vm7, %v6098_v26, %v6094_v31  ;;  %8712 = vrcp.f32 %v10583_v11  ;;  %v3597_v32 = vsel %vm3341_vm6, %v3038_v48, %v3469_v37  ;;  %vm6107_vm9 = vweird.f32 %v8709_v63 }
 0x5d6   : > { %7951 = vst.msk [vmem:[%s10509_s21 + $0x20] sm:$0xff] %vm7946_vm8, %v6099_v6  ;;  %v6103_v21 = vsub.f32 1.0, %v6102_v44  ;;  %v4633_v60 = vmul.f32 0.2, %v4168_v57  ;;  %vm4505_vm10 = vcmp.ge.f32.partialorder %v4168_v57, 0.0  ;;  %vm6108_vm12 = vmor %vm6106_vm11, %vm6107_vm9  ;;  %v3044_v4 = vadd.f32 %v10534_v50, %v9900_v27 }
 0x5d7   : > { %v5024_v39 = vpop.xlane.xlu2 %5023  ;;  %v6125_v19 = vand.u32 2147483647, %v10583_v11  ;;  %v6127_v24 = vand.u32 2147483648, %v10583_v11  ;;  %vm6121_vm3 = vweird.f32 %v10583_v11 }
 0x5d8   : > { %v6104_v38 = vmul.f32 %v8709_v63, %v6103_v21  ;;  %v5394_v2 = vadd.f32 %v10473_v18, %v5024_v39  ;;  %8436 = vmatmul.msk.f32.gmra.mxu3 %vm1710_vm2, %v3597_v32  ;;  %v4761_v33 = vsel %vm4505_vm10, %v4168_v57, %v4633_v60  ;;  %v3471_v17 = vmul.f32 0.2, %v3044_v4 }
 0x5d9   : > { %v4893_v13 = vmul.f32 %v10381_v43, %v4761_v33  ;;  %v6128_v57 = vor.u32 1.1754944e-38, %v6127_v24  ;;  %vm3343_vm5 = vcmp.ge.f32.partialorder %v3044_v4, 0.0  ;;  %vm6126_vm6 = vcmp.eq.f32.partialorder %v6125_v19, 8.507059e+37 }
 0x5da   : > { %v8711_v47 = vpop.eup %8710  ;;  %v6105_v42 = vadd.f32 %v8709_v63, %v6104_v38  ;;  %v8532_v15 = vmul.f32 -1.442695, %v5394_v2  ;;  %v3050_v19 = vadd.f32 %v10534_v50, %v9919_v28 }
 0x5db   : > { %v8713_v20 = vpop.eup %8712  ;;  %v10600_v48 = vadd.f32 1.0, %v8711_v47  ;;  %v4170_v0 = vpop.f32.mrf.mxu3  ;;  %v5067_v37 = vsel %vm528_vm0, %v4893_v13, 0.0 }
 0x5dc   : > { %v6109_v34 = vsel %vm6108_vm12, %v8709_v63, %v6105_v42  ;;  %v6117_v52 = vmul.f32 %v8713_v20, %v10583_v11  ;;  %8714 = vpow2.f32 %v8532_v15  ;;  %v4171_v61 = vadd.f32 %v10375_v25, %v4170_v0  ;;  %5068 = vadd.xlane.f32.xlu2 %v5067_v37 }
 0x5dd   : > { %v6114_v22 = vsel %vm6111_vm14, %v6113_v30, %v6109_v34  ;;  %8716 = vrcp.f32 %v10600_v48  ;;  %vm6122_vm15 = vweird.f32 %v8713_v20  ;;  %v3047_v11 = vadd.f32 %v10534_v50, %v9912_v59 }
 0x5de   : > { %7952 = vst.msk [vmem:[%s10509_s21 + $0x28] sm:$0xff] %vm7946_vm8, %v6114_v22  ;;  %v6118_v29 = vsub.f32 1.0, %v6117_v52  ;;  %v4634_v27 = vmul.f32 0.2, %v4171_v61  ;;  %vm4506_vm1 = vcmp.ge.f32.partialorder %v4171_v61, 0.0  ;;  %vm6123_vm4 = vmor %vm6121_vm3, %vm6122_vm15  ;;  %v6142_v10 = vand.u32 2147483648, %v10600_v48 }
 0x5df   : > { %v5027_v49 = vpop.xlane.xlu0 %5026  ;;  %v3599_v42 = vsel %vm3343_vm5, %v3044_v4, %v3471_v17  ;;  %vm6136_vm10 = vweird.f32 %v10600_v48  ;;  %vm3344_vm12 = vcmp.ge.f32.partialorder %v3047_v11, 0.0 }
 0x5e0   : > { %v6119_v63 = vmul.f32 %v8713_v20, %v6118_v29  ;;  %v5395_v26 = vadd.f32 %v10473_v18, %v5027_v49  ;;  %8437 = vmatmul.msk.f32.gmra.mxu3 %vm1710_vm2, %v3598_v35  ;;  %v4762_v6 = vsel %vm4506_vm1, %v4171_v61, %v4634_v27  ;;  %v6143_v52 = vor.u32 1.1754944e-38, %v6142_v10  ;;  %v10639_v29 = vld [vmem:[%s12490_s9] ss:$0 sm:$0xff] }
 0x5e1   : > { %v4894_v58 = vmul.f32 %v10381_v43, %v4762_v6  ;;  %v6140_v43 = vand.u32 2147483647, %v10600_v48  ;;  %v10651_v35 = vld [vmem:[%s12489_s8] ss:$0 sm:$0xff] }
 0x5e2   : > { %v8715_v53 = vpop.eup %8714  ;;  %v6120_v31 = vadd.f32 %v8713_v20, %v6119_v63  ;;  %v8533_v44 = vmul.f32 -1.442695, %v5395_v26 }
 0x5e3   : > { %v8717_v21 = vpop.eup %8716  ;;  %v10617_v55 = vadd.f32 1.0, %v8715_v53  ;;  %v4173_v16 = vpop.f32.mrf.mxu3  ;;  %v5070_v2 = vsel %vm528_vm0, %v4894_v58, 0.0  ;;  %vm6141_vm13 = vcmp.eq.f32.partialorder %v6140_v43, 8.507059e+37 }
 0x5e4   : > { %v6124_v1 = vsel %vm6123_vm4, %v8713_v20, %v6120_v31  ;;  %v6132_v39 = vmul.f32 %v8717_v21, %v10600_v48  ;;  %8718 = vpow2.f32 %v8533_v44  ;;  %v4174_v60 = vadd.f32 %v10375_v25, %v4173_v16  ;;  %5071 = vadd.xlane.f32.xlu0 %v5070_v2 }
 0x5e5   : > { %v6129_v32 = vsel %vm6126_vm6, %v6128_v57, %v6124_v1  ;;  %8720 = vrcp.f32 %v10617_v55  ;;  %vm6137_vm7 = vweird.f32 %v8717_v21  ;;  %v3472_v20 = vmul.f32 0.2, %v3047_v11 }
 0x5e6   : > { %7953 = vst.msk [vmem:[%s10509_s21 + $0x30] sm:$0xff] %vm7946_vm8, %v6129_v32  ;;  %v6133_v38 = vsub.f32 1.0, %v6132_v39  ;;  %v4635_v59 = vmul.f32 0.2, %v4174_v60  ;;  %vm4507_vm9 = vcmp.ge.f32.partialorder %v4174_v60, 0.0  ;;  %vm6138_vm11 = vmor %vm6136_vm10, %vm6137_vm7  ;;  %v6157_v17 = vand.u32 2147483648, %v10617_v55 }
 0x5e7   : > { %v5030_v47 = vpop.xlane.xlu1 %5029  ;;  %v6155_v26 = vand.u32 2147483647, %v10617_v55  ;;  %v3600_v53 = vsel %vm3344_vm12, %v3047_v11, %v3472_v20  ;;  %vm6151_vm1 = vweird.f32 %v10617_v55  ;;  %vm3345_vm4 = vcmp.ge.f32.partialorder %v3050_v19, 0.0 }
 0x5e8   : > { %v6134_v15 = vmul.f32 %v8717_v21, %v6133_v38  ;;  %v5396_v33 = vadd.f32 %v10473_v18, %v5030_v47  ;;  %8438 = vmatmul.msk.f32.gmra.mxu3 %vm1710_vm2, %v3599_v42  ;;  %v4763_v13 = vsel %vm4507_vm9, %v4174_v60, %v4635_v59  ;;  %v6158_v32 = vor.u32 1.1754944e-38, %v6157_v17 }
 0x5e9   : > { %v4895_v61 = vmul.f32 %v10639_v29, %v4763_v13  ;;  %vm6156_vm5 = vcmp.eq.f32.partialorder %v6155_v26, 8.507059e+37 }
 0x5ea   : > { %v8719_v25 = vpop.eup %8718  ;;  %v6135_v30 = vadd.f32 %v8717_v21, %v6134_v15  ;;  %v8534_v0 = vmul.f32 -1.442695, %v5396_v33 }
 0x5eb   : > { %v8721_v34 = vpop.eup %8720  ;;  %v10634_v4 = vadd.f32 1.0, %v8719_v25  ;;  %v4176_v22 = vpop.f32.mrf.mxu3  ;;  %v5073_v27 = vsel %vm528_vm0, %v4895_v61, 0.0 }
 0x5ec   : > { %v6139_v37 = vsel %vm6138_vm11, %v8717_v21, %v6135_v30  ;;  %v6147_v48 = vmul.f32 %v8721_v34, %v10617_v55  ;;  %8722 = vpow2.f32 %v8534_v0  ;;  %v4177_v63 = vadd.f32 %v10651_v35, %v4176_v22  ;;  %5074 = vadd.xlane.f32.xlu1 %v5073_v27 }
 0x5ed   : > { %v6144_v24 = vsel %vm6141_vm13, %v6143_v52, %v6139_v37  ;;  %8724 = vrcp.f32 %v10634_v4  ;;  %vm6152_vm14 = vweird.f32 %v8721_v34  ;;  %v3473_v21 = vmul.f32 0.2, %v3050_v19 }
 0x5ee   : > { %7954 = vst.msk [vmem:[%s10509_s21 + $0x38] sm:$0xff] %vm7946_vm8, %v6144_v24  ;;  %v6148_v49 = vsub.f32 1.0, %v6147_v48  ;;  %v4636_v44 = vmul.f32 0.2, %v4177_v63  ;;  %vm4508_vm15 = vcmp.ge.f32.partialorder %v4177_v63, 0.0  ;;  %vm6153_vm3 = vmor %vm6151_vm1, %vm6152_vm14  ;;  %v3053_v55 = vadd.f32 %v10534_v50, %v9926_v5 }
 0x5ef   : > { %v5033_v28 = vpop.xlane.xlu2 %5032  ;;  %v6170_v59 = vand.u32 2147483647, %v10634_v4  ;;  %v6172_v33 = vand.u32 2147483648, %v10634_v4  ;;  %v3601_v25 = vsel %vm3345_vm4, %v3050_v19, %v3473_v21  ;;  %vm6166_vm9 = vweird.f32 %v10634_v4 }
 0x5f0   : > { %v6149_v31 = vmul.f32 %v8721_v34, %v6148_v49  ;;  %v5397_v6 = vadd.f32 %v10473_v18, %v5033_v28  ;;  %8439 = vmatmul.msk.f32.gmra.mxu3 %vm1710_vm2, %v3600_v53  ;;  %v4764_v1 = vsel %vm4508_vm15, %v4177_v63, %v4636_v44  ;;  %v3474_v13 = vmul.f32 0.2, %v3053_v55 }
 0x5f1   : > { %v4896_v60 = vmul.f32 %v10639_v29, %v4764_v1  ;;  %v6173_v48 = vor.u32 1.1754944e-38, %v6172_v33  ;;  %vm3346_vm11 = vcmp.ge.f32.partialorder %v3053_v55, 0.0  ;;  %vm6171_vm12 = vcmp.eq.f32.partialorder %v6170_v59, 8.507059e+37 }
 0x5f2   : > { %v8723_v57 = vpop.eup %8722  ;;  %v6150_v16 = vadd.f32 %v8721_v34, %v6149_v31  ;;  %v8535_v58 = vmul.f32 -1.442695, %v5397_v6  ;;  %v3602_v21 = vsel %vm3346_vm11, %v3053_v55, %v3474_v13 }
 0x5f3   : > { %v8725_v39 = vpop.eup %8724  ;;  %v10661_v11 = vadd.f32 1.0, %v8723_v57  ;;  %v4179_v38 = vpop.f32.mrf.mxu3  ;;  %v5076_v15 = vsel %vm528_vm0, %v4896_v60, 0.0 }
 0x5f4   : > { %v6154_v2 = vsel %vm6153_vm3, %v8721_v34, %v6150_v16  ;;  %v6162_v43 = vmul.f32 %v8725_v39, %v10634_v4  ;;  %8726 = vpow2.f32 %v8535_v58  ;;  %v4180_v42 = vadd.f32 %v10651_v35, %v4179_v38  ;;  %5077 = vadd.xlane.f32.xlu2 %v5076_v15  ;;  %v12535_v15 = vld [vmem:[#allocation3_spill] sm:$0xff] }
 0x5f5   : > { %v6159_v10 = vsel %vm6156_vm5, %v6158_v32, %v6154_v2  ;;  %8728 = vrcp.f32 %v10661_v11  ;;  %vm6167_vm6 = vweird.f32 %v8725_v39  ;;  %v3056_v4 = vadd.f32 %v10534_v50, %v9933_v41 }
 0x5f6   : > { %7955 = vst.msk [vmem:[%s10509_s21 + $0x40] sm:$0xff] %vm7946_vm8, %v6159_v10  ;;  %v6163_v47 = vsub.f32 1.0, %v6162_v43  ;;  %v4637_v5 = vmul.f32 0.2, %v4180_v42  ;;  %vm4509_vm7 = vcmp.ge.f32.partialorder %v4180_v42, 0.0  ;;  %vm6168_vm10 = vmor %vm6166_vm9, %vm6167_vm6  ;;  %v6187_v44 = vand.u32 2147483648, %v10661_v11 }
 0x5f7   : > { %v5036_v20 = vpop.xlane.xlu0 %5035  ;;  %v6185_v31 = vand.u32 2147483647, %v10661_v11  ;;  %v3475_v58 = vmul.f32 0.2, %v3056_v4  ;;  %vm6181_vm15 = vweird.f32 %v10661_v11  ;;  %vm3347_vm3 = vcmp.ge.f32.partialorder %v3056_v4, 0.0 }
 0x5f8   : > { %v6164_v30 = vmul.f32 %v8725_v39, %v6163_v47  ;;  %v5398_v0 = vadd.f32 %v10473_v18, %v5036_v20  ;;  %8440 = vmatmul.msk.f32.gmra.mxu3 %vm1710_vm2, %v3601_v25  ;;  %v4765_v61 = vsel %vm4509_vm7, %v4180_v42, %v4637_v5  ;;  %v6188_v2 = vor.u32 1.1754944e-38, %v6187_v44 }
 0x5f9   : > { %v4897_v49 = vmul.f32 %v10639_v29, %v4765_v61  ;;  %vm6186_vm4 = vcmp.eq.f32.partialorder %v6185_v31, 8.507059e+37  ;;  %v3603_v13 = vsel %vm3347_vm3, %v3056_v4, %v3475_v58  ;;  %v12536_v31 = vld [vmem:[#allocation4_spill] sm:$0xff] }
 0x5fa   : > { %v8727_v34 = vpop.eup %8726  ;;  %v6165_v52 = vadd.f32 %v8725_v39, %v6164_v30  ;;  %v8536_v22 = vmul.f32 -1.442695, %v5398_v0 }
 0x5fb   : > { %v8729_v37 = vpop.eup %8728  ;;  %v10678_v19 = vadd.f32 1.0, %v8727_v34  ;;  %v4182_v24 = vpop.f32.mrf.mxu3  ;;  %v5079_v53 = vsel %vm528_vm0, %v4897_v49, 0.0 }
 0x5fc   : > { %v6169_v63 = vsel %vm6168_vm10, %v8725_v39, %v6165_v52  ;;  %v6177_v27 = vmul.f32 %v8729_v37, %v10661_v11  ;;  %8730 = vpow2.f32 %v8536_v22  ;;  %v4183_v28 = vadd.f32 %v10651_v35, %v4182_v24  ;;  %5080 = vadd.xlane.f32.xlu0 %v5079_v53 }
 0x5fd   : > { %v6174_v26 = vsel %vm6171_vm12, %v6173_v48, %v6169_v63  ;;  %8732 = vrcp.f32 %v10678_v19  ;;  %vm6182_vm13 = vweird.f32 %v8729_v37  ;;  %v3059_v11 = vadd.f32 %v10534_v50, %v12535_v15 }
 0x5fe   : > { %7956 = vst.msk [vmem:[%s10509_s21 + $0x48] sm:$0xff] %vm7946_vm8, %v6174_v26  ;;  %v6178_v17 = vsub.f32 1.0, %v6177_v27  ;;  %v4638_v41 = vmul.f32 0.2, %v4183_v28  ;;  %vm4510_vm14 = vcmp.ge.f32.partialorder %v4183_v28, 0.0  ;;  %vm6183_vm1 = vmor %vm6181_vm15, %vm6182_vm13  ;;  %v6202_v5 = vand.u32 2147483648, %v10678_v19 }
 0x5ff   : > { %v5039_v6 = vpop.xlane.xlu1 %5038  ;;  %v6200_v30 = vand.u32 2147483647, %v10678_v19  ;;  %v3476_v61 = vmul.f32 0.2, %v3059_v11  ;;  %vm6196_vm7 = vweird.f32 %v10678_v19  ;;  %vm3348_vm10 = vcmp.ge.f32.partialorder %v3059_v11, 0.0 }
 0x600   : > { %v6179_v57 = vmul.f32 %v8729_v37, %v6178_v17  ;;  %v5399_v16 = vadd.f32 %v10473_v18, %v5039_v6  ;;  %8441 = vmatmul.msk.f32.gmra.mxu3 %vm1710_vm2, %v3602_v21  ;;  %v4766_v38 = vsel %vm4510_vm14, %v4183_v28, %v4638_v41  ;;  %v6203_v27 = vor.u32 1.1754944e-38, %v6202_v5 }
 0x601   : > { %v4898_v10 = vmul.f32 %v10639_v29, %v4766_v38  ;;  %vm6201_vm11 = vcmp.eq.f32.partialorder %v6200_v30, 8.507059e+37 }
 0x602   : > { %v8731_v1 = vpop.eup %8730  ;;  %v6180_v39 = vadd.f32 %v8729_v37, %v6179_v57  ;;  %v8537_v32 = vmul.f32 -1.442695, %v5399_v16 }
 0x603   : > { %v8733_v60 = vpop.eup %8732  ;;  %v10695_v43 = vadd.f32 1.0, %v8731_v1  ;;  %v4185_v55 = vpop.f32.mrf.mxu3  ;;  %v5082_v25 = vsel %vm528_vm0, %v4898_v10, 0.0  ;;  %v3604_v1 = vsel %vm3348_vm10, %v3059_v11, %v3476_v61 }
 0x604   : > { %v6184_v47 = vsel %vm6183_vm1, %v8729_v37, %v6180_v39  ;;  %v6192_v42 = vmul.f32 %v8733_v60, %v10678_v19  ;;  %8734 = vpow2.f32 %v8537_v32  ;;  %v4186_v20 = vadd.f32 %v10651_v35, %v4185_v55  ;;  %5083 = vadd.xlane.f32.xlu1 %v5082_v25  ;;  %v12537_v25 = vld [vmem:[#allocation5_spill] sm:$0xff] }
 0x605   : > { %v6189_v59 = vsel %vm6186_vm4, %v6188_v2, %v6184_v47  ;;  %8736 = vrcp.f32 %v10695_v43  ;;  %vm6197_vm5 = vweird.f32 %v8733_v60  ;;  %v3062_v19 = vadd.f32 %v10534_v50, %v12536_v31 }
 0x606   : > { %7957 = vst.msk [vmem:[%s10509_s21 + $0x50] sm:$0xff] %vm7946_vm8, %v6189_v59  ;;  %v6193_v33 = vsub.f32 1.0, %v6192_v42  ;;  %v4639_v52 = vmul.f32 0.2, %v4186_v20  ;;  %vm4511_vm6 = vcmp.ge.f32.partialorder %v4186_v20, 0.0  ;;  %vm6198_vm9 = vmor %vm6196_vm7, %vm6197_vm5  ;;  %v6217_v16 = vand.u32 2147483648, %v10695_v43 }
 0x607   : > { %v5042_v0 = vpop.xlane.xlu2 %5041  ;;  %v6215_v41 = vand.u32 2147483647, %v10695_v43  ;;  %vm6211_vm14 = vweird.f32 %v10695_v43  ;;  %vm3349_vm1 = vcmp.ge.f32.partialorder %v3062_v19, 0.0 }
 0x608   : > { %v6194_v34 = vmul.f32 %v8733_v60, %v6193_v33  ;;  %v5400_v22 = vadd.f32 %v10473_v18, %v5042_v0  ;;  %8442 = vmatmul.msk.f32.gmra.mxu3 %vm1710_vm2, %v3603_v13  ;;  %v4767_v49 = vsel %vm4511_vm6, %v4186_v20, %v4639_v52  ;;  %v6218_v15 = vor.u32 1.1754944e-38, %v6217_v16 }
 0x609   : > { %v4899_v17 = vmul.f32 %v10639_v29, %v4767_v49  ;;  %vm6216_vm3 = vcmp.eq.f32.partialorder %v6215_v41, 8.507059e+37  ;;  %v12538_v41 = vld [vmem:[#allocation6_spill] sm:$0xff] }
 0x60a   : > { %v8735_v37 = vpop.eup %8734  ;;  %v6195_v48 = vadd.f32 %v8733_v60, %v6194_v34  ;;  %v8538_v24 = vmul.f32 -1.442695, %v5400_v22 }
 0x60b   : > { %v8737_v63 = vpop.eup %8736  ;;  %v10712_v4 = vadd.f32 1.0, %v8735_v37  ;;  %v4188_v26 = vpop.f32.mrf.mxu3  ;;  %v5085_v57 = vsel %vm528_vm0, %v4899_v17, 0.0 }
 0x60c   : > { %v6199_v28 = vsel %vm6198_vm9, %v8733_v60, %v6195_v48  ;;  %v6207_v53 = vmul.f32 %v8737_v63, %v10695_v43  ;;  %8738 = vpow2.f32 %v8538_v24  ;;  %v4189_v21 = vadd.f32 %v10651_v35, %v4188_v26  ;;  %5086 = vadd.xlane.f32.xlu2 %v5085_v57  ;;  %v10743_v24 = vld [vmem:[#allocation2] ss:$0 sm:$0xff] }
 0x60d   : > { %v6204_v44 = vsel %vm6201_vm11, %v6203_v27, %v6199_v28  ;;  %8740 = vrcp.f32 %v10712_v4  ;;  %vm6212_vm12 = vweird.f32 %v8737_v63  ;;  %v3477_v60 = vmul.f32 0.2, %v3062_v19 }
 0x60e   : > { %7958 = vst.msk [vmem:[%s10509_s21 + $0x58] sm:$0xff] %vm7946_vm8, %v6204_v44  ;;  %v6208_v6 = vsub.f32 1.0, %v6207_v53  ;;  %v4640_v32 = vmul.f32 0.2, %v4189_v21  ;;  %vm4512_vm13 = vcmp.ge.f32.partialorder %v4189_v21, 0.0  ;;  %vm6213_vm15 = vmor %vm6211_vm14, %vm6212_vm12  ;;  %v3065_v43 = vadd.f32 %v10534_v50, %v12537_v25 }
 0x60f   : > { %v5045_v58 = vpop.xlane.xlu0 %5044  ;;  %v6230_v34 = vand.u32 2147483647, %v10712_v4  ;;  %v6232_v52 = vand.u32 2147483648, %v10712_v4  ;;  %v3605_v61 = vsel %vm3349_vm1, %v3062_v19, %v3477_v60  ;;  %vm6226_vm6 = vweird.f32 %v10712_v4 }
 0x610   : > { %v6209_v39 = vmul.f32 %v8737_v63, %v6208_v6  ;;  %v5401_v38 = vadd.f32 %v10473_v18, %v5045_v58  ;;  %8443 = vmatmul.msk.f32.gmra.mxu3 %vm1710_vm2, %v3604_v1  ;;  %v4768_v47 = vsel %vm4512_vm13, %v4189_v21, %v4640_v32  ;;  %vm3350_vm9 = vcmp.ge.f32.partialorder %v3065_v43, 0.0 }
 0x611   : > { %v4900_v33 = vmul.f32 %v10639_v29, %v4768_v47  ;;  %v6233_v31 = vor.u32 1.1754944e-38, %v6232_v52  ;;  %vm6231_vm10 = vcmp.eq.f32.partialorder %v6230_v34, 8.507059e+37  ;;  %v12539_v34 = vld [vmem:[#allocation7_spill] sm:$0xff] }
 0x612   : > { %v8739_v2 = vpop.eup %8738  ;;  %v6210_v55 = vadd.f32 %v8737_v63, %v6209_v39  ;;  %v8539_v10 = vmul.f32 -1.442695, %v5401_v38 }
 0x613   : > { %v8741_v42 = vpop.eup %8740  ;;  %v10729_v11 = vadd.f32 1.0, %v8739_v2  ;;  %v4191_v59 = vpop.f32.mrf.mxu3  ;;  %v5088_v13 = vsel %vm528_vm0, %v4900_v33, 0.0 }
 0x614   : > { %v6214_v18 = vsel %vm6213_vm15, %v8737_v63, %v6210_v55  ;;  %v6222_v20 = vmul.f32 %v8741_v42, %v10712_v4  ;;  %8742 = vpow2.f32 %v8539_v10  ;;  %v4192_v0 = vadd.f32 %v10651_v35, %v4191_v59  ;;  %5089 = vadd.xlane.f32.xlu0 %v5088_v13 }
 0x615   : > { %v6219_v30 = vsel %vm6216_vm3, %v6218_v15, %v6214_v18  ;;  %8744 = vrcp.f32 %v10729_v11  ;;  %vm6227_vm4 = vweird.f32 %v8741_v42  ;;  %v3478_v63 = vmul.f32 0.2, %v3065_v43 }
 0x616   : > { %7959 = vst.msk [vmem:[%s10509_s21 + $0x60] sm:$0xff] %vm7946_vm8, %v6219_v30  ;;  %v6223_v5 = vsub.f32 1.0, %v6222_v20  ;;  %v4641_v48 = vmul.f32 0.2, %v4192_v0  ;;  %vm4513_vm5 = vcmp.ge.f32.partialorder %v4192_v0, 0.0  ;;  %vm6228_vm7 = vmor %vm6226_vm6, %vm6227_vm4  ;;  %v3068_v4 = vadd.f32 %v10534_v50, %v12538_v41 }
 0x617   : > { %v5048_v22 = vpop.xlane.xlu1 %5047  ;;  %v6245_v32 = vand.u32 2147483647, %v10729_v11  ;;  %v6247_v38 = vand.u32 2147483648, %v10729_v11  ;;  %v3606_v2 = vsel %vm3350_vm9, %v3065_v43, %v3478_v63  ;;  %vm6241_vm13 = vweird.f32 %v10729_v11 }
 0x618   : > { %v6224_v37 = vmul.f32 %v8741_v42, %v6223_v5  ;;  %v5402_v49 = vadd.f32 %v10743_v24, %v5048_v22  ;;  %8444 = vmatmul.msk.f32.gmra.mxu3 %vm1710_vm2, %v3605_v61  ;;  %v4769_v28 = vsel %vm4513_vm5, %v4192_v0, %v4641_v48  ;;  %vm3351_vm15 = vcmp.ge.f32.partialorder %v3068_v4, 0.0 }
 0x619   : > { %v4901_v6 = vmul.f32 %v10639_v29, %v4769_v28  ;;  %v6248_v25 = vor.u32 1.1754944e-38, %v6247_v38  ;;  %vm6246_vm1 = vcmp.eq.f32.partialorder %v6245_v32, 8.507059e+37  ;;  %v12540_v32 = vld [vmem:[#allocation8_spill] sm:$0xff] }
 0x61a   : > { %v8743_v27 = vpop.eup %8742  ;;  %v6225_v26 = vadd.f32 %v8741_v42, %v6224_v37  ;;  %v8540_v17 = vmul.f32 -1.442695, %v5402_v49 }
 0x61b   : > { %v8745_v53 = vpop.eup %8744  ;;  %v10748_v19 = vadd.f32 1.0, %v8743_v27  ;;  %v4194_v44 = vpop.f32.mrf.mxu3  ;;  %v5091_v39 = vsel %vm528_vm0, %v4901_v6, 0.0 }
 0x61c   : > { %v6229_v21 = vsel %vm6228_vm7, %v8741_v42, %v6225_v26  ;;  %v6237_v57 = vmul.f32 %v8745_v53, %v10729_v11  ;;  %8746 = vpow2.f32 %v8540_v17  ;;  %v4195_v1 = vadd.f32 %v10651_v35, %v4194_v44  ;;  %5092 = vadd.xlane.f32.xlu1 %v5091_v39 }
 0x61d   : > { %v6234_v16 = vsel %vm6231_vm10, %v6233_v31, %v6229_v21  ;;  %8748 = vrcp.f32 %v10748_v19  ;;  %vm6242_vm11 = vweird.f32 %v8745_v53  ;;  %v3479_v42 = vmul.f32 0.2, %v3068_v4 }
 0x61e   : > { %7960 = vst.msk [vmem:[%s10509_s21 + $0x68] sm:$0xff] %vm7946_vm8, %v6234_v16  ;;  %v6238_v58 = vsub.f32 1.0, %v6237_v57  ;;  %v4642_v10 = vmul.f32 0.2, %v4195_v1  ;;  %vm4514_vm12 = vcmp.ge.f32.partialorder %v4195_v1, 0.0  ;;  %vm6243_vm14 = vmor %vm6241_vm13, %vm6242_vm11  ;;  %v3071_v11 = vadd.f32 %v10534_v50, %v12539_v34 }
 0x61f   : > { %v5051_v60 = vpop.xlane.xlu2 %5050  ;;  %v6260_v48 = vand.u32 2147483647, %v10748_v19  ;;  %v6262_v49 = vand.u32 2147483648, %v10748_v19  ;;  %v3607_v27 = vsel %vm3351_vm15, %v3068_v4, %v3479_v42  ;;  %vm6256_vm5 = vweird.f32 %v10748_v19 }
 0x620   : > { %v6239_v55 = vmul.f32 %v8745_v53, %v6238_v58  ;;  %v5403_v47 = vadd.f32 %v10743_v24, %v5051_v60  ;;  %8445 = vmatmul.msk.f32.gmra.mxu3 %vm1710_vm2, %v3606_v2  ;;  %v4770_v18 = vsel %vm4514_vm12, %v4195_v1, %v4642_v10  ;;  %vm3352_vm7 = vcmp.ge.f32.partialorder %v3071_v11, 0.0 }
 0x621   : > { %v4902_v5 = vmul.f32 %v10639_v29, %v4770_v18  ;;  %v6263_v41 = vor.u32 1.1754944e-38, %v6262_v49  ;;  %vm6261_vm9 = vcmp.eq.f32.partialorder %v6260_v48, 8.507059e+37  ;;  %v12541_v48 = vld [vmem:[#allocation9_spill] sm:$0xff] }
 0x622   : > { %v8747_v15 = vpop.eup %8746  ;;  %v6240_v59 = vadd.f32 %v8745_v53, %v6239_v55  ;;  %v8541_v33 = vmul.f32 -1.442695, %v5403_v47 }
 0x623   : > { %v8749_v20 = vpop.eup %8748  ;;  %v10765_v43 = vadd.f32 1.0, %v8747_v15  ;;  %v4197_v30 = vpop.f32.mrf.mxu3  ;;  %v5094_v37 = vsel %vm528_vm0, %v4902_v5, 0.0 }
 0x624   : > { %v6244_v0 = vsel %vm6243_vm14, %v8745_v53, %v6240_v59  ;;  %v6252_v13 = vmul.f32 %v8749_v20, %v10748_v19  ;;  %8750 = vpow2.f32 %v8541_v33  ;;  %v4198_v61 = vadd.f32 %v10651_v35, %v4197_v30  ;;  %5095 = vadd.xlane.f32.xlu2 %v5094_v37  ;;  %v10807_v37 = vld [vmem:[%s12487_s6] ss:$0 sm:$0xff] }
 0x625   : > { %v6249_v52 = vsel %vm6246_vm1, %v6248_v25, %v6244_v0  ;;  %8752 = vrcp.f32 %v10765_v43  ;;  %vm6257_vm3 = vweird.f32 %v8749_v20  ;;  %v3480_v53 = vmul.f32 0.2, %v3071_v11 }
 0x626   : > { %7961 = vst.msk [vmem:[%s10509_s21 + $0x70] sm:$0xff] %vm7946_vm8, %v6249_v52  ;;  %v6253_v22 = vsub.f32 1.0, %v6252_v13  ;;  %v4643_v17 = vmul.f32 0.2, %v4198_v61  ;;  %vm4515_vm4 = vcmp.ge.f32.partialorder %v4198_v61, 0.0  ;;  %vm6258_vm6 = vmor %vm6256_vm5, %vm6257_vm3  ;;  %v3074_v19 = vadd.f32 %v10534_v50, %v12540_v32 }
 0x627   : > { %v5054_v63 = vpop.xlane.xlu0 %5053  ;;  %v6275_v10 = vand.u32 2147483647, %v10765_v43  ;;  %v6277_v47 = vand.u32 2147483648, %v10765_v43  ;;  %v3608_v42 = vsel %vm3352_vm7, %v3071_v11, %v3480_v53  ;;  %vm6271_vm12 = vweird.f32 %v10765_v43 }
 0x628   : > { %v6254_v26 = vmul.f32 %v8749_v20, %v6253_v22  ;;  %v5404_v28 = vadd.f32 %v10743_v24, %v5054_v63  ;;  %8446 = vmatmul.msk.f32.gmra.mxu3 %vm1710_vm2, %v3607_v27  ;;  %v4771_v21 = vsel %vm4515_vm4, %v4198_v61, %v4643_v17  ;;  %v3481_v50 = vmul.f32 0.2, %v3074_v19 }
 0x629   : > { %v4903_v58 = vmul.f32 %v10639_v29, %v4771_v21  ;;  %vm3353_vm13 = vcmp.ge.f32.partialorder %v3074_v19, 0.0  ;;  %v6278_v5 = vor.u32 1.1754944e-38, %v6277_v47  ;;  %vm6276_vm15 = vcmp.eq.f32.partialorder %v6275_v10, 8.507059e+37 }
 0x62a   : > { %v8751_v31 = vpop.eup %8750  ;;  %v6255_v44 = vadd.f32 %v8749_v20, %v6254_v26  ;;  %v8542_v6 = vmul.f32 -1.442695, %v5404_v28  ;;  %v3077_v49 = vadd.f32 %v10807_v37, %v12541_v48  ;;  %v3609_v53 = vsel %vm3353_vm13, %v3074_v19, %v3481_v50 }
 0x62b   : > { %v8753_v57 = vpop.eup %8752  ;;  %v10782_v4 = vadd.f32 1.0, %v8751_v31  ;;  %v4200_v16 = vpop.f32.mrf.mxu3  ;;  %v5097_v55 = vsel %vm528_vm0, %v4903_v58, 0.0 }
 0x62c   : > { %v6259_v1 = vsel %vm6258_vm6, %v8749_v20, %v6255_v44  ;;  %v6267_v39 = vmul.f32 %v8753_v57, %v10765_v43  ;;  %8754 = vpow2.f32 %v8542_v6  ;;  %v4201_v2 = vadd.f32 %v10651_v35, %v4200_v16  ;;  %5098 = vadd.xlane.f32.xlu0 %v5097_v55 }
 0x62d   : > { %v6264_v38 = vsel %vm6261_vm9, %v6263_v41, %v6259_v1  ;;  %8756 = vrcp.f32 %v10782_v4  ;;  %vm6272_vm10 = vweird.f32 %v8753_v57  ;;  %v6292_v17 = vand.u32 2147483648, %v10782_v4 }
 0x62e   : > { %7962 = vst.msk [vmem:[%s10509_s21 + $0x78] sm:$0xff] %vm7946_vm8, %v6264_v38  ;;  %v6268_v60 = vsub.f32 1.0, %v6267_v39  ;;  %v4644_v59 = vmul.f32 0.2, %v4201_v2  ;;  %vm4516_vm11 = vcmp.ge.f32.partialorder %v4201_v2, 0.0  ;;  %vm6273_vm14 = vmor %vm6271_vm12, %vm6272_vm10  ;;  %vm6286_vm4 = vweird.f32 %v10782_v4 }
 0x62f   : > { %v5057_v20 = vpop.xlane.xlu1 %5056  ;;  %v6290_v44 = vand.u32 2147483647, %v10782_v4  ;;  %v3482_v21 = vmul.f32 0.2, %v3077_v49  ;;  %v6293_v1 = vor.u32 1.1754944e-38, %v6292_v17  ;;  %vm3354_vm6 = vcmp.ge.f32.partialorder %v3077_v49, 0.0 }
 0x630   : > { %v6269_v15 = vmul.f32 %v8753_v57, %v6268_v60  ;;  %8447 = vmatmul.msk.f32.gmra.mxu3 %vm1710_vm2, %v3608_v42  ;;  %v4772_v25 = vsel %vm4516_vm11, %v4201_v2, %v4644_v59  ;;  %v5405_v13 = vadd.f32 %v10743_v24, %v5057_v20  ;;  %v12542_v59 = vld [vmem:[#allocation10_spill] sm:$0xff] }
 0x631   : > { %v4904_v11 = vmul.f32 %v10639_v29, %v4772_v25  ;;  %vm6291_vm7 = vcmp.eq.f32.partialorder %v6290_v44, 8.507059e+37  ;;  %v3080_v50 = vadd.f32 %v10807_v37, %v12542_v59 }
 0x632   : > { %v8755_v33 = vpop.eup %8754  ;;  %v6270_v18 = vadd.f32 %v8753_v57, %v6269_v15  ;;  %v8543_v27 = vmul.f32 -1.442695, %v5405_v13  ;;  %v3610_v15 = vsel %vm3354_vm6, %v3077_v49, %v3482_v21 }
 0x633   : > { %v8757_v30 = vpop.eup %8756  ;;  %v10797_v0 = vadd.f32 1.0, %v8755_v33  ;;  %v4203_v34 = vpop.f32.mrf.mxu3  ;;  %v5100_v26 = vsel %vm528_vm0, %v4904_v11, 0.0  ;;  %v3483_v11 = vmul.f32 0.2, %v3080_v50  ;;  %vm3355_vm13 = vcmp.ge.f32.partialorder %v3080_v50, 0.0 }
 0x634   : > { %v6274_v52 = vsel %vm6273_vm14, %v8753_v57, %v6270_v18  ;;  %v6282_v22 = vmul.f32 %v8757_v30, %v10782_v4  ;;  %v4204_v43 = vadd.f32 %v10651_v35, %v4203_v34  ;;  %5101 = vadd.xlane.f32.xlu1 %v5100_v26  ;;  %vm6287_vm3 = vweird.f32 %v8757_v30  ;;  %v12543_v26 = vld [vmem:[#allocation11_spill] sm:$0xff] }
 0x635   : > { %v6279_v61 = vsel %vm6276_vm15, %v6278_v5, %v6274_v52  ;;  %8758 = vrcp.f32 %v10797_v0  ;;  %vm6288_vm5 = vmor %vm6286_vm4, %vm6287_vm3  ;;  %v6307_v33 = vand.u32 2147483648, %v10797_v0  ;;  %v6305_v25 = vand.u32 2147483647, %v10797_v0 }
 0x636   : > { %7963 = vst.msk [vmem:[%s10509_s21 + $0x80] sm:$0xff] %vm7946_vm8, %v6279_v61  ;;  %v6283_v63 = vsub.f32 1.0, %v6282_v22  ;;  %v4645_v28 = vmul.f32 0.2, %v4204_v43  ;;  %vm4517_vm1 = vcmp.ge.f32.partialorder %v4204_v43, 0.0  ;;  %8760 = vpow2.f32 %v8543_v27 }
 0x637   : > { %v5060_v41 = vpop.xlane.xlu2 %5059  ;;  %vm6301_vm11 = vweird.f32 %v10797_v0  ;;  %v6308_v52 = vor.u32 1.1754944e-38, %v6307_v33  ;;  %vm6306_vm14 = vcmp.eq.f32.partialorder %v6305_v25, 8.507059e+37  ;;  %v3083_v17 = vadd.f32 %v10807_v37, %v12543_v26 }
 0x638   : > { %v6284_v31 = vmul.f32 %v8757_v30, %v6283_v63  ;;  %8448 = vmatmul.msk.f32.gmra.mxu3 %vm1710_vm2, %v3609_v53  ;;  %v4773_v6 = vsel %vm4517_vm1, %v4204_v43, %v4645_v28  ;;  %v5406_v39 = vadd.f32 %v10743_v24, %v5060_v41  ;;  %v3611_v44 = vsel %vm3355_vm13, %v3080_v50, %v3483_v11 }
 0x639   : > { %v4905_v16 = vmul.f32 %v10639_v29, %v4773_v6  ;;  %vm3356_vm1 = vcmp.ge.f32.partialorder %v3083_v17, 0.0 }
 0x63a   : > { %v6285_v57 = vadd.f32 %v8757_v30, %v6284_v31  ;;  %v8544_v55 = vmul.f32 -1.442695, %v5406_v39 }
 0x63b   : > { %v8759_v58 = vpop.eup %8758  ;;  %v4206_v32 = vpop.f32.mrf.mxu3  ;;  %v5103_v4 = vsel %vm528_vm0, %v4905_v16, 0.0 }
 0x63c   : > { %v6289_v19 = vsel %vm6288_vm5, %v8757_v30, %v6285_v57  ;;  %v6297_v38 = vmul.f32 %v8759_v58, %v10797_v0  ;;  %v4207_v60 = vadd.f32 %v10651_v35, %v4206_v32  ;;  %v8761_v10 = vpop.eup %8760  ;;  %5104 = vadd.xlane.f32.xlu2 %v5103_v4  ;;  %8762 = vpow2.f32 %v8544_v55  ;;  %v12544_v4 = vld [vmem:[#allocation12_spill] sm:$0xff] }
 0x63d   : > { %v6294_v2 = vsel %vm6291_vm7, %v6293_v1, %v6289_v19  ;;  %v10829_v18 = vadd.f32 1.0, %v8761_v10  ;;  %vm6302_vm10 = vweird.f32 %v8759_v58  ;;  %v3484_v57 = vmul.f32 0.2, %v3083_v17 }
 0x63e   : > { %7964 = vst.msk [vmem:[%s10509_s21 + $0x88] sm:$0xff] %vm7946_vm8, %v6294_v2  ;;  %v6298_v47 = vsub.f32 1.0, %v6297_v38  ;;  %v4646_v42 = vmul.f32 0.2, %v4207_v60  ;;  %vm4518_vm9 = vcmp.ge.f32.partialorder %v4207_v60, 0.0  ;;  %vm6303_vm12 = vmor %vm6301_vm11, %vm6302_vm10  ;;  %v3086_v10 = vadd.f32 %v10807_v37, %v12544_v4 }
 0x63f   : > { %8764 = vrcp.f32 %v10829_v18  ;;  %v5063_v13 = vpop.xlane.xlu0 %5062  ;;  %v6320_v1 = vand.u32 2147483647, %v10829_v18  ;;  %v6322_v39 = vand.u32 2147483648, %v10829_v18  ;;  %vm6316_vm4 = vweird.f32 %v10829_v18 }
 0x640   : > { %v6299_v20 = vmul.f32 %v8759_v58, %v6298_v47  ;;  %8449 = vmatmul.msk.f32.gmra.mxu3 %vm1710_vm2, %v3610_v15  ;;  %v4774_v30 = vsel %vm4518_vm9, %v4207_v60, %v4646_v42  ;;  %v5407_v22 = vadd.f32 %v10743_v24, %v5063_v13  ;;  %v3612_v25 = vsel %vm3356_vm1, %v3083_v17, %v3484_v57 }
 0x641   : > { %v4906_v34 = vmul.f32 %v10639_v29, %v4774_v30  ;;  %v6323_v33 = vor.u32 1.1754944e-38, %v6322_v39  ;;  %vm6321_vm7 = vcmp.eq.f32.partialorder %v6320_v1, 8.507059e+37  ;;  %vm3357_vm9 = vcmp.ge.f32.partialorder %v3086_v10, 0.0 }
 0x642   : > { %v6300_v5 = vadd.f32 %v8759_v58, %v6299_v20  ;;  %v8763_v63 = vpop.eup %8762  ;;  %v8545_v0 = vmul.f32 -1.442695, %v5407_v22 }
 0x643   : > { %v4209_v43 = vpop.f32.mrf.mxu3  ;;  %v5106_v49 = vsel %vm528_vm0, %v4906_v34, 0.0  ;;  %v10843_v28 = vadd.f32 1.0, %v8763_v63  ;;  %v12545_v63 = vld [vmem:[#allocation13_spill] sm:$0xff] }
 0x644   : > { %v6304_v61 = vsel %vm6303_vm12, %v8759_v58, %v6300_v5  ;;  %v4210_v48 = vadd.f32 %v10651_v35, %v4209_v43  ;;  %5107 = vadd.xlane.f32.xlu0 %v5106_v49  ;;  %8766 = vpow2.f32 %v8545_v0 }
 0x645   : > { %v6309_v27 = vsel %vm6306_vm14, %v6308_v52, %v6304_v61  ;;  %v8765_v31 = vpop.eup %8764  ;;  %8768 = vrcp.f32 %v10843_v28  ;;  %v6337_v11 = vand.u32 2147483648, %v10843_v28  ;;  %v6335_v61 = vand.u32 2147483647, %v10843_v28 }
 0x646   : > { %7965 = vst.msk [vmem:[%s10509_s21 + $0x90] sm:$0xff] %vm7946_vm8, %v6309_v27  ;;  %v4647_v53 = vmul.f32 0.2, %v4210_v48  ;;  %vm4519_vm15 = vcmp.ge.f32.partialorder %v4210_v48, 0.0  ;;  %v6312_v6 = vmul.f32 %v8765_v31, %v10829_v18  ;;  %vm6317_vm3 = vweird.f32 %v8765_v31 }
 0x647   : > { %v5066_v16 = vpop.xlane.xlu1 %5065  ;;  %vm6318_vm6 = vmor %vm6316_vm4, %vm6317_vm3  ;;  %v3485_v18 = vmul.f32 0.2, %v3086_v10  ;;  %v3089_v27 = vadd.f32 %v10807_v37, %v12545_v63  ;;  %vm6331_vm11 = vweird.f32 %v10843_v28  ;;  %vm6336_vm14 = vcmp.eq.f32.partialorder %v6335_v61, 8.507059e+37 }
 0x648   : > { %8450 = vmatmul.msk.f32.gmra.mxu3 %vm1710_vm2, %v3611_v44  ;;  %v4775_v21 = vsel %vm4519_vm15, %v4210_v48, %v4647_v53  ;;  %v6313_v41 = vsub.f32 1.0, %v6312_v6  ;;  %v5408_v32 = vadd.f32 %v10743_v24, %v5066_v16 }
 0x649   : > { %v4907_v58 = vmul.f32 %v10639_v29, %v4775_v21  ;;  %v3613_v44 = vsel %vm3357_vm9, %v3086_v10, %v3485_v18  ;;  %v6338_v21 = vor.u32 1.1754944e-38, %v6337_v11  ;;  %v3486_v1 = vmul.f32 0.2, %v3089_v27 }
 0x64a   : > { %v6314_v38 = vmul.f32 %v8765_v31, %v6313_v41  ;;  %v8767_v55 = vpop.eup %8766  ;;  %v8546_v47 = vmul.f32 -1.442695, %v5408_v32  ;;  %vm3358_vm15 = vcmp.ge.f32.partialorder %v3089_v27, 0.0 }
 0x64b   : > { %v4212_v19 = vpop.f32.mrf.mxu3  ;;  %v5109_v2 = vsel %vm528_vm0, %v4907_v58, 0.0  ;;  %v8769_v42 = vpop.eup %8768  ;;  %v10858_v59 = vadd.f32 1.0, %v8767_v55 }
 0x64c   : > { %v4213_v60 = vadd.f32 %v10651_v35, %v4212_v19  ;;  %5110 = vadd.xlane.f32.xlu1 %v5109_v2  ;;  %v6315_v15 = vadd.f32 %v8765_v31, %v6314_v38  ;;  %v6327_v20 = vmul.f32 %v8769_v42, %v10843_v28  ;;  %8770 = vpow2.f32 %v8546_v47 }
 0x64d   : > { %8772 = vrcp.f32 %v10858_v59  ;;  %vm6332_vm10 = vweird.f32 %v8769_v42  ;;  %v6352_v19 = vand.u32 2147483648, %v10858_v59  ;;  %v6350_v55 = vand.u32 2147483647, %v10858_v59 }
 0x64e   : > { %v4648_v50 = vmul.f32 0.2, %v4213_v60  ;;  %vm4520_vm5 = vcmp.ge.f32.partialorder %v4213_v60, 0.0  ;;  %v6319_v30 = vsel %vm6318_vm6, %v8765_v31, %v6315_v15  ;;  %v6328_v13 = vsub.f32 1.0, %v6327_v20  ;;  %vm6333_vm12 = vmor %vm6331_vm11, %vm6332_vm10 }
 0x64f   : > { %v6324_v5 = vsel %vm6321_vm7, %v6323_v33, %v6319_v30  ;;  %v5069_v52 = vpop.xlane.xlu2 %5068  ;;  %v3614_v15 = vsel %vm3358_vm15, %v3089_v27, %v3486_v1  ;;  %v12546_v33 = vld [vmem:[#allocation14_spill] sm:$0xff]  ;;  %vm6346_vm3 = vweird.f32 %v10858_v59  ;;  %v6353_v18 = vor.u32 1.1754944e-38, %v6352_v19 }
 0x650   : > { %8451 = vmatmul.msk.f32.gmra.mxu3 %vm1710_vm2, %v3612_v25  ;;  %v4776_v34 = vsel %vm4520_vm5, %v4213_v60, %v4648_v50  ;;  %7966 = vst.msk [vmem:[%s10509_s21 + $0x98] sm:$0xff] %vm7946_vm8, %v6324_v5  ;;  %v6329_v43 = vmul.f32 %v8769_v42, %v6328_v13  ;;  %v5409_v48 = vadd.f32 %v10743_v24, %v5069_v52  ;;  %vm6351_vm6 = vcmp.eq.f32.partialorder %v6350_v55, 8.507059e+37 }
 0x651   : > { %v4908_v22 = vmul.f32 %v10639_v29, %v4776_v34  ;;  %v3092_v20 = vadd.f32 %v10807_v37, %v12546_v33  ;;  %v10926_v33 = vld [vmem:[%s12489_s8] ss:$0 sm:$0xff] }
 0x652   : > { %v8771_v17 = vpop.eup %8770  ;;  %v6330_v53 = vadd.f32 %v8769_v42, %v6329_v43  ;;  %v8547_v31 = vmul.f32 -1.442695, %v5409_v48 }
 0x653   : > { %v4215_v49 = vpop.f32.mrf.mxu3  ;;  %v5112_v26 = vsel %vm528_vm0, %v4908_v22, 0.0  ;;  %v8773_v6 = vpop.eup %8772  ;;  %v10875_v57 = vadd.f32 1.0, %v8771_v17  ;;  %vm3359_vm7 = vcmp.ge.f32.partialorder %v3092_v20, 0.0 }
 0x654   : > { %v4216_v0 = vadd.f32 %v10651_v35, %v4215_v49  ;;  %5113 = vadd.xlane.f32.xlu2 %v5112_v26  ;;  %v6334_v16 = vsel %vm6333_vm12, %v8769_v42, %v6330_v53  ;;  %v6342_v58 = vmul.f32 %v8773_v6, %v10858_v59  ;;  %8774 = vpow2.f32 %v8547_v31  ;;  %v10902_v49 = vld [vmem:[%s12490_s9] ss:$0 sm:$0xff]  ;;  %v12547_v53 = vld [vmem:[#allocation15_spill] sm:$0xff] }
 0x655   : > { %v6339_v39 = vsel %vm6336_vm14, %v6338_v21, %v6334_v16  ;;  %8776 = vrcp.f32 %v10875_v57  ;;  %vm6347_vm1 = vweird.f32 %v8773_v6  ;;  %v3487_v59 = vmul.f32 0.2, %v3092_v20 }
 0x656   : > { %v4649_v41 = vmul.f32 0.2, %v4216_v0  ;;  %vm4521_vm13 = vcmp.ge.f32.partialorder %v4216_v0, 0.0  ;;  %7967 = vst.msk [vmem:[%s10509_s21 + $0xa0] sm:$0xff] %vm7946_vm8, %v6339_v39  ;;  %v6343_v28 = vsub.f32 1.0, %v6342_v58  ;;  %vm6348_vm4 = vmor %vm6346_vm3, %vm6347_vm1  ;;  %v6367_v61 = vand.u32 2147483648, %v10875_v57 }
 0x657   : > { %v5072_v38 = vpop.xlane.xlu0 %5071  ;;  %v3095_v31 = vadd.f32 %v10807_v37, %v12547_v53  ;;  %vm6361_vm10 = vweird.f32 %v10875_v57  ;;  %v3615_v58 = vsel %vm3359_vm7, %v3092_v20, %v3487_v59 }
 0x658   : > { %8452 = vmatmul.msk.f32.gmra.mxu3 %vm1710_vm2, %v3613_v44  ;;  %v4777_v32 = vsel %vm4521_vm13, %v4216_v0, %v4649_v41  ;;  %v6344_v2 = vmul.f32 %v8773_v6, %v6343_v28  ;;  %v5410_v4 = vadd.f32 %v10743_v24, %v5072_v38  ;;  %v6365_v0 = vand.u32 2147483647, %v10875_v57 }
 0x659   : > { %v4909_v60 = vmul.f32 %v10639_v29, %v4777_v32  ;;  %v6368_v39 = vor.u32 1.1754944e-38, %v6367_v61  ;;  %v3488_v38 = vmul.f32 0.2, %v3095_v31  ;;  %vm3360_vm14 = vcmp.ge.f32.partialorder %v3095_v31, 0.0 }
 0x65a   : > { %v8775_v50 = vpop.eup %8774  ;;  %v6345_v25 = vadd.f32 %v8773_v6, %v6344_v2  ;;  %v8548_v29 = vmul.f32 -1.442695, %v5410_v4  ;;  %vm6366_vm13 = vcmp.eq.f32.partialorder %v6365_v0, 8.507059e+37 }
 0x65b   : > { %v4218_v10 = vpop.f32.mrf.mxu3  ;;  %v5115_v42 = vsel %vm528_vm0, %v4909_v60, 0.0  ;;  %v8777_v30 = vpop.eup %8776  ;;  %v10891_v5 = vadd.f32 1.0, %v8775_v50 }
 0x65c   : > { %v4219_v47 = vadd.f32 %v10651_v35, %v4218_v10  ;;  %5116 = vadd.xlane.f32.xlu0 %v5115_v42  ;;  %v6349_v34 = vsel %vm6348_vm4, %v8773_v6, %v6345_v25  ;;  %v6357_v11 = vmul.f32 %v8777_v30, %v10875_v57  ;;  %8778 = vpow2.f32 %v8548_v29 }
 0x65d   : > { %v6354_v52 = vsel %vm6351_vm6, %v6353_v18, %v6349_v34  ;;  %8780 = vrcp.f32 %v10891_v5  ;;  %vm6362_vm9 = vweird.f32 %v8777_v30  ;;  %v6382_v55 = vand.u32 2147483648, %v10891_v5  ;;  %v12548_v18 = vld [vmem:[#allocation16_spill] sm:$0xff] }
 0x65e   : > { %v4650_v13 = vmul.f32 0.2, %v4219_v47  ;;  %vm4522_vm5 = vcmp.ge.f32.partialorder %v4219_v47, 0.0  ;;  %7968 = vst.msk [vmem:[%s10509_s21 + $0xa8] sm:$0xff] %vm7946_vm8, %v6354_v52  ;;  %v6358_v22 = vsub.f32 1.0, %v6357_v11  ;;  %vm6363_vm11 = vmor %vm6361_vm10, %vm6362_vm9  ;;  %v3616_v29 = vsel %vm3360_vm14, %v3095_v31, %v3488_v38 }
 0x65f   : > { %v5075_v48 = vpop.xlane.xlu1 %5074  ;;  %v6380_v42 = vand.u32 2147483647, %v10891_v5  ;;  %vm6376_vm1 = vweird.f32 %v10891_v5  ;;  %v6383_v59 = vor.u32 1.1754944e-38, %v6382_v55 }
 0x660   : > { %8453 = vmatmul.msk.f32.gmra.mxu3 %vm1710_vm2, %v3614_v15  ;;  %v4778_v43 = vsel %vm4522_vm5, %v4219_v47, %v4650_v13  ;;  %v6359_v27 = vmul.f32 %v8777_v30, %v6358_v22  ;;  %v5411_v26 = vadd.f32 %v10743_v24, %v5075_v48  ;;  %v3098_v13 = vadd.f32 %v10807_v37, %v12548_v18 }
 0x661   : > { %v4910_v63 = vmul.f32 %v10902_v49, %v4778_v43  ;;  %vm6381_vm5 = vcmp.eq.f32.partialorder %v6380_v42, 8.507059e+37 }
 0x662   : > { %v8779_v21 = vpop.eup %8778  ;;  %v6360_v41 = vadd.f32 %v8777_v30, %v6359_v27  ;;  %v8549_v16 = vmul.f32 -1.442695, %v5411_v26  ;;  %vm3361_vm6 = vcmp.ge.f32.partialorder %v3098_v13, 0.0 }
 0x663   : > { %v4221_v17 = vpop.f32.mrf.mxu3  ;;  %v5118_v6 = vsel %vm528_vm0, %v4910_v63, 0.0  ;;  %v8781_v1 = vpop.eup %8780  ;;  %v10912_v28 = vadd.f32 1.0, %v8779_v21 }
 0x664   : > { %v4222_v44 = vadd.f32 %v10651_v35, %v4221_v17  ;;  %5119 = vadd.xlane.f32.xlu1 %v5118_v6  ;;  %v6364_v19 = vsel %vm6363_vm11, %v8777_v30, %v6360_v41  ;;  %v6372_v35 = vmul.f32 %v8781_v1, %v10891_v5  ;;  %8782 = vpow2.f32 %v8549_v16  ;;  %v12549_v41 = vld [vmem:[#allocation17_spill] sm:$0xff] }
 0x665   : > { %v6369_v60 = vsel %vm6366_vm13, %v6368_v39, %v6364_v19  ;;  %8784 = vrcp.f32 %v10912_v28  ;;  %vm6377_vm15 = vweird.f32 %v8781_v1  ;;  %v3489_v5 = vmul.f32 0.2, %v3098_v13 }
 0x666   : > { %v4651_v32 = vmul.f32 0.2, %v4222_v44  ;;  %vm4523_vm12 = vcmp.ge.f32.partialorder %v4222_v44, 0.0  ;;  %7969 = vst.msk [vmem:[%s10509_s21 + $0xb0] sm:$0xff] %vm7946_vm8, %v6369_v60  ;;  %v6373_v57 = vsub.f32 1.0, %v6372_v35  ;;  %vm6378_vm3 = vmor %vm6376_vm1, %vm6377_vm15  ;;  %v6397_v26 = vand.u32 2147483648, %v10912_v28 }
 0x667   : > { %v5078_v4 = vpop.xlane.xlu2 %5077  ;;  %v3101_v16 = vadd.f32 %v10807_v37, %v12549_v41  ;;  %vm6391_vm9 = vweird.f32 %v10912_v28  ;;  %v3617_v35 = vsel %vm3361_vm6, %v3098_v13, %v3489_v5 }
 0x668   : > { %8454 = vmatmul.msk.f32.gmra.mxu3 %vm1710_vm2, %v3615_v58  ;;  %v4779_v2 = vsel %vm4523_vm12, %v4222_v44, %v4651_v32  ;;  %v6374_v47 = vmul.f32 %v8781_v1, %v6373_v57  ;;  %v5412_v15 = vadd.f32 %v10743_v24, %v5078_v4  ;;  %v6395_v44 = vand.u32 2147483647, %v10912_v28 }
 0x669   : > { %v4911_v10 = vmul.f32 %v10902_v49, %v4779_v2  ;;  %v6398_v60 = vor.u32 1.1754944e-38, %v6397_v26  ;;  %vm3362_vm13 = vcmp.ge.f32.partialorder %v3101_v16, 0.0 }
 0x66a   : > { %v8783_v30 = vpop.eup %8782  ;;  %v6375_v34 = vadd.f32 %v8781_v1, %v6374_v47  ;;  %v8550_v11 = vmul.f32 -1.442695, %v5412_v15  ;;  %vm6396_vm12 = vcmp.eq.f32.partialorder %v6395_v44, 8.507059e+37 }
 0x66b   : > { %v4224_v50 = vpop.f32.mrf.mxu3  ;;  %v5121_v25 = vsel %vm528_vm0, %v4911_v10, 0.0  ;;  %v8785_v52 = vpop.eup %8784  ;;  %v10934_v22 = vadd.f32 1.0, %v8783_v30  ;;  %v3490_v10 = vmul.f32 0.2, %v3101_v16 }
 0x66c   : > { %v4225_v20 = vadd.f32 %v10926_v33, %v4224_v50  ;;  %5122 = vadd.xlane.f32.xlu2 %v5121_v25  ;;  %v6379_v61 = vsel %vm6378_vm3, %v8781_v1, %v6375_v34  ;;  %v6387_v48 = vmul.f32 %v8785_v52, %v10912_v28  ;;  %8786 = vpow2.f32 %v8550_v11 }
 0x66d   : > { %v6384_v63 = vsel %vm6381_vm5, %v6383_v59, %v6379_v61  ;;  %8788 = vrcp.f32 %v10934_v22  ;;  %vm6392_vm7 = vweird.f32 %v8785_v52  ;;  %v6412_v15 = vand.u32 2147483648, %v10934_v22  ;;  %v12550_v59 = vld [vmem:[#allocation18_spill] sm:$0xff] }
 0x66e   : > { %v4652_v43 = vmul.f32 0.2, %v4225_v20  ;;  %vm4524_vm4 = vcmp.ge.f32.partialorder %v4225_v20, 0.0  ;;  %7970 = vst.msk [vmem:[%s10509_s21 + $0xb8] sm:$0xff] %vm7946_vm8, %v6384_v63  ;;  %v6388_v27 = vsub.f32 1.0, %v6387_v48  ;;  %vm6393_vm10 = vmor %vm6391_vm9, %vm6392_vm7  ;;  %v3618_v11 = vsel %vm3362_vm13, %v3101_v16, %v3490_v10 }
 0x66f   : > { %v5081_v17 = vpop.xlane.xlu0 %5080  ;;  %vm6406_vm15 = vweird.f32 %v10934_v22  ;;  %v6413_v5 = vor.u32 1.1754944e-38, %v6412_v15 }
 0x670   : > { %8455 = vmatmul.msk.f32.gmra.mxu3 %vm1710_vm2, %v3616_v29  ;;  %v4780_v0 = vsel %vm4524_vm4, %v4225_v20, %v4652_v43  ;;  %v6389_v31 = vmul.f32 %v8785_v52, %v6388_v27  ;;  %v5413_v6 = vadd.f32 %v10743_v24, %v5081_v17  ;;  %v6410_v29 = vand.u32 2147483647, %v10934_v22 }
 0x671   : > { %v4912_v53 = vmul.f32 %v10902_v49, %v4780_v0  ;;  %v3104_v43 = vadd.f32 %v10807_v37, %v12550_v59 }
 0x672   : > { %v8787_v39 = vpop.eup %8786  ;;  %v6390_v32 = vadd.f32 %v8785_v52, %v6389_v31  ;;  %v8551_v19 = vmul.f32 -1.442695, %v5413_v6  ;;  %vm6411_vm4 = vcmp.eq.f32.partialorder %v6410_v29, 8.507059e+37 }
 0x673   : > { %v4227_v21 = vpop.f32.mrf.mxu3  ;;  %v5124_v1 = vsel %vm528_vm0, %v4912_v53, 0.0  ;;  %v8789_v38 = vpop.eup %8788  ;;  %v10950_v57 = vadd.f32 1.0, %v8787_v39  ;;  %vm3363_vm5 = vcmp.ge.f32.partialorder %v3104_v43, 0.0 }
 0x674   : > { %v4228_v58 = vadd.f32 %v10926_v33, %v4227_v21  ;;  %5125 = vadd.xlane.f32.xlu0 %v5124_v1  ;;  %v6394_v55 = vsel %vm6393_vm10, %v8785_v52, %v6390_v32  ;;  %v6402_v4 = vmul.f32 %v8789_v38, %v10934_v22  ;;  %8790 = vpow2.f32 %v8551_v19  ;;  %v12551_v32 = vld [vmem:[#allocation19_spill] sm:$0xff] }
 0x675   : > { %v6399_v47 = vsel %vm6396_vm12, %v6398_v60, %v6394_v55  ;;  %8792 = vrcp.f32 %v10950_v57  ;;  %vm6407_vm14 = vweird.f32 %v8789_v38  ;;  %v3491_v22 = vmul.f32 0.2, %v3104_v43 }
 0x676   : > { %v4653_v2 = vmul.f32 0.2, %v4228_v58  ;;  %vm4525_vm11 = vcmp.ge.f32.partialorder %v4228_v58, 0.0  ;;  %7971 = vst.msk [vmem:[%s10509_s21 + $0xc0] sm:$0xff] %vm7946_vm8, %v6399_v47  ;;  %v6403_v28 = vsub.f32 1.0, %v6402_v4  ;;  %vm6408_vm1 = vmor %vm6406_vm15, %vm6407_vm14  ;;  %v6427_v6 = vand.u32 2147483648, %v10950_v57 }
 0x677   : > { %v5084_v50 = vpop.xlane.xlu1 %5083  ;;  %v3107_v19 = vadd.f32 %v10807_v37, %v12551_v32  ;;  %vm6421_vm7 = vweird.f32 %v10950_v57  ;;  %v3619_v4 = vsel %vm3363_vm5, %v3104_v43, %v3491_v22 }
 0x678   : > { %8456 = vmatmul.msk.f32.gmra.mxu3 %vm1710_vm2, %v3617_v35  ;;  %v4781_v42 = vsel %vm4525_vm11, %v4228_v58, %v4653_v2  ;;  %v6404_v25 = vmul.f32 %v8789_v38, %v6403_v28  ;;  %v5414_v30 = vadd.f32 %v10743_v24, %v5084_v50  ;;  %v6425_v58 = vand.u32 2147483647, %v10950_v57 }
 0x679   : > { %v4913_v20 = vmul.f32 %v10902_v49, %v4781_v42  ;;  %v6428_v47 = vor.u32 1.1754944e-38, %v6427_v6  ;;  %vm3364_vm12 = vcmp.ge.f32.partialorder %v3107_v19, 0.0 }
 0x67a   : > { %v8791_v52 = vpop.eup %8790  ;;  %v6405_v61 = vadd.f32 %v8789_v38, %v6404_v25  ;;  %v8552_v48 = vmul.f32 -1.442695, %v5414_v30  ;;  %vm6426_vm11 = vcmp.eq.f32.partialorder %v6425_v58, 8.507059e+37 }
 0x67b   : > { %v4230_v18 = vpop.f32.mrf.mxu3  ;;  %v5127_v34 = vsel %vm528_vm0, %v4913_v20, 0.0  ;;  %v8793_v63 = vpop.eup %8792  ;;  %v10966_v27 = vadd.f32 1.0, %v8791_v52  ;;  %v3492_v20 = vmul.f32 0.2, %v3107_v19 }
 0x67c   : > { %v4231_v13 = vadd.f32 %v10926_v33, %v4230_v18  ;;  %5128 = vadd.xlane.f32.xlu1 %v5127_v34  ;;  %v6409_v26 = vsel %vm6408_vm1, %v8789_v38, %v6405_v61  ;;  %v6417_v17 = vmul.f32 %v8793_v63, %v10950_v57  ;;  %8794 = vpow2.f32 %v8552_v48 }
 0x67d   : > { %v6414_v53 = vsel %vm6411_vm4, %v6413_v5, %v6409_v26  ;;  %8796 = vrcp.f32 %v10966_v27  ;;  %vm6422_vm6 = vweird.f32 %v8793_v63  ;;  %v6442_v30 = vand.u32 2147483648, %v10966_v27  ;;  %v12552_v5 = vld [vmem:[#allocation20_spill] sm:$0xff] }
 0x67e   : > { %v4654_v0 = vmul.f32 0.2, %v4231_v13  ;;  %vm4526_vm3 = vcmp.ge.f32.partialorder %v4231_v13, 0.0  ;;  %7972 = vst.msk [vmem:[%s10509_s21 + $0xc8] sm:$0xff] %vm7946_vm8, %v6414_v53  ;;  %v6418_v31 = vsub.f32 1.0, %v6417_v17  ;;  %vm6423_vm9 = vmor %vm6421_vm7, %vm6422_vm6  ;;  %v3620_v48 = vsel %vm3364_vm12, %v3107_v19, %v3492_v20 }
 0x67f   : > { %v5087_v21 = vpop.xlane.xlu2 %5086  ;;  %vm6436_vm14 = vweird.f32 %v10966_v27  ;;  %v6443_v22 = vor.u32 1.1754944e-38, %v6442_v30 }
 0x680   : > { %8457 = vmatmul.msk.f32.gmra.mxu3 %vm1710_vm2, %v3618_v11  ;;  %v4782_v44 = vsel %vm4526_vm3, %v4231_v13, %v4654_v0  ;;  %v6419_v16 = vmul.f32 %v8793_v63, %v6418_v31  ;;  %v5415_v1 = vadd.f32 %v10743_v24, %v5087_v21  ;;  %v6440_v11 = vand.u32 2147483647, %v10966_v27 }
 0x681   : > { %v4914_v41 = vmul.f32 %v10902_v49, %v4782_v44  ;;  %v3110_v0 = vadd.f32 %v10807_v37, %v12552_v5 }
 0x682   : > { %v8795_v60 = vpop.eup %8794  ;;  %v6420_v2 = vadd.f32 %v8793_v63, %v6419_v16  ;;  %v8553_v55 = vmul.f32 -1.442695, %v5415_v1  ;;  %vm6441_vm3 = vcmp.eq.f32.partialorder %v6440_v11, 8.507059e+37 }
 0x683   : > { %v4233_v39 = vpop.f32.mrf.mxu3  ;;  %v5130_v38 = vsel %vm528_vm0, %v4914_v41, 0.0  ;;  %v8797_v10 = vpop.eup %8796  ;;  %v10982_v28 = vadd.f32 1.0, %v8795_v60  ;;  %vm3365_vm4 = vcmp.ge.f32.partialorder %v3110_v0, 0.0 }
 0x684   : > { %v4234_v35 = vadd.f32 %v10926_v33, %v4233_v39  ;;  %5131 = vadd.xlane.f32.xlu2 %v5130_v38  ;;  %v6424_v15 = vsel %vm6423_vm9, %v8793_v63, %v6420_v2  ;;  %v6432_v50 = vmul.f32 %v8797_v10, %v10966_v27  ;;  %8798 = vpow2.f32 %v8553_v55  ;;  %v12553_v2 = vld [vmem:[#allocation21_spill] sm:$0xff] }
 0x685   : > { %v6429_v25 = vsel %vm6426_vm11, %v6428_v47, %v6424_v15  ;;  %8800 = vrcp.f32 %v10982_v28  ;;  %vm6437_vm13 = vweird.f32 %v8797_v10  ;;  %v3493_v27 = vmul.f32 0.2, %v3110_v0 }
 0x686   : > { %v4655_v42 = vmul.f32 0.2, %v4234_v35  ;;  %vm4527_vm10 = vcmp.ge.f32.partialorder %v4234_v35, 0.0  ;;  %7973 = vst.msk [vmem:[%s10509_s21 + $0xd0] sm:$0xff] %vm7946_vm8, %v6429_v25  ;;  %v6433_v57 = vsub.f32 1.0, %v6432_v50  ;;  %vm6438_vm15 = vmor %vm6436_vm14, %vm6437_vm13  ;;  %v6457_v58 = vand.u32 2147483648, %v10982_v28 }
 0x687   : > { %v5090_v18 = vpop.xlane.xlu0 %5089  ;;  %v6455_v19 = vand.u32 2147483647, %v10982_v28  ;;  %v3113_v55 = vadd.f32 %v10807_v37, %v12553_v2  ;;  %vm6451_vm6 = vweird.f32 %v10982_v28  ;;  %v3621_v50 = vsel %vm3365_vm4, %v3110_v0, %v3493_v27 }
 0x688   : > { %8458 = vmatmul.msk.f32.gmra.mxu3 %vm1710_vm2, %v3619_v4  ;;  %v4783_v29 = vsel %vm4527_vm10, %v4234_v35, %v4655_v42  ;;  %v6434_v34 = vmul.f32 %v8797_v10, %v6433_v57  ;;  %v5416_v52 = vadd.f32 %v10743_v24, %v5090_v18  ;;  %v11008_v35 = vld [vmem:[#allocation2] ss:$0 sm:$0xff]  ;;  %v6458_v25 = vor.u32 1.1754944e-38, %v6457_v58 }
 0x689   : > { %v4915_v13 = vmul.f32 %v10902_v49, %v4783_v29  ;;  %vm6456_vm10 = vcmp.eq.f32.partialorder %v6455_v19, 8.507059e+37  ;;  %vm3366_vm11 = vcmp.ge.f32.partialorder %v3113_v55, 0.0 }
 0x68a   : > { %v8799_v63 = vpop.eup %8798  ;;  %v6435_v26 = vadd.f32 %v8797_v10, %v6434_v34  ;;  %v8554_v17 = vmul.f32 -1.442695, %v5416_v52 }
 0x68b   : > { %v4236_v59 = vpop.f32.mrf.mxu3  ;;  %v5133_v61 = vsel %vm528_vm0, %v4915_v13, 0.0  ;;  %v8801_v53 = vpop.eup %8800  ;;  %v10998_v24 = vadd.f32 1.0, %v8799_v63  ;;  %v3494_v13 = vmul.f32 0.2, %v3113_v55 }
 0x68c   : > { %v4237_v43 = vadd.f32 %v10926_v33, %v4236_v59  ;;  %5134 = vadd.xlane.f32.xlu0 %v5133_v61  ;;  %v6439_v44 = vsel %vm6438_vm15, %v8797_v10, %v6435_v26  ;;  %v6447_v6 = vmul.f32 %v8801_v53, %v10982_v28  ;;  %8802 = vpow2.f32 %v8554_v17 }
 0x68d   : > { %v6444_v21 = vsel %vm6441_vm3, %v6443_v22, %v6439_v44  ;;  %8804 = vrcp.f32 %v10998_v24  ;;  %vm6452_vm5 = vweird.f32 %v8801_v53  ;;  %v6472_v52 = vand.u32 2147483648, %v10998_v24  ;;  %v12554_v22 = vld [vmem:[#allocation22_spill] sm:$0xff] }
 0x68e   : > { %v4656_v31 = vmul.f32 0.2, %v4237_v43  ;;  %vm4528_vm1 = vcmp.ge.f32.partialorder %v4237_v43, 0.0  ;;  %7974 = vst.msk [vmem:[%s10509_s21 + $0xd8] sm:$0xff] %vm7946_vm8, %v6444_v21  ;;  %v6448_v41 = vsub.f32 1.0, %v6447_v6  ;;  %vm6453_vm7 = vmor %vm6451_vm6, %vm6452_vm5  ;;  %v3622_v17 = vsel %vm3366_vm11, %v3113_v55, %v3494_v13 }
 0x68f   : > { %v5093_v1 = vpop.xlane.xlu1 %5092  ;;  %vm6466_vm13 = vweird.f32 %v10998_v24  ;;  %v6473_v27 = vor.u32 1.1754944e-38, %v6472_v52 }
 0x690   : > { %8459 = vmatmul.msk.f32.gmra.mxu3 %vm1710_vm2, %v3620_v48  ;;  %v4784_v16 = vsel %vm4528_vm1, %v4237_v43, %v4656_v31  ;;  %v6449_v32 = vmul.f32 %v8801_v53, %v6448_v41  ;;  %v5417_v38 = vadd.f32 %v11008_v35, %v5093_v1  ;;  %v6470_v48 = vand.u32 2147483647, %v10998_v24 }
 0x691   : > { %v4916_v39 = vmul.f32 %v10902_v49, %v4784_v16  ;;  %v3116_v31 = vadd.f32 %v10807_v37, %v12554_v22 }
 0x692   : > { %v8803_v47 = vpop.eup %8802  ;;  %v6450_v42 = vadd.f32 %v8801_v53, %v6449_v32  ;;  %v8555_v15 = vmul.f32 -1.442695, %v5417_v38  ;;  %vm6471_vm1 = vcmp.eq.f32.partialorder %v6470_v48, 8.507059e+37 }
 0x693   : > { %v4239_v60 = vpop.f32.mrf.mxu3  ;;  %v5136_v10 = vsel %vm528_vm0, %v4916_v39, 0.0  ;;  %v8805_v20 = vpop.eup %8804  ;;  %v11017_v57 = vadd.f32 1.0, %v8803_v47  ;;  %vm3367_vm3 = vcmp.ge.f32.partialorder %v3116_v31, 0.0 }
 0x694   : > { %v4240_v4 = vadd.f32 %v10926_v33, %v4239_v60  ;;  %5137 = vadd.xlane.f32.xlu1 %v5136_v10  ;;  %v6454_v30 = vsel %vm6453_vm7, %v8801_v53, %v6450_v42  ;;  %v6462_v18 = vmul.f32 %v8805_v20, %v10998_v24  ;;  %8806 = vpow2.f32 %v8555_v15  ;;  %v12555_v42 = vld [vmem:[#allocation23_spill] sm:$0xff] }
 0x695   : > { %v6459_v34 = vsel %vm6456_vm10, %v6458_v25, %v6454_v30  ;;  %8808 = vrcp.f32 %v11017_v57  ;;  %vm6467_vm12 = vweird.f32 %v8805_v20  ;;  %v3495_v24 = vmul.f32 0.2, %v3116_v31 }
 0x696   : > { %v4657_v29 = vmul.f32 0.2, %v4240_v4  ;;  %vm4529_vm9 = vcmp.ge.f32.partialorder %v4240_v4, 0.0  ;;  %7975 = vst.msk [vmem:[%s10509_s21 + $0xe0] sm:$0xff] %vm7946_vm8, %v6459_v34  ;;  %v6463_v28 = vsub.f32 1.0, %v6462_v18  ;;  %vm6468_vm14 = vmor %vm6466_vm13, %vm6467_vm12  ;;  %v6487_v38 = vand.u32 2147483648, %v11017_v57 }
 0x697   : > { %v5096_v59 = vpop.xlane.xlu2 %5095  ;;  %v3119_v15 = vadd.f32 %v10807_v37, %v12555_v42  ;;  %vm6481_vm5 = vweird.f32 %v11017_v57  ;;  %v3623_v18 = vsel %vm3367_vm3, %v3116_v31, %v3495_v24 }
 0x698   : > { %8460 = vmatmul.msk.f32.gmra.mxu3 %vm1710_vm2, %v3621_v50  ;;  %v4785_v11 = vsel %vm4529_vm9, %v4240_v4, %v4657_v29  ;;  %v6464_v61 = vmul.f32 %v8805_v20, %v6463_v28  ;;  %v5418_v63 = vadd.f32 %v11008_v35, %v5096_v59  ;;  %v6485_v4 = vand.u32 2147483647, %v11017_v57 }
 0x699   : > { %v4917_v43 = vmul.f32 %v10902_v49, %v4785_v11  ;;  %v6488_v34 = vor.u32 1.1754944e-38, %v6487_v38  ;;  %v3496_v59 = vmul.f32 0.2, %v3119_v15  ;;  %vm3368_vm10 = vcmp.ge.f32.partialorder %v3119_v15, 0.0 }
 0x69a   : > { %v8807_v53 = vpop.eup %8806  ;;  %v6465_v44 = vadd.f32 %v8805_v20, %v6464_v61  ;;  %v8556_v6 = vmul.f32 -1.442695, %v5418_v63  ;;  %vm6486_vm9 = vcmp.eq.f32.partialorder %v6485_v4, 8.507059e+37 }
 0x69b   : > { %v4242_v5 = vpop.f32.mrf.mxu3  ;;  %v5139_v26 = vsel %vm528_vm0, %v4917_v43, 0.0  ;;  %v8809_v21 = vpop.eup %8808  ;;  %v11033_v41 = vadd.f32 1.0, %v8807_v53 }
 0x69c   : > { %v4243_v0 = vadd.f32 %v10926_v33, %v4242_v5  ;;  %5140 = vadd.xlane.f32.xlu2 %v5139_v26  ;;  %v6469_v58 = vsel %vm6468_vm14, %v8805_v20, %v6465_v44  ;;  %v6477_v1 = vmul.f32 %v8809_v21, %v11017_v57  ;;  %8810 = vpow2.f32 %v8556_v6 }
 0x69d   : > { %v6474_v39 = vsel %vm6471_vm1, %v6473_v27, %v6469_v58  ;;  %8812 = vrcp.f32 %v11033_v41  ;;  %vm6482_vm4 = vweird.f32 %v8809_v21  ;;  %v6502_v48 = vand.u32 2147483648, %v11033_v41  ;;  %v12556_v27 = vld [vmem:[#allocation24_spill] sm:$0xff] }
 0x69e   : > { %v4658_v16 = vmul.f32 0.2, %v4243_v0  ;;  %vm4530_vm15 = vcmp.ge.f32.partialorder %v4243_v0, 0.0  ;;  %7976 = vst.msk [vmem:[%s10509_s21 + $0xe8] sm:$0xff] %vm7946_vm8, %v6474_v39  ;;  %v6478_v32 = vsub.f32 1.0, %v6477_v1  ;;  %vm6483_vm6 = vmor %vm6481_vm5, %vm6482_vm4  ;;  %v3624_v44 = vsel %vm3368_vm10, %v3119_v15, %v3496_v59 }
 0x69f   : > { %v5099_v60 = vpop.xlane.xlu0 %5098  ;;  %v6500_v26 = vand.u32 2147483647, %v11033_v41  ;;  %vm6496_vm12 = vweird.f32 %v11033_v41  ;;  %v6503_v24 = vor.u32 1.1754944e-38, %v6502_v48 }
 0x6a0   : > { %8461 = vmatmul.msk.f32.gmra.mxu3 %vm1710_vm2, %v3622_v17  ;;  %v4786_v19 = vsel %vm4530_vm15, %v4243_v0, %v4658_v16  ;;  %v6479_v55 = vmul.f32 %v8809_v21, %v6478_v32  ;;  %v5419_v10 = vadd.f32 %v11008_v35, %v5099_v60 }
 0x6a1   : > { %v4918_v2 = vmul.f32 %v10902_v49, %v4786_v19  ;;  %vm6501_vm15 = vcmp.eq.f32.partialorder %v6500_v26, 8.507059e+37 }
 0x6a2   : > { %v8811_v25 = vpop.eup %8810  ;;  %v6480_v29 = vadd.f32 %v8809_v21, %v6479_v55  ;;  %v8557_v30 = vmul.f32 -1.442695, %v5419_v10 }
 0x6a3   : > { %v4245_v47 = vpop.f32.mrf.mxu3  ;;  %v5142_v20 = vsel %vm528_vm0, %v4918_v2, 0.0  ;;  %v8813_v13 = vpop.eup %8812  ;;  %v11049_v28 = vadd.f32 1.0, %v8811_v25 }
 0x6a4   : > { %v4246_v50 = vadd.f32 %v10926_v33, %v4245_v47  ;;  %5143 = vadd.xlane.f32.xlu0 %v5142_v20  ;;  %v6484_v37 = vsel %vm6483_vm6, %v8809_v21, %v6480_v29  ;;  %v6492_v52 = vmul.f32 %v8813_v13, %v11033_v41  ;;  %8814 = vpow2.f32 %v8557_v30  ;;  %v11065_v21 = vld [vmem:[%s12487_s6] ss:$0 sm:$0xff]  ;;  %v12557_v29 = vld [vmem:[#allocation25_spill] sm:$0xff] }
 0x6a5   : > { %v6489_v43 = vsel %vm6486_vm9, %v6488_v34, %v6484_v37  ;;  %8816 = vrcp.f32 %v11049_v28  ;;  %vm6497_vm11 = vweird.f32 %v8813_v13  ;;  %v3122_v16 = vadd.f32 %v11065_v21, %v12556_v27 }
 0x6a6   : > { %v4659_v11 = vmul.f32 0.2, %v4246_v50  ;;  %vm4531_vm7 = vcmp.ge.f32.partialorder %v4246_v50, 0.0  ;;  %7977 = vst.msk [vmem:[%s10509_s21 + $0xf0] sm:$0xff] %vm7946_vm8, %v6489_v43  ;;  %v6493_v57 = vsub.f32 1.0, %v6492_v52  ;;  %vm6498_vm13 = vmor %vm6496_vm12, %vm6497_vm11  ;;  %v6517_v55 = vand.u32 2147483648, %v11049_v28 }
 0x6a7   : > { %v5102_v63 = vpop.xlane.xlu1 %5101  ;;  %v3497_v47 = vmul.f32 0.2, %v3122_v16  ;;  %v6515_v20 = vand.u32 2147483647, %v11049_v28  ;;  %vm3369_vm3 = vcmp.ge.f32.partialorder %v3122_v16, 0.0  ;;  %v3125_v30 = vadd.f32 %v11065_v21, %v12557_v29 }
 0x6a8   : > { %8462 = vmatmul.msk.f32.gmra.mxu3 %vm1710_vm2, %v3623_v18  ;;  %v4787_v61 = vsel %vm4531_vm7, %v4246_v50, %v4659_v11  ;;  %v6494_v0 = vmul.f32 %v8813_v13, %v6493_v57  ;;  %v5420_v17 = vadd.f32 %v11008_v35, %v5102_v63  ;;  %vm6511_vm4 = vweird.f32 %v11049_v28 }
 0x6a9   : > { %v4919_v5 = vmul.f32 %v10902_v49, %v4787_v61  ;;  %v6518_v52 = vor.u32 1.1754944e-38, %v6517_v55  ;;  %vm6516_vm7 = vcmp.eq.f32.partialorder %v6515_v20, 8.507059e+37  ;;  %v3625_v63 = vsel %vm3369_vm3, %v3122_v16, %v3497_v47 }
 0x6aa   : > { %v8815_v6 = vpop.eup %8814  ;;  %v6495_v58 = vadd.f32 %v8813_v13, %v6494_v0  ;;  %v8558_v1 = vmul.f32 -1.442695, %v5420_v17  ;;  %vm3370_vm9 = vcmp.ge.f32.partialorder %v3125_v30, 0.0 }
 0x6ab   : > { %v4248_v53 = vpop.f32.mrf.mxu3  ;;  %v5145_v31 = vsel %vm528_vm0, %v4919_v5, 0.0  ;;  %v8817_v39 = vpop.eup %8816  ;;  %v11071_v32 = vadd.f32 1.0, %v8815_v6  ;;  %v3498_v5 = vmul.f32 0.2, %v3125_v30 }
 0x6ac   : > { %v4249_v22 = vadd.f32 %v10926_v33, %v4248_v53  ;;  %5146 = vadd.xlane.f32.xlu1 %v5145_v31  ;;  %v6499_v38 = vsel %vm6498_vm13, %v8813_v13, %v6495_v58  ;;  %v6507_v60 = vmul.f32 %v8817_v39, %v11049_v28  ;;  %8818 = vpow2.f32 %v8558_v1 }
 0x6ad   : > { %v6504_v2 = vsel %vm6501_vm15, %v6503_v24, %v6499_v38  ;;  %8820 = vrcp.f32 %v11071_v32  ;;  %vm6512_vm1 = vweird.f32 %v8817_v39  ;;  %v6530_v6 = vand.u32 2147483647, %v11071_v32 }
 0x6ae   : > { %v4660_v19 = vmul.f32 0.2, %v4249_v22  ;;  %vm4532_vm14 = vcmp.ge.f32.partialorder %v4249_v22, 0.0  ;;  %7978 = vst.msk [vmem:[%s10509_s21 + $0xf8] sm:$0xff] %vm7946_vm8, %v6504_v2  ;;  %v6508_v41 = vsub.f32 1.0, %v6507_v60  ;;  %vm6513_vm5 = vmor %vm6511_vm4, %vm6512_vm1  ;;  %v3626_v24 = vsel %vm3370_vm9, %v3125_v30, %v3498_v5  ;;  %v12558_v2 = vld [vmem:[#allocation26_spill] sm:$0xff] }
 0x6af   : > { %v5105_v4 = vpop.xlane.xlu2 %5104  ;;  %vm6526_vm11 = vweird.f32 %v11071_v32 }
 0x6b0   : > { %8463 = vmatmul.msk.f32.gmra.mxu3 %vm1710_vm2, %v3624_v44  ;;  %v4788_v10 = vsel %vm4532_vm14, %v4249_v22, %v4660_v19  ;;  %v5421_v42 = vadd.f32 %v11008_v35, %v5105_v4  ;;  %v6509_v50 = vmul.f32 %v8817_v39, %v6508_v41  ;;  %v6532_v22 = vand.u32 2147483648, %v11071_v32 }
 0x6b1   : > { %v4920_v15 = vmul.f32 %v10902_v49, %v4788_v10  ;;  %v3128_v41 = vadd.f32 %v11065_v21, %v12558_v2  ;;  %vm6531_vm14 = vcmp.eq.f32.partialorder %v6530_v6, 8.507059e+37 }
 0x6b2   : > { %v8559_v18 = vmul.f32 -1.442695, %v5421_v42  ;;  %v8819_v11 = vpop.eup %8818  ;;  %v6510_v37 = vadd.f32 %v8817_v39, %v6509_v50  ;;  %v6533_v55 = vor.u32 1.1754944e-38, %v6532_v22 }
 0x6b3   : > { %v4251_v25 = vpop.f32.mrf.mxu3  ;;  %v5148_v34 = vsel %vm528_vm0, %v4920_v15, 0.0  ;;  %v8821_v59 = vpop.eup %8820  ;;  %v11087_v43 = vadd.f32 1.0, %v8819_v11  ;;  %vm3371_vm15 = vcmp.ge.f32.partialorder %v3128_v41, 0.0 }
 0x6b4   : > { %v4252_v13 = vadd.f32 %v10926_v33, %v4251_v25  ;;  %5149 = vadd.xlane.f32.xlu2 %v5148_v34  ;;  %8822 = vpow2.f32 %v8559_v18  ;;  %v6514_v61 = vsel %vm6513_vm5, %v8817_v39, %v6510_v37  ;;  %v6522_v48 = vmul.f32 %v8821_v59, %v11071_v32 }
 0x6b5   : > { %v6519_v0 = vsel %vm6516_vm7, %v6518_v52, %v6514_v61  ;;  %8824 = vrcp.f32 %v11087_v43  ;;  %vm6527_vm10 = vweird.f32 %v8821_v59  ;;  %v3499_v25 = vmul.f32 0.2, %v3128_v41 }
 0x6b6   : > { %v4661_v57 = vmul.f32 0.2, %v4252_v13  ;;  %vm4533_vm6 = vcmp.ge.f32.partialorder %v4252_v13, 0.0  ;;  %7979 = vst.msk [vmem:[%s10509_s21 + $0x100] sm:$0xff] %vm7946_vm8, %v6519_v0  ;;  %v6523_v26 = vsub.f32 1.0, %v6522_v48  ;;  %vm6528_vm12 = vmor %vm6526_vm11, %vm6527_vm10  ;;  %v6547_v29 = vand.u32 2147483648, %v11087_v43 }
 0x6b7   : > { %v5108_v28 = vpop.xlane.xlu0 %5107  ;;  %v6545_v34 = vand.u32 2147483647, %v11087_v43  ;;  %vm6541_vm3 = vweird.f32 %v11087_v43  ;;  %v3627_v0 = vsel %vm3371_vm15, %v3128_v41, %v3499_v25 }
 0x6b8   : > { %8464 = vmatmul.msk.f32.gmra.mxu3 %vm1710_vm2, %v3625_v63  ;;  %v5422_v17 = vadd.f32 %v11008_v35, %v5108_v28  ;;  %v4789_v53 = vsel %vm4533_vm6, %v4252_v13, %v4661_v57  ;;  %v6524_v44 = vmul.f32 %v8821_v59, %v6523_v26  ;;  %v6548_v63 = vor.u32 1.1754944e-38, %v6547_v29  ;;  %v12559_v28 = vld [vmem:[#allocation27_spill] sm:$0xff] }
 0x6b9   : > { %v4921_v31 = vmul.f32 %v10902_v49, %v4789_v53  ;;  %v3131_v26 = vadd.f32 %v11065_v21, %v12559_v28  ;;  %vm6546_vm5 = vcmp.eq.f32.partialorder %v6545_v34, 8.507059e+37 }
 0x6ba   : > { %v8560_v27 = vmul.f32 -1.442695, %v5422_v17  ;;  %v8823_v58 = vpop.eup %8822  ;;  %v6525_v19 = vadd.f32 %v8821_v59, %v6524_v44 }
 0x6bb   : > { %v4254_v16 = vpop.f32.mrf.mxu3  ;;  %v5151_v39 = vsel %vm528_vm0, %v4921_v31, 0.0  ;;  %v11102_v38 = vadd.f32 1.0, %v8823_v58  ;;  %v8825_v60 = vpop.eup %8824  ;;  %vm3372_vm10 = vcmp.ge.f32.partialorder %v3131_v26, 0.0 }
 0x6bc   : > { %v4255_v1 = vadd.f32 %v10926_v33, %v4254_v16  ;;  %8826 = vpow2.f32 %v8560_v27  ;;  %5152 = vadd.xlane.f32.xlu0 %v5151_v39  ;;  %v6529_v10 = vsel %vm6528_vm12, %v8821_v59, %v6525_v19  ;;  %v6537_v47 = vmul.f32 %v8825_v60, %v11087_v43 }
 0x6bd   : > { %8828 = vrcp.f32 %v11102_v38  ;;  %v6534_v32 = vsel %vm6531_vm14, %v6533_v55, %v6529_v10  ;;  %vm6542_vm1 = vweird.f32 %v8825_v60  ;;  %v6562_v44 = vand.u32 2147483648, %v11102_v38 }
 0x6be   : > { %v4662_v4 = vmul.f32 0.2, %v4255_v1  ;;  %vm4534_vm13 = vcmp.ge.f32.partialorder %v4255_v1, 0.0  ;;  %7980 = vst.msk [vmem:[%s10509_s21 + $0x108] sm:$0xff] %vm7946_vm8, %v6534_v32  ;;  %v6538_v15 = vsub.f32 1.0, %v6537_v47  ;;  %vm6543_vm4 = vmor %vm6541_vm3, %vm6542_vm1  ;;  %vm6556_vm9 = vweird.f32 %v11102_v38 }
 0x6bf   : > { %v5111_v42 = vpop.xlane.xlu1 %5110  ;;  %v6560_v58 = vand.u32 2147483647, %v11102_v38  ;;  %v6563_v47 = vor.u32 1.1754944e-38, %v6562_v44 }
 0x6c0   : > { %8465 = vmatmul.msk.f32.gmra.mxu3 %vm1710_vm2, %v3626_v24  ;;  %v5423_v50 = vadd.f32 %v11008_v35, %v5111_v42  ;;  %v4790_v20 = vsel %vm4534_vm13, %v4255_v1, %v4662_v4  ;;  %v6539_v13 = vmul.f32 %v8825_v60, %v6538_v15  ;;  %v3500_v24 = vmul.f32 0.2, %v3131_v26  ;;  %v12560_v42 = vld [vmem:[#allocation28_spill] sm:$0xff] }
 0x6c1   : > { %v4922_v30 = vmul.f32 %v10902_v49, %v4790_v20  ;;  %vm6561_vm12 = vcmp.eq.f32.partialorder %v6560_v58, 8.507059e+37 }
 0x6c2   : > { %v8827_v18 = vpop.eup %8826  ;;  %v8561_v11 = vmul.f32 -1.442695, %v5423_v50  ;;  %v6540_v48 = vadd.f32 %v8825_v60, %v6539_v13  ;;  %v3628_v29 = vsel %vm3372_vm10, %v3131_v26, %v3500_v24 }
 0x6c3   : > { %v4257_v37 = vpop.f32.mrf.mxu3  ;;  %v11116_v52 = vadd.f32 1.0, %v8827_v18  ;;  %v5154_v57 = vsel %vm528_vm0, %v4922_v30, 0.0  ;;  %v8829_v61 = vpop.eup %8828 }
 0x6c4   : > { %v4258_v59 = vadd.f32 %v10926_v33, %v4257_v37  ;;  %8830 = vpow2.f32 %v8561_v11  ;;  %5155 = vadd.xlane.f32.xlu1 %v5154_v57  ;;  %v6552_v5 = vmul.f32 %v8829_v61, %v11102_v38  ;;  %v6544_v17 = vsel %vm6543_vm4, %v8825_v60, %v6540_v48 }
 0x6c5   : > { %8832 = vrcp.f32 %v11116_v52  ;;  %v6549_v22 = vsel %vm6546_vm5, %v6548_v63, %v6544_v17  ;;  %vm6557_vm7 = vweird.f32 %v8829_v61  ;;  %v3134_v38 = vadd.f32 %v11065_v21, %v12560_v42 }
 0x6c6   : > { %v4663_v53 = vmul.f32 0.2, %v4258_v59  ;;  %v6553_v31 = vsub.f32 1.0, %v6552_v5  ;;  %vm4535_vm6 = vcmp.ge.f32.partialorder %v4258_v59, 0.0  ;;  %7981 = vst.msk [vmem:[%s10509_s21 + $0x110] sm:$0xff] %vm7946_vm8, %v6549_v22  ;;  %vm6558_vm11 = vmor %vm6556_vm9, %vm6557_vm7  ;;  %v6577_v18 = vand.u32 2147483648, %v11116_v52 }
 0x6c7   : > { %v5114_v43 = vpop.xlane.xlu2 %5113  ;;  %v6575_v30 = vand.u32 2147483647, %v11116_v52  ;;  %vm6571_vm15 = vweird.f32 %v11116_v52  ;;  %vm3373_vm1 = vcmp.ge.f32.partialorder %v3134_v38, 0.0 }
 0x6c8   : > { %8466 = vmatmul.msk.f32.gmra.mxu3 %vm1710_vm2, %v3627_v0  ;;  %v5424_v6 = vadd.f32 %v11008_v35, %v5114_v43  ;;  %v4791_v27 = vsel %vm4535_vm6, %v4258_v59, %v4663_v53  ;;  %v6554_v16 = vmul.f32 %v8829_v61, %v6553_v31  ;;  %v3501_v59 = vmul.f32 0.2, %v3134_v38 }
 0x6c9   : > { %v4923_v1 = vmul.f32 %v10902_v49, %v4791_v27  ;;  %v6578_v28 = vor.u32 1.1754944e-38, %v6577_v18  ;;  %vm6576_vm4 = vcmp.eq.f32.partialorder %v6575_v30, 8.507059e+37 }
 0x6ca   : > { %v8831_v39 = vpop.eup %8830  ;;  %v8562_v19 = vmul.f32 -1.442695, %v5424_v6  ;;  %v6555_v41 = vadd.f32 %v8829_v61, %v6554_v16  ;;  %v3629_v27 = vsel %vm3373_vm1, %v3134_v38, %v3501_v59 }
 0x6cb   : > { %v4260_v60 = vpop.f32.mrf.mxu3  ;;  %v8833_v2 = vpop.eup %8832  ;;  %v11134_v55 = vadd.f32 1.0, %v8831_v39  ;;  %v5157_v10 = vsel %vm528_vm0, %v4923_v1, 0.0 }
 0x6cc   : > { %v4261_v4 = vadd.f32 %v10926_v33, %v4260_v60  ;;  %v6567_v32 = vmul.f32 %v8833_v2, %v11116_v52  ;;  %8834 = vpow2.f32 %v8562_v19  ;;  %5158 = vadd.xlane.f32.xlu2 %v5157_v10  ;;  %v6559_v15 = vsel %vm6558_vm11, %v8829_v61, %v6555_v41  ;;  %v12561_v52 = vld [vmem:[#allocation29_spill] sm:$0xff] }
 0x6cd   : > { %8836 = vrcp.f32 %v11134_v55  ;;  %v6564_v50 = vsel %vm6561_vm12, %v6563_v47, %v6559_v15  ;;  %vm6572_vm14 = vweird.f32 %v8833_v2  ;;  %v3137_v31 = vadd.f32 %v11065_v21, %v12561_v52 }
 0x6ce   : > { %v6568_v20 = vsub.f32 1.0, %v6567_v32  ;;  %v4664_v25 = vmul.f32 0.2, %v4261_v4  ;;  %7982 = vst.msk [vmem:[%s10509_s21 + $0x118] sm:$0xff] %vm7946_vm8, %v6564_v50  ;;  %vm4536_vm13 = vcmp.ge.f32.partialorder %v4261_v4, 0.0  ;;  %vm6573_vm3 = vmor %vm6571_vm15, %vm6572_vm14  ;;  %v6592_v58 = vand.u32 2147483648, %v11134_v55 }
 0x6cf   : > { %v5117_v13 = vpop.xlane.xlu0 %5116  ;;  %v6590_v16 = vand.u32 2147483647, %v11134_v55  ;;  %v3502_v60 = vmul.f32 0.2, %v3137_v31  ;;  %vm6586_vm7 = vweird.f32 %v11134_v55  ;;  %vm3374_vm9 = vcmp.ge.f32.partialorder %v3137_v31, 0.0 }
 0x6d0   : > { %8467 = vmatmul.msk.f32.gmra.mxu3 %vm1710_vm2, %v3628_v29  ;;  %v6569_v34 = vmul.f32 %v8833_v2, %v6568_v20  ;;  %v5425_v11 = vadd.f32 %v11008_v35, %v5117_v13  ;;  %v4792_v37 = vsel %vm4536_vm13, %v4261_v4, %v4664_v25  ;;  %v6593_v38 = vor.u32 1.1754944e-38, %v6592_v58 }
 0x6d1   : > { %v4924_v57 = vmul.f32 %v10902_v49, %v4792_v37  ;;  %vm6591_vm11 = vcmp.eq.f32.partialorder %v6590_v16, 8.507059e+37 }
 0x6d2   : > { %v8835_v61 = vpop.eup %8834  ;;  %v6570_v48 = vadd.f32 %v8833_v2, %v6569_v34  ;;  %v8563_v63 = vmul.f32 -1.442695, %v5425_v11 }
 0x6d3   : > { %v4263_v5 = vpop.f32.mrf.mxu3  ;;  %v8837_v0 = vpop.eup %8836  ;;  %v11151_v26 = vadd.f32 1.0, %v8835_v61  ;;  %v5160_v53 = vsel %vm528_vm0, %v4924_v57, 0.0 }
 0x6d4   : > { %v4264_v17 = vadd.f32 %v10926_v33, %v4263_v5  ;;  %v6574_v22 = vsel %vm6573_vm3, %v8833_v2, %v6570_v48  ;;  %v6582_v49 = vmul.f32 %v8837_v0, %v11134_v55  ;;  %8838 = vpow2.f32 %v8563_v63  ;;  %5161 = vadd.xlane.f32.xlu0 %v5160_v53  ;;  %v11169_v2 = vld [vmem:[%s12490_s9] ss:$0 sm:$0xff] }
 0x6d5   : > { %v6579_v43 = vsel %vm6576_vm4, %v6578_v28, %v6574_v22  ;;  %8840 = vrcp.f32 %v11151_v26  ;;  %vm6587_vm6 = vweird.f32 %v8837_v0  ;;  %v12562_v55 = vld [vmem:[#allocation30_spill] sm:$0xff]  ;;  %v6605_v11 = vand.u32 2147483647, %v11151_v26 }
 0x6d6   : > { %7983 = vst.msk [vmem:[%s10509_s21 + $0x120] sm:$0xff] %vm7946_vm8, %v6579_v43  ;;  %v6583_v44 = vsub.f32 1.0, %v6582_v49  ;;  %v4665_v6 = vmul.f32 0.2, %v4264_v17  ;;  %vm4537_vm5 = vcmp.ge.f32.partialorder %v4264_v17, 0.0  ;;  %vm6588_vm10 = vmor %vm6586_vm7, %vm6587_vm6  ;;  %v3140_v30 = vadd.f32 %v11065_v21, %v12562_v55 }
 0x6d7   : > { %v5120_v1 = vpop.xlane.xlu1 %5119  ;;  %v6607_v37 = vand.u32 2147483648, %v11151_v26  ;;  %vm6601_vm14 = vweird.f32 %v11151_v26  ;;  %vm6606_vm3 = vcmp.eq.f32.partialorder %v6605_v11, 8.507059e+37 }
 0x6d8   : > { %8468 = vmatmul.msk.f32.gmra.mxu3 %vm1710_vm2, %v3629_v27  ;;  %v6584_v39 = vmul.f32 %v8837_v0, %v6583_v44  ;;  %v5426_v24 = vadd.f32 %v11008_v35, %v5120_v1  ;;  %v4793_v19 = vsel %vm4537_vm5, %v4264_v17, %v4665_v6  ;;  %v3503_v63 = vmul.f32 0.2, %v3140_v30  ;;  %v12563_v27 = vld [vmem:[#allocation31_spill] sm:$0xff] }
 0x6d9   : > { %v4925_v41 = vmul.f32 %v11169_v2, %v4793_v19  ;;  %vm3375_vm15 = vcmp.ge.f32.partialorder %v3140_v30, 0.0  ;;  %v6608_v49 = vor.u32 1.1754944e-38, %v6607_v37  ;;  %v3143_v16 = vadd.f32 %v11065_v21, %v12563_v27 }
 0x6da   : > { %v8839_v4 = vpop.eup %8838  ;;  %v6585_v10 = vadd.f32 %v8837_v0, %v6584_v39  ;;  %v8564_v47 = vmul.f32 -1.442695, %v5426_v24  ;;  %v3631_v24 = vsel %vm3375_vm15, %v3140_v30, %v3503_v63 }
 0x6db   : > { %v4266_v32 = vpop.f32.mrf.mxu3  ;;  %v8841_v42 = vpop.eup %8840  ;;  %v11173_v15 = vadd.f32 1.0, %v8839_v4  ;;  %v5163_v20 = vsel %vm528_vm0, %v4925_v41, 0.0  ;;  %vm3376_vm7 = vcmp.ge.f32.partialorder %v3143_v16, 0.0 }
 0x6dc   : > { %v4267_v50 = vadd.f32 %v10926_v33, %v4266_v32  ;;  %v6589_v25 = vsel %vm6588_vm10, %v8837_v0, %v6585_v10  ;;  %v6597_v29 = vmul.f32 %v8841_v42, %v11151_v26  ;;  %8842 = vpow2.f32 %v8564_v47  ;;  %5164 = vadd.xlane.f32.xlu1 %v5163_v20 }
 0x6dd   : > { %v6594_v18 = vsel %vm6591_vm11, %v6593_v38, %v6589_v25  ;;  %8844 = vrcp.f32 %v11173_v15  ;;  %v3630_v33 = vsel %vm3374_vm9, %v3137_v31, %v3502_v60  ;;  %vm6602_vm13 = vweird.f32 %v8841_v42  ;;  %v11195_v31 = vld [vmem:[%s12489_s8] ss:$0 sm:$0xff] }
 0x6de   : > { %7984 = vst.msk [vmem:[%s10509_s21 + $0x128] sm:$0xff] %vm7946_vm8, %v6594_v18  ;;  %v6598_v13 = vsub.f32 1.0, %v6597_v29  ;;  %v4666_v34 = vmul.f32 0.2, %v4267_v50  ;;  %vm4538_vm12 = vcmp.ge.f32.partialorder %v4267_v50, 0.0  ;;  %vm6603_vm1 = vmor %vm6601_vm14, %vm6602_vm13  ;;  %v6622_v60 = vand.u32 2147483648, %v11173_v15 }
 0x6df   : > { %v5123_v59 = vpop.xlane.xlu2 %5122  ;;  %v6620_v19 = vand.u32 2147483647, %v11173_v15  ;;  %v3504_v32 = vmul.f32 0.2, %v3143_v16  ;;  %vm6616_vm6 = vweird.f32 %v11173_v15 }
 0x6e0   : > { %8469 = vmatmul.msk.f32.gmra.mxu3 %vm1710_vm2, %v3630_v33  ;;  %v6599_v57 = vmul.f32 %v8841_v42, %v6598_v13  ;;  %v5427_v61 = vadd.f32 %v11008_v35, %v5123_v59  ;;  %v4794_v48 = vsel %vm4538_vm12, %v4267_v50, %v4666_v34  ;;  %v6623_v55 = vor.u32 1.1754944e-38, %v6622_v60 }
 0x6e1   : > { %v4926_v5 = vmul.f32 %v11169_v2, %v4794_v48  ;;  %vm6621_vm10 = vcmp.eq.f32.partialorder %v6620_v19, 8.507059e+37 }
 0x6e2   : > { %v8843_v0 = vpop.eup %8842  ;;  %v6600_v28 = vadd.f32 %v8841_v42, %v6599_v57  ;;  %v8565_v17 = vmul.f32 -1.442695, %v5427_v61  ;;  %v3632_v61 = vsel %vm3376_vm7, %v3143_v16, %v3504_v32 }
 0x6e3   : > { %v4269_v53 = vpop.f32.mrf.mxu3  ;;  %v8845_v22 = vpop.eup %8844  ;;  %v11190_v52 = vadd.f32 1.0, %v8843_v0  ;;  %v5166_v44 = vsel %vm528_vm0, %v4926_v5, 0.0 }
 0x6e4   : > { %v4270_v43 = vadd.f32 %v11195_v31, %v4269_v53  ;;  %v6604_v6 = vsel %vm6603_vm1, %v8841_v42, %v6600_v28  ;;  %v6612_v26 = vmul.f32 %v8845_v22, %v11173_v15  ;;  %8846 = vpow2.f32 %v8565_v17  ;;  %5167 = vadd.xlane.f32.xlu2 %v5166_v44  ;;  %v12564_v15 = vld [vmem:[#allocation32_spill] sm:$0xff] }
 0x6e5   : > { %v6609_v58 = vsel %vm6606_vm3, %v6608_v49, %v6604_v6  ;;  %8848 = vrcp.f32 %v11190_v52  ;;  %vm6617_vm5 = vweird.f32 %v8845_v22  ;;  %v3146_v11 = vadd.f32 %v11065_v21, %v12564_v15 }
 0x6e6   : > { %7985 = vst.msk [vmem:[%s10509_s21 + $0x130] sm:$0xff] %vm7946_vm8, %v6609_v58  ;;  %v6613_v1 = vsub.f32 1.0, %v6612_v26  ;;  %v4667_v39 = vmul.f32 0.2, %v4270_v43  ;;  %vm4539_vm4 = vcmp.ge.f32.partialorder %v4270_v43, 0.0  ;;  %vm6618_vm9 = vmor %vm6616_vm6, %vm6617_vm5  ;;  %v6637_v63 = vand.u32 2147483648, %v11190_v52 }
 0x6e7   : > { %v5126_v41 = vpop.xlane.xlu0 %5125  ;;  %v6635_v48 = vand.u32 2147483647, %v11190_v52  ;;  %v3505_v53 = vmul.f32 0.2, %v3146_v11  ;;  %vm6631_vm13 = vweird.f32 %v11190_v52  ;;  %vm3377_vm14 = vcmp.ge.f32.partialorder %v3146_v11, 0.0 }
 0x6e8   : > { %8470 = vmatmul.msk.f32.gmra.mxu3 %vm1710_vm2, %v3631_v24  ;;  %v6614_v4 = vmul.f32 %v8845_v22, %v6613_v1  ;;  %v5428_v10 = vadd.f32 %v11008_v35, %v5126_v41  ;;  %v4795_v47 = vsel %vm4539_vm4, %v4270_v43, %v4667_v39  ;;  %v6638_v27 = vor.u32 1.1754944e-38, %v6637_v63 }
 0x6e9   : > { %v4927_v42 = vmul.f32 %v11169_v2, %v4795_v47  ;;  %vm6636_vm1 = vcmp.eq.f32.partialorder %v6635_v48, 8.507059e+37 }
 0x6ea   : > { %v8847_v38 = vpop.eup %8846  ;;  %v6615_v50 = vadd.f32 %v8845_v22, %v6614_v4  ;;  %v8566_v20 = vmul.f32 -1.442695, %v5428_v10  ;;  %v3633_v10 = vsel %vm3377_vm14, %v3146_v11, %v3505_v53 }
 0x6eb   : > { %v4272_v25 = vpop.f32.mrf.mxu3  ;;  %v8849_v29 = vpop.eup %8848  ;;  %v11212_v30 = vadd.f32 1.0, %v8847_v38  ;;  %v5169_v13 = vsel %vm528_vm0, %v4927_v42, 0.0 }
 0x6ec   : > { %v4273_v18 = vadd.f32 %v11195_v31, %v4272_v25  ;;  %v6619_v34 = vsel %vm6618_vm9, %v8845_v22, %v6615_v50  ;;  %v6627_v33 = vmul.f32 %v8849_v29, %v11190_v52  ;;  %8850 = vpow2.f32 %v8566_v20  ;;  %5170 = vadd.xlane.f32.xlu0 %v5169_v13  ;;  %v12565_v52 = vld [vmem:[#allocation33_spill] sm:$0xff] }
 0x6ed   : > { %v6624_v37 = vsel %vm6621_vm10, %v6623_v55, %v6619_v34  ;;  %8852 = vrcp.f32 %v11212_v30  ;;  %vm6632_vm12 = vweird.f32 %v8849_v29  ;;  %v3149_v19 = vadd.f32 %v11065_v21, %v12565_v52 }
 0x6ee   : > { %7986 = vst.msk [vmem:[%s10509_s21 + $0x138] sm:$0xff] %vm7946_vm8, %v6624_v37  ;;  %v6628_v59 = vsub.f32 1.0, %v6627_v33  ;;  %v4668_v57 = vmul.f32 0.2, %v4273_v18  ;;  %vm4540_vm11 = vcmp.ge.f32.partialorder %v4273_v18, 0.0  ;;  %vm6633_vm15 = vmor %vm6631_vm13, %vm6632_vm12  ;;  %v6652_v32 = vand.u32 2147483648, %v11212_v30 }
 0x6ef   : > { %v5129_v5 = vpop.xlane.xlu1 %5128  ;;  %v6650_v47 = vand.u32 2147483647, %v11212_v30  ;;  %v3506_v25 = vmul.f32 0.2, %v3149_v19  ;;  %vm6646_vm5 = vweird.f32 %v11212_v30  ;;  %vm3378_vm6 = vcmp.ge.f32.partialorder %v3149_v19, 0.0 }
 0x6f0   : > { %8471 = vmatmul.msk.f32.gmra.mxu3 %vm1710_vm2, %v3632_v61  ;;  %v6629_v0 = vmul.f32 %v8849_v29, %v6628_v59  ;;  %v5429_v28 = vadd.f32 %v11008_v35, %v5129_v5  ;;  %v4796_v17 = vsel %vm4540_vm11, %v4273_v18, %v4668_v57  ;;  %v6653_v15 = vor.u32 1.1754944e-38, %v6652_v32 }
 0x6f1   : > { %v4928_v22 = vmul.f32 %v11169_v2, %v4796_v17  ;;  %vm6651_vm9 = vcmp.eq.f32.partialorder %v6650_v47, 8.507059e+37 }
 0x6f2   : > { %v8851_v49 = vpop.eup %8850  ;;  %v6630_v43 = vadd.f32 %v8849_v29, %v6629_v0  ;;  %v8567_v44 = vmul.f32 -1.442695, %v5429_v28  ;;  %v3634_v0 = vsel %vm3378_vm6, %v3149_v19, %v3506_v25  ;;  %v11277_v25 = vld [vmem:[#allocation2] ss:$0 sm:$0xff] }
 0x6f3   : > { %v4275_v6 = vpop.f32.mrf.mxu3  ;;  %v8853_v26 = vpop.eup %8852  ;;  %v11229_v16 = vadd.f32 1.0, %v8851_v49  ;;  %v5172_v1 = vsel %vm528_vm0, %v4928_v22, 0.0 }
 0x6f4   : > { %v4276_v58 = vadd.f32 %v11195_v31, %v4275_v6  ;;  %v6634_v39 = vsel %vm6633_vm15, %v8849_v29, %v6630_v43  ;;  %v6642_v24 = vmul.f32 %v8853_v26, %v11212_v30  ;;  %8854 = vpow2.f32 %v8567_v44  ;;  %5173 = vadd.xlane.f32.xlu1 %v5172_v1 }
 0x6f5   : > { %v6639_v60 = vsel %vm6636_vm1, %v6638_v27, %v6634_v39  ;;  %8856 = vrcp.f32 %v11229_v16  ;;  %vm6647_vm4 = vweird.f32 %v8853_v26  ;;  %v3152_v30 = vadd.f32 %v11065_v21, %v10173_v46 }
 0x6f6   : > { %7987 = vst.msk [vmem:[%s10509_s21 + $0x140] sm:$0xff] %vm7946_vm8, %v6639_v60  ;;  %v6643_v41 = vsub.f32 1.0, %v6642_v24  ;;  %v4669_v4 = vmul.f32 0.2, %v4276_v58  ;;  %vm4541_vm3 = vcmp.ge.f32.partialorder %v4276_v58, 0.0  ;;  %vm6648_vm7 = vmor %vm6646_vm5, %vm6647_vm4  ;;  %v6667_v17 = vand.u32 2147483648, %v11229_v16 }
 0x6f7   : > { %v5132_v42 = vpop.xlane.xlu2 %5131  ;;  %v6665_v28 = vand.u32 2147483647, %v11229_v16  ;;  %v3507_v43 = vmul.f32 0.2, %v3152_v30  ;;  %vm6661_vm12 = vweird.f32 %v11229_v16  ;;  %vm3379_vm13 = vcmp.ge.f32.partialorder %v3152_v30, 0.0 }
 0x6f8   : > { %8472 = vmatmul.msk.f32.gmra.mxu3 %vm1710_vm2, %v3633_v10  ;;  %v6644_v38 = vmul.f32 %v8853_v26, %v6643_v41  ;;  %v5430_v50 = vadd.f32 %v11008_v35, %v5132_v42  ;;  %v4797_v20 = vsel %vm4541_vm3, %v4276_v58, %v4669_v4  ;;  %v6668_v39 = vor.u32 1.1754944e-38, %v6667_v17 }
 0x6f9   : > { %v4929_v29 = vmul.f32 %v11169_v2, %v4797_v20  ;;  %vm6666_vm15 = vcmp.eq.f32.partialorder %v6665_v28, 8.507059e+37  ;;  %v3635_v32 = vsel %vm3379_vm13, %v3152_v30, %v3507_v43 }
 0x6fa   : > { %v8855_v55 = vpop.eup %8854  ;;  %v6645_v18 = vadd.f32 %v8853_v26, %v6644_v38  ;;  %v8568_v13 = vmul.f32 -1.442695, %v5430_v50 }
 0x6fb   : > { %v4278_v34 = vpop.f32.mrf.mxu3  ;;  %v8857_v33 = vpop.eup %8856  ;;  %v11246_v11 = vadd.f32 1.0, %v8855_v55  ;;  %v5175_v59 = vsel %vm528_vm0, %v4929_v29, 0.0 }
 0x6fc   : > { %v4279_v37 = vadd.f32 %v11195_v31, %v4278_v34  ;;  %v6649_v57 = vsel %vm6648_vm7, %v8853_v26, %v6645_v18  ;;  %v6657_v61 = vmul.f32 %v8857_v33, %v11229_v16  ;;  %8858 = vpow2.f32 %v8568_v13  ;;  %5176 = vadd.xlane.f32.xlu2 %v5175_v59  ;;  %v12566_v16 = vld [vmem:[#allocation34_spill] sm:$0xff] }
 0x6fd   : > { %v6654_v48 = vsel %vm6651_vm9, %v6653_v15, %v6649_v57  ;;  %8860 = vrcp.f32 %v11246_v11  ;;  %vm6662_vm11 = vweird.f32 %v8857_v33  ;;  %v3155_v41 = vadd.f32 %v11065_v21, %v12566_v16 }
 0x6fe   : > { %7988 = vst.msk [vmem:[%s10509_s21 + $0x148] sm:$0xff] %vm7946_vm8, %v6654_v48  ;;  %v6658_v63 = vsub.f32 1.0, %v6657_v61  ;;  %v4670_v5 = vmul.f32 0.2, %v4279_v37  ;;  %vm4542_vm10 = vcmp.ge.f32.partialorder %v4279_v37, 0.0  ;;  %vm6663_vm14 = vmor %vm6661_vm12, %vm6662_vm11  ;;  %v6682_v38 = vand.u32 2147483648, %v11246_v11 }
 0x6ff   : > { %v5135_v53 = vpop.xlane.xlu0 %5134  ;;  %v6680_v42 = vand.u32 2147483647, %v11246_v11  ;;  %v3508_v18 = vmul.f32 0.2, %v3155_v41  ;;  %vm6676_vm4 = vweird.f32 %v11246_v11  ;;  %vm3380_vm5 = vcmp.ge.f32.partialorder %v3155_v41, 0.0 }
 0x700   : > { %8473 = vmatmul.msk.f32.gmra.mxu3 %vm1710_vm2, %v3634_v0  ;;  %v6659_v22 = vmul.f32 %v8857_v33, %v6658_v63  ;;  %v5431_v46 = vadd.f32 %v11008_v35, %v5135_v53  ;;  %v4798_v49 = vsel %vm4542_vm10, %v4279_v37, %v4670_v5  ;;  %v6683_v57 = vor.u32 1.1754944e-38, %v6682_v38 }
 0x701   : > { %v4930_v44 = vmul.f32 %v11169_v2, %v4798_v49  ;;  %vm6681_vm7 = vcmp.eq.f32.partialorder %v6680_v42, 8.507059e+37 }
 0x702   : > { %v8859_v6 = vpop.eup %8858  ;;  %v6660_v26 = vadd.f32 %v8857_v33, %v6659_v22  ;;  %v8569_v27 = vmul.f32 -1.442695, %v5431_v46  ;;  %v3636_v22 = vsel %vm3380_vm5, %v3155_v41, %v3508_v18 }
 0x703   : > { %v4281_v58 = vpop.f32.mrf.mxu3  ;;  %v8861_v1 = vpop.eup %8860  ;;  %v11263_v24 = vadd.f32 1.0, %v8859_v6  ;;  %v5178_v35 = vsel %vm528_vm0, %v4930_v44, 0.0 }
 0x704   : > { %v4282_v52 = vadd.f32 %v11195_v31, %v4281_v58  ;;  %v6664_v19 = vsel %vm6663_vm14, %v8857_v33, %v6660_v26  ;;  %v6672_v60 = vmul.f32 %v8861_v1, %v11246_v11  ;;  %8862 = vpow2.f32 %v8569_v27  ;;  %5179 = vadd.xlane.f32.xlu0 %v5178_v35  ;;  %v12567_v11 = vld [vmem:[#allocation35_spill] sm:$0xff] }
 0x705   : > { %v6669_v4 = vsel %vm6666_vm15, %v6668_v39, %v6664_v19  ;;  %8864 = vrcp.f32 %v11263_v24  ;;  %vm6677_vm3 = vweird.f32 %v8861_v1  ;;  %v3158_v0 = vadd.f32 %v11065_v21, %v12567_v11 }
 0x706   : > { %7989 = vst.msk [vmem:[%s10509_s21 + $0x150] sm:$0xff] %vm7946_vm8, %v6669_v4  ;;  %v6673_v10 = vsub.f32 1.0, %v6672_v60  ;;  %v4671_v47 = vmul.f32 0.2, %v4282_v52  ;;  %vm4543_vm1 = vcmp.ge.f32.partialorder %v4282_v52, 0.0  ;;  %vm6678_vm6 = vmor %vm6676_vm4, %vm6677_vm3  ;;  %v6697_v49 = vand.u32 2147483648, %v11263_v24 }
 0x707   : > { %v5138_v50 = vpop.xlane.xlu1 %5137  ;;  %v6695_v46 = vand.u32 2147483647, %v11263_v24  ;;  %v3509_v27 = vmul.f32 0.2, %v3158_v0  ;;  %vm6691_vm11 = vweird.f32 %v11263_v24  ;;  %vm3381_vm12 = vcmp.ge.f32.partialorder %v3158_v0, 0.0 }
 0x708   : > { %8474 = vmatmul.msk.f32.gmra.mxu3 %vm1710_vm2, %v3635_v32  ;;  %v6674_v20 = vmul.f32 %v8861_v1, %v6673_v10  ;;  %v5432_v29 = vadd.f32 %v11277_v25, %v5138_v50  ;;  %v4799_v55 = vsel %vm4543_vm1, %v4282_v52, %v4671_v47  ;;  %v6698_v60 = vor.u32 1.1754944e-38, %v6697_v49 }
 0x709   : > { %v4931_v13 = vmul.f32 %v11169_v2, %v4799_v55  ;;  %vm6696_vm14 = vcmp.eq.f32.partialorder %v6695_v46, 8.507059e+37 }
 0x70a   : > { %v8863_v34 = vpop.eup %8862  ;;  %v6675_v33 = vadd.f32 %v8861_v1, %v6674_v20  ;;  %v8570_v15 = vmul.f32 -1.442695, %v5432_v29  ;;  %v3637_v20 = vsel %vm3381_vm12, %v3158_v0, %v3509_v27 }
 0x70b   : > { %v4284_v37 = vpop.f32.mrf.mxu3  ;;  %v8865_v59 = vpop.eup %8864  ;;  %v11282_v61 = vadd.f32 1.0, %v8863_v34  ;;  %v5181_v48 = vsel %vm528_vm0, %v4931_v13, 0.0 }
 0x70c   : > { %v4285_v30 = vadd.f32 %v11195_v31, %v4284_v37  ;;  %v6679_v63 = vsel %vm6678_vm6, %v8861_v1, %v6675_v33  ;;  %v6687_v5 = vmul.f32 %v8865_v59, %v11263_v24  ;;  %8866 = vpow2.f32 %v8570_v15  ;;  %5182 = vadd.xlane.f32.xlu1 %v5181_v48  ;;  %v12568_v24 = vld [vmem:[#allocation36_spill] sm:$0xff] }
 0x70d   : > { %v6684_v28 = vsel %vm6681_vm7, %v6683_v57, %v6679_v63  ;;  %8868 = vrcp.f32 %v11282_v61  ;;  %vm6692_vm10 = vweird.f32 %v8865_v59  ;;  %v3161_v32 = vadd.f32 %v11065_v21, %v12568_v24 }
 0x70e   : > { %7990 = vst.msk [vmem:[%s10509_s21 + $0x158] sm:$0xff] %vm7946_vm8, %v6684_v28  ;;  %v6688_v17 = vsub.f32 1.0, %v6687_v5  ;;  %v4672_v53 = vmul.f32 0.2, %v4285_v30  ;;  %vm4544_vm9 = vcmp.ge.f32.partialorder %v4285_v30, 0.0  ;;  %vm6693_vm13 = vmor %vm6691_vm11, %vm6692_vm10  ;;  %v6712_v55 = vand.u32 2147483648, %v11282_v61 }
 0x70f   : > { %v5141_v43 = vpop.xlane.xlu2 %5140  ;;  %v6710_v29 = vand.u32 2147483647, %v11282_v61  ;;  %v3510_v15 = vmul.f32 0.2, %v3161_v32  ;;  %vm6706_vm3 = vweird.f32 %v11282_v61  ;;  %vm3382_vm4 = vcmp.ge.f32.partialorder %v3161_v32, 0.0 }
 0x710   : > { %8475 = vmatmul.msk.f32.gmra.mxu3 %vm1710_vm2, %v3636_v22  ;;  %v6689_v44 = vmul.f32 %v8865_v59, %v6688_v17  ;;  %v5433_v6 = vadd.f32 %v11277_v25, %v5141_v43  ;;  %v4800_v26 = vsel %vm4544_vm9, %v4285_v30, %v4672_v53  ;;  %v6713_v5 = vor.u32 1.1754944e-38, %v6712_v55 }
 0x711   : > { %v4932_v58 = vmul.f32 %v11169_v2, %v4800_v26  ;;  %vm6711_vm6 = vcmp.eq.f32.partialorder %v6710_v29, 8.507059e+37 }
 0x712   : > { %v8867_v1 = vpop.eup %8866  ;;  %v6690_v39 = vadd.f32 %v8865_v59, %v6689_v44  ;;  %v8571_v52 = vmul.f32 -1.442695, %v5433_v6  ;;  %v3638_v44 = vsel %vm3382_vm4, %v3161_v32, %v3510_v15 }
 0x713   : > { %v4287_v35 = vpop.f32.mrf.mxu3  ;;  %v8869_v19 = vpop.eup %8868  ;;  %v11299_v16 = vadd.f32 1.0, %v8867_v1  ;;  %v5184_v4 = vsel %vm528_vm0, %v4932_v58, 0.0 }
 0x714   : > { %v4288_v41 = vadd.f32 %v11195_v31, %v4287_v35  ;;  %v6694_v10 = vsel %vm6693_vm13, %v8865_v59, %v6690_v39  ;;  %v6702_v47 = vmul.f32 %v8869_v19, %v11282_v61  ;;  %8870 = vpow2.f32 %v8571_v52  ;;  %5185 = vadd.xlane.f32.xlu2 %v5184_v4  ;;  %v12569_v61 = vld [vmem:[#allocation37_spill] sm:$0xff] }
 0x715   : > { %v6699_v42 = vsel %vm6696_vm14, %v6698_v60, %v6694_v10  ;;  %8872 = vrcp.f32 %v11299_v16  ;;  %vm6707_vm1 = vweird.f32 %v8869_v19  ;;  %v3164_v22 = vadd.f32 %v11065_v21, %v12569_v61 }
 0x716   : > { %7991 = vst.msk [vmem:[%s10509_s21 + $0x160] sm:$0xff] %vm7946_vm8, %v6699_v42  ;;  %v6703_v38 = vsub.f32 1.0, %v6702_v47  ;;  %v4673_v50 = vmul.f32 0.2, %v4288_v41  ;;  %vm4545_vm15 = vcmp.ge.f32.partialorder %v4288_v41, 0.0  ;;  %vm6708_vm5 = vmor %vm6706_vm3, %vm6707_vm1  ;;  %v6727_v26 = vand.u32 2147483648, %v11299_v16 }
 0x717   : > { %v5144_v18 = vpop.xlane.xlu0 %5143  ;;  %v6725_v6 = vand.u32 2147483647, %v11299_v16  ;;  %v3511_v39 = vmul.f32 0.2, %v3164_v22  ;;  %vm6721_vm10 = vweird.f32 %v11299_v16  ;;  %vm3383_vm11 = vcmp.ge.f32.partialorder %v3164_v22, 0.0 }
 0x718   : > { %8476 = vmatmul.msk.f32.gmra.mxu3 %vm1710_vm2, %v3637_v20  ;;  %v6704_v13 = vmul.f32 %v8869_v19, %v6703_v38  ;;  %v5434_v34 = vadd.f32 %v11277_v25, %v5144_v18  ;;  %v4801_v33 = vsel %vm4545_vm15, %v4288_v41, %v4673_v50  ;;  %v6728_v10 = vor.u32 1.1754944e-38, %v6727_v26  ;;  %v12570_v50 = vld [vmem:[#allocation38_spill] sm:$0xff] }
 0x719   : > { %v4933_v37 = vmul.f32 %v11169_v2, %v4801_v33  ;;  %vm6726_vm13 = vcmp.eq.f32.partialorder %v6725_v6, 8.507059e+37 }
 0x71a   : > { %v8871_v59 = vpop.eup %8870  ;;  %v6705_v57 = vadd.f32 %v8869_v19, %v6704_v13  ;;  %v8572_v30 = vmul.f32 -1.442695, %v5434_v34  ;;  %v3639_v13 = vsel %vm3383_vm11, %v3164_v22, %v3511_v39 }
 0x71b   : > { %v4290_v48 = vpop.f32.mrf.mxu3  ;;  %v8873_v63 = vpop.eup %8872  ;;  %v11316_v11 = vadd.f32 1.0, %v8871_v59  ;;  %v5187_v28 = vsel %vm528_vm0, %v4933_v37, 0.0 }
 0x71c   : > { %v4291_v0 = vadd.f32 %v11195_v31, %v4290_v48  ;;  %v6709_v17 = vsel %vm6708_vm5, %v8869_v19, %v6705_v57  ;;  %v6717_v53 = vmul.f32 %v8873_v63, %v11299_v16  ;;  %8874 = vpow2.f32 %v8572_v30  ;;  %5188 = vadd.xlane.f32.xlu0 %v5187_v28  ;;  %v11341_v16 = vld [vmem:[%s12487_s6] ss:$0 sm:$0xff] }
 0x71d   : > { %v6714_v46 = vsel %vm6711_vm6, %v6713_v5, %v6709_v17  ;;  %8876 = vrcp.f32 %v11316_v11  ;;  %vm6722_vm9 = vweird.f32 %v8873_v63  ;;  %v3167_v20 = vadd.f32 %v11341_v16, %v12570_v50 }
 0x71e   : > { %7992 = vst.msk [vmem:[%s10509_s21 + $0x168] sm:$0xff] %vm7946_vm8, %v6714_v46  ;;  %v6718_v49 = vsub.f32 1.0, %v6717_v53  ;;  %v4674_v43 = vmul.f32 0.2, %v4291_v0  ;;  %vm4546_vm7 = vcmp.ge.f32.partialorder %v4291_v0, 0.0  ;;  %vm6723_vm12 = vmor %vm6721_vm10, %vm6722_vm9  ;;  %v6742_v33 = vand.u32 2147483648, %v11316_v11 }
 0x71f   : > { %v5147_v27 = vpop.xlane.xlu1 %5146  ;;  %v6740_v34 = vand.u32 2147483647, %v11316_v11  ;;  %v3512_v30 = vmul.f32 0.2, %v3167_v20  ;;  %vm6736_vm1 = vweird.f32 %v11316_v11  ;;  %vm3384_vm3 = vcmp.ge.f32.partialorder %v3167_v20, 0.0 }
 0x720   : > { %8477 = vmatmul.msk.f32.gmra.mxu3 %vm1710_vm2, %v3638_v44  ;;  %v6719_v58 = vmul.f32 %v8873_v63, %v6718_v49  ;;  %v5435_v21 = vadd.f32 %v11277_v25, %v5147_v27  ;;  %v4802_v1 = vsel %vm4546_vm7, %v4291_v0, %v4674_v43  ;;  %v6743_v53 = vor.u32 1.1754944e-38, %v6742_v33 }
 0x721   : > { %v4934_v52 = vmul.f32 %v11169_v2, %v4802_v1  ;;  %vm6741_vm5 = vcmp.eq.f32.partialorder %v6740_v34, 8.507059e+37 }
 0x722   : > { %v8875_v35 = vpop.eup %8874  ;;  %v6720_v19 = vadd.f32 %v8873_v63, %v6719_v58  ;;  %v8573_v60 = vmul.f32 -1.442695, %v5435_v21  ;;  %v3640_v58 = vsel %vm3384_vm3, %v3167_v20, %v3512_v30 }
 0x723   : > { %v4293_v41 = vpop.f32.mrf.mxu3  ;;  %v8877_v4 = vpop.eup %8876  ;;  %v11333_v47 = vadd.f32 1.0, %v8875_v35  ;;  %v5190_v32 = vsel %vm528_vm0, %v4934_v52, 0.0 }
 0x724   : > { %v4294_v24 = vadd.f32 %v11195_v31, %v4293_v41  ;;  %v6724_v42 = vsel %vm6723_vm12, %v8873_v63, %v6720_v19  ;;  %v6732_v38 = vmul.f32 %v8877_v4, %v11316_v11  ;;  %8878 = vpow2.f32 %v8573_v60  ;;  %5191 = vadd.xlane.f32.xlu1 %v5190_v32  ;;  %v12571_v11 = vld [vmem:[#allocation39_spill] sm:$0xff] }
 0x725   : > { %v6729_v29 = vsel %vm6726_vm13, %v6728_v10, %v6724_v42  ;;  %8880 = vrcp.f32 %v11333_v47  ;;  %vm6737_vm15 = vweird.f32 %v8877_v4  ;;  %v3170_v44 = vadd.f32 %v11341_v16, %v12571_v11 }
 0x726   : > { %7993 = vst.msk [vmem:[%s10509_s21 + $0x170] sm:$0xff] %vm7946_vm8, %v6729_v29  ;;  %v6733_v55 = vsub.f32 1.0, %v6732_v38  ;;  %v4675_v18 = vmul.f32 0.2, %v4294_v24  ;;  %vm4547_vm14 = vcmp.ge.f32.partialorder %v4294_v24, 0.0  ;;  %vm6738_vm4 = vmor %vm6736_vm1, %vm6737_vm15  ;;  %v6757_v1 = vand.u32 2147483648, %v11333_v47 }
 0x727   : > { %v5150_v15 = vpop.xlane.xlu2 %5149  ;;  %v6755_v21 = vand.u32 2147483647, %v11333_v47  ;;  %v3513_v60 = vmul.f32 0.2, %v3170_v44  ;;  %vm6751_vm9 = vweird.f32 %v11333_v47  ;;  %vm3385_vm10 = vcmp.ge.f32.partialorder %v3170_v44, 0.0 }
 0x728   : > { %8478 = vmatmul.msk.f32.gmra.mxu3 %vm1710_vm2, %v3639_v13  ;;  %v6734_v37 = vmul.f32 %v8877_v4, %v6733_v55  ;;  %v5436_v59 = vadd.f32 %v11277_v25, %v5150_v15  ;;  %v4803_v57 = vsel %vm4547_vm14, %v4294_v24, %v4675_v18  ;;  %v6758_v38 = vor.u32 1.1754944e-38, %v6757_v1 }
 0x729   : > { %v4935_v48 = vmul.f32 %v11169_v2, %v4803_v57  ;;  %vm6756_vm12 = vcmp.eq.f32.partialorder %v6755_v21, 8.507059e+37 }
 0x72a   : > { %v8879_v63 = vpop.eup %8878  ;;  %v6735_v5 = vadd.f32 %v8877_v4, %v6734_v37  ;;  %v8574_v0 = vmul.f32 -1.442695, %v5436_v59  ;;  %v3641_v37 = vsel %vm3385_vm10, %v3170_v44, %v3513_v60 }
 0x72b   : > { %v4296_v28 = vpop.f32.mrf.mxu3  ;;  %v8881_v17 = vpop.eup %8880  ;;  %v11355_v61 = vadd.f32 1.0, %v8879_v63  ;;  %v5193_v46 = vsel %vm528_vm0, %v4935_v48, 0.0 }
 0x72c   : > { %v4297_v22 = vadd.f32 %v11195_v31, %v4296_v28  ;;  %v6739_v49 = vsel %vm6738_vm4, %v8877_v4, %v6735_v5  ;;  %v6747_v43 = vmul.f32 %v8881_v17, %v11333_v47  ;;  %8882 = vpow2.f32 %v8574_v0  ;;  %5194 = vadd.xlane.f32.xlu2 %v5193_v46  ;;  %v12572_v47 = vld [vmem:[#allocation40_spill] sm:$0xff] }
 0x72d   : > { %v6744_v6 = vsel %vm6741_vm5, %v6743_v53, %v6739_v49  ;;  %8884 = vrcp.f32 %v11355_v61  ;;  %vm6752_vm7 = vweird.f32 %v8881_v17  ;;  %v3173_v13 = vadd.f32 %v11341_v16, %v12572_v47 }
 0x72e   : > { %7994 = vst.msk [vmem:[%s10509_s21 + $0x178] sm:$0xff] %vm7946_vm8, %v6744_v6  ;;  %v6748_v26 = vsub.f32 1.0, %v6747_v43  ;;  %v4676_v27 = vmul.f32 0.2, %v4297_v22  ;;  %vm4548_vm6 = vcmp.ge.f32.partialorder %v4297_v22, 0.0  ;;  %vm6753_vm11 = vmor %vm6751_vm9, %vm6752_vm7  ;;  %v6772_v57 = vand.u32 2147483648, %v11355_v61 }
 0x72f   : > { %v5153_v39 = vpop.xlane.xlu0 %5152  ;;  %v6770_v59 = vand.u32 2147483647, %v11355_v61  ;;  %v3514_v0 = vmul.f32 0.2, %v3173_v13  ;;  %vm6766_vm15 = vweird.f32 %v11355_v61  ;;  %vm3386_vm1 = vcmp.ge.f32.partialorder %v3173_v13, 0.0 }
 0x730   : > { %8479 = vmatmul.msk.f32.gmra.mxu3 %vm1710_vm2, %v3640_v58  ;;  %v6749_v52 = vmul.f32 %v8881_v17, %v6748_v26  ;;  %v5437_v35 = vadd.f32 %v11277_v25, %v5153_v39  ;;  %v4804_v19 = vsel %vm4548_vm6, %v4297_v22, %v4676_v27  ;;  %v6773_v43 = vor.u32 1.1754944e-38, %v6772_v57 }
 0x731   : > { %v4936_v41 = vmul.f32 %v11169_v2, %v4804_v19  ;;  %vm6771_vm4 = vcmp.eq.f32.partialorder %v6770_v59, 8.507059e+37 }
 0x732   : > { %v8883_v4 = vpop.eup %8882  ;;  %v6750_v10 = vadd.f32 %v8881_v17, %v6749_v52  ;;  %v8575_v24 = vmul.f32 -1.442695, %v5437_v35  ;;  %v3642_v52 = vsel %vm3386_vm1, %v3173_v13, %v3514_v0 }
 0x733   : > { %v4299_v32 = vpop.f32.mrf.mxu3  ;;  %v8885_v42 = vpop.eup %8884  ;;  %v11372_v50 = vadd.f32 1.0, %v8883_v4  ;;  %v5196_v29 = vsel %vm528_vm0, %v4936_v41, 0.0 }
 0x734   : > { %v4300_v20 = vadd.f32 %v11195_v31, %v4299_v32  ;;  %v6754_v55 = vsel %vm6753_vm11, %v8881_v17, %v6750_v10  ;;  %v6762_v18 = vmul.f32 %v8885_v42, %v11355_v61  ;;  %8886 = vpow2.f32 %v8575_v24  ;;  %5197 = vadd.xlane.f32.xlu0 %v5196_v29  ;;  %v12573_v61 = vld [vmem:[#allocation41_spill] sm:$0xff] }
 0x735   : > { %v6759_v34 = vsel %vm6756_vm12, %v6758_v38, %v6754_v55  ;;  %8888 = vrcp.f32 %v11372_v50  ;;  %vm6767_vm14 = vweird.f32 %v8885_v42  ;;  %v3176_v58 = vadd.f32 %v11341_v16, %v12573_v61 }
 0x736   : > { %7995 = vst.msk [vmem:[%s10509_s21 + $0x180] sm:$0xff] %vm7946_vm8, %v6759_v34  ;;  %v6763_v33 = vsub.f32 1.0, %v6762_v18  ;;  %v4677_v15 = vmul.f32 0.2, %v4300_v20  ;;  %vm4549_vm13 = vcmp.ge.f32.partialorder %v4300_v20, 0.0  ;;  %vm6768_vm3 = vmor %vm6766_vm15, %vm6767_vm14  ;;  %v6787_v19 = vand.u32 2147483648, %v11372_v50 }
 0x737   : > { %v5156_v30 = vpop.xlane.xlu1 %5155  ;;  %v6785_v35 = vand.u32 2147483647, %v11372_v50  ;;  %v3515_v24 = vmul.f32 0.2, %v3176_v58  ;;  %vm6781_vm7 = vweird.f32 %v11372_v50  ;;  %vm3387_vm9 = vcmp.ge.f32.partialorder %v3176_v58, 0.0 }
 0x738   : > { %8480 = vmatmul.msk.f32.gmra.mxu3 %vm1710_vm2, %v3641_v37  ;;  %v6764_v48 = vmul.f32 %v8885_v42, %v6763_v33  ;;  %v5438_v63 = vadd.f32 %v11277_v25, %v5156_v30  ;;  %v4805_v5 = vsel %vm4549_vm13, %v4300_v20, %v4677_v15  ;;  %v6788_v18 = vor.u32 1.1754944e-38, %v6787_v19 }
 0x739   : > { %v4937_v28 = vmul.f32 %v11169_v2, %v4805_v5  ;;  %vm6786_vm11 = vcmp.eq.f32.partialorder %v6785_v35, 8.507059e+37 }
 0x73a   : > { %v8887_v17 = vpop.eup %8886  ;;  %v6765_v53 = vadd.f32 %v8885_v42, %v6764_v48  ;;  %v8576_v22 = vmul.f32 -1.442695, %v5438_v63  ;;  %v3643_v48 = vsel %vm3387_vm9, %v3176_v58, %v3515_v24 }
 0x73b   : > { %v4302_v46 = vpop.f32.mrf.mxu3  ;;  %v8889_v49 = vpop.eup %8888  ;;  %v11389_v11 = vadd.f32 1.0, %v8887_v17  ;;  %v5199_v6 = vsel %vm528_vm0, %v4937_v28, 0.0 }
 0x73c   : > { %v4303_v44 = vadd.f32 %v11195_v31, %v4302_v46  ;;  %v6769_v26 = vsel %vm6768_vm3, %v8885_v42, %v6765_v53  ;;  %v6777_v27 = vmul.f32 %v8889_v49, %v11372_v50  ;;  %8890 = vpow2.f32 %v8576_v22  ;;  %5200 = vadd.xlane.f32.xlu1 %v5199_v6  ;;  %v12574_v50 = vld [vmem:[#allocation42_spill] sm:$0xff] }
 0x73d   : > { %v6774_v21 = vsel %vm6771_vm4, %v6773_v43, %v6769_v26  ;;  %8892 = vrcp.f32 %v11389_v11  ;;  %vm6782_vm6 = vweird.f32 %v8889_v49  ;;  %v3179_v37 = vadd.f32 %v11341_v16, %v12574_v50 }
 0x73e   : > { %7996 = vst.msk [vmem:[%s10509_s21 + $0x188] sm:$0xff] %vm7946_vm8, %v6774_v21  ;;  %v6778_v1 = vsub.f32 1.0, %v6777_v27  ;;  %v4678_v39 = vmul.f32 0.2, %v4303_v44  ;;  %vm4550_vm5 = vcmp.ge.f32.partialorder %v4303_v44, 0.0  ;;  %vm6783_vm10 = vmor %vm6781_vm7, %vm6782_vm6  ;;  %v6802_v5 = vand.u32 2147483648, %v11389_v11 }
 0x73f   : > { %v5159_v60 = vpop.xlane.xlu2 %5158  ;;  %v6800_v63 = vand.u32 2147483647, %v11389_v11  ;;  %v3516_v22 = vmul.f32 0.2, %v3179_v37  ;;  %vm6796_vm14 = vweird.f32 %v11389_v11  ;;  %vm3388_vm15 = vcmp.ge.f32.partialorder %v3179_v37, 0.0 }
 0x740   : > { %8481 = vmatmul.msk.f32.gmra.mxu3 %vm1710_vm2, %v3642_v52  ;;  %v6779_v41 = vmul.f32 %v8889_v49, %v6778_v1  ;;  %v5439_v4 = vadd.f32 %v11277_v25, %v5159_v60  ;;  %v4806_v10 = vsel %vm4550_vm5, %v4303_v44, %v4678_v39  ;;  %v6803_v27 = vor.u32 1.1754944e-38, %v6802_v5 }
 0x741   : > { %v4938_v32 = vmul.f32 %v11169_v2, %v4806_v10  ;;  %vm6801_vm3 = vcmp.eq.f32.partialorder %v6800_v63, 8.507059e+37  ;;  %v3644_v60 = vsel %vm3388_vm15, %v3179_v37, %v3516_v22 }
 0x742   : > { %v8891_v42 = vpop.eup %8890  ;;  %v6780_v38 = vadd.f32 %v8889_v49, %v6779_v41  ;;  %v8577_v20 = vmul.f32 -1.442695, %v5439_v4 }
 0x743   : > { %v4305_v29 = vpop.f32.mrf.mxu3  ;;  %v8893_v55 = vpop.eup %8892  ;;  %v11406_v47 = vadd.f32 1.0, %v8891_v42  ;;  %v5202_v34 = vsel %vm528_vm0, %v4938_v32, 0.0 }
 0x744   : > { %v4306_v13 = vadd.f32 %v11195_v31, %v4305_v29  ;;  %v6784_v33 = vsel %vm6783_vm10, %v8889_v49, %v6780_v38  ;;  %v6792_v15 = vmul.f32 %v8893_v55, %v11389_v11  ;;  %8894 = vpow2.f32 %v8577_v20  ;;  %5203 = vadd.xlane.f32.xlu2 %v5202_v34  ;;  %v12575_v11 = vld [vmem:[#allocation43_spill] sm:$0xff]  ;;  %v11441_v20 = vld [vmem:[%s12490_s9] ss:$0 sm:$0xff] }
 0x745   : > { %v6789_v59 = vsel %vm6786_vm11, %v6788_v18, %v6784_v33  ;;  %8896 = vrcp.f32 %v11406_v47  ;;  %vm6797_vm13 = vweird.f32 %v8893_v55  ;;  %v3182_v39 = vadd.f32 %v11341_v16, %v12575_v11 }
 0x746   : > { %7997 = vst.msk [vmem:[%s10509_s21 + $0x190] sm:$0xff] %vm7946_vm8, %v6789_v59  ;;  %v6793_v57 = vsub.f32 1.0, %v6792_v15  ;;  %v4679_v30 = vmul.f32 0.2, %v4306_v13  ;;  %vm4551_vm12 = vcmp.ge.f32.partialorder %v4306_v13, 0.0  ;;  %vm6798_vm1 = vmor %vm6796_vm14, %vm6797_vm13  ;;  %v6817_v4 = vand.u32 2147483648, %v11406_v47 }
 0x747   : > { %v5162_v0 = vpop.xlane.xlu0 %5161  ;;  %v6815_v41 = vand.u32 2147483647, %v11406_v47  ;;  %v3517_v38 = vmul.f32 0.2, %v3182_v39  ;;  %vm6811_vm6 = vweird.f32 %v11406_v47  ;;  %vm3389_vm7 = vcmp.ge.f32.partialorder %v3182_v39, 0.0 }
 0x748   : > { %8482 = vmatmul.msk.f32.gmra.mxu3 %vm1710_vm2, %v3643_v48  ;;  %v6794_v28 = vmul.f32 %v8893_v55, %v6793_v57  ;;  %v5440_v17 = vadd.f32 %v11277_v25, %v5162_v0  ;;  %v4807_v53 = vsel %vm4551_vm12, %v4306_v13, %v4679_v30  ;;  %v6818_v15 = vor.u32 1.1754944e-38, %v6817_v4 }
 0x749   : > { %v4939_v46 = vmul.f32 %v11169_v2, %v4807_v53  ;;  %vm6816_vm10 = vcmp.eq.f32.partialorder %v6815_v41, 8.507059e+37 }
 0x74a   : > { %v8895_v49 = vpop.eup %8894  ;;  %v6795_v43 = vadd.f32 %v8893_v55, %v6794_v28  ;;  %v8578_v44 = vmul.f32 -1.442695, %v5440_v17 }
 0x74b   : > { %v4308_v6 = vpop.f32.mrf.mxu3  ;;  %v8897_v26 = vpop.eup %8896  ;;  %v11423_v61 = vadd.f32 1.0, %v8895_v49  ;;  %v5205_v21 = vsel %vm528_vm0, %v4939_v46, 0.0 }
 0x74c   : > { %v4309_v58 = vadd.f32 %v11195_v31, %v4308_v6  ;;  %v6799_v1 = vsel %vm6798_vm1, %v8893_v55, %v6795_v43  ;;  %v6807_v2 = vmul.f32 %v8897_v26, %v11406_v47  ;;  %8898 = vpow2.f32 %v8578_v44  ;;  %5206 = vadd.xlane.f32.xlu0 %v5205_v21 }
 0x74d   : > { %v6804_v52 = vsel %vm6801_vm3, %v6803_v27, %v6799_v1  ;;  %8900 = vrcp.f32 %v11423_v61  ;;  %vm6812_vm5 = vweird.f32 %v8897_v26  ;;  %v3185_v47 = vadd.f32 %v11341_v16, %v10265_v51  ;;  %v11467_v1 = vld [vmem:[%s12489_s8] ss:$0 sm:$0xff] }
 0x74e   : > { %7998 = vst.msk [vmem:[%s10509_s21 + $0x198] sm:$0xff] %vm7946_vm8, %v6804_v52  ;;  %v6808_v35 = vsub.f32 1.0, %v6807_v2  ;;  %v4680_v19 = vmul.f32 0.2, %v4309_v58  ;;  %vm4552_vm4 = vcmp.ge.f32.partialorder %v4309_v58, 0.0  ;;  %vm6813_vm9 = vmor %vm6811_vm6, %vm6812_vm5  ;;  %v6832_v28 = vand.u32 2147483648, %v11423_v61 }
 0x74f   : > { %v5165_v10 = vpop.xlane.xlu1 %5164  ;;  %v6830_v0 = vand.u32 2147483647, %v11423_v61  ;;  %v3518_v46 = vmul.f32 0.2, %v3185_v47  ;;  %vm6826_vm13 = vweird.f32 %v11423_v61  ;;  %vm3390_vm14 = vcmp.ge.f32.partialorder %v3185_v47, 0.0  ;;  %v12576_v52 = vld [vmem:[#allocation44_spill] sm:$0xff] }
 0x750   : > { %8483 = vmatmul.msk.f32.gmra.mxu3 %vm1710_vm2, %v3644_v60  ;;  %v6809_v24 = vmul.f32 %v8897_v26, %v6808_v35  ;;  %v5441_v32 = vadd.f32 %v11277_v25, %v5165_v10  ;;  %v4808_v42 = vsel %vm4552_vm4, %v4309_v58, %v4680_v19  ;;  %v6833_v58 = vor.u32 1.1754944e-38, %v6832_v28 }
 0x751   : > { %v4940_v29 = vmul.f32 %v11441_v20, %v4808_v42  ;;  %vm6831_vm1 = vcmp.eq.f32.partialorder %v6830_v0, 8.507059e+37  ;;  %v3188_v35 = vadd.f32 %v11341_v16, %v12576_v52  ;;  %v3646_v4 = vsel %vm3390_vm14, %v3185_v47, %v3518_v46 }
 0x752   : > { %v8899_v55 = vpop.eup %8898  ;;  %v6810_v18 = vadd.f32 %v8897_v26, %v6809_v24  ;;  %v8579_v13 = vmul.f32 -1.442695, %v5441_v32 }
 0x753   : > { %v4311_v34 = vpop.f32.mrf.mxu3  ;;  %v8901_v33 = vpop.eup %8900  ;;  %v11445_v50 = vadd.f32 1.0, %v8899_v55  ;;  %v5208_v59 = vsel %vm528_vm0, %v4940_v29, 0.0  ;;  %v3519_v55 = vmul.f32 0.2, %v3188_v35  ;;  %vm3391_vm6 = vcmp.ge.f32.partialorder %v3188_v35, 0.0 }
 0x754   : > { %v4312_v37 = vadd.f32 %v11195_v31, %v4311_v34  ;;  %v6814_v57 = vsel %vm6813_vm9, %v8897_v26, %v6810_v18  ;;  %v6822_v30 = vmul.f32 %v8901_v33, %v11423_v61  ;;  %8902 = vpow2.f32 %v8579_v13  ;;  %5209 = vadd.xlane.f32.xlu1 %v5208_v59 }
 0x755   : > { %v6819_v48 = vsel %vm6816_vm10, %v6818_v15, %v6814_v57  ;;  %8904 = vrcp.f32 %v11445_v50  ;;  %v3645_v31 = vsel %vm3389_vm7, %v3182_v39, %v3517_v38  ;;  %vm6827_vm12 = vweird.f32 %v8901_v33 }
 0x756   : > { %7999 = vst.msk [vmem:[%s10509_s21 + $0x1a0] sm:$0xff] %vm7946_vm8, %v6819_v48  ;;  %v6823_v63 = vsub.f32 1.0, %v6822_v30  ;;  %v4681_v5 = vmul.f32 0.2, %v4312_v37  ;;  %vm4553_vm11 = vcmp.ge.f32.partialorder %v4312_v37, 0.0  ;;  %vm6828_vm15 = vmor %vm6826_vm13, %vm6827_vm12  ;;  %v6847_v24 = vand.u32 2147483648, %v11445_v50 }
 0x757   : > { %v5168_v17 = vpop.xlane.xlu2 %5167  ;;  %v6845_v10 = vand.u32 2147483647, %v11445_v50  ;;  %vm6841_vm5 = vweird.f32 %v11445_v50  ;;  %v3647_v28 = vsel %vm3391_vm6, %v3188_v35, %v3519_v55 }
 0x758   : > { %8484 = vmatmul.msk.f32.gmra.mxu3 %vm1710_vm2, %v3645_v31  ;;  %v6824_v53 = vmul.f32 %v8901_v33, %v6823_v63  ;;  %v5442_v51 = vadd.f32 %v11277_v25, %v5168_v17  ;;  %v4809_v22 = vsel %vm4553_vm11, %v4312_v37, %v4681_v5  ;;  %v6848_v59 = vor.u32 1.1754944e-38, %v6847_v24 }
 0x759   : > { %v4941_v49 = vmul.f32 %v11441_v20, %v4809_v22  ;;  %vm6846_vm9 = vcmp.eq.f32.partialorder %v6845_v10, 8.507059e+37 }
 0x75a   : > { %v8903_v43 = vpop.eup %8902  ;;  %v6825_v44 = vadd.f32 %v8901_v33, %v6824_v53  ;;  %v8580_v6 = vmul.f32 -1.442695, %v5442_v51 }
 0x75b   : > { %v4314_v26 = vpop.f32.mrf.mxu3  ;;  %v8905_v27 = vpop.eup %8904  ;;  %v11462_v21 = vadd.f32 1.0, %v8903_v43  ;;  %v5211_v11 = vsel %vm528_vm0, %v4941_v49, 0.0 }
 0x75c   : > { %v4315_v2 = vadd.f32 %v11467_v1, %v4314_v26  ;;  %v6829_v39 = vsel %vm6828_vm15, %v8901_v33, %v6825_v44  ;;  %v6837_v61 = vmul.f32 %v8905_v27, %v11445_v50  ;;  %8906 = vpow2.f32 %v8580_v6  ;;  %5212 = vadd.xlane.f32.xlu2 %v5211_v11 }
 0x75d   : > { %v6834_v19 = vsel %vm6831_vm1, %v6833_v58, %v6829_v39  ;;  %8908 = vrcp.f32 %v11462_v21  ;;  %vm6842_vm4 = vweird.f32 %v8905_v27  ;;  %v3191_v50 = vadd.f32 %v11341_v16, %v10283_v8 }
 0x75e   : > { %8000 = vst.msk [vmem:[%s10509_s21 + $0x1a8] sm:$0xff] %vm7946_vm8, %v6834_v19  ;;  %v6838_v60 = vsub.f32 1.0, %v6837_v61  ;;  %v4682_v41 = vmul.f32 0.2, %v4315_v2  ;;  %vm4554_vm3 = vcmp.ge.f32.partialorder %v4315_v2, 0.0  ;;  %vm6843_vm7 = vmor %vm6841_vm5, %vm6842_vm4  ;;  %v6862_v53 = vand.u32 2147483648, %v11462_v21 }
 0x75f   : > { %v5171_v32 = vpop.xlane.xlu0 %5170  ;;  %v6860_v17 = vand.u32 2147483647, %v11462_v21  ;;  %v3520_v49 = vmul.f32 0.2, %v3191_v50  ;;  %vm6856_vm12 = vweird.f32 %v11462_v21  ;;  %vm3392_vm13 = vcmp.ge.f32.partialorder %v3191_v50, 0.0 }
 0x760   : > { %8485 = vmatmul.msk.f32.gmra.mxu3 %vm1710_vm2, %v3646_v4  ;;  %v6839_v42 = vmul.f32 %v8905_v27, %v6838_v60  ;;  %v5443_v38 = vadd.f32 %v11277_v25, %v5171_v32  ;;  %v4810_v29 = vsel %vm4554_vm3, %v4315_v2, %v4682_v41  ;;  %v6863_v2 = vor.u32 1.1754944e-38, %v6862_v53 }
 0x761   : > { %v4942_v18 = vmul.f32 %v11441_v20, %v4810_v29  ;;  %vm6861_vm15 = vcmp.eq.f32.partialorder %v6860_v17, 8.507059e+37  ;;  %v3648_v4 = vsel %vm3392_vm13, %v3191_v50, %v3520_v49 }
 0x762   : > { %v8907_v13 = vpop.eup %8906  ;;  %v6840_v34 = vadd.f32 %v8905_v27, %v6839_v42  ;;  %v8581_v33 = vmul.f32 -1.442695, %v5443_v38 }
 0x763   : > { %v4317_v15 = vpop.f32.mrf.mxu3  ;;  %v8909_v37 = vpop.eup %8908  ;;  %v11484_v57 = vadd.f32 1.0, %v8907_v13  ;;  %v5214_v47 = vsel %vm528_vm0, %v4942_v18, 0.0 }
 0x764   : > { %v4318_v30 = vadd.f32 %v11467_v1, %v4317_v15  ;;  %v6844_v48 = vsel %vm6843_vm7, %v8905_v27, %v6840_v34  ;;  %v6852_v63 = vmul.f32 %v8909_v37, %v11462_v21  ;;  %8910 = vpow2.f32 %v8581_v33  ;;  %5215 = vadd.xlane.f32.xlu0 %v5214_v47 }
 0x765   : > { %v6849_v5 = vsel %vm6846_vm9, %v6848_v59, %v6844_v48  ;;  %8912 = vrcp.f32 %v11484_v57  ;;  %vm6857_vm11 = vweird.f32 %v8909_v37  ;;  %v3194_v21 = vadd.f32 %v11341_v16, %v10289_v9 }
 0x766   : > { %8001 = vst.msk [vmem:[%s10509_s21 + $0x1b0] sm:$0xff] %vm7946_vm8, %v6849_v5  ;;  %v6853_v31 = vsub.f32 1.0, %v6852_v63  ;;  %v4683_v0 = vmul.f32 0.2, %v4318_v30  ;;  %vm4555_vm10 = vcmp.ge.f32.partialorder %v4318_v30, 0.0  ;;  %vm6858_vm14 = vmor %vm6856_vm12, %vm6857_vm11  ;;  %v6877_v24 = vand.u32 2147483648, %v11484_v57 }
 0x767   : > { %v5174_v51 = vpop.xlane.xlu1 %5173  ;;  %v6875_v10 = vand.u32 2147483647, %v11484_v57  ;;  %v3521_v29 = vmul.f32 0.2, %v3194_v21  ;;  %vm6871_vm4 = vweird.f32 %v11484_v57  ;;  %vm3393_vm5 = vcmp.ge.f32.partialorder %v3194_v21, 0.0 }
 0x768   : > { %8486 = vmatmul.msk.f32.gmra.mxu3 %vm1710_vm2, %v3647_v28  ;;  %v6854_v22 = vmul.f32 %v8909_v37, %v6853_v31  ;;  %v5444_v8 = vadd.f32 %v11277_v25, %v5174_v51  ;;  %v4811_v46 = vsel %vm4555_vm10, %v4318_v30, %v4683_v0 }
 0x769   : > { %v4943_v43 = vmul.f32 %v11441_v20, %v4811_v46  ;;  %vm6876_vm7 = vcmp.eq.f32.partialorder %v6875_v10, 8.507059e+37  ;;  %v3649_v0 = vsel %vm3393_vm5, %v3194_v21, %v3521_v29 }
 0x76a   : > { %v8911_v44 = vpop.eup %8910  ;;  %v6855_v6 = vadd.f32 %v8909_v37, %v6854_v22  ;;  %v8582_v26 = vmul.f32 -1.442695, %v5444_v8 }
 0x76b   : > { %v4320_v27 = vpop.f32.mrf.mxu3  ;;  %v8913_v58 = vpop.eup %8912  ;;  %v11501_v11 = vadd.f32 1.0, %v8911_v44  ;;  %v5217_v61 = vsel %vm528_vm0, %v4943_v43, 0.0 }
 0x76c   : > { %v4321_v39 = vadd.f32 %v11467_v1, %v4320_v27  ;;  %v6859_v52 = vsel %vm6858_vm14, %v8909_v37, %v6855_v6  ;;  %v6867_v35 = vmul.f32 %v8913_v58, %v11484_v57  ;;  %8914 = vpow2.f32 %v8582_v26  ;;  %5218 = vadd.xlane.f32.xlu1 %v5217_v61 }
 0x76d   : > { %v6864_v19 = vsel %vm6861_vm15, %v6863_v2, %v6859_v52  ;;  %8916 = vrcp.f32 %v11501_v11  ;;  %vm6872_vm3 = vweird.f32 %v8913_v58  ;;  %v6878_v37 = vor.u32 1.1754944e-38, %v6877_v24 }
 0x76e   : > { %8002 = vst.msk [vmem:[%s10509_s21 + $0x1b8] sm:$0xff] %vm7946_vm8, %v6864_v19  ;;  %v6868_v60 = vsub.f32 1.0, %v6867_v35  ;;  %v4684_v41 = vmul.f32 0.2, %v4321_v39  ;;  %vm4556_vm1 = vcmp.ge.f32.partialorder %v4321_v39, 0.0  ;;  %vm6873_vm6 = vmor %vm6871_vm4, %vm6872_vm3  ;;  %v3197_v57 = vadd.f32 %v11341_v16, %v10298_v45 }
 0x76f   : > { %v5177_v32 = vpop.xlane.xlu2 %5176  ;;  %v6890_v28 = vand.u32 2147483647, %v11501_v11  ;;  %v6892_v17 = vand.u32 2147483648, %v11501_v11  ;;  %vm6886_vm11 = vweird.f32 %v11501_v11 }
 0x770   : > { %8487 = vmatmul.msk.f32.gmra.mxu3 %vm1710_vm2, %v3648_v4  ;;  %v6869_v42 = vmul.f32 %v8913_v58, %v6868_v60  ;;  %v5445_v9 = vadd.f32 %v11277_v25, %v5177_v32  ;;  %v4812_v38 = vsel %vm4556_vm1, %v4321_v39, %v4684_v41  ;;  %v3522_v8 = vmul.f32 0.2, %v3197_v57 }
 0x771   : > { %v4944_v55 = vmul.f32 %v11441_v20, %v4812_v38  ;;  %vm3394_vm12 = vcmp.ge.f32.partialorder %v3197_v57, 0.0  ;;  %v6893_v27 = vor.u32 1.1754944e-38, %v6892_v17  ;;  %vm6891_vm14 = vcmp.eq.f32.partialorder %v6890_v28, 8.507059e+37 }
 0x772   : > { %v8915_v18 = vpop.eup %8914  ;;  %v6870_v13 = vadd.f32 %v8913_v58, %v6869_v42  ;;  %v8583_v34 = vmul.f32 -1.442695, %v5445_v9  ;;  %v3650_v19 = vsel %vm3394_vm12, %v3197_v57, %v3522_v8 }
 0x773   : > { %v4323_v33 = vpop.f32.mrf.mxu3  ;;  %v8917_v15 = vpop.eup %8916  ;;  %v11518_v59 = vadd.f32 1.0, %v8915_v18  ;;  %v5220_v47 = vsel %vm528_vm0, %v4944_v55, 0.0 }
 0x774   : > { %v4324_v30 = vadd.f32 %v11467_v1, %v4323_v33  ;;  %v6874_v48 = vsel %vm6873_vm6, %v8913_v58, %v6870_v13  ;;  %v6882_v63 = vmul.f32 %v8917_v15, %v11501_v11  ;;  %8918 = vpow2.f32 %v8583_v34  ;;  %5221 = vadd.xlane.f32.xlu2 %v5220_v47 }
 0x775   : > { %v6879_v50 = vsel %vm6876_vm7, %v6878_v37, %v6874_v48  ;;  %8920 = vrcp.f32 %v11518_v59  ;;  %vm6887_vm10 = vweird.f32 %v8917_v15  ;;  %v3200_v11 = vadd.f32 %v11341_v16, %v10305_v12  ;;  %v11549_v12 = vld [vmem:[#allocation2] ss:$0 sm:$0xff] }
 0x776   : > { %8003 = vst.msk [vmem:[%s10509_s21 + $0x1c0] sm:$0xff] %vm7946_vm8, %v6879_v50  ;;  %v6883_v5 = vsub.f32 1.0, %v6882_v63  ;;  %v4685_v31 = vmul.f32 0.2, %v4324_v30  ;;  %vm4557_vm9 = vcmp.ge.f32.partialorder %v4324_v30, 0.0  ;;  %vm6888_vm13 = vmor %vm6886_vm11, %vm6887_vm10  ;;  %v6907_v41 = vand.u32 2147483648, %v11518_v59 }
 0x777   : > { %v5180_v53 = vpop.xlane.xlu0 %5179  ;;  %v6905_v60 = vand.u32 2147483647, %v11518_v59  ;;  %v3523_v42 = vmul.f32 0.2, %v3200_v11  ;;  %vm6901_vm3 = vweird.f32 %v11518_v59  ;;  %vm3395_vm4 = vcmp.ge.f32.partialorder %v3200_v11, 0.0 }
 0x778   : > { %8488 = vmatmul.msk.f32.gmra.mxu3 %vm1710_vm2, %v3649_v0  ;;  %v6884_v51 = vmul.f32 %v8917_v15, %v6883_v5  ;;  %v5446_v45 = vadd.f32 %v11277_v25, %v5180_v53  ;;  %v4813_v22 = vsel %vm4557_vm9, %v4324_v30, %v4685_v31  ;;  %v6908_v34 = vor.u32 1.1754944e-38, %v6907_v41 }
 0x779   : > { %v4945_v46 = vmul.f32 %v11441_v20, %v4813_v22  ;;  %vm6906_vm6 = vcmp.eq.f32.partialorder %v6905_v60, 8.507059e+37  ;;  %v3651_v50 = vsel %vm3395_vm4, %v3200_v11, %v3523_v42 }
 0x77a   : > { %v8919_v49 = vpop.eup %8918  ;;  %v6885_v43 = vadd.f32 %v8917_v15, %v6884_v51  ;;  %v8584_v44 = vmul.f32 -1.442695, %v5446_v45 }
 0x77b   : > { %v4326_v6 = vpop.f32.mrf.mxu3  ;;  %v8921_v26 = vpop.eup %8920  ;;  %v11535_v58 = vadd.f32 1.0, %v8919_v49  ;;  %v5223_v25 = vsel %vm528_vm0, %v4945_v46, 0.0 }
 0x77c   : > { %v4327_v2 = vadd.f32 %v11467_v1, %v4326_v6  ;;  %v6889_v39 = vsel %vm6888_vm13, %v8917_v15, %v6885_v43  ;;  %v6897_v61 = vmul.f32 %v8921_v26, %v11518_v59  ;;  %8922 = vpow2.f32 %v8584_v44  ;;  %5224 = vadd.xlane.f32.xlu0 %v5223_v25 }
 0x77d   : > { %v6894_v52 = vsel %vm6891_vm14, %v6893_v27, %v6889_v39  ;;  %8924 = vrcp.f32 %v11535_v58  ;;  %vm6902_vm1 = vweird.f32 %v8921_v26  ;;  %v3203_v59 = vadd.f32 %v11341_v16, %v10311_v23 }
 0x77e   : > { %8004 = vst.msk [vmem:[%s10509_s21 + $0x1c8] sm:$0xff] %vm7946_vm8, %v6894_v52  ;;  %v6898_v35 = vsub.f32 1.0, %v6897_v61  ;;  %v4686_v21 = vmul.f32 0.2, %v4327_v2  ;;  %vm4558_vm15 = vcmp.ge.f32.partialorder %v4327_v2, 0.0  ;;  %vm6903_vm5 = vmor %vm6901_vm3, %vm6902_vm1  ;;  %v6922_v31 = vand.u32 2147483648, %v11535_v58 }
 0x77f   : > { %v5183_v4 = vpop.xlane.xlu1 %5182  ;;  %v6920_v5 = vand.u32 2147483647, %v11535_v58  ;;  %v3524_v53 = vmul.f32 0.2, %v3203_v59  ;;  %vm6916_vm10 = vweird.f32 %v11535_v58  ;;  %vm3396_vm11 = vcmp.ge.f32.partialorder %v3203_v59, 0.0 }
 0x780   : > { %8489 = vmatmul.msk.f32.gmra.mxu3 %vm1710_vm2, %v3650_v19  ;;  %v6899_v10 = vmul.f32 %v8921_v26, %v6898_v35  ;;  %v5447_v24 = vadd.f32 %v11549_v12, %v5183_v4  ;;  %v4814_v32 = vsel %vm4558_vm15, %v4327_v2, %v4686_v21  ;;  %v6923_v43 = vor.u32 1.1754944e-38, %v6922_v31 }
 0x781   : > { %v4946_v9 = vmul.f32 %v11441_v20, %v4814_v32  ;;  %vm6921_vm13 = vcmp.eq.f32.partialorder %v6920_v5, 8.507059e+37  ;;  %v3652_v11 = vsel %vm3396_vm11, %v3203_v59, %v3524_v53 }
 0x782   : > { %v8923_v38 = vpop.eup %8922  ;;  %v6900_v29 = vadd.f32 %v8921_v26, %v6899_v10  ;;  %v8585_v55 = vmul.f32 -1.442695, %v5447_v24 }
 0x783   : > { %v4329_v18 = vpop.f32.mrf.mxu3  ;;  %v8925_v13 = vpop.eup %8924  ;;  %v11554_v33 = vadd.f32 1.0, %v8923_v38  ;;  %v5226_v37 = vsel %vm528_vm0, %v4946_v9, 0.0 }
 0x784   : > { %v4330_v15 = vadd.f32 %v11467_v1, %v4329_v18  ;;  %v6904_v30 = vsel %vm6903_vm5, %v8921_v26, %v6900_v29  ;;  %v6912_v47 = vmul.f32 %v8925_v13, %v11535_v58  ;;  %8926 = vpow2.f32 %v8585_v55  ;;  %5227 = vadd.xlane.f32.xlu1 %v5226_v37 }
 0x785   : > { %v6909_v48 = vsel %vm6906_vm6, %v6908_v34, %v6904_v30  ;;  %8928 = vrcp.f32 %v11554_v33  ;;  %vm6917_vm9 = vweird.f32 %v8925_v13  ;;  %v3206_v58 = vadd.f32 %v11341_v16, %v10317_v40 }
 0x786   : > { %8005 = vst.msk [vmem:[%s10509_s21 + $0x1d0] sm:$0xff] %vm7946_vm8, %v6909_v48  ;;  %v6913_v63 = vsub.f32 1.0, %v6912_v47  ;;  %v4687_v57 = vmul.f32 0.2, %v4330_v15  ;;  %vm4559_vm7 = vcmp.ge.f32.partialorder %v4330_v15, 0.0  ;;  %vm6918_vm12 = vmor %vm6916_vm10, %vm6917_vm9  ;;  %v6937_v35 = vand.u32 2147483648, %v11554_v33 }
 0x787   : > { %v5186_v0 = vpop.xlane.xlu2 %5185  ;;  %v6935_v52 = vand.u32 2147483647, %v11554_v33  ;;  %v3525_v41 = vmul.f32 0.2, %v3206_v58  ;;  %vm6931_vm1 = vweird.f32 %v11554_v33  ;;  %vm3397_vm3 = vcmp.ge.f32.partialorder %v3206_v58, 0.0 }
 0x788   : > { %8490 = vmatmul.msk.f32.gmra.mxu3 %vm1710_vm2, %v3651_v50  ;;  %v6914_v28 = vmul.f32 %v8925_v13, %v6913_v63  ;;  %v5448_v23 = vadd.f32 %v11549_v12, %v5186_v0  ;;  %v4815_v17 = vsel %vm4559_vm7, %v4330_v15, %v4687_v57  ;;  %v6938_v38 = vor.u32 1.1754944e-38, %v6937_v35 }
 0x789   : > { %v4947_v51 = vmul.f32 %v11441_v20, %v4815_v17  ;;  %vm6936_vm5 = vcmp.eq.f32.partialorder %v6935_v52, 8.507059e+37  ;;  %v3653_v47 = vsel %vm3397_vm3, %v3206_v58, %v3525_v41 }
 0x78a   : > { %v8927_v45 = vpop.eup %8926  ;;  %v6915_v22 = vadd.f32 %v8925_v13, %v6914_v28  ;;  %v8586_v8 = vmul.f32 -1.442695, %v5448_v23 }
 0x78b   : > { %v4332_v46 = vpop.f32.mrf.mxu3  ;;  %v8929_v49 = vpop.eup %8928  ;;  %v11571_v44 = vadd.f32 1.0, %v8927_v45  ;;  %v5229_v26 = vsel %vm528_vm0, %v4947_v51, 0.0 }
 0x78c   : > { %v4333_v6 = vadd.f32 %v11467_v1, %v4332_v46  ;;  %v6919_v27 = vsel %vm6918_vm12, %v8925_v13, %v6915_v22  ;;  %v6927_v2 = vmul.f32 %v8929_v49, %v11554_v33  ;;  %8930 = vpow2.f32 %v8586_v8  ;;  %5230 = vadd.xlane.f32.xlu2 %v5229_v26  ;;  %v11609_v8 = vpop.f32.mrf.mxu2 }
 0x78d   : > { %v6924_v25 = vsel %vm6921_vm13, %v6923_v43, %v6919_v27  ;;  %8932 = vrcp.f32 %v11571_v44  ;;  %vm6932_vm15 = vweird.f32 %v8929_v49  ;;  %v3209_v33 = vadd.f32 %v11341_v16, %v10326_v54  ;;  %v11615_v43 = vld [vmem:[%s12487_s6] ss:$0 sm:$0xff] }
 0x78e   : > { %8006 = vst.msk [vmem:[%s10509_s21 + $0x1d8] sm:$0xff] %vm7946_vm8, %v6924_v25  ;;  %v6928_v39 = vsub.f32 1.0, %v6927_v2  ;;  %v4688_v61 = vmul.f32 0.2, %v4333_v6  ;;  %vm4560_vm14 = vcmp.ge.f32.partialorder %v4333_v6, 0.0  ;;  %vm6933_vm4 = vmor %vm6931_vm1, %vm6932_vm15  ;;  %v6952_v48 = vand.u32 2147483648, %v11571_v44 }
 0x78f   : > { %v5189_v21 = vpop.xlane.xlu0 %5188  ;;  %v6950_v59 = vand.u32 2147483647, %v11571_v44  ;;  %v3526_v50 = vmul.f32 0.2, %v3209_v33  ;;  %vm6946_vm9 = vweird.f32 %v11571_v44  ;;  %vm3398_vm10 = vcmp.ge.f32.partialorder %v3209_v33, 0.0 }
 0x790   : > { %8491 = vmatmul.msk.f32.gmra.mxu3 %vm1710_vm2, %v3652_v11  ;;  %v6929_v19 = vmul.f32 %v8929_v49, %v6928_v39  ;;  %v5449_v40 = vadd.f32 %v11549_v12, %v5189_v21  ;;  %v4816_v60 = vsel %vm4560_vm14, %v4333_v6, %v4688_v61  ;;  %v6953_v53 = vor.u32 1.1754944e-38, %v6952_v48 }
 0x791   : > { %v4948_v4 = vmul.f32 %v11441_v20, %v4816_v60  ;;  %vm6951_vm12 = vcmp.eq.f32.partialorder %v6950_v59, 8.507059e+37  ;;  %v3654_v2 = vsel %vm3398_vm10, %v3209_v33, %v3526_v50 }
 0x792   : > { %v8931_v10 = vpop.eup %8930  ;;  %v6930_v24 = vadd.f32 %v8929_v49, %v6929_v19  ;;  %v8587_v32 = vmul.f32 -1.442695, %v5449_v40 }
 0x793   : > { %v4335_v42 = vpop.f32.mrf.mxu3  ;;  %v8933_v9 = vpop.eup %8932  ;;  %v11588_v29 = vadd.f32 1.0, %v8931_v10  ;;  %v5232_v18 = vsel %vm528_vm0, %v4948_v4, 0.0 }
 0x794   : > { %v4336_v55 = vadd.f32 %v11467_v1, %v4335_v42  ;;  %v6934_v13 = vsel %vm6933_vm4, %v8929_v49, %v6930_v24  ;;  %v6942_v34 = vmul.f32 %v8933_v9, %v11571_v44  ;;  %8934 = vpow2.f32 %v8587_v32  ;;  %5233 = vadd.xlane.f32.xlu0 %v5232_v18 }
 0x795   : > { %v6939_v15 = vsel %vm6936_vm5, %v6938_v38, %v6934_v13  ;;  %8936 = vrcp.f32 %v11588_v29  ;;  %vm6947_vm7 = vweird.f32 %v8933_v9  ;;  %v3212_v44 = vadd.f32 %v11615_v43, %v10333_v3 }
 0x796   : > { %8007 = vst.msk [vmem:[%s10509_s21 + $0x1e0] sm:$0xff] %vm7946_vm8, %v6939_v15  ;;  %v6943_v37 = vsub.f32 1.0, %v6942_v34  ;;  %v4689_v30 = vmul.f32 0.2, %v4336_v55  ;;  %vm4561_vm6 = vcmp.ge.f32.partialorder %v4336_v55, 0.0  ;;  %vm6948_vm11 = vmor %vm6946_vm9, %vm6947_vm7  ;;  %v6967_v25 = vand.u32 2147483648, %v11588_v29 }
 0x797   : > { %v5192_v63 = vpop.xlane.xlu1 %5191  ;;  %v6965_v58 = vand.u32 2147483647, %v11588_v29  ;;  %v3527_v52 = vmul.f32 0.2, %v3212_v44  ;;  %vm6961_vm15 = vweird.f32 %v11588_v29  ;;  %vm3399_vm1 = vcmp.ge.f32.partialorder %v3212_v44, 0.0 }
 0x798   : > { %8492 = vmatmul.msk.f32.gmra.mxu3 %vm1710_vm2, %v3653_v47  ;;  %v6944_v57 = vmul.f32 %v8933_v9, %v6943_v37  ;;  %v5450_v54 = vadd.f32 %v11549_v12, %v5192_v63  ;;  %v4817_v16 = vsel %vm4561_vm6, %v4336_v55, %v4689_v30  ;;  %v6968_v4 = vor.u32 1.1754944e-38, %v6967_v25  ;;  %v11637_v55 = vpop.f32.mrf.mxu2 }
 0x799   : > { %v4949_v5 = vmul.f32 %v11441_v20, %v4817_v16  ;;  %vm6966_vm4 = vcmp.eq.f32.partialorder %v6965_v58, 8.507059e+37  ;;  %v3215_v38 = vadd.f32 %v11615_v43, %v10339_v7  ;;  %v3655_v34 = vsel %vm3399_vm1, %v3212_v44, %v3527_v52 }
 0x79a   : > { %v8935_v31 = vpop.eup %8934  ;;  %v6945_v0 = vadd.f32 %v8933_v9, %v6944_v57  ;;  %v8588_v28 = vmul.f32 -1.442695, %v5450_v54 }
 0x79b   : > { %v4338_v23 = vpop.f32.mrf.mxu3  ;;  %v8937_v17 = vpop.eup %8936  ;;  %v11605_v51 = vadd.f32 1.0, %v8935_v31  ;;  %v5235_v22 = vsel %vm528_vm0, %v4949_v5, 0.0  ;;  %v3528_v59 = vmul.f32 0.2, %v3215_v38  ;;  %vm3400_vm9 = vcmp.ge.f32.partialorder %v3215_v38, 0.0 }
 0x79c   : > { %v4339_v45 = vadd.f32 %v11467_v1, %v4338_v23  ;;  %v6949_v46 = vsel %vm6948_vm11, %v8933_v9, %v6945_v0  ;;  %v6957_v49 = vmul.f32 %v8937_v17, %v11588_v29  ;;  %8938 = vpow2.f32 %v8588_v28  ;;  %5236 = vadd.xlane.f32.xlu1 %v5235_v22 }
 0x79d   : > { %v6954_v6 = vsel %vm6951_vm12, %v6953_v53, %v6949_v46  ;;  %8940 = vrcp.f32 %v11605_v51  ;;  %vm6962_vm14 = vweird.f32 %v8937_v17  ;;  %v6980_v33 = vand.u32 2147483647, %v11605_v51 }
 0x79e   : > { %8008 = vst.msk [vmem:[%s10509_s21 + $0x1e8] sm:$0xff] %vm7946_vm8, %v6954_v6  ;;  %v6958_v26 = vsub.f32 1.0, %v6957_v49  ;;  %v4690_v27 = vmul.f32 0.2, %v4339_v45  ;;  %vm4562_vm13 = vcmp.ge.f32.partialorder %v4339_v45, 0.0  ;;  %vm6963_vm3 = vmor %vm6961_vm15, %vm6962_vm14  ;;  %v6982_v15 = vand.u32 2147483648, %v11605_v51 }
 0x79f   : > { %v5195_v39 = vpop.xlane.xlu2 %5194  ;;  %vm6976_vm7 = vweird.f32 %v11605_v51  ;;  %vm6981_vm11 = vcmp.eq.f32.partialorder %v6980_v33, 8.507059e+37  ;;  %v3218_v53 = vadd.f32 %v11615_v43, %v10345_v36  ;;  %v3656_v46 = vsel %vm3400_vm9, %v3215_v38, %v3528_v59 }
 0x7a0   : > { %8493 = vmatmul.msk.f32.gmra.mxu3 %vm1710_vm2, %v3654_v2  ;;  %v6959_v61 = vmul.f32 %v8937_v17, %v6958_v26  ;;  %v5451_v3 = vadd.f32 %v11549_v12, %v5195_v39  ;;  %v4818_v11 = vsel %vm4562_vm13, %v4339_v45, %v4690_v27  ;;  %v6983_v5 = vor.u32 1.1754944e-38, %v6982_v15  ;;  %v11662_v26 = vpop.f32.mrf.mxu2 }
 0x7a1   : > { %v4950_v35 = vmul.f32 %v11441_v20, %v4818_v11  ;;  %v3529_v58 = vmul.f32 0.2, %v3218_v53  ;;  %vm3401_vm15 = vcmp.ge.f32.partialorder %v3218_v53, 0.0 }
 0x7a2   : > { %v8939_v21 = vpop.eup %8938  ;;  %v6960_v19 = vadd.f32 %v8937_v17, %v6959_v61  ;;  %v8589_v40 = vmul.f32 -1.442695, %v5451_v3 }
 0x7a3   : > { %v4341_v60 = vpop.f32.mrf.mxu3  ;;  %v8941_v41 = vpop.eup %8940  ;;  %v11629_v10 = vadd.f32 1.0, %v8939_v21  ;;  %v5238_v32 = vsel %vm528_vm0, %v4950_v35, 0.0 }
 0x7a4   : > { %v4342_v24 = vadd.f32 %v11467_v1, %v4341_v60  ;;  %v6964_v42 = vsel %vm6963_vm3, %v8937_v17, %v6960_v19  ;;  %v6972_v9 = vmul.f32 %v8941_v41, %v11605_v51  ;;  %8942 = vpow2.f32 %v8589_v40  ;;  %5239 = vadd.xlane.f32.xlu2 %v5238_v32 }
 0x7a5   : > { %v6969_v29 = vsel %vm6966_vm4, %v6968_v4, %v6964_v42  ;;  %8944 = vrcp.f32 %v11629_v10  ;;  %vm6977_vm6 = vweird.f32 %v8941_v41  ;;  %v6995_v49 = vand.u32 2147483647, %v11629_v10 }
 0x7a6   : > { %8009 = vst.msk [vmem:[%s10509_s21 + $0x1f0] sm:$0xff] %vm7946_vm8, %v6969_v29  ;;  %v6973_v18 = vsub.f32 1.0, %v6972_v9  ;;  %v4691_v13 = vmul.f32 0.2, %v4342_v24  ;;  %vm4563_vm5 = vcmp.ge.f32.partialorder %v4342_v24, 0.0  ;;  %vm6978_vm10 = vmor %vm6976_vm7, %vm6977_vm6  ;;  %v6997_v44 = vand.u32 2147483648, %v11629_v10 }
 0x7a7   : > { %v5198_v37 = vpop.xlane.xlu0 %5197  ;;  %vm6991_vm14 = vweird.f32 %v11629_v10  ;;  %vm6996_vm3 = vcmp.eq.f32.partialorder %v6995_v49, 8.507059e+37  ;;  %v3221_v4 = vadd.f32 %v11615_v43, %v10354_v14  ;;  %v3657_v42 = vsel %vm3401_vm15, %v3218_v53, %v3529_v58 }
 0x7a8   : > { %8494 = vmatmul.msk.f32.gmra.mxu3 %vm1710_vm2, %v3655_v34  ;;  %v6974_v7 = vmul.f32 %v8941_v41, %v6973_v18  ;;  %v5452_v30 = vadd.f32 %v11549_v12, %v5198_v37  ;;  %v4819_v47 = vsel %vm4563_vm5, %v4342_v24, %v4691_v13  ;;  %v6998_v35 = vor.u32 1.1754944e-38, %v6997_v44  ;;  %v11683_v37 = vpop.f32.mrf.mxu2 }
 0x7a9   : > { %v4951_v48 = vmul.f32 %v11441_v20, %v4819_v47  ;;  %v3530_v34 = vmul.f32 0.2, %v3221_v4  ;;  %vm3402_vm7 = vcmp.ge.f32.partialorder %v3221_v4, 0.0 }
 0x7aa   : > { %v8943_v63 = vpop.eup %8942  ;;  %v6975_v57 = vadd.f32 %v8941_v41, %v6974_v7  ;;  %v8590_v54 = vmul.f32 -1.442695, %v5452_v30 }
 0x7ab   : > { %v4344_v16 = vpop.f32.mrf.mxu3  ;;  %v8945_v50 = vpop.eup %8944  ;;  %v11648_v31 = vadd.f32 1.0, %v8943_v63  ;;  %v5241_v28 = vsel %vm528_vm0, %v4951_v48, 0.0 }
 0x7ac   : > { %v4345_v0 = vadd.f32 %v11467_v1, %v4344_v16  ;;  %v6979_v23 = vsel %vm6978_vm10, %v8941_v41, %v6975_v57  ;;  %v6987_v17 = vmul.f32 %v8945_v50, %v11629_v10  ;;  %8946 = vpow2.f32 %v8590_v54  ;;  %5242 = vadd.xlane.f32.xlu0 %v5241_v28 }
 0x7ad   : > { %v6984_v51 = vsel %vm6981_vm11, %v6983_v5, %v6979_v23  ;;  %8948 = vrcp.f32 %v11648_v31  ;;  %vm6992_vm13 = vweird.f32 %v8945_v50  ;;  %v7010_v9 = vand.u32 2147483647, %v11648_v31 }
 0x7ae   : > { %8010 = vst.msk [vmem:[%s10509_s21 + $0x1f8] sm:$0xff] %vm7946_vm8, %v6984_v51  ;;  %v6988_v45 = vsub.f32 1.0, %v6987_v17  ;;  %v4692_v22 = vmul.f32 0.2, %v4345_v0  ;;  %vm4564_vm12 = vcmp.ge.f32.partialorder %v4345_v0, 0.0  ;;  %vm6993_vm1 = vmor %vm6991_vm14, %vm6992_vm13  ;;  %v7012_v38 = vand.u32 2147483648, %v11648_v31 }
 0x7af   : > { %v5201_v6 = vpop.xlane.xlu1 %5200  ;;  %vm7006_vm6 = vweird.f32 %v11648_v31  ;;  %vm7011_vm10 = vcmp.eq.f32.partialorder %v7010_v9, 8.507059e+37  ;;  %v3224_v5 = vadd.f32 %v11615_v43, %v10361_v62  ;;  %v3658_v23 = vsel %vm3402_vm7, %v3221_v4, %v3530_v34 }
 0x7b0   : > { %8495 = vmatmul.msk.f32.gmra.mxu3 %vm1710_vm2, %v3656_v46  ;;  %v6989_v36 = vmul.f32 %v8945_v50, %v6988_v45  ;;  %v5453_v27 = vadd.f32 %v11549_v12, %v5201_v6  ;;  %v4820_v2 = vsel %vm4564_vm12, %v4345_v0, %v4692_v22  ;;  %v7013_v48 = vor.u32 1.1754944e-38, %v7012_v38 }
 0x7b1   : > { %v4952_v25 = vmul.f32 %v11441_v20, %v4820_v2  ;;  %v3531_v46 = vmul.f32 0.2, %v3224_v5  ;;  %vm3403_vm14 = vcmp.ge.f32.partialorder %v3224_v5, 0.0 }
 0x7b2   : > { %v8947_v39 = vpop.eup %8946  ;;  %v6990_v61 = vadd.f32 %v8945_v50, %v6989_v36  ;;  %v8591_v3 = vmul.f32 -1.442695, %v5453_v27 }
 0x7b3   : > { %v4347_v11 = vpop.f32.mrf.mxu3  ;;  %v8949_v52 = vpop.eup %8948  ;;  %v11667_v21 = vadd.f32 1.0, %v8947_v39  ;;  %v5244_v40 = vsel %vm528_vm0, %v4952_v25, 0.0 }
 0x7b4   : > { %v4348_v19 = vadd.f32 %v11467_v1, %v4347_v11  ;;  %v6994_v60 = vsel %vm6993_vm1, %v8945_v50, %v6990_v61  ;;  %v7002_v41 = vmul.f32 %v8949_v52, %v11648_v31  ;;  %8950 = vpow2.f32 %v8591_v3  ;;  %5245 = vadd.xlane.f32.xlu1 %v5244_v40  ;;  %v11707_v3 = vpop.f32.mrf.mxu2 }
 0x7b5   : > { %v6999_v10 = vsel %vm6996_vm3, %v6998_v35, %v6994_v60  ;;  %8952 = vrcp.f32 %v11667_v21  ;;  %vm7007_vm5 = vweird.f32 %v8949_v52  ;;  %v7025_v17 = vand.u32 2147483647, %v11667_v21 }
 0x7b6   : > { %8011 = vst.msk [vmem:[%s10509_s21 + $0x200] sm:$0xff] %vm7946_vm8, %v6999_v10  ;;  %v7003_v24 = vsub.f32 1.0, %v7002_v41  ;;  %v4693_v32 = vmul.f32 0.2, %v4348_v19  ;;  %vm4565_vm4 = vcmp.ge.f32.partialorder %v4348_v19, 0.0  ;;  %vm7008_vm9 = vmor %vm7006_vm6, %vm7007_vm5  ;;  %v7027_v53 = vand.u32 2147483648, %v11667_v21 }
 0x7b7   : > { %v5204_v29 = vpop.xlane.xlu2 %5203  ;;  %vm7021_vm13 = vweird.f32 %v11667_v21  ;;  %vm7026_vm1 = vcmp.eq.f32.partialorder %v7025_v17, 8.507059e+37  ;;  %v3659_v40 = vsel %vm3403_vm14, %v3224_v5, %v3531_v46 }
 0x7b8   : > { %8496 = vmatmul.msk.f32.gmra.mxu3 %vm1710_vm2, %v3657_v42  ;;  %v7004_v18 = vmul.f32 %v8949_v52, %v7003_v24  ;;  %v5454_v14 = vadd.f32 %v11549_v12, %v5204_v29  ;;  %v4821_v13 = vsel %vm4565_vm4, %v4348_v19, %v4693_v32  ;;  %v7028_v58 = vor.u32 1.1754944e-38, %v7027_v53  ;;  %v11723_v42 = vld [vmem:[%s12490_s9] ss:$0 sm:$0xff] }
 0x7b9   : > { %v4953_v33 = vmul.f32 %v11441_v20, %v4821_v13 }
 0x7ba   : > { %v8951_v15 = vpop.eup %8950  ;;  %v7005_v7 = vadd.f32 %v8949_v52, %v7004_v18  ;;  %v8592_v30 = vmul.f32 -1.442695, %v5454_v14 }
 0x7bb   : > { %v4350_v47 = vpop.f32.mrf.mxu3  ;;  %v8953_v59 = vpop.eup %8952  ;;  %v11686_v63 = vadd.f32 1.0, %v8951_v15  ;;  %v5247_v54 = vsel %vm528_vm0, %v4953_v33, 0.0 }
 0x7bc   : > { %v4351_v57 = vadd.f32 %v11467_v1, %v4350_v47  ;;  %v7009_v16 = vsel %vm7008_vm9, %v8949_v52, %v7005_v7  ;;  %v7017_v50 = vmul.f32 %v8953_v59, %v11667_v21  ;;  %8954 = vpow2.f32 %v8592_v30  ;;  %5248 = vadd.xlane.f32.xlu2 %v5247_v54 }
 0x7bd   : > { %v7014_v31 = vsel %vm7011_vm10, %v7013_v48, %v7009_v16  ;;  %8956 = vrcp.f32 %v11686_v63  ;;  %vm7022_vm12 = vweird.f32 %v8953_v59  ;;  %v3227_v52 = vadd.f32 %v11615_v43, %v10367_v56 }
 0x7be   : > { %8012 = vst.msk [vmem:[%s10509_s21 + $0x208] sm:$0xff] %vm7946_vm8, %v7014_v31  ;;  %v7018_v0 = vsub.f32 1.0, %v7017_v50  ;;  %v4694_v28 = vmul.f32 0.2, %v4351_v57  ;;  %vm4566_vm11 = vcmp.ge.f32.partialorder %v4351_v57, 0.0  ;;  %vm7023_vm15 = vmor %vm7021_vm13, %vm7022_vm12  ;;  %v7042_v41 = vand.u32 2147483648, %v11686_v63 }
 0x7bf   : > { %v5207_v51 = vpop.xlane.xlu0 %5206  ;;  %v7040_v60 = vand.u32 2147483647, %v11686_v63  ;;  %v3532_v32 = vmul.f32 0.2, %v3227_v52  ;;  %vm7036_vm5 = vweird.f32 %v11686_v63  ;;  %vm3404_vm6 = vcmp.ge.f32.partialorder %v3227_v52, 0.0 }
 0x7c0   : > { %8497 = vmatmul.msk.f32.gmra.mxu3 %vm1710_vm2, %v3658_v23  ;;  %v7019_v45 = vmul.f32 %v8953_v59, %v7018_v0  ;;  %v5455_v62 = vadd.f32 %v11549_v12, %v5207_v51  ;;  %v4822_v22 = vsel %vm4566_vm11, %v4351_v57, %v4694_v28  ;;  %v7043_v34 = vor.u32 1.1754944e-38, %v7042_v41 }
 0x7c1   : > { %v4954_v49 = vmul.f32 %v11441_v20, %v4822_v22  ;;  %vm7041_vm9 = vcmp.eq.f32.partialorder %v7040_v60, 8.507059e+37  ;;  %v3660_v54 = vsel %vm3404_vm6, %v3227_v52, %v3532_v32 }
 0x7c2   : > { %v8955_v44 = vpop.eup %8954  ;;  %v7020_v6 = vadd.f32 %v8953_v59, %v7019_v45  ;;  %v8593_v36 = vmul.f32 -1.442695, %v5455_v62 }
 0x7c3   : > { %v4353_v27 = vpop.f32.mrf.mxu3  ;;  %v8957_v2 = vpop.eup %8956  ;;  %v11703_v25 = vadd.f32 1.0, %v8955_v44  ;;  %v5250_v61 = vsel %vm528_vm0, %v4954_v49, 0.0  ;;  %v11751_v49 = vld [vmem:[%s12489_s8] ss:$0 sm:$0xff] }
 0x7c4   : > { %v4354_v39 = vadd.f32 %v11467_v1, %v4353_v27  ;;  %v7024_v20 = vsel %vm7023_vm15, %v8953_v59, %v7020_v6  ;;  %v7032_v11 = vmul.f32 %v8957_v2, %v11686_v63  ;;  %8958 = vpow2.f32 %v8593_v36  ;;  %5251 = vadd.xlane.f32.xlu0 %v5250_v61  ;;  %v11735_v63 = vpop.f32.mrf.mxu2 }
 0x7c5   : > { %v7029_v35 = vsel %vm7026_vm1, %v7028_v58, %v7024_v20  ;;  %8960 = vrcp.f32 %v11703_v25  ;;  %vm7037_vm4 = vweird.f32 %v8957_v2  ;;  %v3230_v59 = vadd.f32 %v11615_v43, %v11609_v8 }
 0x7c6   : > { %8013 = vst.msk [vmem:[%s10509_s21 + $0x210] sm:$0xff] %vm7946_vm8, %v7029_v35  ;;  %v7033_v21 = vsub.f32 1.0, %v7032_v11  ;;  %v4695_v19 = vmul.f32 0.2, %v4354_v39  ;;  %vm4567_vm3 = vcmp.ge.f32.partialorder %v4354_v39, 0.0  ;;  %vm7038_vm7 = vmor %vm7036_vm5, %vm7037_vm4  ;;  %v7057_v50 = vand.u32 2147483648, %v11703_v25 }
 0x7c7   : > { %v5210_v4 = vpop.xlane.xlu1 %5209  ;;  %v7055_v16 = vand.u32 2147483647, %v11703_v25  ;;  %vm3405_vm12 = vcmp.ge.f32.partialorder %v3230_v59, 0.0  ;;  %v3533_v17 = vmul.f32 0.2, %v3230_v59  ;;  %vm7051_vm13 = vweird.f32 %v11703_v25 }
 0x7c8   : > { %8498 = vmatmul.msk.f32.gmra.mxu3 %vm1710_vm2, %v3659_v40  ;;  %v7034_v10 = vmul.f32 %v8957_v2, %v7033_v21  ;;  %v5456_v56 = vadd.f32 %v11549_v12, %v5210_v4  ;;  %v4823_v24 = vsel %vm4567_vm3, %v4354_v39, %v4695_v19  ;;  %v7058_v22 = vor.u32 1.1754944e-38, %v7057_v50 }
 0x7c9   : > { %v4955_v9 = vmul.f32 %v11723_v42, %v4823_v24  ;;  %vm7056_vm15 = vcmp.eq.f32.partialorder %v7055_v16, 8.507059e+37  ;;  %v3661_v61 = vsel %vm3405_vm12, %v3230_v59, %v3533_v17 }
 0x7ca   : > { %v8959_v38 = vpop.eup %8958  ;;  %v7035_v29 = vadd.f32 %v8957_v2, %v7034_v10  ;;  %v8594_v18 = vmul.f32 -1.442695, %v5456_v56 }
 0x7cb   : > { %v4356_v14 = vpop.f32.mrf.mxu3  ;;  %v8961_v13 = vpop.eup %8960  ;;  %v11727_v33 = vadd.f32 1.0, %v8959_v38  ;;  %v5253_v7 = vsel %vm528_vm0, %v4955_v9, 0.0 }
 0x7cc   : > { %v4357_v15 = vadd.f32 %v11467_v1, %v4356_v14  ;;  %v7039_v30 = vsel %vm7038_vm7, %v8957_v2, %v7035_v29  ;;  %v7047_v47 = vmul.f32 %v8961_v13, %v11703_v25  ;;  %8962 = vpow2.f32 %v8594_v18  ;;  %5254 = vadd.xlane.f32.xlu1 %v5253_v7  ;;  %v11765_v35 = vpop.f32.mrf.mxu2 }
 0x7cd   : > { %v7044_v48 = vsel %vm7041_vm9, %v7043_v34, %v7039_v30  ;;  %8964 = vrcp.f32 %v11727_v33  ;;  %vm7052_vm11 = vweird.f32 %v8961_v13  ;;  %v3233_v2 = vadd.f32 %v11615_v43, %v11637_v55 }
 0x7ce   : > { %8014 = vst.msk [vmem:[%s10509_s21 + $0x218] sm:$0xff] %vm7946_vm8, %v7044_v48  ;;  %v7048_v57 = vsub.f32 1.0, %v7047_v47  ;;  %v4696_v1 = vmul.f32 0.2, %v4357_v15  ;;  %vm4568_vm10 = vcmp.ge.f32.partialorder %v4357_v15, 0.0  ;;  %vm7053_vm14 = vmor %vm7051_vm13, %vm7052_vm11  ;;  %v7072_v11 = vand.u32 2147483648, %v11727_v33 }
 0x7cf   : > { %v5213_v5 = vpop.xlane.xlu2 %5212  ;;  %v7070_v20 = vand.u32 2147483647, %v11727_v33  ;;  %vm3406_vm4 = vcmp.ge.f32.partialorder %v3233_v2, 0.0  ;;  %v3534_v41 = vmul.f32 0.2, %v3233_v2  ;;  %vm7066_vm5 = vweird.f32 %v11727_v33 }
 0x7d0   : > { %8499 = vmatmul.msk.f32.gmra.mxu3 %vm1710_vm2, %v3660_v54  ;;  %v7049_v8 = vmul.f32 %v8961_v13, %v7048_v57  ;;  %v5457_v31 = vadd.f32 %v11549_v12, %v5213_v5  ;;  %v4824_v0 = vsel %vm4568_vm10, %v4357_v15, %v4696_v1  ;;  %v7073_v32 = vor.u32 1.1754944e-38, %v7072_v11 }
 0x7d1   : > { %v4956_v28 = vmul.f32 %v11723_v42, %v4824_v0  ;;  %vm7071_vm7 = vcmp.eq.f32.partialorder %v7070_v20, 8.507059e+37  ;;  %v3662_v7 = vsel %vm3406_vm4, %v3233_v2, %v3534_v41 }
 0x7d2   : > { %v8963_v23 = vpop.eup %8962  ;;  %v7050_v53 = vadd.f32 %v8961_v13, %v7049_v8  ;;  %v8595_v51 = vmul.f32 -1.442695, %v5457_v31 }
 0x7d3   : > { %v4359_v45 = vpop.f32.mrf.mxu3  ;;  %v8965_v62 = vpop.eup %8964  ;;  %v11746_v46 = vadd.f32 1.0, %v8963_v23  ;;  %v5256_v6 = vsel %vm528_vm0, %v4956_v28, 0.0 }
 0x7d4   : > { %v4360_v44 = vadd.f32 %v11751_v49, %v4359_v45  ;;  %v7054_v36 = vsel %vm7053_vm14, %v8961_v13, %v7050_v53  ;;  %v7062_v27 = vmul.f32 %v8965_v62, %v11727_v33  ;;  %8966 = vpow2.f32 %v8595_v51  ;;  %5257 = vadd.xlane.f32.xlu2 %v5256_v6  ;;  %v11786_v50 = vpop.f32.mrf.mxu2 }
 0x7d5   : > { %v7059_v58 = vsel %vm7056_vm15, %v7058_v22, %v7054_v36  ;;  %8968 = vrcp.f32 %v11746_v46  ;;  %vm7067_vm3 = vweird.f32 %v8965_v62  ;;  %v3236_v13 = vadd.f32 %v11615_v43, %v11662_v26 }
 0x7d6   : > { %8015 = vst.msk [vmem:[%s10509_s21 + $0x220] sm:$0xff] %vm7946_vm8, %v7059_v58  ;;  %v7063_v25 = vsub.f32 1.0, %v7062_v27  ;;  %v4697_v39 = vmul.f32 0.2, %v4360_v44  ;;  %vm4569_vm1 = vcmp.ge.f32.partialorder %v4360_v44, 0.0  ;;  %vm7068_vm6 = vmor %vm7066_vm5, %vm7067_vm3  ;;  %v7087_v47 = vand.u32 2147483648, %v11746_v46 }
 0x7d7   : > { %v5216_v52 = vpop.xlane.xlu0 %5215  ;;  %v7085_v30 = vand.u32 2147483647, %v11746_v46  ;;  %vm3407_vm11 = vcmp.ge.f32.partialorder %v3236_v13, 0.0  ;;  %v3535_v16 = vmul.f32 0.2, %v3236_v13  ;;  %vm7081_vm12 = vweird.f32 %v11746_v46 }
 0x7d8   : > { %8500 = vmatmul.msk.f32.gmra.mxu3 %vm1710_vm2, %v3661_v61  ;;  %v7064_v55 = vmul.f32 %v8965_v62, %v7063_v25  ;;  %v5458_v21 = vadd.f32 %v11549_v12, %v5216_v52  ;;  %v4825_v19 = vsel %vm4569_vm1, %v4360_v44, %v4697_v39  ;;  %v7088_v28 = vor.u32 1.1754944e-38, %v7087_v47 }
 0x7d9   : > { %v4957_v40 = vmul.f32 %v11723_v42, %v4825_v19  ;;  %vm7086_vm14 = vcmp.eq.f32.partialorder %v7085_v30, 8.507059e+37  ;;  %v3663_v6 = vsel %vm3407_vm11, %v3236_v13, %v3535_v16 }
 0x7da   : > { %v8967_v60 = vpop.eup %8966  ;;  %v7065_v4 = vadd.f32 %v8965_v62, %v7064_v55  ;;  %v8596_v10 = vmul.f32 -1.442695, %v5458_v21 }
 0x7db   : > { %v4362_v56 = vpop.f32.mrf.mxu3  ;;  %v8969_v24 = vpop.eup %8968  ;;  %v11770_v9 = vadd.f32 1.0, %v8967_v60  ;;  %v5259_v29 = vsel %vm528_vm0, %v4957_v40, 0.0 }
 0x7dc   : > { %v4363_v38 = vadd.f32 %v11751_v49, %v4362_v56  ;;  %v7069_v18 = vsel %vm7068_vm6, %v8965_v62, %v7065_v4  ;;  %v7077_v14 = vmul.f32 %v8969_v24, %v11746_v46  ;;  %8970 = vpow2.f32 %v8596_v10  ;;  %5260 = vadd.xlane.f32.xlu0 %v5259_v29  ;;  %v11810_v4 = vpop.f32.mrf.mxu2 }
 0x7dd   : > { %v7074_v34 = vsel %vm7071_vm7, %v7073_v32, %v7069_v18  ;;  %8972 = vrcp.f32 %v11770_v9  ;;  %vm7082_vm10 = vweird.f32 %v8969_v24  ;;  %v3239_v62 = vadd.f32 %v11615_v43, %v11683_v37 }
 0x7de   : > { %8016 = vst.msk [vmem:[%s10509_s21 + $0x228] sm:$0xff] %vm7946_vm8, %v7074_v34  ;;  %v7078_v33 = vsub.f32 1.0, %v7077_v14  ;;  %v4698_v15 = vmul.f32 0.2, %v4363_v38  ;;  %vm4570_vm9 = vcmp.ge.f32.partialorder %v4363_v38, 0.0  ;;  %vm7083_vm13 = vmor %vm7081_vm12, %vm7082_vm10  ;;  %v7102_v27 = vand.u32 2147483648, %v11770_v9 }
 0x7df   : > { %v5219_v59 = vpop.xlane.xlu1 %5218  ;;  %v7100_v36 = vand.u32 2147483647, %v11770_v9  ;;  %vm3408_vm3 = vcmp.ge.f32.partialorder %v3239_v62, 0.0  ;;  %v3536_v20 = vmul.f32 0.2, %v3239_v62  ;;  %vm7096_vm4 = vweird.f32 %v11770_v9 }
 0x7e0   : > { %8501 = vmatmul.msk.f32.gmra.mxu3 %vm1710_vm2, %v3662_v7  ;;  %v7079_v48 = vmul.f32 %v8969_v24, %v7078_v33  ;;  %v5459_v26 = vadd.f32 %v11549_v12, %v5219_v59  ;;  %v4826_v57 = vsel %vm4570_vm9, %v4363_v38, %v4698_v15  ;;  %v7103_v19 = vor.u32 1.1754944e-38, %v7102_v27 }
 0x7e1   : > { %v4958_v1 = vmul.f32 %v11723_v42, %v4826_v57  ;;  %vm7101_vm6 = vcmp.eq.f32.partialorder %v7100_v36, 8.507059e+37  ;;  %v3664_v29 = vsel %vm3408_vm3, %v3239_v62, %v3536_v20  ;;  %v11841_v62 = vld [vmem:[#allocation2] ss:$0 sm:$0xff] }
 0x7e2   : > { %v8971_v54 = vpop.eup %8970  ;;  %v7080_v5 = vadd.f32 %v8969_v24, %v7079_v48  ;;  %v8597_v8 = vmul.f32 -1.442695, %v5459_v26 }
 0x7e3   : > { %v4365_v31 = vpop.f32.mrf.mxu3  ;;  %v8973_v0 = vpop.eup %8972  ;;  %v11789_v23 = vadd.f32 1.0, %v8971_v54  ;;  %v5262_v53 = vsel %vm528_vm0, %v4958_v1, 0.0 }
 0x7e4   : > { %v4366_v17 = vadd.f32 %v11751_v49, %v4365_v31  ;;  %v7084_v51 = vsel %vm7083_vm13, %v8969_v24, %v7080_v5  ;;  %v7092_v45 = vmul.f32 %v8973_v0, %v11770_v9  ;;  %8974 = vpow2.f32 %v8597_v8  ;;  %5263 = vadd.xlane.f32.xlu1 %v5262_v53 }
 0x7e5   : > { %v7089_v22 = vsel %vm7086_vm14, %v7088_v28, %v7084_v51  ;;  %8976 = vrcp.f32 %v11789_v23  ;;  %vm7097_vm1 = vweird.f32 %v8973_v0  ;;  %v3242_v24 = vadd.f32 %v11615_v43, %v11707_v3 }
 0x7e6   : > { %8017 = vst.msk [vmem:[%s10509_s21 + $0x230] sm:$0xff] %vm7946_vm8, %v7089_v22  ;;  %v7093_v46 = vsub.f32 1.0, %v7092_v45  ;;  %v4699_v44 = vmul.f32 0.2, %v4366_v17  ;;  %vm4571_vm15 = vcmp.ge.f32.partialorder %v4366_v17, 0.0  ;;  %vm7098_vm5 = vmor %vm7096_vm4, %vm7097_vm1  ;;  %v7117_v14 = vand.u32 2147483648, %v11789_v23 }
 0x7e7   : > { %v5222_v2 = vpop.xlane.xlu2 %5221  ;;  %v7115_v18 = vand.u32 2147483647, %v11789_v23  ;;  %vm3409_vm10 = vcmp.ge.f32.partialorder %v3242_v24, 0.0  ;;  %v3537_v30 = vmul.f32 0.2, %v3242_v24  ;;  %vm7111_vm11 = vweird.f32 %v11789_v23 }
 0x7e8   : > { %8502 = vmatmul.msk.f32.gmra.mxu3 %vm1710_vm2, %v3663_v6  ;;  %v7094_v58 = vmul.f32 %v8973_v0, %v7093_v46  ;;  %v5460_v37 = vadd.f32 %v11549_v12, %v5222_v2  ;;  %v4827_v25 = vsel %vm4571_vm15, %v4366_v17, %v4699_v44  ;;  %v7118_v57 = vor.u32 1.1754944e-38, %v7117_v14 }
 0x7e9   : > { %v4959_v39 = vmul.f32 %v11723_v42, %v4827_v25  ;;  %vm7116_vm13 = vcmp.eq.f32.partialorder %v7115_v18, 8.507059e+37  ;;  %v3245_v8 = vadd.f32 %v11615_v43, %v11735_v63  ;;  %v3665_v17 = vsel %vm3409_vm10, %v3242_v24, %v3537_v30 }
 0x7ea   : > { %v8975_v61 = vpop.eup %8974  ;;  %v7095_v11 = vadd.f32 %v8973_v0, %v7094_v58  ;;  %v8598_v52 = vmul.f32 -1.442695, %v5460_v37 }
 0x7eb   : > { %v4368_v55 = vpop.f32.mrf.mxu3  ;;  %v8977_v21 = vpop.eup %8976  ;;  %v11806_v40 = vadd.f32 1.0, %v8975_v61  ;;  %v5265_v41 = vsel %vm528_vm0, %v4959_v39, 0.0  ;;  %vm3410_vm1 = vcmp.ge.f32.partialorder %v3245_v8, 0.0  ;;  %v3538_v36 = vmul.f32 0.2, %v3245_v8 }
 0x7ec   : > { %v4369_v60 = vadd.f32 %v11751_v49, %v4368_v55  ;;  %v7099_v10 = vsel %vm7098_vm5, %v8973_v0, %v7095_v11  ;;  %v7107_v56 = vmul.f32 %v8977_v21, %v11789_v23  ;;  %8978 = vpow2.f32 %v8598_v52  ;;  %5266 = vadd.xlane.f32.xlu2 %v5265_v41  ;;  %v11833_v0 = vpop.f32.mrf.mxu2 }
 0x7ed   : > { %v7104_v32 = vsel %vm7101_vm6, %v7103_v19, %v7099_v10  ;;  %8980 = vrcp.f32 %v11806_v40  ;;  %vm7112_vm9 = vweird.f32 %v8977_v21  ;;  %v7130_v53 = vand.u32 2147483647, %v11806_v40 }
 0x7ee   : > { %8018 = vst.msk [vmem:[%s10509_s21 + $0x238] sm:$0xff] %vm7946_vm8, %v7104_v32  ;;  %v7108_v9 = vsub.f32 1.0, %v7107_v56  ;;  %v4700_v38 = vmul.f32 0.2, %v4369_v60  ;;  %vm4572_vm7 = vcmp.ge.f32.partialorder %v4369_v60, 0.0  ;;  %vm7113_vm12 = vmor %vm7111_vm11, %vm7112_vm9  ;;  %v7132_v51 = vand.u32 2147483648, %v11806_v40 }
 0x7ef   : > { %v5225_v13 = vpop.xlane.xlu0 %5224  ;;  %vm7126_vm3 = vweird.f32 %v11806_v40  ;;  %vm7131_vm5 = vcmp.eq.f32.partialorder %v7130_v53, 8.507059e+37  ;;  %v3248_v55 = vadd.f32 %v11615_v43, %v11765_v35 }
 0x7f0   : > { %8503 = vmatmul.msk.f32.gmra.mxu3 %vm1710_vm2, %v3664_v29  ;;  %v7109_v34 = vmul.f32 %v8977_v21, %v7108_v9  ;;  %v5461_v3 = vadd.f32 %v11549_v12, %v5225_v13  ;;  %v4828_v33 = vsel %vm4572_vm7, %v4369_v60, %v4700_v38  ;;  %v7133_v25 = vor.u32 1.1754944e-38, %v7132_v51 }
 0x7f1   : > { %v4960_v15 = vmul.f32 %v11723_v42, %v4828_v33  ;;  %v3666_v60 = vsel %vm3410_vm1, %v3245_v8, %v3538_v36  ;;  %vm3411_vm9 = vcmp.ge.f32.partialorder %v3248_v55, 0.0  ;;  %v3539_v18 = vmul.f32 0.2, %v3248_v55 }
 0x7f2   : > { %v8979_v7 = vpop.eup %8978  ;;  %v7110_v47 = vadd.f32 %v8977_v21, %v7109_v34  ;;  %v8599_v59 = vmul.f32 -1.442695, %v5461_v3 }
 0x7f3   : > { %v4371_v48 = vpop.f32.mrf.mxu3  ;;  %v8981_v26 = vpop.eup %8980  ;;  %v11825_v1 = vadd.f32 1.0, %v8979_v7  ;;  %v5268_v12 = vsel %vm528_vm0, %v4960_v15, 0.0 }
 0x7f4   : > { %v4372_v54 = vadd.f32 %v11751_v49, %v4371_v48  ;;  %v7114_v16 = vsel %vm7113_vm12, %v8977_v21, %v7110_v47  ;;  %v7122_v5 = vmul.f32 %v8981_v26, %v11806_v40  ;;  %8982 = vpow2.f32 %v8599_v59  ;;  %5269 = vadd.xlane.f32.xlu0 %v5268_v12  ;;  %v11860_v24 = vpop.f32.mrf.mxu2 }
 0x7f5   : > { %v7119_v31 = vsel %vm7116_vm13, %v7118_v57, %v7114_v16  ;;  %8984 = vrcp.f32 %v11825_v1  ;;  %vm7127_vm15 = vweird.f32 %v8981_v26  ;;  %v7145_v41 = vand.u32 2147483647, %v11825_v1 }
 0x7f6   : > { %8019 = vst.msk [vmem:[%s10509_s21 + $0x240] sm:$0xff] %vm7946_vm8, %v7119_v31  ;;  %v7123_v28 = vsub.f32 1.0, %v7122_v5  ;;  %v4701_v23 = vmul.f32 0.2, %v4372_v54  ;;  %vm4573_vm14 = vcmp.ge.f32.partialorder %v4372_v54, 0.0  ;;  %vm7128_vm4 = vmor %vm7126_vm3, %vm7127_vm15  ;;  %v7147_v10 = vand.u32 2147483648, %v11825_v1 }
 0x7f7   : > { %v5228_v45 = vpop.xlane.xlu1 %5227  ;;  %vm7141_vm10 = vweird.f32 %v11825_v1  ;;  %vm7146_vm12 = vcmp.eq.f32.partialorder %v7145_v41, 8.507059e+37  ;;  %v3251_v48 = vadd.f32 %v11615_v43, %v11786_v50 }
 0x7f8   : > { %8504 = vmatmul.msk.f32.gmra.mxu3 %vm1710_vm2, %v3665_v17  ;;  %v7124_v63 = vmul.f32 %v8981_v26, %v7123_v28  ;;  %v5462_v22 = vadd.f32 %v11841_v62, %v5228_v45  ;;  %v4829_v46 = vsel %vm4573_vm14, %v4372_v54, %v4701_v23  ;;  %v7148_v33 = vor.u32 1.1754944e-38, %v7147_v10 }
 0x7f9   : > { %v4961_v44 = vmul.f32 %v11723_v42, %v4829_v46  ;;  %v3667_v54 = vsel %vm3411_vm9, %v3248_v55, %v3539_v18  ;;  %vm3412_vm15 = vcmp.ge.f32.partialorder %v3251_v48, 0.0  ;;  %v3540_v17 = vmul.f32 0.2, %v3251_v48 }
 0x7fa   : > { %v8983_v6 = vpop.eup %8982  ;;  %v7125_v27 = vadd.f32 %v8981_v26, %v7124_v63  ;;  %v8600_v2 = vmul.f32 -1.442695, %v5462_v22 }
 0x7fb   : > { %v4374_v58 = vpop.f32.mrf.mxu3  ;;  %v8985_v37 = vpop.eup %8984  ;;  %v11846_v39 = vadd.f32 1.0, %v8983_v6  ;;  %v5271_v20 = vsel %vm528_vm0, %v4961_v44, 0.0 }
 0x7fc   : > { %v4375_v61 = vadd.f32 %v11751_v49, %v4374_v58  ;;  %v7129_v11 = vsel %vm7128_vm4, %v8981_v26, %v7125_v27  ;;  %v7137_v52 = vmul.f32 %v8985_v37, %v11825_v1  ;;  %8986 = vpow2.f32 %v8600_v2  ;;  %5272 = vadd.xlane.f32.xlu1 %v5271_v20  ;;  %v11881_v53 = vpop.f32.mrf.mxu2 }
 0x7fd   : > { %v7134_v21 = vsel %vm7131_vm5, %v7133_v25, %v7129_v11  ;;  %8988 = vrcp.f32 %v11846_v39  ;;  %vm7142_vm7 = vweird.f32 %v8985_v37  ;;  %v7160_v12 = vand.u32 2147483647, %v11846_v39 }
 0x7fe   : > { %8020 = vst.msk [vmem:[%s10509_s21 + $0x248] sm:$0xff] %vm7946_vm8, %v7134_v21  ;;  %v7138_v19 = vsub.f32 1.0, %v7137_v52  ;;  %v4702_v40 = vmul.f32 0.2, %v4375_v61  ;;  %vm4574_vm6 = vcmp.ge.f32.partialorder %v4375_v61, 0.0  ;;  %vm7143_vm11 = vmor %vm7141_vm10, %vm7142_vm7  ;;  %v7162_v16 = vand.u32 2147483648, %v11846_v39 }
 0x7ff   : > { %v5231_v56 = vpop.xlane.xlu2 %5230  ;;  %vm7156_vm1 = vweird.f32 %v11846_v39  ;;  %vm7161_vm4 = vcmp.eq.f32.partialorder %v7160_v12, 8.507059e+37  ;;  %v3254_v58 = vadd.f32 %v11615_v43, %v11810_v4 }
 0x800   : > { %8505 = vmatmul.msk.f32.gmra.mxu3 %vm1710_vm2, %v3666_v60  ;;  %v7139_v35 = vmul.f32 %v8985_v37, %v7138_v19  ;;  %v5463_v32 = vadd.f32 %v11841_v62, %v5231_v56  ;;  %v4830_v9 = vsel %vm4574_vm6, %v4375_v61, %v4702_v40  ;;  %v7163_v46 = vor.u32 1.1754944e-38, %v7162_v16 }
 0x801   : > { %v4962_v38 = vmul.f32 %v11723_v42, %v4830_v9  ;;  %v3668_v61 = vsel %vm3412_vm15, %v3251_v48, %v3540_v17  ;;  %vm3413_vm7 = vcmp.ge.f32.partialorder %v3254_v58, 0.0  ;;  %v3541_v40 = vmul.f32 0.2, %v3254_v58 }
 0x802   : > { %v8987_v29 = vpop.eup %8986  ;;  %v7140_v14 = vadd.f32 %v8985_v37, %v7139_v35  ;;  %v8601_v13 = vmul.f32 -1.442695, %v5463_v32 }
 0x803   : > { %v4377_v34 = vpop.f32.mrf.mxu3  ;;  %v8989_v3 = vpop.eup %8988  ;;  %v11865_v15 = vadd.f32 1.0, %v8987_v29  ;;  %v5274_v30 = vsel %vm528_vm0, %v4962_v38, 0.0 }
 0x804   : > { %v4378_v7 = vadd.f32 %v11751_v49, %v4377_v34  ;;  %v7144_v47 = vsel %vm7143_vm11, %v8985_v37, %v7140_v14  ;;  %v7152_v59 = vmul.f32 %v8989_v3, %v11846_v39  ;;  %8990 = vpow2.f32 %v8601_v13  ;;  %5275 = vadd.xlane.f32.xlu2 %v5274_v30  ;;  %v11905_v29 = vpop.f32.mrf.mxu2  ;;  %v11911_v13 = vld [vmem:[%s12487_s6] ss:$0 sm:$0xff] }
 0x805   : > { %v7149_v26 = vsel %vm7146_vm12, %v7148_v33, %v7144_v47  ;;  %8992 = vrcp.f32 %v11865_v15  ;;  %vm7157_vm14 = vweird.f32 %v8989_v3  ;;  %v7175_v20 = vand.u32 2147483647, %v11865_v15 }
 0x806   : > { %8021 = vst.msk [vmem:[%s10509_s21 + $0x250] sm:$0xff] %vm7946_vm8, %v7149_v26  ;;  %v7153_v57 = vsub.f32 1.0, %v7152_v59  ;;  %v4703_v1 = vmul.f32 0.2, %v4378_v7  ;;  %vm4575_vm13 = vcmp.ge.f32.partialorder %v4378_v7, 0.0  ;;  %vm7158_vm3 = vmor %vm7156_vm1, %vm7157_vm14  ;;  %v7177_v11 = vand.u32 2147483648, %v11865_v15 }
 0x807   : > { %v5234_v5 = vpop.xlane.xlu0 %5233  ;;  %vm7171_vm9 = vweird.f32 %v11865_v15  ;;  %vm7176_vm11 = vcmp.eq.f32.partialorder %v7175_v20, 8.507059e+37  ;;  %v3257_v34 = vadd.f32 %v11911_v13, %v11833_v0 }
 0x808   : > { %8506 = vmatmul.msk.f32.gmra.mxu3 %vm1710_vm2, %v3667_v54  ;;  %v7154_v8 = vmul.f32 %v8989_v3, %v7153_v57  ;;  %v5464_v50 = vadd.f32 %v11841_v62, %v5234_v5  ;;  %v4831_v31 = vsel %vm4575_vm13, %v4378_v7, %v4703_v1  ;;  %v7178_v35 = vor.u32 1.1754944e-38, %v7177_v11 }
 0x809   : > { %v4963_v28 = vmul.f32 %v11723_v42, %v4831_v31  ;;  %v3669_v7 = vsel %vm3413_vm7, %v3254_v58, %v3541_v40  ;;  %vm3414_vm14 = vcmp.ge.f32.partialorder %v3257_v34, 0.0  ;;  %v3542_v54 = vmul.f32 0.2, %v3257_v34 }
 0x80a   : > { %v8991_v23 = vpop.eup %8990  ;;  %v7155_v51 = vadd.f32 %v8989_v3, %v7154_v8  ;;  %v8602_v45 = vmul.f32 -1.442695, %v5464_v50 }
 0x80b   : > { %v4380_v63 = vpop.f32.mrf.mxu3  ;;  %v8993_v22 = vpop.eup %8992  ;;  %v11884_v44 = vadd.f32 1.0, %v8991_v23  ;;  %v5277_v36 = vsel %vm528_vm0, %v4963_v28, 0.0 }
 0x80c   : > { %v4381_v6 = vadd.f32 %v11751_v49, %v4380_v63  ;;  %v7159_v27 = vsel %vm7158_vm3, %v8989_v3, %v7155_v51  ;;  %v7167_v2 = vmul.f32 %v8993_v22, %v11865_v15  ;;  %8994 = vpow2.f32 %v8602_v45  ;;  %5278 = vadd.xlane.f32.xlu0 %v5277_v36 }
 0x80d   : > { %v7164_v37 = vsel %vm7161_vm4, %v7163_v46, %v7159_v27  ;;  %8996 = vrcp.f32 %v11884_v44  ;;  %vm7172_vm6 = vweird.f32 %v8993_v22  ;;  %v7190_v30 = vand.u32 2147483647, %v11884_v44 }
 0x80e   : > { %8022 = vst.msk [vmem:[%s10509_s21 + $0x258] sm:$0xff] %vm7946_vm8, %v7164_v37  ;;  %v7168_v25 = vsub.f32 1.0, %v7167_v2  ;;  %v4704_v39 = vmul.f32 0.2, %v4381_v6  ;;  %vm4576_vm5 = vcmp.ge.f32.partialorder %v4381_v6, 0.0  ;;  %vm7173_vm10 = vmor %vm7171_vm9, %vm7172_vm6  ;;  %v7192_v47 = vand.u32 2147483648, %v11884_v44 }
 0x80f   : > { %v5237_v52 = vpop.xlane.xlu1 %5236  ;;  %vm7186_vm15 = vweird.f32 %v11884_v44  ;;  %vm7191_vm3 = vcmp.eq.f32.partialorder %v7190_v30, 8.507059e+37  ;;  %v3260_v45 = vadd.f32 %v11911_v13, %v11860_v24 }
 0x810   : > { %8507 = vmatmul.msk.f32.gmra.mxu3 %vm1710_vm2, %v3668_v61  ;;  %v7169_v55 = vmul.f32 %v8993_v22, %v7168_v25  ;;  %v5465_v43 = vadd.f32 %v11841_v62, %v5237_v52  ;;  %v4832_v4 = vsel %vm4576_vm5, %v4381_v6, %v4704_v39  ;;  %v7193_v50 = vor.u32 1.1754944e-38, %v7192_v47 }
 0x811   : > { %v4964_v21 = vmul.f32 %v11723_v42, %v4832_v4  ;;  %v3670_v6 = vsel %vm3414_vm14, %v3257_v34, %v3542_v54  ;;  %vm3415_vm6 = vcmp.ge.f32.partialorder %v3260_v45, 0.0  ;;  %v3543_v61 = vmul.f32 0.2, %v3260_v45 }
 0x812   : > { %v8995_v19 = vpop.eup %8994  ;;  %v7170_v60 = vadd.f32 %v8993_v22, %v7169_v55  ;;  %v8603_v41 = vmul.f32 -1.442695, %v5465_v43 }
 0x813   : > { %v4383_v10 = vpop.f32.mrf.mxu3  ;;  %v8997_v56 = vpop.eup %8996  ;;  %v11901_v32 = vadd.f32 1.0, %v8995_v19  ;;  %v5280_v38 = vsel %vm528_vm0, %v4964_v21, 0.0 }
 0x814   : > { %v4384_v9 = vadd.f32 %v11751_v49, %v4383_v10  ;;  %v7174_v18 = vsel %vm7173_vm10, %v8993_v22, %v7170_v60  ;;  %v7182_v14 = vmul.f32 %v8997_v56, %v11884_v44  ;;  %8998 = vpow2.f32 %v8603_v41  ;;  %5281 = vadd.xlane.f32.xlu1 %v5280_v38  ;;  %v11933_v22 = vpop.f32.mrf.mxu2 }
 0x815   : > { %v7179_v3 = vsel %vm7176_vm11, %v7178_v35, %v7174_v18  ;;  %9000 = vrcp.f32 %v11901_v32  ;;  %vm7187_vm13 = vweird.f32 %v8997_v56  ;;  %v7205_v36 = vand.u32 2147483647, %v11901_v32 }
 0x816   : > { %8023 = vst.msk [vmem:[%s10509_s21 + $0x260] sm:$0xff] %vm7946_vm8, %v7179_v3  ;;  %v7183_v33 = vsub.f32 1.0, %v7182_v14  ;;  %v4705_v15 = vmul.f32 0.2, %v4384_v9  ;;  %vm4577_vm12 = vcmp.ge.f32.partialorder %v4384_v9, 0.0  ;;  %vm7188_vm1 = vmor %vm7186_vm15, %vm7187_vm13  ;;  %v7207_v27 = vand.u32 2147483648, %v11901_v32 }
 0x817   : > { %v5240_v59 = vpop.xlane.xlu2 %5239  ;;  %vm7201_vm7 = vweird.f32 %v11901_v32  ;;  %vm7206_vm10 = vcmp.eq.f32.partialorder %v7205_v36, 8.507059e+37  ;;  %v3263_v41 = vadd.f32 %v11911_v13, %v11881_v53 }
 0x818   : > { %8508 = vmatmul.msk.f32.gmra.mxu3 %vm1710_vm2, %v3669_v7  ;;  %v7184_v48 = vmul.f32 %v8997_v56, %v7183_v33  ;;  %v5466_v0 = vadd.f32 %v11841_v62, %v5240_v59  ;;  %v4833_v26 = vsel %vm4577_vm12, %v4384_v9, %v4705_v15  ;;  %v7208_v43 = vor.u32 1.1754944e-38, %v7207_v27 }
 0x819   : > { %v4965_v57 = vmul.f32 %v11723_v42, %v4833_v26  ;;  %vm3416_vm13 = vcmp.ge.f32.partialorder %v3263_v41, 0.0  ;;  %v3544_v7 = vmul.f32 0.2, %v3263_v41 }
 0x81a   : > { %v8999_v1 = vpop.eup %8998  ;;  %v7185_v12 = vadd.f32 %v8997_v56, %v7184_v48  ;;  %v8604_v16 = vmul.f32 -1.442695, %v5466_v0 }
 0x81b   : > { %v4386_v5 = vpop.f32.mrf.mxu3  ;;  %v9001_v8 = vpop.eup %9000  ;;  %v11925_v31 = vadd.f32 1.0, %v8999_v1  ;;  %v5283_v23 = vsel %vm528_vm0, %v4965_v57, 0.0 }
 0x81c   : > { %v4387_v28 = vadd.f32 %v11751_v49, %v4386_v5  ;;  %v7189_v17 = vsel %vm7188_vm1, %v8997_v56, %v7185_v12  ;;  %v7197_v51 = vmul.f32 %v9001_v8, %v11901_v32  ;;  %9002 = vpow2.f32 %v8604_v16  ;;  %5284 = vadd.xlane.f32.xlu2 %v5283_v23  ;;  %v11958_v14 = vpop.f32.mrf.mxu2 }
 0x81d   : > { %v7194_v63 = vsel %vm7191_vm3, %v7193_v50, %v7189_v17  ;;  %9004 = vrcp.f32 %v11925_v31  ;;  %vm7202_vm5 = vweird.f32 %v9001_v8  ;;  %v3671_v32 = vsel %vm3415_vm6, %v3260_v45, %v3543_v61 }
 0x81e   : > { %8024 = vst.msk [vmem:[%s10509_s21 + $0x268] sm:$0xff] %vm7946_vm8, %v7194_v63  ;;  %v7198_v46 = vsub.f32 1.0, %v7197_v51  ;;  %v4706_v44 = vmul.f32 0.2, %v4387_v28  ;;  %vm4578_vm4 = vcmp.ge.f32.partialorder %v4387_v28, 0.0  ;;  %vm7203_vm9 = vmor %vm7201_vm7, %vm7202_vm5  ;;  %v7222_v38 = vand.u32 2147483648, %v11925_v31 }
 0x81f   : > { %v5243_v2 = vpop.xlane.xlu0 %5242  ;;  %v7220_v9 = vand.u32 2147483647, %v11925_v31  ;;  %vm7216_vm14 = vweird.f32 %v11925_v31  ;;  %v3266_v16 = vadd.f32 %v11911_v13, %v11905_v29 }
 0x820   : > { %8509 = vmatmul.msk.f32.gmra.mxu3 %vm1710_vm2, %v3670_v6  ;;  %v7199_v24 = vmul.f32 %v9001_v8, %v7198_v46  ;;  %v5467_v58 = vadd.f32 %v11841_v62, %v5243_v2  ;;  %v4834_v37 = vsel %vm4578_vm4, %v4387_v28, %v4706_v44  ;;  %v7223_v0 = vor.u32 1.1754944e-38, %v7222_v38 }
 0x821   : > { %v4966_v25 = vmul.f32 %v11723_v42, %v4834_v37  ;;  %vm7221_vm1 = vcmp.eq.f32.partialorder %v7220_v9, 8.507059e+37  ;;  %vm3417_vm5 = vcmp.ge.f32.partialorder %v3266_v16, 0.0  ;;  %v3545_v44 = vmul.f32 0.2, %v3266_v16 }
 0x822   : > { %v9003_v39 = vpop.eup %9002  ;;  %v7200_v20 = vadd.f32 %v9001_v8, %v7199_v24  ;;  %v8605_v11 = vmul.f32 -1.442695, %v5467_v58 }
 0x823   : > { %v4389_v52 = vpop.f32.mrf.mxu3  ;;  %v9005_v55 = vpop.eup %9004  ;;  %v11944_v4 = vadd.f32 1.0, %v9003_v39  ;;  %v5286_v19 = vsel %vm528_vm0, %v4966_v25, 0.0 }
 0x824   : > { %v4390_v21 = vadd.f32 %v11751_v49, %v4389_v52  ;;  %v7204_v40 = vsel %vm7203_vm9, %v9001_v8, %v7200_v20  ;;  %v7212_v60 = vmul.f32 %v9005_v55, %v11925_v31  ;;  %9006 = vpow2.f32 %v8605_v11  ;;  %5287 = vadd.xlane.f32.xlu0 %v5286_v19  ;;  %v11979_v6 = vpop.f32.mrf.mxu2 }
 0x825   : > { %v7209_v10 = vsel %vm7206_vm10, %v7208_v43, %v7204_v40  ;;  %9008 = vrcp.f32 %v11944_v4  ;;  %vm7217_vm12 = vweird.f32 %v9005_v55  ;;  %v3672_v31 = vsel %vm3416_vm13, %v3263_v41, %v3544_v7 }
 0x826   : > { %8025 = vst.msk [vmem:[%s10509_s21 + $0x270] sm:$0xff] %vm7946_vm8, %v7209_v10  ;;  %v7213_v56 = vsub.f32 1.0, %v7212_v60  ;;  %v4707_v35 = vmul.f32 0.2, %v4390_v21  ;;  %vm4579_vm11 = vcmp.ge.f32.partialorder %v4390_v21, 0.0  ;;  %vm7218_vm15 = vmor %vm7216_vm14, %vm7217_vm12  ;;  %v7237_v23 = vand.u32 2147483648, %v11944_v4 }
 0x827   : > { %v5246_v18 = vpop.xlane.xlu1 %5245  ;;  %v7235_v28 = vand.u32 2147483647, %v11944_v4  ;;  %vm7231_vm6 = vweird.f32 %v11944_v4  ;;  %v3269_v11 = vadd.f32 %v11911_v13, %v11933_v22 }
 0x828   : > { %8510 = vmatmul.msk.f32.gmra.mxu3 %vm1710_vm2, %v3671_v32  ;;  %v7214_v53 = vmul.f32 %v9005_v55, %v7213_v56  ;;  %v5468_v34 = vadd.f32 %v11841_v62, %v5246_v18  ;;  %v4835_v3 = vsel %vm4579_vm11, %v4390_v21, %v4707_v35  ;;  %v7238_v58 = vor.u32 1.1754944e-38, %v7237_v23 }
 0x829   : > { %v4967_v33 = vmul.f32 %v11723_v42, %v4835_v3  ;;  %vm7236_vm9 = vcmp.eq.f32.partialorder %v7235_v28, 8.507059e+37  ;;  %vm3418_vm12 = vcmp.ge.f32.partialorder %v3269_v11, 0.0  ;;  %v3546_v35 = vmul.f32 0.2, %v3269_v11 }
 0x82a   : > { %v9007_v15 = vpop.eup %9006  ;;  %v7215_v30 = vadd.f32 %v9005_v55, %v7214_v53  ;;  %v8606_v47 = vmul.f32 -1.442695, %v5468_v34 }
 0x82b   : > { %v4392_v59 = vpop.f32.mrf.mxu3  ;;  %v9009_v48 = vpop.eup %9008  ;;  %v11963_v26 = vadd.f32 1.0, %v9007_v15  ;;  %v5289_v1 = vsel %vm528_vm0, %v4967_v33, 0.0 }
 0x82c   : > { %v4393_v57 = vadd.f32 %v11751_v49, %v4392_v59  ;;  %v7219_v54 = vsel %vm7218_vm15, %v9005_v55, %v7215_v30  ;;  %v7227_v12 = vmul.f32 %v9009_v48, %v11944_v4  ;;  %9010 = vpow2.f32 %v8606_v47  ;;  %5290 = vadd.xlane.f32.xlu1 %v5289_v1  ;;  %v12003_v15 = vpop.f32.mrf.mxu2 }
 0x82d   : > { %v7224_v5 = vsel %vm7221_vm1, %v7223_v0, %v7219_v54  ;;  %9012 = vrcp.f32 %v11963_v26  ;;  %vm7232_vm4 = vweird.f32 %v9009_v48  ;;  %v3673_v4 = vsel %vm3417_vm5, %v3266_v16, %v3545_v44  ;;  %v12019_v16 = vld [vmem:[%s12490_s9] ss:$0 sm:$0xff] }
 0x82e   : > { %8026 = vst.msk [vmem:[%s10509_s21 + $0x278] sm:$0xff] %vm7946_vm8, %v7224_v5  ;;  %v7228_v8 = vsub.f32 1.0, %v7227_v12  ;;  %v4708_v50 = vmul.f32 0.2, %v4393_v57  ;;  %vm4580_vm3 = vcmp.ge.f32.partialorder %v4393_v57, 0.0  ;;  %vm7233_vm7 = vmor %vm7231_vm6, %vm7232_vm4  ;;  %v7252_v19 = vand.u32 2147483648, %v11963_v26 }
 0x82f   : > { %v5249_v17 = vpop.xlane.xlu2 %5248  ;;  %v7250_v21 = vand.u32 2147483647, %v11963_v26  ;;  %vm7246_vm13 = vweird.f32 %v11963_v26  ;;  %v3272_v30 = vadd.f32 %v11911_v13, %v11958_v14  ;;  %v3674_v0 = vsel %vm3418_vm12, %v3269_v11, %v3546_v35 }
 0x830   : > { %8511 = vmatmul.msk.f32.gmra.mxu3 %vm1710_vm2, %v3672_v31  ;;  %v7229_v51 = vmul.f32 %v9009_v48, %v7228_v8  ;;  %v5469_v29 = vadd.f32 %v11841_v62, %v5249_v17  ;;  %v4836_v45 = vsel %vm4580_vm3, %v4393_v57, %v4708_v50  ;;  %v7253_v53 = vor.u32 1.1754944e-38, %v7252_v19 }
 0x831   : > { %v4968_v63 = vmul.f32 %v11723_v42, %v4836_v45  ;;  %vm7251_vm15 = vcmp.eq.f32.partialorder %v7250_v21, 8.507059e+37  ;;  %vm3419_vm4 = vcmp.ge.f32.partialorder %v3272_v30, 0.0  ;;  %v3547_v50 = vmul.f32 0.2, %v3272_v30 }
 0x832   : > { %v9011_v46 = vpop.eup %9010  ;;  %v7230_v36 = vadd.f32 %v9009_v48, %v7229_v51  ;;  %v8607_v27 = vmul.f32 -1.442695, %v5469_v29 }
 0x833   : > { %v4395_v2 = vpop.f32.mrf.mxu3  ;;  %v9013_v24 = vpop.eup %9012  ;;  %v11982_v37 = vadd.f32 1.0, %v9011_v46  ;;  %v5292_v39 = vsel %vm528_vm0, %v4968_v63, 0.0 }
 0x834   : > { %v4396_v25 = vadd.f32 %v11751_v49, %v4395_v2  ;;  %v7234_v61 = vsel %vm7233_vm7, %v9009_v48, %v7230_v36  ;;  %v7242_v20 = vmul.f32 %v9013_v24, %v11963_v26  ;;  %9014 = vpow2.f32 %v8607_v27  ;;  %5293 = vadd.xlane.f32.xlu2 %v5292_v39  ;;  %v12031_v2 = vpop.f32.mrf.mxu2 }
 0x835   : > { %v7239_v52 = vsel %vm7236_vm9, %v7238_v58, %v7234_v61  ;;  %9016 = vrcp.f32 %v11982_v37  ;;  %vm7247_vm11 = vweird.f32 %v9013_v24  ;;  %v7265_v26 = vand.u32 2147483647, %v11982_v37 }
 0x836   : > { %8027 = vst.msk [vmem:[%s10509_s21 + $0x280] sm:$0xff] %vm7946_vm8, %v7239_v52  ;;  %v7243_v55 = vsub.f32 1.0, %v7242_v20  ;;  %v4709_v43 = vmul.f32 0.2, %v4396_v25  ;;  %vm4581_vm10 = vcmp.ge.f32.partialorder %v4396_v25, 0.0  ;;  %vm7248_vm14 = vmor %vm7246_vm13, %vm7247_vm11  ;;  %v7267_v57 = vand.u32 2147483648, %v11982_v37 }
 0x837   : > { %v5252_v40 = vpop.xlane.xlu0 %5251  ;;  %vm7261_vm5 = vweird.f32 %v11982_v37  ;;  %vm7266_vm7 = vcmp.eq.f32.partialorder %v7265_v26, 8.507059e+37  ;;  %v3275_v36 = vadd.f32 %v11911_v13, %v11979_v6  ;;  %v3675_v58 = vsel %vm3419_vm4, %v3272_v30, %v3547_v50 }
 0x838   : > { %8512 = vmatmul.msk.f32.gmra.mxu3 %vm1710_vm2, %v3673_v4  ;;  %v7244_v60 = vmul.f32 %v9013_v24, %v7243_v55  ;;  %v5470_v22 = vadd.f32 %v11841_v62, %v5252_v40  ;;  %v4837_v41 = vsel %vm4581_vm10, %v4396_v25, %v4709_v43  ;;  %v7268_v51 = vor.u32 1.1754944e-38, %v7267_v57 }
 0x839   : > { %v4969_v10 = vmul.f32 %v11723_v42, %v4837_v41  ;;  %vm3420_vm11 = vcmp.ge.f32.partialorder %v3275_v36, 0.0  ;;  %v3548_v55 = vmul.f32 0.2, %v3275_v36 }
 0x83a   : > { %v9015_v56 = vpop.eup %9014  ;;  %v7245_v32 = vadd.f32 %v9013_v24, %v7244_v60  ;;  %v8608_v9 = vmul.f32 -1.442695, %v5470_v22  ;;  %v12047_v22 = vld [vmem:[%s12489_s8] ss:$0 sm:$0xff] }
 0x83b   : > { %v4398_v38 = vpop.f32.mrf.mxu3  ;;  %v9017_v18 = vpop.eup %9016  ;;  %v11999_v34 = vadd.f32 1.0, %v9015_v56  ;;  %v5295_v33 = vsel %vm528_vm0, %v4969_v10, 0.0 }
 0x83c   : > { %v4399_v3 = vadd.f32 %v11751_v49, %v4398_v38  ;;  %v7249_v42 = vsel %vm7248_vm14, %v9013_v24, %v7245_v32  ;;  %v7257_v7 = vmul.f32 %v9017_v18, %v11982_v37  ;;  %9018 = vpow2.f32 %v8608_v9  ;;  %5296 = vadd.xlane.f32.xlu0 %v5295_v33 }
 0x83d   : > { %v7254_v47 = vsel %vm7251_vm15, %v7253_v53, %v7249_v42  ;;  %9020 = vrcp.f32 %v11999_v34  ;;  %vm7262_vm3 = vweird.f32 %v9017_v18  ;;  %v7280_v37 = vand.u32 2147483647, %v11999_v34  ;;  %v3283_v42 = vpop.f32.mrf.mxu2 }
 0x83e   : > { %8028 = vst.msk [vmem:[%s10509_s21 + $0x288] sm:$0xff] %vm7946_vm8, %v7254_v47  ;;  %v7258_v59 = vsub.f32 1.0, %v7257_v7  ;;  %v4710_v48 = vmul.f32 0.2, %v4399_v3  ;;  %vm4582_vm1 = vcmp.ge.f32.partialorder %v4399_v3, 0.0  ;;  %vm7263_vm6 = vmor %vm7261_vm5, %vm7262_vm3  ;;  %v7282_v25 = vand.u32 2147483648, %v11999_v34 }
 0x83f   : > { %v5255_v1 = vpop.xlane.xlu1 %5254  ;;  %vm7276_vm12 = vweird.f32 %v11999_v34  ;;  %vm7281_vm14 = vcmp.eq.f32.partialorder %v7280_v37, 8.507059e+37  ;;  %v3278_v32 = vadd.f32 %v11911_v13, %v12003_v15  ;;  %v3676_v53 = vsel %vm3420_vm11, %v3275_v36, %v3548_v55 }
 0x840   : > { %8513 = vmatmul.msk.f32.gmra.mxu3 %vm1710_vm2, %v3674_v0  ;;  %v7259_v54 = vmul.f32 %v9017_v18, %v7258_v59  ;;  %v5471_v14 = vadd.f32 %v11841_v62, %v5255_v1  ;;  %v4838_v12 = vsel %vm4582_vm1, %v4399_v3, %v4710_v48  ;;  %v7283_v40 = vor.u32 1.1754944e-38, %v7282_v25 }
 0x841   : > { %v4970_v5 = vmul.f32 %v12019_v16, %v4838_v12  ;;  %vm3421_vm3 = vcmp.ge.f32.partialorder %v3278_v32, 0.0  ;;  %v3549_v48 = vmul.f32 0.2, %v3278_v32 }
 0x842   : > { %v9019_v8 = vpop.eup %9018  ;;  %v7260_v31 = vadd.f32 %v9017_v18, %v7259_v54  ;;  %v8609_v28 = vmul.f32 -1.442695, %v5471_v14 }
 0x843   : > { %v4401_v23 = vpop.f32.mrf.mxu3  ;;  %v9021_v17 = vpop.eup %9020  ;;  %v12023_v29 = vadd.f32 1.0, %v9019_v8  ;;  %v5298_v63 = vsel %vm528_vm0, %v4970_v5, 0.0 }
 0x844   : > { %v4402_v45 = vadd.f32 %v11751_v49, %v4401_v23  ;;  %v7264_v46 = vsel %vm7263_vm6, %v9017_v18, %v7260_v31  ;;  %v7272_v44 = vmul.f32 %v9021_v17, %v11999_v34  ;;  %9022 = vpow2.f32 %v8609_v28  ;;  %5299 = vadd.xlane.f32.xlu1 %v5298_v63 }
 0x845   : > { %v7269_v27 = vsel %vm7266_vm7, %v7268_v51, %v7264_v46  ;;  %9024 = vrcp.f32 %v12023_v29  ;;  %vm7277_vm10 = vweird.f32 %v9021_v17  ;;  %v7295_v34 = vand.u32 2147483647, %v12023_v29 }
 0x846   : > { %8029 = vst.msk [vmem:[%s10509_s21 + $0x290] sm:$0xff] %vm7946_vm8, %v7269_v27  ;;  %v7273_v24 = vsub.f32 1.0, %v7272_v44  ;;  %v4711_v49 = vmul.f32 0.2, %v4402_v45  ;;  %vm4583_vm9 = vcmp.ge.f32.partialorder %v4402_v45, 0.0  ;;  %vm7278_vm13 = vmor %vm7276_vm12, %vm7277_vm10  ;;  %v7297_v3 = vand.u32 2147483648, %v12023_v29 }
 0x847   : > { %v5258_v39 = vpop.xlane.xlu2 %5257  ;;  %vm7291_vm4 = vweird.f32 %v12023_v29  ;;  %vm7296_vm6 = vcmp.eq.f32.partialorder %v7295_v34, 8.507059e+37  ;;  %v3281_v31 = vadd.f32 %v11911_v13, %v12031_v2  ;;  %v3677_v51 = vsel %vm3421_vm3, %v3278_v32, %v3549_v48 }
 0x848   : > { %8514 = vmatmul.msk.f32.gmra.mxu3 %vm1710_vm2, %v3675_v58  ;;  %v7274_v6 = vmul.f32 %v9021_v17, %v7273_v24  ;;  %v5472_v61 = vadd.f32 %v11841_v62, %v5258_v39  ;;  %v4839_v20 = vsel %vm4583_vm9, %v4402_v45, %v4711_v49  ;;  %v7298_v54 = vor.u32 1.1754944e-38, %v7297_v3  ;;  %v3286_v49 = vpop.f32.mrf.mxu2 }
 0x849   : > { %v4971_v11 = vmul.f32 %v12019_v16, %v4839_v20  ;;  %vm3422_vm10 = vcmp.ge.f32.partialorder %v3281_v31, 0.0  ;;  %v3550_v24 = vmul.f32 0.2, %v3281_v31 }
 0x84a   : > { %v9023_v52 = vpop.eup %9022  ;;  %v7275_v43 = vadd.f32 %v9021_v17, %v7274_v6  ;;  %v8610_v4 = vmul.f32 -1.442695, %v5472_v61 }
 0x84b   : > { %v4404_v21 = vpop.f32.mrf.mxu3  ;;  %v9025_v19 = vpop.eup %9024  ;;  %v12042_v60 = vadd.f32 1.0, %v9023_v52  ;;  %v5301_v10 = vsel %vm528_vm0, %v4971_v11, 0.0 }
 0x84c   : > { %v4405_v41 = vadd.f32 %v12047_v22, %v4404_v21  ;;  %v7279_v56 = vsel %vm7278_vm13, %v9021_v17, %v7275_v43  ;;  %v7287_v35 = vmul.f32 %v9025_v19, %v12023_v29  ;;  %9026 = vpow2.f32 %v8610_v4  ;;  %5302 = vadd.xlane.f32.xlu2 %v5301_v10 }
 0x84d   : > { %v7284_v9 = vsel %vm7281_vm14, %v7283_v40, %v7279_v56  ;;  %9028 = vrcp.f32 %v12042_v60  ;;  %vm7292_vm1 = vweird.f32 %v9025_v19  ;;  %v7310_v29 = vand.u32 2147483647, %v12042_v60 }
 0x84e   : > { %8030 = vst.msk [vmem:[%s10509_s21 + $0x298] sm:$0xff] %vm7946_vm8, %v7284_v9  ;;  %v7288_v38 = vsub.f32 1.0, %v7287_v35  ;;  %v4712_v18 = vmul.f32 0.2, %v4405_v41  ;;  %vm4584_vm15 = vcmp.ge.f32.partialorder %v4405_v41, 0.0  ;;  %vm7293_vm5 = vmor %vm7291_vm4, %vm7292_vm1  ;;  %v7312_v45 = vand.u32 2147483648, %v12042_v60 }
 0x84f   : > { %v5261_v33 = vpop.xlane.xlu0 %5260  ;;  %vm7306_vm11 = vweird.f32 %v12042_v60  ;;  %vm7311_vm13 = vcmp.eq.f32.partialorder %v7310_v29, 8.507059e+37  ;;  %v3284_v43 = vadd.f32 %v11911_v13, %v3283_v42  ;;  %v3678_v40 = vsel %vm3422_vm10, %v3281_v31, %v3550_v24 }
 0x850   : > { %8515 = vmatmul.msk.f32.gmra.mxu3 %vm1710_vm2, %v3676_v53  ;;  %v7289_v7 = vmul.f32 %v9025_v19, %v7288_v38  ;;  %v5473_v15 = vadd.f32 %v11841_v62, %v5261_v33  ;;  %v4840_v30 = vsel %vm4584_vm15, %v4405_v41, %v4712_v18  ;;  %v7313_v6 = vor.u32 1.1754944e-38, %v7312_v45 }
 0x851   : > { %v4972_v47 = vmul.f32 %v12019_v16, %v4840_v30  ;;  %vm3423_vm1 = vcmp.ge.f32.partialorder %v3284_v43, 0.0  ;;  %v3551_v18 = vmul.f32 0.2, %v3284_v43 }
 0x852   : > { %v9027_v59 = vpop.eup %9026  ;;  %v7290_v0 = vadd.f32 %v9025_v19, %v7289_v7  ;;  %v8611_v26 = vmul.f32 -1.442695, %v5473_v15 }
 0x853   : > { %v4407_v57 = vpop.f32.mrf.mxu3  ;;  %v9029_v1 = vpop.eup %9028  ;;  %v12064_v14 = vadd.f32 1.0, %v9027_v59  ;;  %v5304_v5 = vsel %vm528_vm0, %v4972_v47, 0.0 }
 0x854   : > { %v4408_v12 = vadd.f32 %v12047_v22, %v4407_v57  ;;  %v7294_v8 = vsel %vm7293_vm5, %v9025_v19, %v7290_v0  ;;  %v7302_v50 = vmul.f32 %v9029_v1, %v12042_v60  ;;  %9030 = vpow2.f32 %v8611_v26  ;;  %5305 = vadd.xlane.f32.xlu0 %v5304_v5  ;;  %v3289_v47 = vpop.f32.mrf.mxu2 }
 0x855   : > { %v7299_v28 = vsel %vm7296_vm6, %v7298_v54, %v7294_v8  ;;  %9032 = vrcp.f32 %v12064_v14  ;;  %vm7307_vm9 = vweird.f32 %v9029_v1  ;;  %v7325_v60 = vand.u32 2147483647, %v12064_v14 }
 0x856   : > { %8031 = vst.msk [vmem:[%s10509_s21 + $0x2a0] sm:$0xff] %vm7946_vm8, %v7299_v28  ;;  %v7303_v23 = vsub.f32 1.0, %v7302_v50  ;;  %v4713_v17 = vmul.f32 0.2, %v4408_v12  ;;  %vm4585_vm7 = vcmp.ge.f32.partialorder %v4408_v12, 0.0  ;;  %vm7308_vm12 = vmor %vm7306_vm11, %vm7307_vm9  ;;  %v7327_v41 = vand.u32 2147483648, %v12064_v14 }
 0x857   : > { %v5264_v63 = vpop.xlane.xlu1 %5263  ;;  %vm7321_vm3 = vweird.f32 %v12064_v14  ;;  %vm7326_vm5 = vcmp.eq.f32.partialorder %v7325_v60, 8.507059e+37  ;;  %v3287_v0 = vadd.f32 %v11911_v13, %v3286_v49  ;;  %v3679_v54 = vsel %vm3423_vm1, %v3284_v43, %v3551_v18 }
 0x858   : > { %8516 = vmatmul.msk.f32.gmra.mxu3 %vm1710_vm2, %v3677_v51  ;;  %v7304_v46 = vmul.f32 %v9029_v1, %v7303_v23  ;;  %v5474_v44 = vadd.f32 %v11841_v62, %v5264_v63  ;;  %v4841_v36 = vsel %vm4585_vm7, %v4408_v12, %v4713_v17  ;;  %v7328_v42 = vor.u32 1.1754944e-38, %v7327_v41 }
 0x859   : > { %v4973_v27 = vmul.f32 %v12019_v16, %v4841_v36  ;;  %vm3424_vm9 = vcmp.ge.f32.partialorder %v3287_v0, 0.0  ;;  %v3552_v17 = vmul.f32 0.2, %v3287_v0  ;;  %v3290_v24 = vadd.f32 %v11911_v13, %v3289_v47 }
 0x85a   : > { %v9031_v2 = vpop.eup %9030  ;;  %v7305_v58 = vadd.f32 %v9029_v1, %v7304_v46  ;;  %v8612_v37 = vmul.f32 -1.442695, %v5474_v44 }
 0x85b   : > { %v4410_v25 = vpop.f32.mrf.mxu3  ;;  %v9033_v39 = vpop.eup %9032  ;;  %v12081_v61 = vadd.f32 1.0, %v9031_v2  ;;  %v5307_v11 = vsel %vm528_vm0, %v4973_v27, 0.0 }
 0x85c   : > { %v4411_v20 = vadd.f32 %v12047_v22, %v4410_v25  ;;  %v7309_v52 = vsel %vm7308_vm12, %v9029_v1, %v7305_v58  ;;  %v7317_v55 = vmul.f32 %v9033_v39, %v12064_v14  ;;  %9034 = vpow2.f32 %v8612_v37  ;;  %5308 = vadd.xlane.f32.xlu1 %v5307_v11  ;;  %v3292_v58 = vpop.f32.mrf.mxu2 }
 0x85d   : > { %v7314_v4 = vsel %vm7311_vm13, %v7313_v6, %v7309_v52  ;;  %9036 = vrcp.f32 %v12081_v61  ;;  %vm7322_vm15 = vweird.f32 %v9033_v39  ;;  %v7340_v14 = vand.u32 2147483647, %v12081_v61  ;;  %v12126_v52 = vld [vmem:[#allocation2] ss:$0 sm:$0xff] }
 0x85e   : > { %8032 = vst.msk [vmem:[%s10509_s21 + $0x2a8] sm:$0xff] %vm7946_vm8, %v7314_v4  ;;  %v7318_v21 = vsub.f32 1.0, %v7317_v55  ;;  %vm4586_vm14 = vcmp.ge.f32.partialorder %v4411_v20, 0.0  ;;  %v4714_v19 = vmul.f32 0.2, %v4411_v20  ;;  %vm7323_vm4 = vmor %vm7321_vm3, %vm7322_vm15  ;;  %v7342_v12 = vand.u32 2147483648, %v12081_v61 }
 0x85f   : > { %v5267_v10 = vpop.xlane.xlu2 %5266  ;;  %vm7336_vm10 = vweird.f32 %v12081_v61  ;;  %vm7341_vm12 = vcmp.eq.f32.partialorder %v7340_v14, 8.507059e+37  ;;  %vm3425_vm15 = vcmp.ge.f32.partialorder %v3290_v24, 0.0 }
 0x860   : > { %8517 = vmatmul.msk.f32.gmra.mxu3 %vm1710_vm2, %v3678_v40  ;;  %v7319_v56 = vmul.f32 %v9033_v39, %v7318_v21  ;;  %v5475_v35 = vadd.f32 %v11841_v62, %v5267_v10  ;;  %v4842_v32 = vsel %vm4586_vm14, %v4411_v20, %v4714_v19  ;;  %v7343_v46 = vor.u32 1.1754944e-38, %v7342_v12 }
 0x861   : > { %v4974_v9 = vmul.f32 %v12019_v16, %v4842_v32  ;;  %v3553_v19 = vmul.f32 0.2, %v3290_v24 }
 0x862   : > { %v9035_v38 = vpop.eup %9034  ;;  %v7320_v53 = vadd.f32 %v9033_v39, %v7319_v56  ;;  %v8613_v34 = vmul.f32 -1.442695, %v5475_v35 }
 0x863   : > { %v4413_v3 = vpop.f32.mrf.mxu3  ;;  %v9037_v33 = vpop.eup %9036  ;;  %v12097_v7 = vadd.f32 1.0, %v9035_v38  ;;  %v5310_v30 = vsel %vm528_vm0, %v4974_v9, 0.0 }
 0x864   : > { %v4414_v15 = vadd.f32 %v12047_v22, %v4413_v3  ;;  %v7324_v59 = vsel %vm7323_vm4, %v9033_v39, %v7320_v53  ;;  %v7332_v48 = vmul.f32 %v9037_v33, %v12081_v61  ;;  %9038 = vpow2.f32 %v8613_v34  ;;  %5311 = vadd.xlane.f32.xlu2 %v5310_v30  ;;  %v3295_v47 = vpop.f32.mrf.mxu2 }
 0x865   : > { %v7329_v26 = vsel %vm7326_vm5, %v7328_v42, %v7324_v59  ;;  %9040 = vrcp.f32 %v12097_v7  ;;  %vm7337_vm7 = vweird.f32 %v9037_v33  ;;  %v3680_v39 = vsel %vm3424_vm9, %v3287_v0, %v3552_v17 }
 0x866   : > { %8033 = vst.msk [vmem:[%s10509_s21 + $0x2b0] sm:$0xff] %vm7946_vm8, %v7329_v26  ;;  %v7333_v57 = vsub.f32 1.0, %v7332_v48  ;;  %vm4587_vm6 = vcmp.ge.f32.partialorder %v4414_v15, 0.0  ;;  %v4715_v1 = vmul.f32 0.2, %v4414_v15  ;;  %vm7338_vm11 = vmor %vm7336_vm10, %vm7337_vm7  ;;  %v7357_v61 = vand.u32 2147483648, %v12097_v7 }
 0x867   : > { %v5270_v5 = vpop.xlane.xlu0 %5269  ;;  %v7355_v6 = vand.u32 2147483647, %v12097_v7  ;;  %vm7351_vm1 = vweird.f32 %v12097_v7  ;;  %v3293_v53 = vadd.f32 %v11911_v13, %v3292_v58  ;;  %v3681_v42 = vsel %vm3425_vm15, %v3290_v24, %v3553_v19 }
 0x868   : > { %8518 = vmatmul.msk.f32.gmra.mxu3 %vm1710_vm2, %v3679_v54  ;;  %v7334_v8 = vmul.f32 %v9037_v33, %v7333_v57  ;;  %v5476_v50 = vadd.f32 %v11841_v62, %v5270_v5  ;;  %v4843_v31 = vsel %vm4587_vm6, %v4414_v15, %v4715_v1  ;;  %v7358_v56 = vor.u32 1.1754944e-38, %v7357_v61 }
 0x869   : > { %v4975_v28 = vmul.f32 %v12019_v16, %v4843_v31  ;;  %vm7356_vm4 = vcmp.eq.f32.partialorder %v7355_v6, 8.507059e+37  ;;  %vm3426_vm7 = vcmp.ge.f32.partialorder %v3293_v53, 0.0  ;;  %v3554_v1 = vmul.f32 0.2, %v3293_v53 }
 0x86a   : > { %v9039_v23 = vpop.eup %9038  ;;  %v7335_v51 = vadd.f32 %v9037_v33, %v7334_v8  ;;  %v8614_v29 = vmul.f32 -1.442695, %v5476_v50 }
 0x86b   : > { %v4416_v45 = vpop.f32.mrf.mxu3  ;;  %v9041_v63 = vpop.eup %9040  ;;  %v12113_v44 = vadd.f32 1.0, %v9039_v23  ;;  %v5313_v62 = vsel %vm528_vm0, %v4975_v28, 0.0 }
 0x86c   : > { %v4417_v36 = vadd.f32 %v12047_v22, %v4416_v45  ;;  %v7339_v27 = vsel %vm7338_vm11, %v9037_v33, %v7335_v51  ;;  %v7347_v2 = vmul.f32 %v9041_v63, %v12097_v7  ;;  %9042 = vpow2.f32 %v8614_v29  ;;  %5314 = vadd.xlane.f32.xlu0 %v5313_v62 }
 0x86d   : > { %v7344_v49 = vsel %vm7341_vm12, %v7343_v46, %v7339_v27  ;;  %9044 = vrcp.f32 %v12113_v44  ;;  %vm7352_vm14 = vweird.f32 %v9041_v63  ;;  %v7370_v7 = vand.u32 2147483647, %v12113_v44 }
 0x86e   : > { %8034 = vst.msk [vmem:[%s10509_s21 + $0x2b8] sm:$0xff] %vm7946_vm8, %v7344_v49  ;;  %v7348_v37 = vsub.f32 1.0, %v7347_v2  ;;  %vm4588_vm13 = vcmp.ge.f32.partialorder %v4417_v36, 0.0  ;;  %v4716_v25 = vmul.f32 0.2, %v4417_v36  ;;  %vm7353_vm3 = vmor %vm7351_vm1, %vm7352_vm14  ;;  %v7372_v15 = vand.u32 2147483648, %v12113_v44 }
 0x86f   : > { %v5273_v20 = vpop.xlane.xlu1 %5272  ;;  %vm7366_vm9 = vweird.f32 %v12113_v44  ;;  %vm7371_vm11 = vcmp.eq.f32.partialorder %v7370_v7, 8.507059e+37  ;;  %v3296_v51 = vadd.f32 %v11911_v13, %v3295_v47  ;;  %v3682_v46 = vsel %vm3426_vm7, %v3293_v53, %v3554_v1 }
 0x870   : > { %8519 = vmatmul.msk.f32.gmra.mxu3 %vm1710_vm2, %v3680_v39  ;;  %v7349_v11 = vmul.f32 %v9041_v63, %v7348_v37  ;;  %v5477_v55 = vadd.f32 %v12126_v52, %v5273_v20  ;;  %v4844_v43 = vsel %vm4588_vm13, %v4417_v36, %v4716_v25  ;;  %v7373_v8 = vor.u32 1.1754944e-38, %v7372_v15  ;;  %v3298_v25 = vpop.f32.mrf.mxu2 }
 0x871   : > { %v4976_v4 = vmul.f32 %v12019_v16, %v4844_v43  ;;  %vm3427_vm14 = vcmp.ge.f32.partialorder %v3296_v51, 0.0  ;;  %v3555_v37 = vmul.f32 0.2, %v3296_v51 }
 0x872   : > { %v9043_v21 = vpop.eup %9042  ;;  %v7350_v40 = vadd.f32 %v9041_v63, %v7349_v11  ;;  %v8615_v60 = vmul.f32 -1.442695, %v5477_v55 }
 0x873   : > { %v4419_v41 = vpop.f32.mrf.mxu3  ;;  %v9045_v10 = vpop.eup %9044  ;;  %v12131_v35 = vadd.f32 1.0, %v9043_v21  ;;  %v5316_v9 = vsel %vm528_vm0, %v4976_v4, 0.0 }
 0x874   : > { %v4420_v32 = vadd.f32 %v12047_v22, %v4419_v41  ;;  %v7354_v38 = vsel %vm7353_vm3, %v9041_v63, %v7350_v40  ;;  %v7362_v18 = vmul.f32 %v9045_v10, %v12113_v44  ;;  %9046 = vpow2.f32 %v8615_v60  ;;  %5317 = vadd.xlane.f32.xlu1 %v5316_v9 }
 0x875   : > { %v7359_v34 = vsel %vm7356_vm4, %v7358_v56, %v7354_v38  ;;  %9048 = vrcp.f32 %v12131_v35  ;;  %vm7367_vm6 = vweird.f32 %v9045_v10  ;;  %v7385_v44 = vand.u32 2147483647, %v12131_v35 }
 0x876   : > { %8035 = vst.msk [vmem:[%s10509_s21 + $0x2c0] sm:$0xff] %vm7946_vm8, %v7359_v34  ;;  %v7363_v3 = vsub.f32 1.0, %v7362_v18  ;;  %vm4589_vm5 = vcmp.ge.f32.partialorder %v4420_v32, 0.0  ;;  %v4717_v33 = vmul.f32 0.2, %v4420_v32  ;;  %vm7368_vm10 = vmor %vm7366_vm9, %vm7367_vm6  ;;  %v7387_v36 = vand.u32 2147483648, %v12131_v35 }
 0x877   : > { %v5276_v30 = vpop.xlane.xlu2 %5275  ;;  %vm7381_vm15 = vweird.f32 %v12131_v35  ;;  %vm7386_vm3 = vcmp.eq.f32.partialorder %v7385_v44, 8.507059e+37  ;;  %v3299_v40 = vadd.f32 %v11911_v13, %v3298_v25  ;;  %v3683_v56 = vsel %vm3427_vm14, %v3296_v51, %v3555_v37 }
 0x878   : > { %8520 = vmatmul.msk.f32.gmra.mxu3 %vm1710_vm2, %v3681_v42  ;;  %v7364_v59 = vmul.f32 %v9045_v10, %v7363_v3  ;;  %v5478_v48 = vadd.f32 %v12126_v52, %v5276_v30  ;;  %v4845_v0 = vsel %vm4589_vm5, %v4420_v32, %v4717_v33  ;;  %v7388_v11 = vor.u32 1.1754944e-38, %v7387_v36 }
 0x879   : > { %v4977_v26 = vmul.f32 %v12019_v16, %v4845_v0  ;;  %vm3428_vm6 = vcmp.ge.f32.partialorder %v3299_v40, 0.0  ;;  %v3556_v3 = vmul.f32 0.2, %v3299_v40 }
 0x87a   : > { %v9047_v57 = vpop.eup %9046  ;;  %v7365_v54 = vadd.f32 %v9045_v10, %v7364_v59  ;;  %v8616_v14 = vmul.f32 -1.442695, %v5478_v48 }
 0x87b   : > { %v4422_v12 = vpop.f32.mrf.mxu3  ;;  %v9049_v5 = vpop.eup %9048  ;;  %v12147_v50 = vadd.f32 1.0, %v9047_v57  ;;  %v5319_v28 = vsel %vm528_vm0, %v4977_v26, 0.0 }
 0x87c   : > { %v4423_v31 = vadd.f32 %v12047_v22, %v4422_v12  ;;  %v7369_v23 = vsel %vm7368_vm10, %v9045_v10, %v7365_v54  ;;  %v7377_v17 = vmul.f32 %v9049_v5, %v12131_v35  ;;  %9050 = vpow2.f32 %v8616_v14  ;;  %5320 = vadd.xlane.f32.xlu2 %v5319_v28 }
 0x87d   : > { %v7374_v29 = vsel %vm7371_vm11, %v7373_v8, %v7369_v23  ;;  %9052 = vrcp.f32 %v12147_v50  ;;  %vm7382_vm13 = vweird.f32 %v9049_v5  ;;  %v7400_v35 = vand.u32 2147483647, %v12147_v50 }
 0x87e   : > { %8036 = vst.msk [vmem:[%s10509_s21 + $0x2c8] sm:$0xff] %vm7946_vm8, %v7374_v29  ;;  %v7378_v45 = vsub.f32 1.0, %v7377_v17  ;;  %vm4590_vm12 = vcmp.ge.f32.partialorder %v4423_v31, 0.0  ;;  %v4718_v63 = vmul.f32 0.2, %v4423_v31  ;;  %vm7383_vm1 = vmor %vm7381_vm15, %vm7382_vm13  ;;  %v7402_v32 = vand.u32 2147483648, %v12147_v50 }
 0x87f   : > { %v5279_v62 = vpop.xlane.xlu0 %5278  ;;  %vm7396_vm7 = vweird.f32 %v12147_v50  ;;  %vm7401_vm10 = vcmp.eq.f32.partialorder %v7400_v35, 8.507059e+37  ;;  %v3684_v14 = vsel %vm3428_vm6, %v3299_v40, %v3556_v3 }
 0x880   : > { %8521 = vmatmul.msk.f32.gmra.mxu3 %vm1710_vm2, %v3682_v46  ;;  %v7379_v27 = vmul.f32 %v9049_v5, %v7378_v45  ;;  %v5479_v2 = vadd.f32 %v12126_v52, %v5279_v62  ;;  %v4846_v24 = vsel %vm4590_vm12, %v4423_v31, %v4718_v63  ;;  %v7403_v30 = vor.u32 1.1754944e-38, %v7402_v32 }
 0x881   : > { %v4978_v49 = vmul.f32 %v12019_v16, %v4846_v24 }
 0x882   : > { %v9051_v58 = vpop.eup %9050  ;;  %v7380_v39 = vadd.f32 %v9049_v5, %v7379_v27  ;;  %v8617_v6 = vmul.f32 -1.442695, %v5479_v2 }
 0x883   : > { %v4425_v61 = vpop.f32.mrf.mxu3  ;;  %v9053_v20 = vpop.eup %9052  ;;  %v12163_v55 = vadd.f32 1.0, %v9051_v58  ;;  %v5322_v4 = vsel %vm528_vm0, %v4978_v49, 0.0 }
 0x884   : > { %v4426_v43 = vadd.f32 %v12047_v22, %v4425_v61  ;;  %v7384_v21 = vsel %vm7383_vm1, %v9049_v5, %v7380_v39  ;;  %v7392_v19 = vmul.f32 %v9053_v20, %v12147_v50  ;;  %9054 = vpow2.f32 %v8617_v6  ;;  %5323 = vadd.xlane.f32.xlu0 %v5322_v4 }
 0x885   : > { %v7389_v60 = vsel %vm7386_vm3, %v7388_v11, %v7384_v21  ;;  %9056 = vrcp.f32 %v12163_v55  ;;  %vm7397_vm5 = vweird.f32 %v9053_v20  ;;  %v7415_v12 = vand.u32 2147483647, %v12163_v55 }
 0x886   : > { %8037 = vst.msk [vmem:[%s10509_s21 + $0x2d0] sm:$0xff] %vm7946_vm8, %v7389_v60  ;;  %v7393_v41 = vsub.f32 1.0, %v7392_v19  ;;  %vm4591_vm4 = vcmp.ge.f32.partialorder %v4426_v43, 0.0  ;;  %v4719_v10 = vmul.f32 0.2, %v4426_v43  ;;  %vm7398_vm9 = vmor %vm7396_vm7, %vm7397_vm5  ;;  %v7417_v5 = vand.u32 2147483648, %v12163_v55 }
 0x887   : > { %v5282_v9 = vpop.xlane.xlu1 %5281  ;;  %vm7411_vm13 = vweird.f32 %v12163_v55 }
 0x888   : > { %8522 = vmatmul.msk.f32.gmra.mxu3 %vm1710_vm2, %v3683_v56  ;;  %v7394_v38 = vmul.f32 %v9053_v20, %v7393_v41  ;;  %v5480_v13 = vadd.f32 %v12126_v52, %v5282_v9  ;;  %v4847_v18 = vsel %vm4591_vm4, %v4426_v43, %v4719_v10  ;;  %v7418_v46 = vor.u32 1.1754944e-38, %v7417_v5 }
 0x889   : > { %v4979_v53 = vmul.f32 %v12019_v16, %v4847_v18 }
 0x88a   : > { %v9055_v34 = vpop.eup %9054  ;;  %v7395_v33 = vadd.f32 %v9053_v20, %v7394_v38  ;;  %v8618_v42 = vmul.f32 -1.442695, %v5480_v13 }
 0x88b   : > { %v4428_v7 = vpop.f32.mrf.mxu3  ;;  %v9057_v15 = vpop.eup %9056  ;;  %v12179_v47 = vadd.f32 1.0, %v9055_v34  ;;  %v5325_v48 = vsel %vm528_vm0, %v4979_v53, 0.0 }
 0x88c   : > { %v4429_v59 = vadd.f32 %v12047_v22, %v4428_v7  ;;  %v7399_v0 = vsel %vm7398_vm9, %v9053_v20, %v7395_v33  ;;  %v7407_v26 = vmul.f32 %v9057_v15, %v12163_v55  ;;  %9058 = vpow2.f32 %v8618_v42  ;;  %5326 = vadd.xlane.f32.xlu1 %v5325_v48 }
 0x88d   : > { %v7404_v57 = vsel %vm7401_vm10, %v7403_v30, %v7399_v0  ;;  %9060 = vrcp.f32 %v12179_v47  ;;  %vm7412_vm12 = vweird.f32 %v9057_v15  ;;  %v7430_v37 = vand.u32 2147483647, %v12179_v47 }
 0x88e   : > { %8038 = vst.msk [vmem:[%s10509_s21 + $0x2d8] sm:$0xff] %vm7946_vm8, %v7404_v57  ;;  %v7408_v1 = vsub.f32 1.0, %v7407_v26  ;;  %vm4592_vm11 = vcmp.ge.f32.partialorder %v4429_v59, 0.0  ;;  %v4720_v54 = vmul.f32 0.2, %v4429_v59  ;;  %vm7413_vm14 = vmor %vm7411_vm13, %vm7412_vm12  ;;  %v7432_v25 = vand.u32 2147483648, %v12179_v47 }
 0x88f   : > { %v5285_v8 = vpop.xlane.xlu2 %5284  ;;  %vm7426_vm3 = vweird.f32 %v12179_v47  ;;  %vm7431_vm5 = vcmp.eq.f32.partialorder %v7430_v37, 8.507059e+37 }
 0x890   : > { %8523 = vmatmul.msk.f32.gmra.mxu3 %vm1710_vm2, %v3684_v14  ;;  %v7409_v50 = vmul.f32 %v9057_v15, %v7408_v1  ;;  %v5481_v31 = vadd.f32 %v12126_v52, %v5285_v8  ;;  %v4848_v28 = vsel %vm4592_vm11, %v4429_v59, %v4720_v54  ;;  %vm7416_vm2 = vcmp.eq.f32.partialorder %v7415_v12, 8.507059e+37 }
 0x891   : > { %v4980_v23 = vmul.f32 %v12019_v16, %v4848_v28  ;;  %v7433_v40 = vor.u32 1.1754944e-38, %v7432_v25 }
 0x892   : > { %v9059_v17 = vpop.eup %9058  ;;  %v7410_v51 = vadd.f32 %v9057_v15, %v7409_v50  ;;  %v8619_v29 = vmul.f32 -1.442695, %v5481_v31 }
 0x893   : > { %v4431_v45 = vpop.f32.mrf.mxu3  ;;  %v9061_v63 = vpop.eup %9060  ;;  %v12194_v44 = vadd.f32 1.0, %v9059_v17  ;;  %v5328_v62 = vsel %vm528_vm0, %v4980_v23, 0.0 }
 0x894   : > { %v4432_v36 = vadd.f32 %v12047_v22, %v4431_v45  ;;  %v7414_v27 = vsel %vm7413_vm14, %v9057_v15, %v7410_v51  ;;  %v7422_v2 = vmul.f32 %v9061_v63, %v12179_v47  ;;  %9062 = vpow2.f32 %v8619_v29  ;;  %5329 = vadd.xlane.f32.xlu2 %v5328_v62 }
 0x895   : > { %v7419_v24 = vsel %vm7416_vm2, %v7418_v46, %v7414_v27  ;;  %9064 = vrcp.f32 %v12194_v44  ;;  %vm7427_vm1 = vweird.f32 %v9061_v63  ;;  %v7445_v13 = vand.u32 2147483647, %v12194_v44 }
 0x896   : > { %8039 = vst.msk [vmem:[%s10509_s21 + $0x2e0] sm:$0xff] %vm7946_vm8, %v7419_v24  ;;  %v7423_v49 = vsub.f32 1.0, %v7422_v2  ;;  %vm4593_vm15 = vcmp.ge.f32.partialorder %v4432_v36, 0.0  ;;  %v4721_v58 = vmul.f32 0.2, %v4432_v36  ;;  %vm7428_vm4 = vmor %vm7426_vm3, %vm7427_vm1  ;;  %v7447_v18 = vand.u32 2147483648, %v12194_v44 }
 0x897   : > { %v5288_v39 = vpop.xlane.xlu0 %5287  ;;  %vm7441_vm9 = vweird.f32 %v12194_v44  ;;  %vm7446_vm11 = vcmp.eq.f32.partialorder %v7445_v13, 8.507059e+37 }
 0x898   : > { %v7424_v6 = vmul.f32 %v9061_v63, %v7423_v49  ;;  %v5482_v61 = vadd.f32 %v12126_v52, %v5288_v39  ;;  %v4849_v20 = vsel %vm4593_vm15, %v4432_v36, %v4721_v58  ;;  %v7448_v48 = vor.u32 1.1754944e-38, %v7447_v18 }
 0x899   : > { %v4981_v11 = vmul.f32 %v12019_v16, %v4849_v20 }
 0x89a   : > { %v9063_v55 = vpop.eup %9062  ;;  %v7425_v43 = vadd.f32 %v9061_v63, %v7424_v6  ;;  %v8620_v4 = vmul.f32 -1.442695, %v5482_v61 }
 0x89b   : > { %v4434_v21 = vpop.f32.mrf.mxu3  ;;  %v9065_v19 = vpop.eup %9064  ;;  %v12207_v60 = vadd.f32 1.0, %v9063_v55  ;;  %v5331_v10 = vsel %vm528_vm0, %v4981_v11, 0.0 }
 0x89c   : > { %v4435_v41 = vadd.f32 %v12047_v22, %v4434_v21  ;;  %v7429_v56 = vsel %vm7428_vm4, %v9061_v63, %v7425_v43  ;;  %v7437_v35 = vmul.f32 %v9065_v19, %v12194_v44  ;;  %9066 = vpow2.f32 %v8620_v4  ;;  %5332 = vadd.xlane.f32.xlu0 %v5331_v10 }
 0x89d   : > { %v7434_v32 = vsel %vm7431_vm5, %v7433_v40, %v7429_v56  ;;  %9068 = vrcp.f32 %v12207_v60  ;;  %vm7442_vm7 = vweird.f32 %v9065_v19  ;;  %v7460_v8 = vand.u32 2147483647, %v12207_v60 }
 0x89e   : > { %8040 = vst.msk [vmem:[%s10509_s21 + $0x2e8] sm:$0xff] %vm7946_vm8, %v7434_v32  ;;  %v7438_v9 = vsub.f32 1.0, %v7437_v35  ;;  %vm4594_vm6 = vcmp.ge.f32.partialorder %v4435_v41, 0.0  ;;  %v4722_v38 = vmul.f32 0.2, %v4435_v41  ;;  %vm7443_vm10 = vmor %vm7441_vm9, %vm7442_vm7  ;;  %v7462_v50 = vand.u32 2147483648, %v12207_v60 }
 0x89f   : > { %v5291_v53 = vpop.xlane.xlu1 %5290  ;;  %vm7456_vm14 = vweird.f32 %v12207_v60  ;;  %vm7461_vm15 = vcmp.eq.f32.partialorder %v7460_v8, 8.507059e+37 }
 0x8a0   : > { %v7439_v34 = vmul.f32 %v9065_v19, %v7438_v9  ;;  %v5483_v3 = vadd.f32 %v12126_v52, %v5291_v53  ;;  %v4850_v33 = vsel %vm4594_vm6, %v4435_v41, %v4722_v38  ;;  %v7463_v36 = vor.u32 1.1754944e-38, %v7462_v50 }
 0x8a1   : > { %v4982_v42 = vmul.f32 %v12019_v16, %v4850_v33 }
 0x8a2   : > { %v9067_v7 = vpop.eup %9066  ;;  %v7440_v15 = vadd.f32 %v9065_v19, %v7439_v34  ;;  %v8621_v30 = vmul.f32 -1.442695, %v5483_v3 }
 0x8a3   : > { %v4437_v47 = vpop.f32.mrf.mxu3  ;;  %v9069_v59 = vpop.eup %9068  ;;  %v12220_v0 = vadd.f32 1.0, %v9067_v7  ;;  %v5334_v57 = vsel %vm528_vm0, %v4982_v42, 0.0 }
 0x8a4   : > { %v4438_v26 = vadd.f32 %v12047_v22, %v4437_v47  ;;  %v7444_v1 = vsel %vm7443_vm10, %v9065_v19, %v7440_v15  ;;  %v7452_v54 = vmul.f32 %v9069_v59, %v12207_v60  ;;  %9070 = vpow2.f32 %v8621_v30  ;;  %5335 = vadd.xlane.f32.xlu1 %v5334_v57 }
 0x8a5   : > { %v7449_v14 = vsel %vm7446_vm11, %v7448_v48, %v7444_v1  ;;  %9072 = vrcp.f32 %v12220_v0  ;;  %vm7457_vm13 = vweird.f32 %v9069_v59  ;;  %v7475_v39 = vand.u32 2147483647, %v12220_v0 }
 0x8a6   : > { %8041 = vst.msk [vmem:[%s10509_s21 + $0x2f0] sm:$0xff] %vm7946_vm8, %v7449_v14  ;;  %v7453_v12 = vsub.f32 1.0, %v7452_v54  ;;  %vm4595_vm12 = vcmp.ge.f32.partialorder %v4438_v26, 0.0  ;;  %v4723_v5 = vmul.f32 0.2, %v4438_v26  ;;  %vm7458_vm2 = vmor %vm7456_vm14, %vm7457_vm13  ;;  %v7477_v6 = vand.u32 2147483648, %v12220_v0 }
 0x8a7   : > { %v5294_v31 = vpop.xlane.xlu2 %5293  ;;  %vm7471_vm4 = vweird.f32 %v12220_v0  ;;  %vm7476_vm6 = vcmp.eq.f32.partialorder %v7475_v39, 8.507059e+37 }
 0x8a8   : > { %v7454_v28 = vmul.f32 %v9069_v59, %v7453_v12  ;;  %v5484_v23 = vadd.f32 %v12126_v52, %v5294_v31  ;;  %v4851_v17 = vsel %vm4595_vm12, %v4438_v26, %v4723_v5  ;;  %v7478_v41 = vor.u32 1.1754944e-38, %v7477_v6 }
 0x8a9   : > { %v4983_v51 = vmul.f32 %v12019_v16, %v4851_v17 }
 0x8aa   : > { %v9071_v29 = vpop.eup %9070  ;;  %v7455_v45 = vadd.f32 %v9069_v59, %v7454_v28  ;;  %v8622_v63 = vmul.f32 -1.442695, %v5484_v23 }
 0x8ab   : > { %v4440_v46 = vpop.f32.mrf.mxu3  ;;  %v9073_v44 = vpop.eup %9072  ;;  %v12233_v62 = vadd.f32 1.0, %v9071_v29  ;;  %v5337_v2 = vsel %vm528_vm0, %v4983_v51, 0.0  ;;  %v12273_v29 = vld [vmem:[%s12490_s9] ss:$0 sm:$0xff] }
 0x8ac   : > { %v4441_v27 = vadd.f32 %v12047_v22, %v4440_v46  ;;  %v7459_v24 = vsel %vm7458_vm2, %v9069_v59, %v7455_v45  ;;  %v7467_v49 = vmul.f32 %v9073_v44, %v12220_v0  ;;  %9074 = vpow2.f32 %v8622_v63  ;;  %5338 = vadd.xlane.f32.xlu2 %v5337_v2 }
 0x8ad   : > { %v7464_v58 = vsel %vm7461_vm15, %v7463_v36, %v7459_v24  ;;  %9076 = vrcp.f32 %v12233_v62  ;;  %vm7472_vm3 = vweird.f32 %v9073_v44  ;;  %v7490_v53 = vand.u32 2147483647, %v12233_v62 }
 0x8ae   : > { %8042 = vst.msk [vmem:[%s10509_s21 + $0x2f8] sm:$0xff] %vm7946_vm8, %v7464_v58  ;;  %v7468_v37 = vsub.f32 1.0, %v7467_v49  ;;  %vm4596_vm1 = vcmp.ge.f32.partialorder %v4441_v27, 0.0  ;;  %v4724_v25 = vmul.f32 0.2, %v4441_v27  ;;  %vm7473_vm5 = vmor %vm7471_vm4, %vm7472_vm3  ;;  %v7492_v34 = vand.u32 2147483648, %v12233_v62 }
 0x8af   : > { %v5297_v61 = vpop.xlane.xlu0 %5296  ;;  %vm7486_vm10 = vweird.f32 %v12233_v62  ;;  %vm7491_vm12 = vcmp.eq.f32.partialorder %v7490_v53, 8.507059e+37 }
 0x8b0   : > { %v7469_v20 = vmul.f32 %v9073_v44, %v7468_v37  ;;  %v5485_v11 = vadd.f32 %v12126_v52, %v5297_v61  ;;  %v4852_v55 = vsel %vm4596_vm1, %v4441_v27, %v4724_v25  ;;  %v7493_v26 = vor.u32 1.1754944e-38, %v7492_v34 }
 0x8b1   : > { %v4984_v43 = vmul.f32 %v12019_v16, %v4852_v55 }
 0x8b2   : > { %v9075_v4 = vpop.eup %9074  ;;  %v7470_v21 = vadd.f32 %v9073_v44, %v7469_v20  ;;  %v8623_v19 = vmul.f32 -1.442695, %v5485_v11 }
 0x8b3   : > { %v4443_v40 = vpop.f32.mrf.mxu3  ;;  %v9077_v60 = vpop.eup %9076  ;;  %v12246_v10 = vadd.f32 1.0, %v9075_v4  ;;  %v5340_v35 = vsel %vm528_vm0, %v4984_v43, 0.0 }
 0x8b4   : > { %v4444_v56 = vadd.f32 %v12047_v22, %v4443_v40  ;;  %v7474_v32 = vsel %vm7473_vm5, %v9073_v44, %v7470_v21  ;;  %v7482_v9 = vmul.f32 %v9077_v60, %v12233_v62  ;;  %9078 = vpow2.f32 %v8623_v19  ;;  %5341 = vadd.xlane.f32.xlu0 %v5340_v35  ;;  %v12295_v35 = vld [vmem:[%s12489_s8] ss:$0 sm:$0xff] }
 0x8b5   : > { %v7479_v38 = vsel %vm7476_vm6, %v7478_v41, %v7474_v32  ;;  %9080 = vrcp.f32 %v12246_v10  ;;  %vm7487_vm9 = vweird.f32 %v9077_v60  ;;  %v7505_v50 = vand.u32 2147483647, %v12246_v10 }
 0x8b6   : > { %8043 = vst.msk [vmem:[%s10509_s21 + $0x300] sm:$0xff] %vm7946_vm8, %v7479_v38  ;;  %v7483_v13 = vsub.f32 1.0, %v7482_v9  ;;  %vm4597_vm7 = vcmp.ge.f32.partialorder %v4444_v56, 0.0  ;;  %v4725_v18 = vmul.f32 0.2, %v4444_v56  ;;  %vm7488_vm11 = vmor %vm7486_vm10, %vm7487_vm9  ;;  %v7507_v31 = vand.u32 2147483648, %v12246_v10 }
 0x8b7   : > { %v5300_v3 = vpop.xlane.xlu1 %5299  ;;  %vm7501_vm2 = vweird.f32 %v12246_v10  ;;  %vm7506_vm1 = vcmp.eq.f32.partialorder %v7505_v50, 8.507059e+37 }
 0x8b8   : > { %v7484_v33 = vmul.f32 %v9077_v60, %v7483_v13  ;;  %v5486_v42 = vadd.f32 %v12126_v52, %v5300_v3  ;;  %v4853_v7 = vsel %vm4597_vm7, %v4444_v56, %v4725_v18  ;;  %v7508_v27 = vor.u32 1.1754944e-38, %v7507_v31 }
 0x8b9   : > { %v4985_v15 = vmul.f32 %v12019_v16, %v4853_v7 }
 0x8ba   : > { %v9079_v30 = vpop.eup %9078  ;;  %v7485_v47 = vadd.f32 %v9077_v60, %v7484_v33  ;;  %v8624_v59 = vmul.f32 -1.442695, %v5486_v42 }
 0x8bb   : > { %v4446_v48 = vpop.f32.mrf.mxu3  ;;  %v9081_v0 = vpop.eup %9080  ;;  %v12259_v57 = vadd.f32 1.0, %v9079_v30  ;;  %v5343_v54 = vsel %vm528_vm0, %v4985_v15, 0.0 }
 0x8bc   : > { %v4447_v1 = vadd.f32 %v12047_v22, %v4446_v48  ;;  %v7489_v14 = vsel %vm7488_vm11, %v9077_v60, %v7485_v47  ;;  %v7497_v16 = vmul.f32 %v9081_v0, %v12246_v10  ;;  %9082 = vpow2.f32 %v8624_v59  ;;  %5344 = vadd.xlane.f32.xlu1 %v5343_v54 }
 0x8bd   : > { %v7494_v12 = vsel %vm7491_vm12, %v7493_v26, %v7489_v14  ;;  %9084 = vrcp.f32 %v12259_v57  ;;  %vm7502_vm14 = vweird.f32 %v9081_v0  ;;  %v7520_v61 = vand.u32 2147483647, %v12259_v57 }
 0x8be   : > { %8044 = vst.msk [vmem:[%s10509_s21 + $0x308] sm:$0xff] %vm7946_vm8, %v7494_v12  ;;  %v7498_v5 = vsub.f32 1.0, %v7497_v16  ;;  %vm4598_vm13 = vcmp.ge.f32.partialorder %v4447_v1, 0.0  ;;  %v4726_v8 = vmul.f32 0.2, %v4447_v1  ;;  %vm7503_vm15 = vmor %vm7501_vm2, %vm7502_vm14  ;;  %vm7516_vm5 = vweird.f32 %v12259_v57 }
 0x8bf   : > { %v5303_v28 = vpop.xlane.xlu2 %5302  ;;  %vm7521_vm7 = vcmp.eq.f32.partialorder %v7520_v61, 8.507059e+37 }
 0x8c0   : > { %v7499_v23 = vmul.f32 %v9081_v0, %v7498_v5  ;;  %v5487_v17 = vadd.f32 %v12126_v52, %v5303_v28  ;;  %v4854_v51 = vsel %vm4598_vm13, %v4447_v1, %v4726_v8 }
 0x8c1   : > { %v4986_v45 = vmul.f32 %v12273_v29, %v4854_v51 }
 0x8c2   : > { %v9083_v63 = vpop.eup %9082  ;;  %v7500_v46 = vadd.f32 %v9081_v0, %v7499_v23  ;;  %v8625_v44 = vmul.f32 -1.442695, %v5487_v17 }
 0x8c3   : > { %v4449_v36 = vpop.f32.mrf.mxu3  ;;  %v9085_v62 = vpop.eup %9084  ;;  %v12277_v2 = vadd.f32 1.0, %v9083_v63  ;;  %v5346_v49 = vsel %vm528_vm0, %v4986_v45, 0.0 }
 0x8c4   : > { %v4450_v24 = vadd.f32 %v12047_v22, %v4449_v36  ;;  %v7504_v58 = vsel %vm7503_vm15, %v9081_v0, %v7500_v46  ;;  %v7512_v37 = vmul.f32 %v9085_v62, %v12259_v57  ;;  %9086 = vpow2.f32 %v8625_v44  ;;  %5347 = vadd.xlane.f32.xlu2 %v5346_v49 }
 0x8c5   : > { %v7509_v25 = vsel %vm7506_vm1, %v7508_v27, %v7504_v58  ;;  %9088 = vrcp.f32 %v12277_v2  ;;  %v7522_v22 = vand.u32 2147483648, %v12259_v57  ;;  %vm7517_vm4 = vweird.f32 %v9085_v62 }
 0x8c6   : > { %8045 = vst.msk [vmem:[%s10509_s21 + $0x310] sm:$0xff] %vm7946_vm8, %v7509_v25  ;;  %v7513_v39 = vsub.f32 1.0, %v7512_v37  ;;  %vm4599_vm3 = vcmp.ge.f32.partialorder %v4450_v24, 0.0  ;;  %v4727_v6 = vmul.f32 0.2, %v4450_v24  ;;  %vm7518_vm6 = vmor %vm7516_vm5, %vm7517_vm4  ;;  %v7537_v33 = vand.u32 2147483648, %v12277_v2 }
 0x8c7   : > { %v5306_v20 = vpop.xlane.xlu0 %5305  ;;  %v7523_v10 = vor.u32 1.1754944e-38, %v7522_v22  ;;  %v7535_v3 = vand.u32 2147483647, %v12277_v2  ;;  %vm7531_vm11 = vweird.f32 %v12277_v2 }
 0x8c8   : > { %v7514_v11 = vmul.f32 %v9085_v62, %v7513_v39  ;;  %v5488_v55 = vadd.f32 %v12126_v52, %v5306_v20  ;;  %v4855_v43 = vsel %vm4599_vm3, %v4450_v24, %v4727_v6  ;;  %v7538_v1 = vor.u32 1.1754944e-38, %v7537_v33 }
 0x8c9   : > { %v4987_v4 = vmul.f32 %v12273_v29, %v4855_v43  ;;  %vm7536_vm13 = vcmp.eq.f32.partialorder %v7535_v3, 8.507059e+37 }
 0x8ca   : > { %v9087_v21 = vpop.eup %9086  ;;  %v7515_v19 = vadd.f32 %v9085_v62, %v7514_v11  ;;  %v8626_v40 = vmul.f32 -1.442695, %v5488_v55 }
 0x8cb   : > { %v4452_v60 = vpop.f32.mrf.mxu3  ;;  %v9089_v41 = vpop.eup %9088  ;;  %v12290_v56 = vadd.f32 1.0, %v9087_v21  ;;  %v5349_v9 = vsel %vm528_vm0, %v4987_v4, 0.0 }
 0x8cc   : > { %v4453_v32 = vadd.f32 %v12295_v35, %v4452_v60  ;;  %v7519_v38 = vsel %vm7518_vm6, %v9085_v62, %v7515_v19  ;;  %v7527_v13 = vmul.f32 %v9089_v41, %v12277_v2  ;;  %9090 = vpow2.f32 %v8626_v40  ;;  %5350 = vadd.xlane.f32.xlu0 %v5349_v9 }
 0x8cd   : > { %v7524_v18 = vsel %vm7521_vm7, %v7523_v10, %v7519_v38  ;;  %9092 = vrcp.f32 %v12290_v56  ;;  %vm7532_vm10 = vweird.f32 %v9089_v41  ;;  %v7550_v28 = vand.u32 2147483647, %v12290_v56 }
 0x8ce   : > { %8046 = vst.msk [vmem:[%s10509_s21 + $0x318] sm:$0xff] %vm7946_vm8, %v7524_v18  ;;  %v7528_v53 = vsub.f32 1.0, %v7527_v13  ;;  %vm4600_vm9 = vcmp.ge.f32.partialorder %v4453_v32, 0.0  ;;  %v4728_v34 = vmul.f32 0.2, %v4453_v32  ;;  %vm7533_vm12 = vmor %vm7531_vm11, %vm7532_vm10  ;;  %v7552_v23 = vand.u32 2147483648, %v12290_v56 }
 0x8cf   : > { %v5309_v42 = vpop.xlane.xlu1 %5308  ;;  %vm7546_vm15 = vweird.f32 %v12290_v56  ;;  %vm7551_vm3 = vcmp.eq.f32.partialorder %v7550_v28, 8.507059e+37 }
 0x8d0   : > { %v7529_v7 = vmul.f32 %v9089_v41, %v7528_v53  ;;  %v5489_v15 = vadd.f32 %v12126_v52, %v5309_v42  ;;  %v4856_v30 = vsel %vm4600_vm9, %v4453_v32, %v4728_v34  ;;  %v7553_v24 = vor.u32 1.1754944e-38, %v7552_v23 }
 0x8d1   : > { %v4988_v47 = vmul.f32 %v12273_v29, %v4856_v30 }
 0x8d2   : > { %v9091_v59 = vpop.eup %9090  ;;  %v7530_v48 = vadd.f32 %v9089_v41, %v7529_v7  ;;  %v8627_v0 = vmul.f32 -1.442695, %v5489_v15 }
 0x8d3   : > { %v4455_v26 = vpop.f32.mrf.mxu3  ;;  %v9093_v57 = vpop.eup %9092  ;;  %v12308_v54 = vadd.f32 1.0, %v9091_v59  ;;  %v5352_v16 = vsel %vm528_vm0, %v4988_v47, 0.0 }
 0x8d4   : > { %v4456_v14 = vadd.f32 %v12295_v35, %v4455_v26  ;;  %v7534_v12 = vsel %vm7533_vm12, %v9089_v41, %v7530_v48  ;;  %v7542_v5 = vmul.f32 %v9093_v57, %v12290_v56  ;;  %9094 = vpow2.f32 %v8627_v0  ;;  %5353 = vadd.xlane.f32.xlu1 %v5352_v16 }
 0x8d5   : > { %v7539_v8 = vsel %vm7536_vm13, %v7538_v1, %v7534_v12  ;;  %9096 = vrcp.f32 %v12308_v54  ;;  %vm7547_vm2 = vweird.f32 %v9093_v57  ;;  %v7565_v20 = vand.u32 2147483647, %v12308_v54 }
 0x8d6   : > { %8047 = vst.msk [vmem:[%s10509_s21 + $0x320] sm:$0xff] %vm7946_vm8, %v7539_v8  ;;  %v7543_v50 = vsub.f32 1.0, %v7542_v5  ;;  %vm4601_vm14 = vcmp.ge.f32.partialorder %v4456_v14, 0.0  ;;  %v4729_v31 = vmul.f32 0.2, %v4456_v14  ;;  %vm7548_vm1 = vmor %vm7546_vm15, %vm7547_vm2  ;;  %v7567_v11 = vand.u32 2147483648, %v12308_v54 }
 0x8d7   : > { %v5312_v17 = vpop.xlane.xlu2 %5311  ;;  %vm7561_vm6 = vweird.f32 %v12308_v54  ;;  %vm7566_vm9 = vcmp.eq.f32.partialorder %v7565_v20, 8.507059e+37 }
 0x8d8   : > { %v7544_v51 = vmul.f32 %v9093_v57, %v7543_v50  ;;  %v5490_v45 = vadd.f32 %v12126_v52, %v5312_v17  ;;  %v4857_v63 = vsel %vm4601_vm14, %v4456_v14, %v4729_v31  ;;  %v7568_v32 = vor.u32 1.1754944e-38, %v7567_v11 }
 0x8d9   : > { %v4989_v46 = vmul.f32 %v12273_v29, %v4857_v63 }
 0x8da   : > { %v9095_v44 = vpop.eup %9094  ;;  %v7545_v36 = vadd.f32 %v9093_v57, %v7544_v51  ;;  %v8628_v62 = vmul.f32 -1.442695, %v5490_v45 }
 0x8db   : > { %v4458_v27 = vpop.f32.mrf.mxu3  ;;  %v9097_v2 = vpop.eup %9096  ;;  %v12321_v49 = vadd.f32 1.0, %v9095_v44  ;;  %v5355_v37 = vsel %vm528_vm0, %v4989_v46, 0.0 }
 0x8dc   : > { %v4459_v58 = vadd.f32 %v12295_v35, %v4458_v27  ;;  %v7549_v25 = vsel %vm7548_vm1, %v9093_v57, %v7545_v36  ;;  %v7557_v39 = vmul.f32 %v9097_v2, %v12308_v54  ;;  %9098 = vpow2.f32 %v8628_v62  ;;  %5356 = vadd.xlane.f32.xlu2 %v5355_v37 }
 0x8dd   : > { %v7554_v6 = vsel %vm7551_vm3, %v7553_v24, %v7549_v25  ;;  %9100 = vrcp.f32 %v12321_v49  ;;  %vm7562_vm5 = vweird.f32 %v9097_v2  ;;  %v7580_v42 = vand.u32 2147483647, %v12321_v49 }
 0x8de   : > { %8048 = vst.msk [vmem:[%s10509_s21 + $0x328] sm:$0xff] %vm7946_vm8, %v7554_v6  ;;  %v7558_v61 = vsub.f32 1.0, %v7557_v39  ;;  %vm4602_vm4 = vcmp.ge.f32.partialorder %v4459_v58, 0.0  ;;  %v4730_v22 = vmul.f32 0.2, %v4459_v58  ;;  %vm7563_vm7 = vmor %vm7561_vm6, %vm7562_vm5  ;;  %v7582_v7 = vand.u32 2147483648, %v12321_v49 }
 0x8df   : > { %v5315_v55 = vpop.xlane.xlu0 %5314  ;;  %vm7576_vm12 = vweird.f32 %v12321_v49  ;;  %vm7581_vm14 = vcmp.eq.f32.partialorder %v7580_v42, 8.507059e+37 }
 0x8e0   : > { %v7559_v43 = vmul.f32 %v9097_v2, %v7558_v61  ;;  %v5491_v4 = vadd.f32 %v12126_v52, %v5315_v55  ;;  %v4858_v21 = vsel %vm4602_vm4, %v4459_v58, %v4730_v22  ;;  %v7583_v14 = vor.u32 1.1754944e-38, %v7582_v7 }
 0x8e1   : > { %v4990_v19 = vmul.f32 %v12273_v29, %v4858_v21  ;;  %v12370_v21 = vld [vmem:[#allocation2] ss:$0 sm:$0xff] }
 0x8e2   : > { %v9099_v40 = vpop.eup %9098  ;;  %v7560_v60 = vadd.f32 %v9097_v2, %v7559_v43  ;;  %v8629_v41 = vmul.f32 -1.442695, %v5491_v4 }
 0x8e3   : > { %v4461_v10 = vpop.f32.mrf.mxu3  ;;  %v9101_v56 = vpop.eup %9100  ;;  %v12334_v9 = vadd.f32 1.0, %v9099_v40  ;;  %v5358_v13 = vsel %vm528_vm0, %v4990_v19, 0.0 }
 0x8e4   : > { %v4462_v38 = vadd.f32 %v12295_v35, %v4461_v10  ;;  %v7564_v18 = vsel %vm7563_vm7, %v9097_v2, %v7560_v60  ;;  %v7572_v53 = vmul.f32 %v9101_v56, %v12321_v49  ;;  %9102 = vpow2.f32 %v8629_v41  ;;  %5359 = vadd.xlane.f32.xlu0 %v5358_v13 }
 0x8e5   : > { %v7569_v34 = vsel %vm7566_vm9, %v7568_v32, %v7564_v18  ;;  %9104 = vrcp.f32 %v12334_v9  ;;  %vm7577_vm11 = vweird.f32 %v9101_v56  ;;  %v7595_v17 = vand.u32 2147483647, %v12334_v9 }
 0x8e6   : > { %8049 = vst.msk [vmem:[%s10509_s21 + $0x330] sm:$0xff] %vm7946_vm8, %v7569_v34  ;;  %v7573_v3 = vsub.f32 1.0, %v7572_v53  ;;  %vm4603_vm10 = vcmp.ge.f32.partialorder %v4462_v38, 0.0  ;;  %v4731_v33 = vmul.f32 0.2, %v4462_v38  ;;  %vm7578_vm13 = vmor %vm7576_vm12, %vm7577_vm11  ;;  %v7597_v51 = vand.u32 2147483648, %v12334_v9 }
 0x8e7   : > { %v5318_v15 = vpop.xlane.xlu1 %5317  ;;  %vm7591_vm1 = vweird.f32 %v12334_v9  ;;  %vm7596_vm4 = vcmp.eq.f32.partialorder %v7595_v17, 8.507059e+37 }
 0x8e8   : > { %v7574_v30 = vmul.f32 %v9101_v56, %v7573_v3  ;;  %v5492_v47 = vadd.f32 %v12126_v52, %v5318_v15  ;;  %v4859_v59 = vsel %vm4603_vm10, %v4462_v38, %v4731_v33  ;;  %v7598_v58 = vor.u32 1.1754944e-38, %v7597_v51 }
 0x8e9   : > { %v4991_v48 = vmul.f32 %v12273_v29, %v4859_v59 }
 0x8ea   : > { %v9103_v0 = vpop.eup %9102  ;;  %v7575_v26 = vadd.f32 %v9101_v56, %v7574_v30  ;;  %v8630_v57 = vmul.f32 -1.442695, %v5492_v47 }
 0x8eb   : > { %v4464_v1 = vpop.f32.mrf.mxu3  ;;  %v9105_v54 = vpop.eup %9104  ;;  %v12347_v16 = vadd.f32 1.0, %v9103_v0  ;;  %v5361_v5 = vsel %vm528_vm0, %v4991_v48, 0.0 }
 0x8ec   : > { %v4465_v12 = vadd.f32 %v12295_v35, %v4464_v1  ;;  %v7579_v8 = vsel %vm7578_vm13, %v9101_v56, %v7575_v26  ;;  %v7587_v50 = vmul.f32 %v9105_v54, %v12334_v9  ;;  %9106 = vpow2.f32 %v8630_v57  ;;  %5362 = vadd.xlane.f32.xlu1 %v5361_v5 }
 0x8ed   : > { %v7584_v31 = vsel %vm7581_vm14, %v7583_v14, %v7579_v8  ;;  %9108 = vrcp.f32 %v12347_v16  ;;  %vm7592_vm15 = vweird.f32 %v9105_v54  ;;  %v7610_v11 = vand.u32 2147483647, %v12347_v16 }
 0x8ee   : > { %8050 = vst.msk [vmem:[%s10509_s21 + $0x338] sm:$0xff] %vm7946_vm8, %v7584_v31  ;;  %v7588_v28 = vsub.f32 1.0, %v7587_v50  ;;  %vm4604_vm2 = vcmp.ge.f32.partialorder %v4465_v12, 0.0  ;;  %v4732_v23 = vmul.f32 0.2, %v4465_v12  ;;  %vm7593_vm3 = vmor %vm7591_vm1, %vm7592_vm15  ;;  %v7612_v55 = vand.u32 2147483648, %v12347_v16 }
 0x8ef   : > { %v5321_v45 = vpop.xlane.xlu2 %5320  ;;  %vm7606_vm7 = vweird.f32 %v12347_v16  ;;  %vm7611_vm10 = vcmp.eq.f32.partialorder %v7610_v11, 8.507059e+37 }
 0x8f0   : > { %v7589_v63 = vmul.f32 %v9105_v54, %v7588_v28  ;;  %v5493_v46 = vadd.f32 %v12126_v52, %v5321_v45  ;;  %v4860_v44 = vsel %vm4604_vm2, %v4465_v12, %v4732_v23  ;;  %v7613_v38 = vor.u32 1.1754944e-38, %v7612_v55 }
 0x8f1   : > { %v4992_v36 = vmul.f32 %v12273_v29, %v4860_v44 }
 0x8f2   : > { %v9107_v62 = vpop.eup %9106  ;;  %v7590_v27 = vadd.f32 %v9105_v54, %v7589_v63  ;;  %v8631_v2 = vmul.f32 -1.442695, %v5493_v46 }
 0x8f3   : > { %v4467_v24 = vpop.f32.mrf.mxu3  ;;  %v9109_v49 = vpop.eup %9108  ;;  %v12360_v37 = vadd.f32 1.0, %v9107_v62  ;;  %v5364_v39 = vsel %vm528_vm0, %v4992_v36, 0.0 }
 0x8f4   : > { %v4468_v25 = vadd.f32 %v12295_v35, %v4467_v24  ;;  %v7594_v52 = vsel %vm7593_vm3, %v9105_v54, %v7590_v27  ;;  %v7602_v6 = vmul.f32 %v9109_v49, %v12347_v16  ;;  %9110 = vpow2.f32 %v8631_v2  ;;  %5365 = vadd.xlane.f32.xlu2 %v5364_v39 }
 0x8f5   : > { %v7599_v61 = vsel %vm7596_vm4, %v7598_v58, %v7594_v52  ;;  %9112 = vrcp.f32 %v12360_v37  ;;  %vm7607_vm6 = vweird.f32 %v9109_v49  ;;  %v7625_v15 = vand.u32 2147483647, %v12360_v37 }
 0x8f6   : > { %8051 = vst.msk [vmem:[%s10509_s21 + $0x340] sm:$0xff] %vm7946_vm8, %v7599_v61  ;;  %v7603_v22 = vsub.f32 1.0, %v7602_v6  ;;  %vm4605_vm5 = vcmp.ge.f32.partialorder %v4468_v25, 0.0  ;;  %v4733_v20 = vmul.f32 0.2, %v4468_v25  ;;  %vm7608_vm9 = vmor %vm7606_vm7, %vm7607_vm6  ;;  %v7627_v30 = vand.u32 2147483648, %v12360_v37 }
 0x8f7   : > { %v5324_v43 = vpop.xlane.xlu0 %5323  ;;  %vm7621_vm13 = vweird.f32 %v12360_v37  ;;  %vm7626_vm2 = vcmp.eq.f32.partialorder %v7625_v15, 8.507059e+37 }
 0x8f8   : > { %v7604_v4 = vmul.f32 %v9109_v49, %v7603_v22  ;;  %v5494_v19 = vadd.f32 %v12370_v21, %v5324_v43  ;;  %v4861_v40 = vsel %vm4605_vm5, %v4468_v25, %v4733_v20  ;;  %v7628_v12 = vor.u32 1.1754944e-38, %v7627_v30 }
 0x8f9   : > { %v4993_v60 = vmul.f32 %v12273_v29, %v4861_v40 }
 0x8fa   : > { %v9111_v41 = vpop.eup %9110  ;;  %v7605_v10 = vadd.f32 %v9109_v49, %v7604_v4  ;;  %v8632_v56 = vmul.f32 -1.442695, %v5494_v19 }
 0x8fb   : > { %v4470_v32 = vpop.f32.mrf.mxu3  ;;  %v9113_v9 = vpop.eup %9112  ;;  %v12375_v13 = vadd.f32 1.0, %v9111_v41  ;;  %v5367_v53 = vsel %vm528_vm0, %v4993_v60, 0.0 }
 0x8fc   : > { %v4471_v18 = vadd.f32 %v12295_v35, %v4470_v32  ;;  %v7609_v34 = vsel %vm7608_vm9, %v9109_v49, %v7605_v10  ;;  %v7617_v3 = vmul.f32 %v9113_v9, %v12360_v37  ;;  %9114 = vpow2.f32 %v8632_v56  ;;  %5368 = vadd.xlane.f32.xlu0 %v5367_v53 }
 0x8fd   : > { %v7614_v33 = vsel %vm7611_vm10, %v7613_v38, %v7609_v34  ;;  %9116 = vrcp.f32 %v12375_v13  ;;  %vm7622_vm12 = vweird.f32 %v9113_v9  ;;  %v7640_v45 = vand.u32 2147483647, %v12375_v13 }
 0x8fe   : > { %8052 = vst.msk [vmem:[%s10509_s21 + $0x348] sm:$0xff] %vm7946_vm8, %v7614_v33  ;;  %v7618_v42 = vsub.f32 1.0, %v7617_v3  ;;  %vm4606_vm11 = vcmp.ge.f32.partialorder %v4471_v18, 0.0  ;;  %v4734_v7 = vmul.f32 0.2, %v4471_v18  ;;  %vm7623_vm14 = vmor %vm7621_vm13, %vm7622_vm12  ;;  %v7642_v63 = vand.u32 2147483648, %v12375_v13 }
 0x8ff   : > { %v5327_v47 = vpop.xlane.xlu1 %5326  ;;  %vm7636_vm3 = vweird.f32 %v12375_v13  ;;  %vm7641_vm5 = vcmp.eq.f32.partialorder %v7640_v45, 8.507059e+37 }
 0x900   : > { %v7619_v59 = vmul.f32 %v9113_v9, %v7618_v42  ;;  %v5495_v48 = vadd.f32 %v12370_v21, %v5327_v47  ;;  %v4862_v0 = vsel %vm4606_vm11, %v4471_v18, %v4734_v7  ;;  %v7643_v25 = vor.u32 1.1754944e-38, %v7642_v63 }
 0x901   : > { %v4994_v26 = vmul.f32 %v12273_v29, %v4862_v0 }
 0x902   : > { %v9115_v57 = vpop.eup %9114  ;;  %v7620_v1 = vadd.f32 %v9113_v9, %v7619_v59  ;;  %v8633_v54 = vmul.f32 -1.442695, %v5495_v48 }
 0x903   : > { %v4473_v14 = vpop.f32.mrf.mxu3  ;;  %v9117_v16 = vpop.eup %9116  ;;  %v12388_v5 = vadd.f32 1.0, %v9115_v57  ;;  %v5370_v50 = vsel %vm528_vm0, %v4994_v26, 0.0 }
 0x904   : > { %v4474_v8 = vadd.f32 %v12295_v35, %v4473_v14  ;;  %v7624_v31 = vsel %vm7623_vm14, %v9113_v9, %v7620_v1  ;;  %v7632_v28 = vmul.f32 %v9117_v16, %v12375_v13  ;;  %9118 = vpow2.f32 %v8633_v54  ;;  %5371 = vadd.xlane.f32.xlu1 %v5370_v50 }
 0x905   : > { %v7629_v23 = vsel %vm7626_vm2, %v7628_v12, %v7624_v31  ;;  %9120 = vrcp.f32 %v12388_v5  ;;  %vm7637_vm1 = vweird.f32 %v9117_v16  ;;  %v7655_v43 = vand.u32 2147483647, %v12388_v5 }
 0x906   : > { %8053 = vst.msk [vmem:[%s10509_s21 + $0x350] sm:$0xff] %vm7946_vm8, %v7629_v23  ;;  %v7633_v17 = vsub.f32 1.0, %v7632_v28  ;;  %vm4607_vm15 = vcmp.ge.f32.partialorder %v4474_v8, 0.0  ;;  %v4735_v51 = vmul.f32 0.2, %v4474_v8  ;;  %vm7638_vm4 = vmor %vm7636_vm3, %vm7637_vm1  ;;  %v7657_v4 = vand.u32 2147483648, %v12388_v5 }
 0x907   : > { %v5330_v46 = vpop.xlane.xlu2 %5329  ;;  %vm7651_vm9 = vweird.f32 %v12388_v5  ;;  %vm7656_vm11 = vcmp.eq.f32.partialorder %v7655_v43, 8.507059e+37 }
 0x908   : > { %v7634_v44 = vmul.f32 %v9117_v16, %v7633_v17  ;;  %v5496_v36 = vadd.f32 %v12370_v21, %v5330_v46  ;;  %v4863_v62 = vsel %vm4607_vm15, %v4474_v8, %v4735_v51  ;;  %v7658_v18 = vor.u32 1.1754944e-38, %v7657_v4 }
 0x909   : > { %v4995_v27 = vmul.f32 %v12273_v29, %v4863_v62 }
 0x90a   : > { %v9119_v2 = vpop.eup %9118  ;;  %v7635_v24 = vadd.f32 %v9117_v16, %v7634_v44  ;;  %v8634_v49 = vmul.f32 -1.442695, %v5496_v36 }
 0x90b   : > { %v4476_v58 = vpop.f32.mrf.mxu3  ;;  %v9121_v37 = vpop.eup %9120  ;;  %v12401_v39 = vadd.f32 1.0, %v9119_v2  ;;  %v5373_v6 = vsel %vm528_vm0, %v4995_v27, 0.0 }
 0x90c   : > { %v4477_v52 = vadd.f32 %v12295_v35, %v4476_v58  ;;  %v7639_v61 = vsel %vm7638_vm4, %v9117_v16, %v7635_v24  ;;  %v7647_v22 = vmul.f32 %v9121_v37, %v12388_v5  ;;  %9122 = vpow2.f32 %v8634_v49  ;;  %5374 = vadd.xlane.f32.xlu2 %v5373_v6 }
 0x90d   : > { %v7644_v20 = vsel %vm7641_vm5, %v7643_v25, %v7639_v61  ;;  %9124 = vrcp.f32 %v12401_v39  ;;  %vm7652_vm7 = vweird.f32 %v9121_v37  ;;  %v7670_v47 = vand.u32 2147483647, %v12401_v39 }
 0x90e   : > { %8054 = vst.msk [vmem:[%s10509_s21 + $0x358] sm:$0xff] %vm7946_vm8, %v7644_v20  ;;  %v7648_v11 = vsub.f32 1.0, %v7647_v22  ;;  %vm4608_vm6 = vcmp.ge.f32.partialorder %v4477_v52, 0.0  ;;  %v4736_v55 = vmul.f32 0.2, %v4477_v52  ;;  %vm7653_vm10 = vmor %vm7651_vm9, %vm7652_vm7  ;;  %v7672_v59 = vand.u32 2147483648, %v12401_v39 }
 0x90f   : > { %v5333_v19 = vpop.xlane.xlu0 %5332  ;;  %vm7666_vm14 = vweird.f32 %v12401_v39  ;;  %vm7671_vm15 = vcmp.eq.f32.partialorder %v7670_v47, 8.507059e+37 }
 0x910   : > { %v7649_v40 = vmul.f32 %v9121_v37, %v7648_v11  ;;  %v5497_v60 = vadd.f32 %v12370_v21, %v5333_v19  ;;  %v4864_v41 = vsel %vm4608_vm6, %v4477_v52, %v4736_v55  ;;  %v7673_v12 = vor.u32 1.1754944e-38, %v7672_v59 }
 0x911   : > { %v4996_v10 = vmul.f32 %v12273_v29, %v4864_v41 }
 0x912   : > { %v9123_v56 = vpop.eup %9122  ;;  %v7650_v32 = vadd.f32 %v9121_v37, %v7649_v40  ;;  %v8635_v9 = vmul.f32 -1.442695, %v5497_v60 }
 0x913   : > { %v4479_v38 = vpop.f32.mrf.mxu3  ;;  %v9125_v13 = vpop.eup %9124  ;;  %v6008_v53 = vadd.f32 1.0, %v9123_v56  ;;  %v5376_v3 = vsel %vm528_vm0, %v4996_v10, 0.0 }
 0x914   : > { %v4480_v34 = vadd.f32 %v12295_v35, %v4479_v38  ;;  %v7654_v33 = vsel %vm7653_vm10, %v9121_v37, %v7650_v32  ;;  %v7662_v42 = vmul.f32 %v9125_v13, %v12401_v39  ;;  %9126 = vpow2.f32 %v8635_v9  ;;  %5377 = vadd.xlane.f32.xlu0 %v5376_v3 }
 0x915   : > { %v7659_v7 = vsel %vm7656_vm11, %v7658_v18, %v7654_v33  ;;  %9128 = vrcp.f32 %v6008_v53  ;;  %vm7667_vm13 = vweird.f32 %v9125_v13  ;;  %v7687_v23 = vand.u32 2147483648, %v6008_v53 }
 0x916   : > { %8055 = vst.msk [vmem:[%s10509_s21 + $0x360] sm:$0xff] %vm7946_vm8, %v7659_v7  ;;  %v7663_v15 = vsub.f32 1.0, %v7662_v42  ;;  %vm4609_vm12 = vcmp.ge.f32.partialorder %v4480_v34, 0.0  ;;  %v4737_v30 = vmul.f32 0.2, %v4480_v34  ;;  %vm7668_vm2 = vmor %vm7666_vm14, %vm7667_vm13 }
 0x917   : > { %v5336_v35 = vpop.xlane.xlu1 %5335  ;;  %v7685_v45 = vand.u32 2147483647, %v6008_v53  ;;  %v7688_v27 = vor.u32 1.1754944e-38, %v7687_v23 }
 0x918   : > { %v7664_v48 = vmul.f32 %v9125_v13, %v7663_v15  ;;  %v5498_v0 = vadd.f32 %v12370_v21, %v5336_v35  ;;  %v4865_v26 = vsel %vm4609_vm12, %v4480_v34, %v4737_v30 }
 0x919   : > { %v4997_v57 = vmul.f32 %v12273_v29, %v4865_v26  ;;  %vm7686_vm4 = vcmp.eq.f32.partialorder %v7685_v45, 8.507059e+37 }
 0x91a   : > { %v9127_v1 = vpop.eup %9126  ;;  %v7665_v54 = vadd.f32 %v9125_v13, %v7664_v48  ;;  %v8636_v14 = vmul.f32 -1.442695, %v5498_v0 }
 0x91b   : > { %v9129_v16 = vpop.eup %9128  ;;  %v6009_v5 = vadd.f32 1.0, %v9127_v1  ;;  %v5379_v8 = vsel %vm528_vm0, %v4997_v57, 0.0  ;;  %vm7681_vm0 = vweird.f32 %v6008_v53 }
 0x91c   : > { %v7669_v50 = vsel %vm7668_vm2, %v9125_v13, %v7665_v54  ;;  %v7677_v31 = vmul.f32 %v9129_v16, %v6008_v53  ;;  %9130 = vpow2.f32 %v8636_v14  ;;  %5380 = vadd.xlane.f32.xlu1 %v5379_v8  ;;  %vm7682_vm1 = vweird.f32 %v9129_v16 }
 0x91d   : > { %v7674_v28 = vsel %vm7671_vm15, %v7673_v12, %v7669_v50  ;;  %9132 = vrcp.f32 %v6009_v5  ;;  %vm7683_vm3 = vmor %vm7681_vm0, %vm7682_vm1  ;;  %v7702_v25 = vand.u32 2147483648, %v6009_v5  ;;  %v7700_v6 = vand.u32 2147483647, %v6009_v5 }
 0x91e   : > { %8056 = vst.msk [vmem:[%s10509_s21 + $0x368] sm:$0xff] %vm7946_vm8, %v7674_v28  ;;  %v7678_v29 = vsub.f32 1.0, %v7677_v31  ;;  %vm7696_vm6 = vweird.f32 %v6009_v5 }
 0x91f   : > { %v5339_v17 = vpop.xlane.xlu2 %5338  ;;  %v7703_v43 = vor.u32 1.1754944e-38, %v7702_v25  ;;  %vm7701_vm9 = vcmp.eq.f32.partialorder %v7700_v6, 8.507059e+37 }
 0x920   : > { %v7679_v51 = vmul.f32 %v9129_v16, %v7678_v29  ;;  %v5499_v63 = vadd.f32 %v12370_v21, %v5339_v17 }
 0x922   : > { %v9131_v46 = vpop.eup %9130  ;;  %v7680_v44 = vadd.f32 %v9129_v16, %v7679_v51  ;;  %v8637_v36 = vmul.f32 -1.442695, %v5499_v63 }
 0x923   : > { %v9133_v62 = vpop.eup %9132  ;;  %v6010_v2 = vadd.f32 1.0, %v9131_v46 }
 0x924   : > { %v7684_v24 = vsel %vm7683_vm3, %v9129_v16, %v7680_v44  ;;  %v7692_v49 = vmul.f32 %v9133_v62, %v6009_v5  ;;  %9134 = vpow2.f32 %v8637_v36  ;;  %vm7697_vm5 = vweird.f32 %v9133_v62 }
 0x925   : > { %v7689_v58 = vsel %vm7686_vm4, %v7688_v27, %v7684_v24  ;;  %9136 = vrcp.f32 %v6010_v2  ;;  %vm7698_vm7 = vmor %vm7696_vm6, %vm7697_vm5  ;;  %v7717_v10 = vand.u32 2147483648, %v6010_v2  ;;  %v7715_v9 = vand.u32 2147483647, %v6010_v2 }
 0x926   : > { %8057 = vst.msk [vmem:[%s10509_s21 + $0x370] sm:$0xff] %vm7946_vm8, %v7689_v58  ;;  %v7693_v37 = vsub.f32 1.0, %v7692_v49  ;;  %vm7711_vm11 = vweird.f32 %v6010_v2 }
 0x927   : > { %v5342_v39 = vpop.xlane.xlu0 %5341  ;;  %v7718_v3 = vor.u32 1.1754944e-38, %v7717_v10  ;;  %vm7716_vm13 = vcmp.eq.f32.partialorder %v7715_v9, 8.507059e+37 }
 0x928   : > { %v7694_v52 = vmul.f32 %v9133_v62, %v7693_v37  ;;  %v5500_v61 = vadd.f32 %v12370_v21, %v5342_v39 }
 0x92a   : > { %v9135_v22 = vpop.eup %9134  ;;  %v7695_v20 = vadd.f32 %v9133_v62, %v7694_v52  ;;  %v8638_v11 = vmul.f32 -1.442695, %v5500_v61 }
 0x92b   : > { %v9137_v55 = vpop.eup %9136  ;;  %v6011_v4 = vadd.f32 1.0, %v9135_v22 }
 0x92c   : > { %v7699_v19 = vsel %vm7698_vm7, %v9133_v62, %v7695_v20  ;;  %v7707_v40 = vmul.f32 %v9137_v55, %v6010_v2  ;;  %9138 = vpow2.f32 %v8638_v11  ;;  %vm7712_vm10 = vweird.f32 %v9137_v55 }
 0x92d   : > { %v7704_v60 = vsel %vm7701_vm9, %v7703_v43, %v7699_v19  ;;  %9140 = vrcp.f32 %v6011_v4  ;;  %vm7713_vm12 = vmor %vm7711_vm11, %vm7712_vm10  ;;  %v7732_v47 = vand.u32 2147483648, %v6011_v4  ;;  %v7730_v48 = vand.u32 2147483647, %v6011_v4 }
 0x92e   : > { %8058 = vst.msk [vmem:[%s10509_s21 + $0x378] sm:$0xff] %vm7946_vm8, %v7704_v60  ;;  %v7708_v41 = vsub.f32 1.0, %v7707_v40  ;;  %vm7726_vm2 = vweird.f32 %v6011_v4 }
 0x92f   : > { %v5345_v56 = vpop.xlane.xlu1 %5344  ;;  %v7733_v14 = vor.u32 1.1754944e-38, %v7732_v47  ;;  %vm7731_vm1 = vcmp.eq.f32.partialorder %v7730_v48, 8.507059e+37 }
 0x930   : > { %v7709_v32 = vmul.f32 %v9137_v55, %v7708_v41  ;;  %v5501_v38 = vadd.f32 %v12370_v21, %v5345_v56 }
 0x932   : > { %v9139_v13 = vpop.eup %9138  ;;  %v7710_v18 = vadd.f32 %v9137_v55, %v7709_v32  ;;  %v8639_v53 = vmul.f32 -1.442695, %v5501_v38 }
 0x933   : > { %v9141_v34 = vpop.eup %9140  ;;  %v6012_v33 = vadd.f32 1.0, %v9139_v13 }
 0x934   : > { %v7714_v42 = vsel %vm7713_vm12, %v9137_v55, %v7710_v18  ;;  %v7722_v7 = vmul.f32 %v9141_v34, %v6011_v4  ;;  %9142 = vpow2.f32 %v8639_v53  ;;  %vm7727_vm14 = vweird.f32 %v9141_v34 }
 0x935   : > { %v7719_v15 = vsel %vm7716_vm13, %v7718_v3, %v7714_v42  ;;  %9144 = vrcp.f32 %v6012_v33  ;;  %vm7728_vm15 = vmor %vm7726_vm2, %vm7727_vm14  ;;  %v7747_v31 = vand.u32 2147483648, %v6012_v33  ;;  %v7745_v23 = vand.u32 2147483647, %v6012_v33 }
 0x936   : > { %8059 = vst.msk [vmem:[%s10509_s21 + $0x380] sm:$0xff] %vm7946_vm8, %v7719_v15  ;;  %v7723_v30 = vsub.f32 1.0, %v7722_v7  ;;  %vm7741_vm3 = vweird.f32 %v6012_v33 }
 0x937   : > { %v5348_v59 = vpop.xlane.xlu2 %5347  ;;  %v7748_v44 = vor.u32 1.1754944e-38, %v7747_v31  ;;  %vm7746_vm5 = vcmp.eq.f32.partialorder %v7745_v23, 8.507059e+37 }
 0x938   : > { %v7724_v35 = vmul.f32 %v9141_v34, %v7723_v30  ;;  %v5502_v0 = vadd.f32 %v12370_v21, %v5348_v59 }
 0x93a   : > { %v9143_v26 = vpop.eup %9142  ;;  %v7725_v57 = vadd.f32 %v9141_v34, %v7724_v35  ;;  %v8640_v1 = vmul.f32 -1.442695, %v5502_v0 }
 0x93b   : > { %v9145_v54 = vpop.eup %9144  ;;  %v6013_v16 = vadd.f32 1.0, %v9143_v26 }
 0x93c   : > { %v7729_v12 = vsel %vm7728_vm15, %v9141_v34, %v7725_v57  ;;  %v7737_v5 = vmul.f32 %v9145_v54, %v6012_v33  ;;  %9146 = vpow2.f32 %v8640_v1  ;;  %vm7742_vm0 = vweird.f32 %v9145_v54 }
 0x93d   : > { %v7734_v8 = vsel %vm7731_vm1, %v7733_v14, %v7729_v12  ;;  %9148 = vrcp.f32 %v6013_v16  ;;  %vm7743_vm4 = vmor %vm7741_vm3, %vm7742_vm0  ;;  %v7762_v49 = vand.u32 2147483648, %v6013_v16  ;;  %v7760_v25 = vand.u32 2147483647, %v6013_v16 }
 0x93e   : > { %8060 = vst.msk [vmem:[%s10509_s21 + $0x388] sm:$0xff] %vm7946_vm8, %v7734_v8  ;;  %v7738_v50 = vsub.f32 1.0, %v7737_v5  ;;  %vm7756_vm7 = vweird.f32 %v6013_v16 }
 0x93f   : > { %v5351_v28 = vpop.xlane.xlu0 %5350  ;;  %v7763_v20 = vor.u32 1.1754944e-38, %v7762_v49  ;;  %vm7761_vm10 = vcmp.eq.f32.partialorder %v7760_v25, 8.507059e+37 }
 0x940   : > { %v7739_v29 = vmul.f32 %v9145_v54, %v7738_v50  ;;  %v5503_v17 = vadd.f32 %v12370_v21, %v5351_v28 }
 0x942   : > { %v9147_v51 = vpop.eup %9146  ;;  %v7740_v45 = vadd.f32 %v9145_v54, %v7739_v29  ;;  %v8641_v63 = vmul.f32 -1.442695, %v5503_v17 }
 0x943   : > { %v9149_v46 = vpop.eup %9148  ;;  %v6014_v36 = vadd.f32 1.0, %v9147_v51 }
 0x944   : > { %v7744_v62 = vsel %vm7743_vm4, %v9145_v54, %v7740_v45  ;;  %v7752_v27 = vmul.f32 %v9149_v46, %v6013_v16  ;;  %9150 = vpow2.f32 %v8641_v63  ;;  %vm7757_vm6 = vweird.f32 %v9149_v46 }
 0x945   : > { %v7749_v2 = vsel %vm7746_vm5, %v7748_v44, %v7744_v62  ;;  %9152 = vrcp.f32 %v6014_v36  ;;  %vm7758_vm9 = vmor %vm7756_vm7, %vm7757_vm6  ;;  %v7777_v40 = vand.u32 2147483648, %v6014_v36  ;;  %v7775_v10 = vand.u32 2147483647, %v6014_v36 }
 0x946   : > { %8061 = vst.msk [vmem:[%s10509_s21 + $0x390] sm:$0xff] %vm7946_vm8, %v7749_v2  ;;  %v7753_v24 = vsub.f32 1.0, %v7752_v27  ;;  %vm7771_vm12 = vweird.f32 %v6014_v36 }
 0x947   : > { %v5354_v58 = vpop.xlane.xlu1 %5353  ;;  %v7778_v18 = vor.u32 1.1754944e-38, %v7777_v40  ;;  %vm7776_vm14 = vcmp.eq.f32.partialorder %v7775_v10, 8.507059e+37 }
 0x948   : > { %v7754_v37 = vmul.f32 %v9149_v46, %v7753_v24  ;;  %v5504_v39 = vadd.f32 %v12370_v21, %v5354_v58 }
 0x94a   : > { %v9151_v52 = vpop.eup %9150  ;;  %v7755_v6 = vadd.f32 %v9149_v46, %v7754_v37  ;;  %v8642_v61 = vmul.f32 -1.442695, %v5504_v39 }
 0x94b   : > { %v9153_v22 = vpop.eup %9152  ;;  %v6015_v11 = vadd.f32 1.0, %v9151_v52 }
 0x94c   : > { %v7759_v55 = vsel %vm7758_vm9, %v9149_v46, %v7755_v6  ;;  %v7767_v43 = vmul.f32 %v9153_v22, %v6014_v36  ;;  %9154 = vpow2.f32 %v8642_v61  ;;  %vm7772_vm11 = vweird.f32 %v9153_v22 }
 0x94d   : > { %v7764_v4 = vsel %vm7761_vm10, %v7763_v20, %v7759_v55  ;;  %9156 = vrcp.f32 %v6015_v11  ;;  %vm7773_vm13 = vmor %vm7771_vm12, %vm7772_vm11  ;;  %v7792_v7 = vand.u32 2147483648, %v6015_v11  ;;  %v7790_v47 = vand.u32 2147483647, %v6015_v11 }
 0x94e   : > { %8062 = vst.msk [vmem:[%s10509_s21 + $0x398] sm:$0xff] %vm7946_vm8, %v7764_v4  ;;  %v7768_v19 = vsub.f32 1.0, %v7767_v43  ;;  %vm7786_vm15 = vweird.f32 %v6015_v11 }
 0x94f   : > { %v5357_v60 = vpop.xlane.xlu2 %5356  ;;  %v7793_v57 = vor.u32 1.1754944e-38, %v7792_v7  ;;  %vm7791_vm0 = vcmp.eq.f32.partialorder %v7790_v47, 8.507059e+37 }
 0x950   : > { %v7769_v41 = vmul.f32 %v9153_v22, %v7768_v19  ;;  %v5505_v56 = vadd.f32 %v12370_v21, %v5357_v60 }
 0x952   : > { %v9155_v32 = vpop.eup %9154  ;;  %v7770_v9 = vadd.f32 %v9153_v22, %v7769_v41  ;;  %v8643_v38 = vmul.f32 -1.442695, %v5505_v56 }
 0x953   : > { %v9157_v13 = vpop.eup %9156  ;;  %v6016_v53 = vadd.f32 1.0, %v9155_v32 }
 0x954   : > { %v7774_v34 = vsel %vm7773_vm13, %v9153_v22, %v7770_v9  ;;  %v7782_v3 = vmul.f32 %v9157_v13, %v6015_v11  ;;  %9158 = vpow2.f32 %v8643_v38  ;;  %vm7787_vm2 = vweird.f32 %v9157_v13 }
 0x955   : > { %v7779_v33 = vsel %vm7776_vm14, %v7778_v18, %v7774_v34  ;;  %9160 = vrcp.f32 %v6016_v53  ;;  %vm7788_vm1 = vmor %vm7786_vm15, %vm7787_vm2  ;;  %v7807_v5 = vand.u32 2147483648, %v6016_v53  ;;  %v7805_v31 = vand.u32 2147483647, %v6016_v53 }
 0x956   : > { %8063 = vst.msk [vmem:[%s10509_s21 + $0x3a0] sm:$0xff] %vm7946_vm8, %v7779_v33  ;;  %v7783_v42 = vsub.f32 1.0, %v7782_v3  ;;  %vm7801_vm4 = vweird.f32 %v6016_v53 }
 0x957   : > { %v5360_v15 = vpop.xlane.xlu0 %5359  ;;  %v7808_v45 = vor.u32 1.1754944e-38, %v7807_v5  ;;  %vm7806_vm6 = vcmp.eq.f32.partialorder %v7805_v31, 8.507059e+37 }
 0x958   : > { %v7784_v30 = vmul.f32 %v9157_v13, %v7783_v42  ;;  %v5506_v59 = vadd.f32 %v12370_v21, %v5360_v15 }
 0x95a   : > { %v9159_v35 = vpop.eup %9158  ;;  %v7785_v48 = vadd.f32 %v9157_v13, %v7784_v30  ;;  %v8644_v0 = vmul.f32 -1.442695, %v5506_v59 }
 0x95b   : > { %v9161_v26 = vpop.eup %9160  ;;  %v6017_v1 = vadd.f32 1.0, %v9159_v35 }
 0x95c   : > { %v7789_v54 = vsel %vm7788_vm1, %v9157_v13, %v7785_v48  ;;  %v7797_v14 = vmul.f32 %v9161_v26, %v6016_v53  ;;  %9162 = vpow2.f32 %v8644_v0  ;;  %vm7802_vm3 = vweird.f32 %v9161_v26 }
 0x95d   : > { %v7794_v16 = vsel %vm7791_vm0, %v7793_v57, %v7789_v54  ;;  %9164 = vrcp.f32 %v6017_v1  ;;  %vm7803_vm5 = vmor %vm7801_vm4, %vm7802_vm3  ;;  %v7822_v27 = vand.u32 2147483648, %v6017_v1  ;;  %v7820_v49 = vand.u32 2147483647, %v6017_v1 }
 0x95e   : > { %8064 = vst.msk [vmem:[%s10509_s21 + $0x3a8] sm:$0xff] %vm7946_vm8, %v7794_v16  ;;  %v7798_v12 = vsub.f32 1.0, %v7797_v14  ;;  %vm7816_vm9 = vweird.f32 %v6017_v1 }
 0x95f   : > { %v5363_v8 = vpop.xlane.xlu1 %5362  ;;  %v7823_v6 = vor.u32 1.1754944e-38, %v7822_v27  ;;  %vm7821_vm11 = vcmp.eq.f32.partialorder %v7820_v49, 8.507059e+37 }
 0x960   : > { %v7799_v50 = vmul.f32 %v9161_v26, %v7798_v12  ;;  %v5507_v28 = vadd.f32 %v12370_v21, %v5363_v8 }
 0x962   : > { %v9163_v29 = vpop.eup %9162  ;;  %v7800_v23 = vadd.f32 %v9161_v26, %v7799_v50  ;;  %v8645_v17 = vmul.f32 -1.442695, %v5507_v28 }
 0x963   : > { %v9165_v51 = vpop.eup %9164  ;;  %v6018_v63 = vadd.f32 1.0, %v9163_v29 }
 0x964   : > { %v7804_v46 = vsel %vm7803_vm5, %v9161_v26, %v7800_v23  ;;  %v7812_v44 = vmul.f32 %v9165_v51, %v6017_v1  ;;  %9166 = vpow2.f32 %v8645_v17  ;;  %vm7817_vm7 = vweird.f32 %v9165_v51 }
 0x965   : > { %v7809_v36 = vsel %vm7806_vm6, %v7808_v45, %v7804_v46  ;;  %9168 = vrcp.f32 %v6018_v63  ;;  %vm7818_vm10 = vmor %vm7816_vm9, %vm7817_vm7  ;;  %v7837_v43 = vand.u32 2147483648, %v6018_v63  ;;  %v7835_v40 = vand.u32 2147483647, %v6018_v63 }
 0x966   : > { %8065 = vst.msk [vmem:[%s10509_s21 + $0x3b0] sm:$0xff] %vm7946_vm8, %v7809_v36  ;;  %v7813_v62 = vsub.f32 1.0, %v7812_v44  ;;  %vm7831_vm13 = vweird.f32 %v6018_v63 }
 0x967   : > { %v5366_v2 = vpop.xlane.xlu2 %5365  ;;  %v7838_v9 = vor.u32 1.1754944e-38, %v7837_v43  ;;  %vm7836_vm2 = vcmp.eq.f32.partialorder %v7835_v40, 8.507059e+37 }
 0x968   : > { %v7814_v24 = vmul.f32 %v9165_v51, %v7813_v62  ;;  %v5508_v58 = vadd.f32 %v12370_v21, %v5366_v2 }
 0x96a   : > { %v9167_v37 = vpop.eup %9166  ;;  %v7815_v25 = vadd.f32 %v9165_v51, %v7814_v24  ;;  %v8646_v39 = vmul.f32 -1.442695, %v5508_v58 }
 0x96b   : > { %v9169_v52 = vpop.eup %9168  ;;  %v6019_v61 = vadd.f32 1.0, %v9167_v37 }
 0x96c   : > { %v7819_v22 = vsel %vm7818_vm10, %v9165_v51, %v7815_v25  ;;  %v7827_v20 = vmul.f32 %v9169_v52, %v6018_v63  ;;  %9170 = vpow2.f32 %v8646_v39  ;;  %vm7832_vm12 = vweird.f32 %v9169_v52 }
 0x96d   : > { %v7824_v11 = vsel %vm7821_vm11, %v7823_v6, %v7819_v22  ;;  %9172 = vrcp.f32 %v6019_v61  ;;  %vm7833_vm14 = vmor %vm7831_vm13, %vm7832_vm12  ;;  %v7852_v3 = vand.u32 2147483648, %v6019_v61  ;;  %v7850_v7 = vand.u32 2147483647, %v6019_v61 }
 0x96e   : > { %8066 = vst.msk [vmem:[%s10509_s21 + $0x3b8] sm:$0xff] %vm7946_vm8, %v7824_v11  ;;  %v7828_v55 = vsub.f32 1.0, %v7827_v20  ;;  %vm7846_vm1 = vweird.f32 %v6019_v61 }
 0x96f   : > { %v5369_v4 = vpop.xlane.xlu0 %5368  ;;  %v7853_v48 = vor.u32 1.1754944e-38, %v7852_v3  ;;  %vm7851_vm3 = vcmp.eq.f32.partialorder %v7850_v7, 8.507059e+37 }
 0x970   : > { %v7829_v19 = vmul.f32 %v9169_v52, %v7828_v55  ;;  %v5509_v60 = vadd.f32 %v12370_v21, %v5369_v4 }
 0x972   : > { %v9171_v41 = vpop.eup %9170  ;;  %v7830_v10 = vadd.f32 %v9169_v52, %v7829_v19  ;;  %v8647_v56 = vmul.f32 -1.442695, %v5509_v60 }
 0x973   : > { %v9173_v32 = vpop.eup %9172  ;;  %v6020_v38 = vadd.f32 1.0, %v9171_v41 }
 0x974   : > { %v7834_v13 = vsel %vm7833_vm14, %v9169_v52, %v7830_v10  ;;  %v7842_v18 = vmul.f32 %v9173_v32, %v6019_v61  ;;  %9174 = vpow2.f32 %v8647_v56  ;;  %vm7847_vm15 = vweird.f32 %v9173_v32 }
 0x975   : > { %v7839_v53 = vsel %vm7836_vm2, %v7838_v9, %v7834_v13  ;;  %9176 = vrcp.f32 %v6020_v38  ;;  %vm7848_vm0 = vmor %vm7846_vm1, %vm7847_vm15  ;;  %v7867_v14 = vand.u32 2147483648, %v6020_v38  ;;  %v7865_v5 = vand.u32 2147483647, %v6020_v38 }
 0x976   : > { %8067 = vst.msk [vmem:[%s10509_s21 + $0x3c0] sm:$0xff] %vm7946_vm8, %v7839_v53  ;;  %v7843_v34 = vsub.f32 1.0, %v7842_v18  ;;  %vm7861_vm5 = vweird.f32 %v6020_v38 }
 0x977   : > { %v5372_v33 = vpop.xlane.xlu1 %5371  ;;  %v7868_v23 = vor.u32 1.1754944e-38, %v7867_v14  ;;  %vm7866_vm7 = vcmp.eq.f32.partialorder %v7865_v5, 8.507059e+37 }
 0x978   : > { %v7844_v42 = vmul.f32 %v9173_v32, %v7843_v34  ;;  %v5510_v15 = vadd.f32 %v12370_v21, %v5372_v33 }
 0x97a   : > { %v9175_v30 = vpop.eup %9174  ;;  %v7845_v47 = vadd.f32 %v9173_v32, %v7844_v42  ;;  %v8648_v59 = vmul.f32 -1.442695, %v5510_v15 }
 0x97b   : > { %v9177_v35 = vpop.eup %9176  ;;  %v6021_v0 = vadd.f32 1.0, %v9175_v30 }
 0x97c   : > { %v7849_v26 = vsel %vm7848_vm0, %v9173_v32, %v7845_v47  ;;  %v7857_v57 = vmul.f32 %v9177_v35, %v6020_v38  ;;  %9178 = vpow2.f32 %v8648_v59  ;;  %vm7862_vm4 = vweird.f32 %v9177_v35 }
 0x97d   : > { %v7854_v1 = vsel %vm7851_vm3, %v7853_v48, %v7849_v26  ;;  %9180 = vrcp.f32 %v6021_v0  ;;  %vm7863_vm6 = vmor %vm7861_vm5, %vm7862_vm4  ;;  %v7882_v44 = vand.u32 2147483648, %v6021_v0  ;;  %v7880_v27 = vand.u32 2147483647, %v6021_v0 }
 0x97e   : > { %8068 = vst.msk [vmem:[%s10509_s21 + $0x3c8] sm:$0xff] %vm7946_vm8, %v7854_v1  ;;  %v7858_v54 = vsub.f32 1.0, %v7857_v57  ;;  %vm7876_vm10 = vweird.f32 %v6021_v0 }
 0x97f   : > { %v5375_v16 = vpop.xlane.xlu2 %5374  ;;  %v7883_v25 = vor.u32 1.1754944e-38, %v7882_v44  ;;  %vm7881_vm12 = vcmp.eq.f32.partialorder %v7880_v27, 8.507059e+37 }
 0x980   : > { %v7859_v12 = vmul.f32 %v9177_v35, %v7858_v54  ;;  %v5511_v8 = vadd.f32 %v12370_v21, %v5375_v16 }
 0x982   : > { %v9179_v50 = vpop.eup %9178  ;;  %v7860_v31 = vadd.f32 %v9177_v35, %v7859_v12  ;;  %v8649_v28 = vmul.f32 -1.442695, %v5511_v8 }
 0x983   : > { %v9181_v29 = vpop.eup %9180  ;;  %v6022_v17 = vadd.f32 1.0, %v9179_v50 }
 0x984   : > { %v7864_v51 = vsel %vm7863_vm6, %v9177_v35, %v7860_v31  ;;  %v7872_v45 = vmul.f32 %v9181_v29, %v6021_v0  ;;  %9182 = vpow2.f32 %v8649_v28  ;;  %vm7877_vm9 = vweird.f32 %v9181_v29 }
 0x985   : > { %v7869_v63 = vsel %vm7866_vm7, %v7868_v23, %v7864_v51  ;;  %9184 = vrcp.f32 %v6022_v17  ;;  %vm7878_vm11 = vmor %vm7876_vm10, %vm7877_vm9  ;;  %v7897_v20 = vand.u32 2147483648, %v6022_v17  ;;  %v7895_v43 = vand.u32 2147483647, %v6022_v17 }
 0x986   : > { %8069 = vst.msk [vmem:[%s10509_s21 + $0x3d0] sm:$0xff] %vm7946_vm8, %v7869_v63  ;;  %v7873_v46 = vsub.f32 1.0, %v7872_v45  ;;  %vm7891_vm14 = vweird.f32 %v6022_v17 }
 0x987   : > { %v5378_v36 = vpop.xlane.xlu0 %5377  ;;  %v7898_v10 = vor.u32 1.1754944e-38, %v7897_v20  ;;  %vm7896_vm15 = vcmp.eq.f32.partialorder %v7895_v43, 8.507059e+37 }
 0x988   : > { %v7874_v62 = vmul.f32 %v9181_v29, %v7873_v46  ;;  %v5512_v2 = vadd.f32 %v12370_v21, %v5378_v36 }
 0x98a   : > { %v9183_v24 = vpop.eup %9182  ;;  %v7875_v49 = vadd.f32 %v9181_v29, %v7874_v62  ;;  %v8650_v58 = vmul.f32 -1.442695, %v5512_v2 }
 0x98b   : > { %v9185_v37 = vpop.eup %9184  ;;  %v6023_v39 = vadd.f32 1.0, %v9183_v24 }
 0x98c   : > { %v7879_v52 = vsel %vm7878_vm11, %v9181_v29, %v7875_v49  ;;  %v7887_v6 = vmul.f32 %v9185_v37, %v6022_v17  ;;  %9186 = vpow2.f32 %v8650_v58  ;;  %vm7892_vm13 = vweird.f32 %v9185_v37 }
 0x98d   : > { %v7884_v61 = vsel %vm7881_vm12, %v7883_v25, %v7879_v52  ;;  %9188 = vrcp.f32 %v6023_v39  ;;  %vm7893_vm2 = vmor %vm7891_vm14, %vm7892_vm13  ;;  %v7912_v18 = vand.u32 2147483648, %v6023_v39  ;;  %v7910_v53 = vand.u32 2147483647, %v6023_v39 }
 0x98e   : > { %8070 = vst.msk [vmem:[%s10509_s21 + $0x3d8] sm:$0xff] %vm7946_vm8, %v7884_v61  ;;  %v7888_v22 = vsub.f32 1.0, %v7887_v6  ;;  %vm7906_vm0 = vweird.f32 %v6023_v39 }
 0x98f   : > { %v5381_v11 = vpop.xlane.xlu1 %5380  ;;  %v7913_v42 = vor.u32 1.1754944e-38, %v7912_v18  ;;  %vm7911_vm4 = vcmp.eq.f32.partialorder %v7910_v53, 8.507059e+37 }
 0x990   : > { %v7889_v55 = vmul.f32 %v9185_v37, %v7888_v22  ;;  %v5513_v4 = vadd.f32 %v12370_v21, %v5381_v11 }
 0x992   : > { %v9187_v19 = vpop.eup %9186  ;;  %v7890_v40 = vadd.f32 %v9185_v37, %v7889_v55  ;;  %v8651_v60 = vmul.f32 -1.442695, %v5513_v4 }
 0x993   : > { %v9189_v41 = vpop.eup %9188  ;;  %v6024_v56 = vadd.f32 1.0, %v9187_v19 }
 0x994   : > { %v7894_v32 = vsel %vm7893_vm2, %v9185_v37, %v7890_v40  ;;  %v7902_v9 = vmul.f32 %v9189_v41, %v6023_v39  ;;  %9190 = vpow2.f32 %v8651_v60  ;;  %vm7907_vm1 = vweird.f32 %v9189_v41 }
 0x995   : > { %v7899_v38 = vsel %vm7896_vm15, %v7898_v10, %v7894_v32  ;;  %9192 = vrcp.f32 %v6024_v56  ;;  %vm7908_vm3 = vmor %vm7906_vm0, %vm7907_vm1  ;;  %v7927_v35 = vand.u32 2147483648, %v6024_v56  ;;  %v7925_v0 = vand.u32 2147483647, %v6024_v56 }
 0x996   : > { %8071 = vst.msk [vmem:[%s10509_s21 + $0x3e0] sm:$0xff] %vm7946_vm8, %v7899_v38  ;;  %v7903_v13 = vsub.f32 1.0, %v7902_v9  ;;  %vm7921_vm6 = vweird.f32 %v6024_v56 }
 0x997   : > { %v7928_v1 = vor.u32 1.1754944e-38, %v7927_v35  ;;  %vm7926_vm9 = vcmp.eq.f32.partialorder %v7925_v0, 8.507059e+37 }
 0x998   : > { %v7904_v21 = vmul.f32 %v9189_v41, %v7903_v13 }
 0x99a   : > { %v9191_v34 = vpop.eup %9190  ;;  %v7905_v3 = vadd.f32 %v9189_v41, %v7904_v21 }
 0x99b   : > { %v9193_v33 = vpop.eup %9192  ;;  %v6025_v7 = vadd.f32 1.0, %v9191_v34 }
 0x99c   : > { %v7909_v15 = vsel %vm7908_vm3, %v9189_v41, %v7905_v3  ;;  %v7917_v30 = vmul.f32 %v9193_v33, %v6024_v56  ;;  %vm7922_vm5 = vweird.f32 %v9193_v33 }
 0x99d   : > { %v7914_v47 = vsel %vm7911_vm4, %v7913_v42, %v7909_v15  ;;  %9194 = vrcp.f32 %v6025_v7  ;;  %vm7923_vm7 = vmor %vm7921_vm6, %vm7922_vm5  ;;  %v7942_v5 = vand.u32 2147483648, %v6025_v7  ;;  %v7940_v50 = vand.u32 2147483647, %v6025_v7 }
 0x99e   : > { %8072 = vst.msk [vmem:[%s10509_s21 + $0x3e8] sm:$0xff] %vm7946_vm8, %v7914_v47  ;;  %v7918_v59 = vsub.f32 1.0, %v7917_v30  ;;  %vm7936_vm11 = vweird.f32 %v6025_v7 }
 0x99f   : > { %v7943_v28 = vor.u32 1.1754944e-38, %v7942_v5  ;;  %vm7941_vm13 = vcmp.eq.f32.partialorder %v7940_v50, 8.507059e+37 }
 0x9a0   : > { %v7919_v48 = vmul.f32 %v9193_v33, %v7918_v59 }
 0x9a2   : > { %v7920_v26 = vadd.f32 %v9193_v33, %v7919_v48 }
 0x9a3   : > { %v9195_v57 = vpop.eup %9194 }
 0x9a4   : > { %v7924_v54 = vsel %vm7923_vm7, %v9193_v33, %v7920_v26  ;;  %v7932_v14 = vmul.f32 %v9195_v57, %v6025_v7  ;;  %vm7937_vm10 = vweird.f32 %v9195_v57 }
 0x9a5   : > { %v7929_v16 = vsel %vm7926_vm9, %v7928_v1, %v7924_v54  ;;  %vm7938_vm12 = vmor %vm7936_vm11, %vm7937_vm10 }
 0x9a6   : > { %8073 = vst.msk [vmem:[%s10509_s21 + $0x3f0] sm:$0xff] %vm7946_vm8, %v7929_v16  ;;  %v7933_v12 = vsub.f32 1.0, %v7932_v14 }
 0x9a8   : > { %v7934_v8 = vmul.f32 %v9195_v57, %v7933_v12 }
 0x9aa   : > { %v7935_v31 = vadd.f32 %v9195_v57, %v7934_v8 }
 0x9ac   : > { %v7939_v29 = vsel %vm7938_vm12, %v9195_v57, %v7935_v31 }
 0x9ad   : > { %v7944_v23 = vsel %vm7941_vm13, %v7943_v28, %v7939_v29 }
 0x9ae   : > { %8074 = vst.msk [vmem:[%s10509_s21 + $0x3f8] sm:$0xff] %vm7946_vm8, %v7944_v23 }
 0x9af PF: > { %s23_s19 = sadd.s32 1, %s9235_s19  }
 0x9b0   : > { %p20_p4 = scmp.ge.s32.totalorder %s23_s19, 4  }
 0x9b2   :  { %22 = sbr.rel (!%p20_p4) target bundleno = 3 (0x3), region = 94 }

</bundles_post_ra>
